<compile_context>
chip_gen: v6e
topology: v6e:2x2x1
jax: 0.10.0
libtpu: 0.0.40
codegen_flags: <defaults>
</compile_context>

<pallas_src>
import functools

import numpy as np
import jax
import jax.numpy as jnp
from jax import lax
from jax.experimental import pallas as pl
from jax.experimental.pallas import tpu as pltpu


def _sigmoid(z):
    # 0.5*(tanh(z/2)+1): transcendental runs on the EUP, no VPU divide.
    return 0.5 * (jnp.tanh(0.5 * z) + 1.0)


# ------------------------------- cell kernel ---------------------------------
def _cell_kernel(x_ref, h_ref, c_ref, m_ref, w_ref, b_ref, ho_ref, co_ref,
                 *, offsets, mm_dtype):
    """One ConvLSTMCell step on one image-aligned R-tile (halo-free).

    im2col: for every conv tap (dh, dw) a lane-rolled copy of h / x is masked
    by the host-built validity row (zero 'same' padding), cast to mm_dtype and
    stacked on sublanes; one MXU contraction against the pre-packed
    [4*Ch, K] weight produces all four gate pre-activations at once.
    """
    tr = x_ref.shape[-1]
    ch = ho_ref.shape[0]
    h = h_ref[...]
    x = x_ref[...]
    m = m_ref[...]

    parts = []
    for v in (h, x):                       # h taps first: large aligned blocks
        for t, off in enumerate(offsets):
            if off == 0:
                tap = v                    # centre tap: never padded, no roll
            else:
                tap = pltpu.roll(v, shift=(-off) % tr, axis=1) * m[t:t + 1, :]
            parts.append(tap.astype(mm_dtype))
    stack = jnp.concatenate(parts, axis=0)                       # [K, tr]

    conv = jnp.dot(w_ref[...], stack,
                   preferred_element_type=jnp.float32) + b_ref[...]

    i_g = _sigmoid(conv[0 * ch:1 * ch])
    f_g = _sigmoid(conv[1 * ch:2 * ch])
    o_g = _sigmoid(conv[2 * ch:3 * ch])
    g_g = jnp.tanh(conv[3 * ch:4 * ch])

    c_next = f_g * c_ref[...] + i_g * g_g
    co_ref[...] = c_next
    ho_ref[...] = o_g * jnp.tanh(c_next)


# ------------------------------ host-side helpers -----------------------------
def _pack_weights(w, b, cin, ch, cin_pad, mm_dtype):
    """torch Conv2d weight [4Ch, Cin+Ch, kh, kw] -> [4Ch, K] matching the
    in-kernel im2col stack: h taps first then x taps, tap-major / channel-minor,
    x channels zero-padded to cin_pad for sublane alignment."""
    w = jnp.asarray(w, jnp.float32)
    kh, kw = int(w.shape[2]), int(w.shape[3])
    wx = jnp.transpose(w[:, :cin], (0, 2, 3, 1))          # [4Ch, kh, kw, Cin]
    wh = jnp.transpose(w[:, cin:], (0, 2, 3, 1))          # [4Ch, kh, kw, Ch]
    wx = jnp.pad(wx, ((0, 0), (0, 0), (0, 0), (0, cin_pad - cin)))
    packed = jnp.concatenate(
        [wh.reshape(4 * ch, kh * kw * ch),
         wx.reshape(4 * ch, kh * kw * cin_pad)], axis=1).astype(mm_dtype)
    b_col = jnp.asarray(b, jnp.float32).reshape(4 * ch, 1)
    return packed, b_col


def _tap_geometry(tile_r, H, W, kh, kw):
    """Lane offsets + validity masks (0/1 f32) for every conv tap.  The mask
    pattern is periodic in H*W and tiles are image-aligned, so one
    [ntaps, tile_r] table (constant-index BlockSpec) serves every grid step."""
    ph, pw = kh // 2, kw // 2
    r = np.arange(tile_r)
    hh = (r % (H * W)) // W
    ww = r % W
    offsets, rows = [], []
    for dh in range(-ph, kh - ph):
        for dw in range(-pw, kw - pw):
            offsets.append(dh * W + dw)
            rows.append(((hh + dh >= 0) & (hh + dh < H) &
                         (ww + dw >= 0) & (ww + dw < W)).astype(np.float32))
    return tuple(offsets), jnp.asarray(np.stack(rows, axis=0))


def _choose_tile_r(R, img, target_lanes=4096):
    """Largest image-aligned divisor of R that is <= target and a multiple of
    128 (lane-dense stores, cheap double buffering); fall back to the largest
    image-aligned 128-multiple divisor of any size, then to R itself."""
    best_small, best_any = None, None
    t = img
    while t <= R:
        if R % t == 0 and t % 128 == 0:
            best_any = t
            if t <= max(target_lanes, img):
                best_small = t
        t += img
    if best_small is not None:
        return best_small
    if best_any is not None:
        return best_any
    # TODO(synk): awkward H*W irreconcilable with 128 lanes -> single block
    # (masked stores, possible VMEM pressure on v7x).
    return R


# -------------------------------- layer runner --------------------------------
def _run_layer(xs, w_packed, b_col, ch, H, W, kernel_size, mm_dtype,
               tile_r=None):
    """Scan one ConvLSTM layer over time.  xs: [T, Cin_pad, R] (f32)."""
    T, cin_pad, R = xs.shape
    kh, kw = kernel_size
    img = H * W
    if tile_r is None:
        tile_r = _choose_tile_r(R, img)
    assert R % tile_r == 0 and tile_r % img == 0, (R, tile_r, img)
    rt = R // tile_r
    K = w_packed.shape[1]

    offsets, mask = _tap_geometry(tile_r, H, W, kh, kw)
    ntaps = mask.shape[0]

    tile_map = lambda r: (0, r)
    const_map = lambda r: (0, 0)
    state_spec = pl.BlockSpec((ch, tile_r), tile_map)

    cell = pl.pallas_call(
        functools.partial(_cell_kernel, offsets=offsets, mm_dtype=mm_dtype),
        out_shape=(jax.ShapeDtypeStruct((ch, R), jnp.float32),    # h_next
                   jax.ShapeDtypeStruct((ch, R), jnp.float32)),   # c_next
        grid_spec=pltpu.PrefetchScalarGridSpec(
            num_scalar_prefetch=0, grid=(rt,),
            in_specs=[pl.BlockSpec((cin_pad, tile_r), tile_map),  # x_t
                      state_spec,                                 # h_prev
                      state_spec,                                 # c_prev
                      pl.BlockSpec((ntaps, tile_r), const_map),   # tap masks
                      pl.BlockSpec((4 * ch, K), const_map),       # packed W
                      pl.BlockSpec((4 * ch, 1), const_map)],      # bias
            out_specs=[state_spec, state_spec]),
        compiler_params=pltpu.CompilerParams(
            dimension_semantics=("parallel",),       # no cross-tile state
            vmem_limit_bytes=32 * 1024 * 1024),
    )

    h0 = jnp.zeros((ch, R), jnp.float32)
    c0 = jnp.zeros((ch, R), jnp.float32)

    def step(carry, x_t):
        h_prev, c_prev = carry
        h_next, c_next = cell(x_t, h_prev, c_prev, mask, w_packed, b_col)
        return (h_next, c_next), h_next

    (h_last, c_last), h_seq = lax.scan(step, (h0, c0), xs)
    return h_seq, h_last, c_last


# --------------------------------- full forward -------------------------------
@functools.partial(jax.jit, static_argnames=("hidden_dims", "kernel_size",
                                              "batch_first",
                                              "return_all_layers",
                                              "mm_dtype", "tile_r"))
def conv_lstm_forward(input_tensor, params_list, hidden_state=None, *,
                      hidden_dims, kernel_size=(3, 3), batch_first=False,
                      return_all_layers=False, mm_dtype=jnp.bfloat16,
                      tile_r=None):
    """ConvLSTM.forward.  input_tensor: (t,b,c,h,w) or (b,t,c,h,w).

    Returns (layer_output_list, last_state_list) exactly like the torch module.
    """
    if hidden_state is not None:
        raise NotImplementedError()        # matches the torch module
    kh, kw = kernel_size
    assert kh % 2 == 1 and kw % 2 == 1, "odd 'same'-padding kernels only"
    if not batch_first:                    # (t,b,c,h,w) -> (b,t,c,h,w)
        input_tensor = jnp.transpose(input_tensor, (1, 0, 2, 3, 4))
    B, T, C0, H, W = input_tensor.shape
    R = B * H * W
    pad_to = 16 if mm_dtype == jnp.bfloat16 else 8

    # ONE layout change for the whole sequence (not one per step):
    # (b,t,c,h,w) -> [T, C, R] with R = (b, h, w) row-major so each image is a
    # contiguous lane run (image-aligned tiles => halo-free conv rolls).
    cur = jnp.transpose(input_tensor.astype(jnp.float32),
                        (1, 2, 0, 3, 4)).reshape(T, C0, R)

    layer_outputs, last_states = [], []
    cin = C0
    for li, p in enumerate(params_list):
        ch = hidden_dims[li]
        assert ch % pad_to == 0, "hidden_dim must be sublane-aligned"
        cin_pad = -(-cin // pad_to) * pad_to
        if cin_pad != cur.shape[1]:
            cur = jnp.pad(cur, ((0, 0), (0, cin_pad - cur.shape[1]), (0, 0)))
        w_packed, b_col = _pack_weights(p["w"], p["b"], cin, ch, cin_pad,
                                        mm_dtype)
        h_seq, h_last, c_last = _run_layer(cur, w_packed, b_col, ch, H, W,
                                           kernel_size, mm_dtype,
                                           tile_r=tile_r)
        layer_outputs.append(h_seq)
        last_states.append((h_last, c_last))
        cur = h_seq
        cin = ch

    if not return_all_layers:
        layer_outputs = layer_outputs[-1:]
        last_states = last_states[-1:]

    def seq_back(a):    # [T, C, R] -> (b, t, c, h, w)
        C = a.shape[1]
        return jnp.transpose(a.reshape(T, C, B, H, W), (2, 0, 1, 3, 4))

    def state_back(a):  # [C, R] -> (b, c, h, w)
        C = a.shape[0]
        return jnp.transpose(a.reshape(C, B, H, W), (1, 0, 2, 3))

    return ([seq_back(a) for a in layer_outputs],
            [(state_back(h), state_back(c)) for (h, c) in last_states])


# ------------------------------ pure-JAX reference ----------------------------
def conv_lstm_reference(input_tensor, params_list, *, hidden_dims,
                        kernel_size=(3, 3), batch_first=False,
                        return_all_layers=False):
    kh, kw = kernel_size
    ph, pw = kh // 2, kw // 2
    if not batch_first:
        input_tensor = jnp.transpose(input_tensor, (1, 0, 2, 3, 4))
    B, T, C0, H, W = input_tensor.shape
    cur = input_tensor.astype(jnp.float32)
    layer_outputs, last_states = [], []
    for li, p in enumerate(params_list):
        ch = hidden_dims[li]
        h = jnp.zeros((B, ch, H, W), jnp.float32)
        c = jnp.zeros((B, ch, H, W), jnp.float32)
        outs = []
        for t in range(T):
            combined = jnp.concatenate([cur[:, t], h], axis=1)
            conv = lax.conv_general_dilated(
                combined, jnp.asarray(p["w"], jnp.float32), (1, 1),
                ((ph, ph), (pw, pw)),
                dimension_numbers=("NCHW", "OIHW", "NCHW"),
                precision=lax.Precision.HIGHEST)
            conv = conv + jnp.asarray(p["b"], jnp.float32)[None, :, None, None]
            cc_i, cc_f, cc_o, cc_g = jnp.split(conv, 4, axis=1)
            c = jax.nn.sigmoid(cc_f) * c + jax.nn.sigmoid(cc_i) * jnp.tanh(cc_g)
            h = jax.nn.sigmoid(cc_o) * jnp.tanh(c)
            outs.append(h)
        cur = jnp.stack(outs, axis=1)
        layer_outputs.append(cur)
        last_states.append((h, c))
    if not return_all_layers:
        layer_outputs = layer_outputs[-1:]
        last_states = last_states[-1:]
    return layer_outputs, last_states


# ------------------------------------ main ------------------------------------
if __name__ == "__main__":
    key = jax.random.PRNGKey(0)
    B, T, Ci, H, W = 2, 8, 4, 16, 16
    hidden_dims = (32, 32)
    num_layers = len(hidden_dims)
    ksize = (3, 3)

    keys = jax.random.split(key, 2 * num_layers + 1)
    params_list = []
    cin = Ci
    for li in range(num_layers):
        ch = hidden_dims[li]
        fan_in = (cin + ch) * ksize[0] * ksize[1]
        bound = 1.0 / np.sqrt(fan_in)       # torch Conv2d default init scale
        w = jax.random.uniform(keys[2 * li], (4 * ch, cin + ch, *ksize),
                               jnp.float32, -bound, bound)
        b = jax.random.uniform(keys[2 * li + 1], (4 * ch,), jnp.float32,
                               -bound, bound)
        params_list.append(dict(w=w, b=b))
        cin = ch

    # (t, b, c, h, w) since batch_first=False
    x = jax.random.normal(keys[-1], (T, B, Ci, H, W), dtype=jnp.float32)

    ref_outs, ref_states = conv_lstm_reference(
        x, params_list, hidden_dims=hidden_dims, kernel_size=ksize)

    def check(outs, states, atol):
        assert len(outs) == 1 and len(states) == 1
        assert outs[0].shape == (B, T, hidden_dims[-1], H, W)
        for got, ref in [(outs[0], ref_outs[0]),
                         (states[0][0], ref_states[0][0]),
                         (states[0][1], ref_states[0][1])]:
            err = float(jnp.max(jnp.abs(got - ref)))
            assert err <= atol, err

    # default: bf16 MXU operands, f32 accumulation, f32 recurrent state
    outs, states = conv_lstm_forward(x, params_list, hidden_dims=hidden_dims,
                                     kernel_size=ksize)
    jax.block_until_ready(outs[0])
    check(outs, states, atol=5e-2)

    # f32 MXU operands: tight tolerance, proves the im2col/pack structure exact
    outs32, states32 = conv_lstm_forward(x, params_list,
                                         hidden_dims=hidden_dims,
                                         kernel_size=ksize,
                                         mm_dtype=jnp.float32)
    jax.block_until_ready(outs32[0])
    check(outs32, states32, atol=5e-3)

    # explicit 2-tile grid (image-aligned, 256-lane tiles) to exercise the
    # pipelined / multi-TensorCore "parallel" path
    outs_t, states_t = conv_lstm_forward(x, params_list,
                                         hidden_dims=hidden_dims,
                                         kernel_size=ksize, tile_r=256)
    jax.block_until_ready(outs_t[0])
    check(outs_t, states_t, atol=5e-2)

    print("KERNEL_OK")
</pallas_src>

<mosaic_0001>
module attributes {stable_mosaic.version = 11 : i64} {
  func.func @_cell_kernel(%arg0: i32, %arg1: memref<16x512xf32, #tpu.memory_space<vmem>>, %arg2: memref<32x512xf32, #tpu.memory_space<vmem>>, %arg3: memref<32x512xf32, #tpu.memory_space<vmem>>, %arg4: memref<9x512xf32, #tpu.memory_space<vmem>>, %arg5: memref<128x432xbf16, #tpu.memory_space<vmem>>, %arg6: memref<128x1xf32, #tpu.memory_space<vmem>>, %arg7: memref<32x512xf32, #tpu.memory_space<vmem>>, %arg8: memref<32x512xf32, #tpu.memory_space<vmem>>) attributes {dimension_semantics = [#tpu.dimension_semantics<parallel>], iteration_bounds = array<i64: 1>, scalar_prefetch = 0 : i64, scratch_operands = 0 : i64, tpu.core_type = #tpu.core_type<tc>, window_params = [{transform_indices = @transform_0, window_bounds = array<i64: 16, 512>}, {transform_indices = @transform_1, window_bounds = array<i64: 32, 512>}, {transform_indices = @transform_2, window_bounds = array<i64: 32, 512>}, {pipeline_mode = #tpu.pipeline_mode<synchronous>, transform_indices = @transform_3, window_bounds = array<i64: 9, 512>}, {pipeline_mode = #tpu.pipeline_mode<synchronous>, transform_indices = @transform_4, window_bounds = array<i64: 128, 432>}, {pipeline_mode = #tpu.pipeline_mode<synchronous>, transform_indices = @transform_5, window_bounds = array<i64: 128, 1>}, {transform_indices = @transform_6, window_bounds = array<i64: 32, 512>}, {transform_indices = @transform_7, window_bounds = array<i64: 32, 512>}]} {
    %c0 = arith.constant 0 : index
    %c0_0 = arith.constant 0 : index
    %0 = vector.load %arg2[%c0, %c0_0] : memref<32x512xf32, #tpu.memory_space<vmem>>, vector<32x512xf32>
    %c0_1 = arith.constant 0 : index
    %c0_2 = arith.constant 0 : index
    %1 = vector.load %arg1[%c0_1, %c0_2] : memref<16x512xf32, #tpu.memory_space<vmem>>, vector<16x512xf32>
    %c0_3 = arith.constant 0 : index
    %c0_4 = arith.constant 0 : index
    %2 = vector.load %arg4[%c0_3, %c0_4] : memref<9x512xf32, #tpu.memory_space<vmem>>, vector<9x512xf32>
    %c17_i32 = arith.constant 17 : i32
    %3 = tpu.dynamic_rotate %0 by %c17_i32 dim 1 : vector<32x512xf32>, i32 -> vector<32x512xf32>
    %4 = vector.extract_strided_slice %2 {offsets = [0, 0], sizes = [1, 512], strides = [1, 1]} : vector<9x512xf32> to vector<1x512xf32>
    %5 = vector.broadcast %4 : vector<1x512xf32> to vector<32x512xf32>
    %6 = arith.mulf %3, %5 : vector<32x512xf32>
    %7 = arith.truncf %6 : vector<32x512xf32> to vector<32x512xbf16>
    %c16_i32 = arith.constant 16 : i32
    %8 = tpu.dynamic_rotate %0 by %c16_i32 dim 1 : vector<32x512xf32>, i32 -> vector<32x512xf32>
    %9 = vector.extract_strided_slice %2 {offsets = [1, 0], sizes = [1, 512], strides = [1, 1]} : vector<9x512xf32> to vector<1x512xf32>
    %10 = vector.broadcast %9 : vector<1x512xf32> to vector<32x512xf32>
    %11 = arith.mulf %8, %10 : vector<32x512xf32>
    %12 = arith.truncf %11 : vector<32x512xf32> to vector<32x512xbf16>
    %c15_i32 = arith.constant 15 : i32
    %13 = tpu.dynamic_rotate %0 by %c15_i32 dim 1 : vector<32x512xf32>, i32 -> vector<32x512xf32>
    %14 = vector.extract_strided_slice %2 {offsets = [2, 0], sizes = [1, 512], strides = [1, 1]} : vector<9x512xf32> to vector<1x512xf32>
    %15 = vector.broadcast %14 : vector<1x512xf32> to vector<32x512xf32>
    %16 = arith.mulf %13, %15 : vector<32x512xf32>
    %17 = arith.truncf %16 : vector<32x512xf32> to vector<32x512xbf16>
    %c1_i32 = arith.constant 1 : i32
    %18 = tpu.dynamic_rotate %0 by %c1_i32 dim 1 : vector<32x512xf32>, i32 -> vector<32x512xf32>
    %19 = vector.extract_strided_slice %2 {offsets = [3, 0], sizes = [1, 512], strides = [1, 1]} : vector<9x512xf32> to vector<1x512xf32>
    %20 = vector.broadcast %19 : vector<1x512xf32> to vector<32x512xf32>
    %21 = arith.mulf %18, %20 : vector<32x512xf32>
    %22 = arith.truncf %21 : vector<32x512xf32> to vector<32x512xbf16>
    %23 = arith.truncf %0 : vector<32x512xf32> to vector<32x512xbf16>
    %c511_i32 = arith.constant 511 : i32
    %24 = tpu.dynamic_rotate %0 by %c511_i32 dim 1 : vector<32x512xf32>, i32 -> vector<32x512xf32>
    %25 = vector.extract_strided_slice %2 {offsets = [5, 0], sizes = [1, 512], strides = [1, 1]} : vector<9x512xf32> to vector<1x512xf32>
    %26 = vector.broadcast %25 : vector<1x512xf32> to vector<32x512xf32>
    %27 = arith.mulf %24, %26 : vector<32x512xf32>
    %28 = arith.truncf %27 : vector<32x512xf32> to vector<32x512xbf16>
    %c497_i32 = arith.constant 497 : i32
    %29 = tpu.dynamic_rotate %0 by %c497_i32 dim 1 : vector<32x512xf32>, i32 -> vector<32x512xf32>
    %30 = vector.extract_strided_slice %2 {offsets = [6, 0], sizes = [1, 512], strides = [1, 1]} : vector<9x512xf32> to vector<1x512xf32>
    %31 = vector.broadcast %30 : vector<1x512xf32> to vector<32x512xf32>
    %32 = arith.mulf %29, %31 : vector<32x512xf32>
    %33 = arith.truncf %32 : vector<32x512xf32> to vector<32x512xbf16>
    %c496_i32 = arith.constant 496 : i32
    %34 = tpu.dynamic_rotate %0 by %c496_i32 dim 1 : vector<32x512xf32>, i32 -> vector<32x512xf32>
    %35 = vector.extract_strided_slice %2 {offsets = [7, 0], sizes = [1, 512], strides = [1, 1]} : vector<9x512xf32> to vector<1x512xf32>
    %36 = vector.broadcast %35 : vector<1x512xf32> to vector<32x512xf32>
    %37 = arith.mulf %34, %36 : vector<32x512xf32>
    %38 = arith.truncf %37 : vector<32x512xf32> to vector<32x512xbf16>
    %c495_i32 = arith.constant 495 : i32
    %39 = tpu.dynamic_rotate %0 by %c495_i32 dim 1 : vector<32x512xf32>, i32 -> vector<32x512xf32>
    %40 = vector.extract_strided_slice %2 {offsets = [8, 0], sizes = [1, 512], strides = [1, 1]} : vector<9x512xf32> to vector<1x512xf32>
    %41 = vector.broadcast %40 : vector<1x512xf32> to vector<32x512xf32>
    %42 = arith.mulf %39, %41 : vector<32x512xf32>
    %43 = arith.truncf %42 : vector<32x512xf32> to vector<32x512xbf16>
    %c17_i32_5 = arith.constant 17 : i32
    %44 = tpu.dynamic_rotate %1 by %c17_i32_5 dim 1 : vector<16x512xf32>, i32 -> vector<16x512xf32>
    %45 = vector.extract_strided_slice %2 {offsets = [0, 0], sizes = [1, 512], strides = [1, 1]} : vector<9x512xf32> to vector<1x512xf32>
    %46 = vector.broadcast %45 : vector<1x512xf32> to vector<16x512xf32>
    %47 = arith.mulf %44, %46 : vector<16x512xf32>
    %48 = arith.truncf %47 : vector<16x512xf32> to vector<16x512xbf16>
    %c16_i32_6 = arith.constant 16 : i32
    %49 = tpu.dynamic_rotate %1 by %c16_i32_6 dim 1 : vector<16x512xf32>, i32 -> vector<16x512xf32>
    %50 = vector.extract_strided_slice %2 {offsets = [1, 0], sizes = [1, 512], strides = [1, 1]} : vector<9x512xf32> to vector<1x512xf32>
    %51 = vector.broadcast %50 : vector<1x512xf32> to vector<16x512xf32>
    %52 = arith.mulf %49, %51 : vector<16x512xf32>
    %53 = arith.truncf %52 : vector<16x512xf32> to vector<16x512xbf16>
    %c15_i32_7 = arith.constant 15 : i32
    %54 = tpu.dynamic_rotate %1 by %c15_i32_7 dim 1 : vector<16x512xf32>, i32 -> vector<16x512xf32>
    %55 = vector.extract_strided_slice %2 {offsets = [2, 0], sizes = [1, 512], strides = [1, 1]} : vector<9x512xf32> to vector<1x512xf32>
    %56 = vector.broadcast %55 : vector<1x512xf32> to vector<16x512xf32>
    %57 = arith.mulf %54, %56 : vector<16x512xf32>
    %58 = arith.truncf %57 : vector<16x512xf32> to vector<16x512xbf16>
    %c1_i32_8 = arith.constant 1 : i32
    %59 = tpu.dynamic_rotate %1 by %c1_i32_8 dim 1 : vector<16x512xf32>, i32 -> vector<16x512xf32>
    %60 = vector.extract_strided_slice %2 {offsets = [3, 0], sizes = [1, 512], strides = [1, 1]} : vector<9x512xf32> to vector<1x512xf32>
    %61 = vector.broadcast %60 : vector<1x512xf32> to vector<16x512xf32>
    %62 = arith.mulf %59, %61 : vector<16x512xf32>
    %63 = arith.truncf %62 : vector<16x512xf32> to vector<16x512xbf16>
    %64 = arith.truncf %1 : vector<16x512xf32> to vector<16x512xbf16>
    %c511_i32_9 = arith.constant 511 : i32
    %65 = tpu.dynamic_rotate %1 by %c511_i32_9 dim 1 : vector<16x512xf32>, i32 -> vector<16x512xf32>
    %66 = vector.extract_strided_slice %2 {offsets = [5, 0], sizes = [1, 512], strides = [1, 1]} : vector<9x512xf32> to vector<1x512xf32>
    %67 = vector.broadcast %66 : vector<1x512xf32> to vector<16x512xf32>
    %68 = arith.mulf %65, %67 : vector<16x512xf32>
    %69 = arith.truncf %68 : vector<16x512xf32> to vector<16x512xbf16>
    %c497_i32_10 = arith.constant 497 : i32
    %70 = tpu.dynamic_rotate %1 by %c497_i32_10 dim 1 : vector<16x512xf32>, i32 -> vector<16x512xf32>
    %71 = vector.extract_strided_slice %2 {offsets = [6, 0], sizes = [1, 512], strides = [1, 1]} : vector<9x512xf32> to vector<1x512xf32>
    %72 = vector.broadcast %71 : vector<1x512xf32> to vector<16x512xf32>
    %73 = arith.mulf %70, %72 : vector<16x512xf32>
    %74 = arith.truncf %73 : vector<16x512xf32> to vector<16x512xbf16>
    %c496_i32_11 = arith.constant 496 : i32
    %75 = tpu.dynamic_rotate %1 by %c496_i32_11 dim 1 : vector<16x512xf32>, i32 -> vector<16x512xf32>
    %76 = vector.extract_strided_slice %2 {offsets = [7, 0], sizes = [1, 512], strides = [1, 1]} : vector<9x512xf32> to vector<1x512xf32>
    %77 = vector.broadcast %76 : vector<1x512xf32> to vector<16x512xf32>
    %78 = arith.mulf %75, %77 : vector<16x512xf32>
    %79 = arith.truncf %78 : vector<16x512xf32> to vector<16x512xbf16>
    %c495_i32_12 = arith.constant 495 : i32
    %80 = tpu.dynamic_rotate %1 by %c495_i32_12 dim 1 : vector<16x512xf32>, i32 -> vector<16x512xf32>
    %81 = vector.extract_strided_slice %2 {offsets = [8, 0], sizes = [1, 512], strides = [1, 1]} : vector<9x512xf32> to vector<1x512xf32>
    %82 = vector.broadcast %81 : vector<1x512xf32> to vector<16x512xf32>
    %83 = arith.mulf %80, %82 : vector<16x512xf32>
    %84 = arith.truncf %83 : vector<16x512xf32> to vector<16x512xbf16>
    %85 = tpu.concatenate %7, %12, %17, %22, %23, %28, %33, %38, %43, %48, %53, %58, %63, %64, %69, %74 in 0 : vector<32x512xbf16>, vector<32x512xbf16>, vector<32x512xbf16>, vector<32x512xbf16>, vector<32x512xbf16>, vector<32x512xbf16>, vector<32x512xbf16>, vector<32x512xbf16>, vector<32x512xbf16>, vector<16x512xbf16>, vector<16x512xbf16>, vector<16x512xbf16>, vector<16x512xbf16>, vector<16x512xbf16>, vector<16x512xbf16>, vector<16x512xbf16> -> vector<400x512xbf16>
    %86 = tpu.concatenate %79, %84 in 0 : vector<16x512xbf16>, vector<16x512xbf16> -> vector<32x512xbf16>
    %87 = tpu.concatenate %85, %86 in 0 : vector<400x512xbf16>, vector<32x512xbf16> -> vector<432x512xbf16>
    %c0_13 = arith.constant 0 : index
    %c0_14 = arith.constant 0 : index
    %88 = vector.load %arg5[%c0_13, %c0_14] : memref<128x432xbf16, #tpu.memory_space<vmem>>, vector<128x432xbf16>
    %cst = arith.constant dense<0.000000e+00> : vector<128x512xf32>
    %89 = tpu.matmul %88, %87, %cst {dimension_numbers = #tpu.dot_dimension_numbers<[1], [0], [0], [1], [0, 0, 1, 1], [], []>} : vector<128x432xbf16>, vector<432x512xbf16>, vector<128x512xf32> -> vector<128x512xf32>
    %c0_15 = arith.constant 0 : index
    %c0_16 = arith.constant 0 : index
    %90 = vector.load %arg6[%c0_15, %c0_16] : memref<128x1xf32, #tpu.memory_space<vmem>>, vector<128x1xf32>
    %91 = vector.broadcast %90 : vector<128x1xf32> to vector<128x512xf32>
    %92 = arith.addf %89, %91 : vector<128x512xf32>
    %93 = vector.extract_strided_slice %92 {offsets = [0, 0], sizes = [32, 512], strides = [1, 1]} : vector<128x512xf32> to vector<32x512xf32>
    %cst_17 = arith.constant 5.000000e-01 : f32
    %94 = vector.broadcast %cst_17 : f32 to vector<32x512xf32>
    %95 = arith.mulf %94, %93 : vector<32x512xf32>
    %96 = math.tanh %95 : vector<32x512xf32>
    %cst_18 = arith.constant 1.000000e+00 : f32
    %97 = vector.broadcast %cst_18 : f32 to vector<32x512xf32>
    %98 = arith.addf %96, %97 : vector<32x512xf32>
    %cst_19 = arith.constant 5.000000e-01 : f32
    %99 = vector.broadcast %cst_19 : f32 to vector<32x512xf32>
    %100 = arith.mulf %99, %98 : vector<32x512xf32>
    %101 = vector.extract_strided_slice %92 {offsets = [32, 0], sizes = [32, 512], strides = [1, 1]} : vector<128x512xf32> to vector<32x512xf32>
    %cst_20 = arith.constant 5.000000e-01 : f32
    %102 = vector.broadcast %cst_20 : f32 to vector<32x512xf32>
    %103 = arith.mulf %102, %101 : vector<32x512xf32>
    %104 = math.tanh %103 : vector<32x512xf32>
    %cst_21 = arith.constant 1.000000e+00 : f32
    %105 = vector.broadcast %cst_21 : f32 to vector<32x512xf32>
    %106 = arith.addf %104, %105 : vector<32x512xf32>
    %cst_22 = arith.constant 5.000000e-01 : f32
    %107 = vector.broadcast %cst_22 : f32 to vector<32x512xf32>
    %108 = arith.mulf %107, %106 : vector<32x512xf32>
    %109 = vector.extract_strided_slice %92 {offsets = [64, 0], sizes = [32, 512], strides = [1, 1]} : vector<128x512xf32> to vector<32x512xf32>
    %cst_23 = arith.constant 5.000000e-01 : f32
    %110 = vector.broadcast %cst_23 : f32 to vector<32x512xf32>
    %111 = arith.mulf %110, %109 : vector<32x512xf32>
    %112 = math.tanh %111 : vector<32x512xf32>
    %cst_24 = arith.constant 1.000000e+00 : f32
    %113 = vector.broadcast %cst_24 : f32 to vector<32x512xf32>
    %114 = arith.addf %112, %113 : vector<32x512xf32>
    %cst_25 = arith.constant 5.000000e-01 : f32
    %115 = vector.broadcast %cst_25 : f32 to vector<32x512xf32>
    %116 = arith.mulf %115, %114 : vector<32x512xf32>
    %117 = vector.extract_strided_slice %92 {offsets = [96, 0], sizes = [32, 512], strides = [1, 1]} : vector<128x512xf32> to vector<32x512xf32>
    %118 = math.tanh %117 : vector<32x512xf32>
    %c0_26 = arith.constant 0 : index
    %c0_27 = arith.constant 0 : index
    %119 = vector.load %arg3[%c0_26, %c0_27] : memref<32x512xf32, #tpu.memory_space<vmem>>, vector<32x512xf32>
    %120 = arith.mulf %108, %119 : vector<32x512xf32>
    %121 = arith.mulf %100, %118 : vector<32x512xf32>
    %122 = arith.addf %120, %121 : vector<32x512xf32>
    %c0_28 = arith.constant 0 : index
    %c0_29 = arith.constant 0 : index
    %123 = vector.load %arg8[%c0_28, %c0_29] : memref<32x512xf32, #tpu.memory_space<vmem>>, vector<32x512xf32>
    tpu.vector_store %arg8[%c0_28, %c0_29], %122 {strides = array<i32>} : memref<32x512xf32, #tpu.memory_space<vmem>>, vector<32x512xf32>,
    %124 = math.tanh %122 : vector<32x512xf32>
    %125 = arith.mulf %116, %124 : vector<32x512xf32>
    %c0_30 = arith.constant 0 : index
    %c0_31 = arith.constant 0 : index
    %126 = vector.load %arg7[%c0_30, %c0_31] : memref<32x512xf32, #tpu.memory_space<vmem>>, vector<32x512xf32>
    tpu.vector_store %arg7[%c0_30, %c0_31], %125 {strides = array<i32>} : memref<32x512xf32, #tpu.memory_space<vmem>>, vector<32x512xf32>,
    return
  }
  func.func @transform_0(%arg0: i32) -> (i32, i32) {
    %c0_i32 = arith.constant 0 : i32
    %c0_i32_0 = arith.constant 0 : i32
    return %c0_i32, %arg0 : i32, i32
  }
  func.func @transform_1(%arg0: i32) -> (i32, i32) {
    %c0_i32 = arith.constant 0 : i32
    %c0_i32_0 = arith.constant 0 : i32
    return %c0_i32, %arg0 : i32, i32
  }
  func.func @transform_2(%arg0: i32) -> (i32, i32) {
    %c0_i32 = arith.constant 0 : i32
    %c0_i32_0 = arith.constant 0 : i32
    return %c0_i32, %arg0 : i32, i32
  }
  func.func @transform_3(%arg0: i32) -> (i32, i32) {
    %c0_i32 = arith.constant 0 : i32
    %c0_i32_0 = arith.constant 0 : i32
    %c0_i32_1 = arith.constant 0 : i32
    return %c0_i32, %c0_i32_0 : i32, i32
  }
  func.func @transform_4(%arg0: i32) -> (i32, i32) {
    %c0_i32 = arith.constant 0 : i32
    %c0_i32_0 = arith.constant 0 : i32
    %c0_i32_1 = arith.constant 0 : i32
    return %c0_i32, %c0_i32_0 : i32, i32
  }
  func.func @transform_5(%arg0: i32) -> (i32, i32) {
    %c0_i32 = arith.constant 0 : i32
    %c0_i32_0 = arith.constant 0 : i32
    %c0_i32_1 = arith.constant 0 : i32
    return %c0_i32, %c0_i32_0 : i32, i32
  }
  func.func @transform_6(%arg0: i32) -> (i32, i32) {
    %c0_i32 = arith.constant 0 : i32
    %c0_i32_0 = arith.constant 0 : i32
    return %c0_i32, %arg0 : i32, i32
  }
  func.func @transform_7(%arg0: i32) -> (i32, i32) {
    %c0_i32 = arith.constant 0 : i32
    %c0_i32_0 = arith.constant 0 : i32
    return %c0_i32, %arg0 : i32, i32
  }
}

module attributes {stable_mosaic.version = 11 : i64} {
  func.func @_cell_kernel(%arg0: i32, %arg1: memref<32x512xf32, #tpu.memory_space<vmem>>, %arg2: memref<32x512xf32, #tpu.memory_space<vmem>>, %arg3: memref<32x512xf32, #tpu.memory_space<vmem>>, %arg4: memref<9x512xf32, #tpu.memory_space<vmem>>, %arg5: memref<128x576xbf16, #tpu.memory_space<vmem>>, %arg6: memref<128x1xf32, #tpu.memory_space<vmem>>, %arg7: memref<32x512xf32, #tpu.memory_space<vmem>>, %arg8: memref<32x512xf32, #tpu.memory_space<vmem>>) attributes {dimension_semantics = [#tpu.dimension_semantics<parallel>], iteration_bounds = array<i64: 1>, scalar_prefetch = 0 : i64, scratch_operands = 0 : i64, tpu.core_type = #tpu.core_type<tc>, window_params = [{transform_indices = @transform_0, window_bounds = array<i64: 32, 512>}, {transform_indices = @transform_1, window_bounds = array<i64: 32, 512>}, {transform_indices = @transform_2, window_bounds = array<i64: 32, 512>}, {pipeline_mode = #tpu.pipeline_mode<synchronous>, transform_indices = @transform_3, window_bounds = array<i64: 9, 512>}, {pipeline_mode = #tpu.pipeline_mode<synchronous>, transform_indices = @transform_4, window_bounds = array<i64: 128, 576>}, {pipeline_mode = #tpu.pipeline_mode<synchronous>, transform_indices = @transform_5, window_bounds = array<i64: 128, 1>}, {transform_indices = @transform_6, window_bounds = array<i64: 32, 512>}, {transform_indices = @transform_7, window_bounds = array<i64: 32, 512>}]} {
    %c0 = arith.constant 0 : index
    %c0_0 = arith.constant 0 : index
    %0 = vector.load %arg2[%c0, %c0_0] : memref<32x512xf32, #tpu.memory_space<vmem>>, vector<32x512xf32>
    %c0_1 = arith.constant 0 : index
    %c0_2 = arith.constant 0 : index
    %1 = vector.load %arg1[%c0_1, %c0_2] : memref<32x512xf32, #tpu.memory_space<vmem>>, vector<32x512xf32>
    %c0_3 = arith.constant 0 : index
    %c0_4 = arith.constant 0 : index
    %2 = vector.load %arg4[%c0_3, %c0_4] : memref<9x512xf32, #tpu.memory_space<vmem>>, vector<9x512xf32>
    %c17_i32 = arith.constant 17 : i32
    %3 = tpu.dynamic_rotate %0 by %c17_i32 dim 1 : vector<32x512xf32>, i32 -> vector<32x512xf32>
    %4 = vector.extract_strided_slice %2 {offsets = [0, 0], sizes = [1, 512], strides = [1, 1]} : vector<9x512xf32> to vector<1x512xf32>
    %5 = vector.broadcast %4 : vector<1x512xf32> to vector<32x512xf32>
    %6 = arith.mulf %3, %5 : vector<32x512xf32>
    %7 = arith.truncf %6 : vector<32x512xf32> to vector<32x512xbf16>
    %c16_i32 = arith.constant 16 : i32
    %8 = tpu.dynamic_rotate %0 by %c16_i32 dim 1 : vector<32x512xf32>, i32 -> vector<32x512xf32>
    %9 = vector.extract_strided_slice %2 {offsets = [1, 0], sizes = [1, 512], strides = [1, 1]} : vector<9x512xf32> to vector<1x512xf32>
    %10 = vector.broadcast %9 : vector<1x512xf32> to vector<32x512xf32>
    %11 = arith.mulf %8, %10 : vector<32x512xf32>
    %12 = arith.truncf %11 : vector<32x512xf32> to vector<32x512xbf16>
    %c15_i32 = arith.constant 15 : i32
    %13 = tpu.dynamic_rotate %0 by %c15_i32 dim 1 : vector<32x512xf32>, i32 -> vector<32x512xf32>
    %14 = vector.extract_strided_slice %2 {offsets = [2, 0], sizes = [1, 512], strides = [1, 1]} : vector<9x512xf32> to vector<1x512xf32>
    %15 = vector.broadcast %14 : vector<1x512xf32> to vector<32x512xf32>
    %16 = arith.mulf %13, %15 : vector<32x512xf32>
    %17 = arith.truncf %16 : vector<32x512xf32> to vector<32x512xbf16>
    %c1_i32 = arith.constant 1 : i32
    %18 = tpu.dynamic_rotate %0 by %c1_i32 dim 1 : vector<32x512xf32>, i32 -> vector<32x512xf32>
    %19 = vector.extract_strided_slice %2 {offsets = [3, 0], sizes = [1, 512], strides = [1, 1]} : vector<9x512xf32> to vector<1x512xf32>
    %20 = vector.broadcast %19 : vector<1x512xf32> to vector<32x512xf32>
    %21 = arith.mulf %18, %20 : vector<32x512xf32>
    %22 = arith.truncf %21 : vector<32x512xf32> to vector<32x512xbf16>
    %23 = arith.truncf %0 : vector<32x512xf32> to vector<32x512xbf16>
    %c511_i32 = arith.constant 511 : i32
    %24 = tpu.dynamic_rotate %0 by %c511_i32 dim 1 : vector<32x512xf32>, i32 -> vector<32x512xf32>
    %25 = vector.extract_strided_slice %2 {offsets = [5, 0], sizes = [1, 512], strides = [1, 1]} : vector<9x512xf32> to vector<1x512xf32>
    %26 = vector.broadcast %25 : vector<1x512xf32> to vector<32x512xf32>
    %27 = arith.mulf %24, %26 : vector<32x512xf32>
    %28 = arith.truncf %27 : vector<32x512xf32> to vector<32x512xbf16>
    %c497_i32 = arith.constant 497 : i32
    %29 = tpu.dynamic_rotate %0 by %c497_i32 dim 1 : vector<32x512xf32>, i32 -> vector<32x512xf32>
    %30 = vector.extract_strided_slice %2 {offsets = [6, 0], sizes = [1, 512], strides = [1, 1]} : vector<9x512xf32> to vector<1x512xf32>
    %31 = vector.broadcast %30 : vector<1x512xf32> to vector<32x512xf32>
    %32 = arith.mulf %29, %31 : vector<32x512xf32>
    %33 = arith.truncf %32 : vector<32x512xf32> to vector<32x512xbf16>
    %c496_i32 = arith.constant 496 : i32
    %34 = tpu.dynamic_rotate %0 by %c496_i32 dim 1 : vector<32x512xf32>, i32 -> vector<32x512xf32>
    %35 = vector.extract_strided_slice %2 {offsets = [7, 0], sizes = [1, 512], strides = [1, 1]} : vector<9x512xf32> to vector<1x512xf32>
    %36 = vector.broadcast %35 : vector<1x512xf32> to vector<32x512xf32>
    %37 = arith.mulf %34, %36 : vector<32x512xf32>
    %38 = arith.truncf %37 : vector<32x512xf32> to vector<32x512xbf16>
    %c495_i32 = arith.constant 495 : i32
    %39 = tpu.dynamic_rotate %0 by %c495_i32 dim 1 : vector<32x512xf32>, i32 -> vector<32x512xf32>
    %40 = vector.extract_strided_slice %2 {offsets = [8, 0], sizes = [1, 512], strides = [1, 1]} : vector<9x512xf32> to vector<1x512xf32>
    %41 = vector.broadcast %40 : vector<1x512xf32> to vector<32x512xf32>
    %42 = arith.mulf %39, %41 : vector<32x512xf32>
    %43 = arith.truncf %42 : vector<32x512xf32> to vector<32x512xbf16>
    %c17_i32_5 = arith.constant 17 : i32
    %44 = tpu.dynamic_rotate %1 by %c17_i32_5 dim 1 : vector<32x512xf32>, i32 -> vector<32x512xf32>
    %45 = vector.extract_strided_slice %2 {offsets = [0, 0], sizes = [1, 512], strides = [1, 1]} : vector<9x512xf32> to vector<1x512xf32>
    %46 = vector.broadcast %45 : vector<1x512xf32> to vector<32x512xf32>
    %47 = arith.mulf %44, %46 : vector<32x512xf32>
    %48 = arith.truncf %47 : vector<32x512xf32> to vector<32x512xbf16>
    %c16_i32_6 = arith.constant 16 : i32
    %49 = tpu.dynamic_rotate %1 by %c16_i32_6 dim 1 : vector<32x512xf32>, i32 -> vector<32x512xf32>
    %50 = vector.extract_strided_slice %2 {offsets = [1, 0], sizes = [1, 512], strides = [1, 1]} : vector<9x512xf32> to vector<1x512xf32>
    %51 = vector.broadcast %50 : vector<1x512xf32> to vector<32x512xf32>
    %52 = arith.mulf %49, %51 : vector<32x512xf32>
    %53 = arith.truncf %52 : vector<32x512xf32> to vector<32x512xbf16>
    %c15_i32_7 = arith.constant 15 : i32
    %54 = tpu.dynamic_rotate %1 by %c15_i32_7 dim 1 : vector<32x512xf32>, i32 -> vector<32x512xf32>
    %55 = vector.extract_strided_slice %2 {offsets = [2, 0], sizes = [1, 512], strides = [1, 1]} : vector<9x512xf32> to vector<1x512xf32>
    %56 = vector.broadcast %55 : vector<1x512xf32> to vector<32x512xf32>
    %57 = arith.mulf %54, %56 : vector<32x512xf32>
    %58 = arith.truncf %57 : vector<32x512xf32> to vector<32x512xbf16>
    %c1_i32_8 = arith.constant 1 : i32
    %59 = tpu.dynamic_rotate %1 by %c1_i32_8 dim 1 : vector<32x512xf32>, i32 -> vector<32x512xf32>
    %60 = vector.extract_strided_slice %2 {offsets = [3, 0], sizes = [1, 512], strides = [1, 1]} : vector<9x512xf32> to vector<1x512xf32>
    %61 = vector.broadcast %60 : vector<1x512xf32> to vector<32x512xf32>
    %62 = arith.mulf %59, %61 : vector<32x512xf32>
    %63 = arith.truncf %62 : vector<32x512xf32> to vector<32x512xbf16>
    %64 = arith.truncf %1 : vector<32x512xf32> to vector<32x512xbf16>
    %c511_i32_9 = arith.constant 511 : i32
    %65 = tpu.dynamic_rotate %1 by %c511_i32_9 dim 1 : vector<32x512xf32>, i32 -> vector<32x512xf32>
    %66 = vector.extract_strided_slice %2 {offsets = [5, 0], sizes = [1, 512], strides = [1, 1]} : vector<9x512xf32> to vector<1x512xf32>
    %67 = vector.broadcast %66 : vector<1x512xf32> to vector<32x512xf32>
    %68 = arith.mulf %65, %67 : vector<32x512xf32>
    %69 = arith.truncf %68 : vector<32x512xf32> to vector<32x512xbf16>
    %c497_i32_10 = arith.constant 497 : i32
    %70 = tpu.dynamic_rotate %1 by %c497_i32_10 dim 1 : vector<32x512xf32>, i32 -> vector<32x512xf32>
    %71 = vector.extract_strided_slice %2 {offsets = [6, 0], sizes = [1, 512], strides = [1, 1]} : vector<9x512xf32> to vector<1x512xf32>
    %72 = vector.broadcast %71 : vector<1x512xf32> to vector<32x512xf32>
    %73 = arith.mulf %70, %72 : vector<32x512xf32>
    %74 = arith.truncf %73 : vector<32x512xf32> to vector<32x512xbf16>
    %c496_i32_11 = arith.constant 496 : i32
    %75 = tpu.dynamic_rotate %1 by %c496_i32_11 dim 1 : vector<32x512xf32>, i32 -> vector<32x512xf32>
    %76 = vector.extract_strided_slice %2 {offsets = [7, 0], sizes = [1, 512], strides = [1, 1]} : vector<9x512xf32> to vector<1x512xf32>
    %77 = vector.broadcast %76 : vector<1x512xf32> to vector<32x512xf32>
    %78 = arith.mulf %75, %77 : vector<32x512xf32>
    %79 = arith.truncf %78 : vector<32x512xf32> to vector<32x512xbf16>
    %c495_i32_12 = arith.constant 495 : i32
    %80 = tpu.dynamic_rotate %1 by %c495_i32_12 dim 1 : vector<32x512xf32>, i32 -> vector<32x512xf32>
    %81 = vector.extract_strided_slice %2 {offsets = [8, 0], sizes = [1, 512], strides = [1, 1]} : vector<9x512xf32> to vector<1x512xf32>
    %82 = vector.broadcast %81 : vector<1x512xf32> to vector<32x512xf32>
    %83 = arith.mulf %80, %82 : vector<32x512xf32>
    %84 = arith.truncf %83 : vector<32x512xf32> to vector<32x512xbf16>
    %85 = tpu.concatenate %7, %12, %17, %22, %23, %28, %33, %38, %43, %48, %53, %58, %63, %64, %69, %74 in 0 : vector<32x512xbf16>, vector<32x512xbf16>, vector<32x512xbf16>, vector<32x512xbf16>, vector<32x512xbf16>, vector<32x512xbf16>, vector<32x512xbf16>, vector<32x512xbf16>, vector<32x512xbf16>, vector<32x512xbf16>, vector<32x512xbf16>, vector<32x512xbf16>, vector<32x512xbf16>, vector<32x512xbf16>, vector<32x512xbf16>, vector<32x512xbf16> -> vector<512x512xbf16>
    %86 = tpu.concatenate %79, %84 in 0 : vector<32x512xbf16>, vector<32x512xbf16> -> vector<64x512xbf16>
    %87 = tpu.concatenate %85, %86 in 0 : vector<512x512xbf16>, vector<64x512xbf16> -> vector<576x512xbf16>
    %c0_13 = arith.constant 0 : index
    %c0_14 = arith.constant 0 : index
    %88 = vector.load %arg5[%c0_13, %c0_14] : memref<128x576xbf16, #tpu.memory_space<vmem>>, vector<128x576xbf16>
    %cst = arith.constant dense<0.000000e+00> : vector<128x512xf32>
    %89 = tpu.matmul %88, %87, %cst {dimension_numbers = #tpu.dot_dimension_numbers<[1], [0], [0], [1], [0, 0, 1, 1], [], []>} : vector<128x576xbf16>, vector<576x512xbf16>, vector<128x512xf32> -> vector<128x512xf32>
    %c0_15 = arith.constant 0 : index
    %c0_16 = arith.constant 0 : index
    %90 = vector.load %arg6[%c0_15, %c0_16] : memref<128x1xf32, #tpu.memory_space<vmem>>, vector<128x1xf32>
    %91 = vector.broadcast %90 : vector<128x1xf32> to vector<128x512xf32>
    %92 = arith.addf %89, %91 : vector<128x512xf32>
    %93 = vector.extract_strided_slice %92 {offsets = [0, 0], sizes = [32, 512], strides = [1, 1]} : vector<128x512xf32> to vector<32x512xf32>
    %cst_17 = arith.constant 5.000000e-01 : f32
    %94 = vector.broadcast %cst_17 : f32 to vector<32x512xf32>
    %95 = arith.mulf %94, %93 : vector<32x512xf32>
    %96 = math.tanh %95 : vector<32x512xf32>
    %cst_18 = arith.constant 1.000000e+00 : f32
    %97 = vector.broadcast %cst_18 : f32 to vector<32x512xf32>
    %98 = arith.addf %96, %97 : vector<32x512xf32>
    %cst_19 = arith.constant 5.000000e-01 : f32
    %99 = vector.broadcast %cst_19 : f32 to vector<32x512xf32>
    %100 = arith.mulf %99, %98 : vector<32x512xf32>
    %101 = vector.extract_strided_slice %92 {offsets = [32, 0], sizes = [32, 512], strides = [1, 1]} : vector<128x512xf32> to vector<32x512xf32>
    %cst_20 = arith.constant 5.000000e-01 : f32
    %102 = vector.broadcast %cst_20 : f32 to vector<32x512xf32>
    %103 = arith.mulf %102, %101 : vector<32x512xf32>
    %104 = math.tanh %103 : vector<32x512xf32>
    %cst_21 = arith.constant 1.000000e+00 : f32
    %105 = vector.broadcast %cst_21 : f32 to vector<32x512xf32>
    %106 = arith.addf %104, %105 : vector<32x512xf32>
    %cst_22 = arith.constant 5.000000e-01 : f32
    %107 = vector.broadcast %cst_22 : f32 to vector<32x512xf32>
    %108 = arith.mulf %107, %106 : vector<32x512xf32>
    %109 = vector.extract_strided_slice %92 {offsets = [64, 0], sizes = [32, 512], strides = [1, 1]} : vector<128x512xf32> to vector<32x512xf32>
    %cst_23 = arith.constant 5.000000e-01 : f32
    %110 = vector.broadcast %cst_23 : f32 to vector<32x512xf32>
    %111 = arith.mulf %110, %109 : vector<32x512xf32>
    %112 = math.tanh %111 : vector<32x512xf32>
    %cst_24 = arith.constant 1.000000e+00 : f32
    %113 = vector.broadcast %cst_24 : f32 to vector<32x512xf32>
    %114 = arith.addf %112, %113 : vector<32x512xf32>
    %cst_25 = arith.constant 5.000000e-01 : f32
    %115 = vector.broadcast %cst_25 : f32 to vector<32x512xf32>
    %116 = arith.mulf %115, %114 : vector<32x512xf32>
    %117 = vector.extract_strided_slice %92 {offsets = [96, 0], sizes = [32, 512], strides = [1, 1]} : vector<128x512xf32> to vector<32x512xf32>
    %118 = math.tanh %117 : vector<32x512xf32>
    %c0_26 = arith.constant 0 : index
    %c0_27 = arith.constant 0 : index
    %119 = vector.load %arg3[%c0_26, %c0_27] : memref<32x512xf32, #tpu.memory_space<vmem>>, vector<32x512xf32>
    %120 = arith.mulf %108, %119 : vector<32x512xf32>
    %121 = arith.mulf %100, %118 : vector<32x512xf32>
    %122 = arith.addf %120, %121 : vector<32x512xf32>
    %c0_28 = arith.constant 0 : index
    %c0_29 = arith.constant 0 : index
    %123 = vector.load %arg8[%c0_28, %c0_29] : memref<32x512xf32, #tpu.memory_space<vmem>>, vector<32x512xf32>
    tpu.vector_store %arg8[%c0_28, %c0_29], %122 {strides = array<i32>} : memref<32x512xf32, #tpu.memory_space<vmem>>, vector<32x512xf32>,
    %124 = math.tanh %122 : vector<32x512xf32>
    %125 = arith.mulf %116, %124 : vector<32x512xf32>
    %c0_30 = arith.constant 0 : index
    %c0_31 = arith.constant 0 : index
    %126 = vector.load %arg7[%c0_30, %c0_31] : memref<32x512xf32, #tpu.memory_space<vmem>>, vector<32x512xf32>
    tpu.vector_store %arg7[%c0_30, %c0_31], %125 {strides = array<i32>} : memref<32x512xf32, #tpu.memory_space<vmem>>, vector<32x512xf32>,
    return
  }
  func.func @transform_0(%arg0: i32) -> (i32, i32) {
    %c0_i32 = arith.constant 0 : i32
    %c0_i32_0 = arith.constant 0 : i32
    return %c0_i32, %arg0 : i32, i32
  }
  func.func @transform_1(%arg0: i32) -> (i32, i32) {
    %c0_i32 = arith.constant 0 : i32
    %c0_i32_0 = arith.constant 0 : i32
    return %c0_i32, %arg0 : i32, i32
  }
  func.func @transform_2(%arg0: i32) -> (i32, i32) {
    %c0_i32 = arith.constant 0 : i32
    %c0_i32_0 = arith.constant 0 : i32
    return %c0_i32, %arg0 : i32, i32
  }
  func.func @transform_3(%arg0: i32) -> (i32, i32) {
    %c0_i32 = arith.constant 0 : i32
    %c0_i32_0 = arith.constant 0 : i32
    %c0_i32_1 = arith.constant 0 : i32
    return %c0_i32, %c0_i32_0 : i32, i32
  }
  func.func @transform_4(%arg0: i32) -> (i32, i32) {
    %c0_i32 = arith.constant 0 : i32
    %c0_i32_0 = arith.constant 0 : i32
    %c0_i32_1 = arith.constant 0 : i32
    return %c0_i32, %c0_i32_0 : i32, i32
  }
  func.func @transform_5(%arg0: i32) -> (i32, i32) {
    %c0_i32 = arith.constant 0 : i32
    %c0_i32_0 = arith.constant 0 : i32
    %c0_i32_1 = arith.constant 0 : i32
    return %c0_i32, %c0_i32_0 : i32, i32
  }
  func.func @transform_6(%arg0: i32) -> (i32, i32) {
    %c0_i32 = arith.constant 0 : i32
    %c0_i32_0 = arith.constant 0 : i32
    return %c0_i32, %arg0 : i32, i32
  }
  func.func @transform_7(%arg0: i32) -> (i32, i32) {
    %c0_i32 = arith.constant 0 : i32
    %c0_i32_0 = arith.constant 0 : i32
    return %c0_i32, %arg0 : i32, i32
  }
}

</mosaic_0001>

<bundles_post_ra>
// kernel: closed_call.18
= control target key start
LH: loop header
LB: loop body
LE: loop exit
PB: predicated region body
PF: predicated region fallthrough
CT: control target
= control target key end

     0   :  { %s2494_s28 = smov 1   ;;  %s2495_s26 = smov 127   ;;  %v90_v20 = vlaneseq  ;;  %vm1352_vm5 = vcmask 392192   ;;  %s5082_s1 = inlined_call_operand.vmem [shape: f32[32,512], index: 1, kind: input, shape index: {}]   ;;  %s5083_s0 = inlined_call_operand.vmem [shape: f32[16,512], index: 0, kind: input, shape index: {}]   ;;  %s5084_s3 = inlined_call_operand.vmem [shape: f32[9,512], index: 3, kind: input, shape index: {}]   ;;  %s5085_s4 = inlined_call_operand.vmem [shape: bf16[128,432], index: 4, kind: input, shape index: {}]   ;;  %s5086_s5 = inlined_call_operand.vmem [shape: f32[128,1], index: 5, kind: input, shape index: {}]   ;;  %s5087_s2 = inlined_call_operand.vmem [shape: f32[32,512], index: 2, kind: input, shape index: {}]   ;;  %s5088_s7 = inlined_call_operand.vmem [shape: f32[32,512], index: 7, kind: output, shape index: {1}]   ;;  %s5089_s6 = inlined_call_operand.vmem [shape: f32[32,512], index: 6, kind: output, shape index: {0}]  }
   0x1   :  { %v2546_v0 = vld [vmem:[%s5082_s1 + $0x48] sm:$0xff]  ;;  %v2551_v1 = vld [vmem:[%s5082_s1 + $0x40] sm:$0xff]  ;;  %v2574_v4 = vld [vmem:[%s5082_s1 + $0x78] sm:$0xff]  ;;  %s2496_s17 = smov 15   ;;  %s2497_s22 = smov 16  }
   0x2   :  { %339 = vrot.lane.b32.xlu1 %v2546_v0, %s2494_s28  ;;  %331 = vrot.lane.b32.xlu0 %v2551_v1, %s2494_s28  ;;  %v2560_v2 = vld [vmem:[%s5082_s1 + $0x68] sm:$0xff]  ;;  %v2565_v3 = vld [vmem:[%s5082_s1 + $0x60] sm:$0xff]  ;;  %v2755_v21 = vshrl.u32 %v90_v20, 7  ;;  %v2757_v22 = vand.u32 127, %v90_v20  ;;  %s2498_s29 = smov 17   ;;  %s2499_s30 = smov 111  }
   0x3   :  { %v2579_v5 = vld [vmem:[%s5082_s1 + $0x58] sm:$0xff]  ;;  %v2588_v6 = vld [vmem:[%s5082_s1 + $0x20] sm:$0xff]  ;;  %v2602_v8 = vld [vmem:[%s5082_s1 + $0x28] sm:$0xff]  ;;  %s2500_s12 = smov 112   ;;  %s2501_s18 = smov 113  }
   0x4   :  { %v2593_v7 = vld [vmem:[%s5082_s1] sm:$0xff]  ;;  %v2607_v9 = vld [vmem:[%s5082_s1 + $0x8] sm:$0xff]  ;;  %v2630_v12 = vld [vmem:[%s5083_s0 + $0x30] sm:$0xff]  ;;  %v2764_v23 = vsub.s32 3, %v2755_v21  ;;  %vm359_vm0 = vcmp.lt.s32.totalorder %v2757_v22, 1  ;;  %v2840_v52 = vsub.s32 5, %v2755_v21 }
   0x5   :  { %v2616_v10 = vld [vmem:[%s5083_s0 + $0x28] sm:$0xff]  ;;  %v2635_v13 = vld [vmem:[%s5083_s0 + $0x10] sm:$0xff]  ;;  %v2644_v14 = vld [vmem:[%s5082_s1 + $0x38] sm:$0xff]  ;;  %vm456_vm1 = vcmp.lt.s32.totalorder %v2757_v22, 127  ;;  %vm270_vm2 = vcmp.lt.s32.totalorder %v2757_v22, 15  ;;  %vm181_vm3 = vcmp.lt.s32.totalorder %v2757_v22, 16 }
   0x6   :  { %341 = vrot.lane.b32.xlu1 %v2560_v2, %s2494_s28  ;;  %333 = vrot.lane.b32.xlu0 %v2565_v3, %s2494_s28  ;;  %v2621_v11 = vld [vmem:[%s5083_s0 + $0x8] sm:$0xff]  ;;  %v2649_v15 = vld [vmem:[%s5082_s1 + $0x18] sm:$0xff]  ;;  %5154 = vst [vmem:[#allocation2_spill] sm:$0xff] %v2840_v52  ;;  %vm92_vm4 = vcmp.lt.s32.totalorder %v2757_v22, 17  ;;  %vm723_vm6 = vcmp.lt.s32.totalorder %v2757_v22, 111  ;;  %vm634_vm7 = vcmp.lt.s32.totalorder %v2757_v22, 112 }
   0x7   :  { %v2658_v16 = vld [vmem:[%s5083_s0 + $0x20] sm:$0xff]  ;;  %v2704_v18 = vld [vmem:[%s5083_s0 + $0x38] sm:$0xff]  ;;  %v2769_v24 = vld [vmem:[%s5084_s3 + $0x8] sm:$0xff]  ;;  %vm545_vm8 = vcmp.lt.s32.totalorder %v2757_v22, 113 }
   0x8   :  { %v2663_v17 = vld [vmem:[%s5083_s0] sm:$0xff]  ;;  %v2709_v19 = vld [vmem:[%s5083_s0 + $0x18] sm:$0xff]  ;;  %v2780_v27 = vrot.slane %v2769_v24, %v2764_v23  ;;  %v2849_v56 = vrot.slane %v2769_v24, %v2840_v52 }
   0x9   :  { %v2788_v29 = vld [vmem:[%s5084_s3] sm:$0xff]  ;;  %v2493_v22 = vld [vmem:[%s5085_s4 + $0x8] ss:$16 sps:$4 sm:$0xff]  }
   0xa   :  { %357 = vrot.lane.b32.xlu1 %v2574_v4, %s2494_s28  ;;  %355 = vrot.lane.b32.xlu0 %v2579_v5, %s2494_s28  ;;  %v2803_v35 = vrot.slane %v2788_v29, %v2764_v23 }
   0xe   :  { %329 = vrot.lane.b32.xlu1 %v2588_v6, %s2494_s28  ;;  %327 = vrot.lane.b32.xlu0 %v2593_v7, %s2494_s28 }
  0x12   :  { %337 = vrot.lane.b32.xlu1 %v2602_v8, %s2494_s28  ;;  %335 = vrot.lane.b32.xlu0 %v2607_v9, %s2494_s28 }
  0x16   :  { %934 = vrot.lane.b32.xlu1 %v2616_v10, %s2495_s26  ;;  %932 = vrot.lane.b32.xlu0 %v2621_v11, %s2495_s26 }
  0x1a   :  { %938 = vrot.lane.b32.xlu1 %v2630_v12, %s2495_s26  ;;  %936 = vrot.lane.b32.xlu0 %v2635_v13, %s2495_s26 }
  0x1e   :  { %353 = vrot.lane.b32.xlu1 %v2644_v14, %s2494_s28  ;;  %351 = vrot.lane.b32.xlu0 %v2649_v15, %s2494_s28 }
  0x22   :  { %930 = vrot.lane.b32.xlu1 %v2658_v16, %s2495_s26  ;;  %928 = vrot.lane.b32.xlu0 %v2663_v17, %s2495_s26 }
  0x26   :  { %244 = vrot.lane.b32.xlu1 %v2565_v3, %s2496_s17  ;;  %242 = vrot.lane.b32.xlu0 %v2551_v1, %s2496_s17 }
  0x2a   :  { %252 = vrot.lane.b32.xlu1 %v2560_v2, %s2496_s17  ;;  %250 = vrot.lane.b32.xlu0 %v2546_v0, %s2496_s17 }
  0x2e   :  { %268 = vrot.lane.b32.xlu1 %v2574_v4, %s2496_s17  ;;  %266 = vrot.lane.b32.xlu0 %v2579_v5, %s2496_s17 }
  0x32   :  { %240 = vrot.lane.b32.xlu1 %v2588_v6, %s2496_s17  ;;  %238 = vrot.lane.b32.xlu0 %v2593_v7, %s2496_s17 }
  0x36   :  { %248 = vrot.lane.b32.xlu1 %v2602_v8, %s2496_s17  ;;  %246 = vrot.lane.b32.xlu0 %v2607_v9, %s2496_s17 }
  0x3a   :  { %890 = vrot.lane.b32.xlu1 %v2658_v16, %s2494_s28  ;;  %888 = vrot.lane.b32.xlu0 %v2663_v17, %s2494_s28 }
  0x3e   :  { %894 = vrot.lane.b32.xlu1 %v2616_v10, %s2494_s28  ;;  %892 = vrot.lane.b32.xlu0 %v2621_v11, %s2494_s28 }
  0x42   :  { %264 = vrot.lane.b32.xlu1 %v2644_v14, %s2496_s17  ;;  %262 = vrot.lane.b32.xlu0 %v2649_v15, %s2496_s17 }
  0x46   :  { %902 = vrot.lane.b32.xlu1 %v2704_v18, %s2494_s28  ;;  %900 = vrot.lane.b32.xlu0 %v2709_v19, %s2494_s28 }
  0x4a   :  { %155 = vrot.lane.b32.xlu1 %v2565_v3, %s2497_s22  ;;  %153 = vrot.lane.b32.xlu0 %v2551_v1, %s2497_s22 }
  0x4e   :  { %163 = vrot.lane.b32.xlu1 %v2560_v2, %s2497_s22  ;;  %161 = vrot.lane.b32.xlu0 %v2546_v0, %s2497_s22 }
  0x52   :  { %854 = vrot.lane.b32.xlu1 %v2658_v16, %s2496_s17  ;;  %852 = vrot.lane.b32.xlu0 %v2663_v17, %s2496_s17 }
  0x56   :  { %858 = vrot.lane.b32.xlu1 %v2616_v10, %s2496_s17  ;;  %856 = vrot.lane.b32.xlu0 %v2621_v11, %s2496_s17 }
  0x5a   :  { %179 = vrot.lane.b32.xlu1 %v2574_v4, %s2497_s22  ;;  %177 = vrot.lane.b32.xlu0 %v2579_v5, %s2497_s22 }
  0x5e   :  { %866 = vrot.lane.b32.xlu1 %v2704_v18, %s2496_s17  ;;  %864 = vrot.lane.b32.xlu0 %v2709_v19, %s2496_s17 }
  0x62   :  { %151 = vrot.lane.b32.xlu1 %v2588_v6, %s2497_s22  ;;  %149 = vrot.lane.b32.xlu0 %v2593_v7, %s2497_s22 }
  0x66   :  { %159 = vrot.lane.b32.xlu1 %v2602_v8, %s2497_s22  ;;  %157 = vrot.lane.b32.xlu0 %v2607_v9, %s2497_s22 }
  0x6a   :  { %818 = vrot.lane.b32.xlu1 %v2658_v16, %s2497_s22  ;;  %816 = vrot.lane.b32.xlu0 %v2663_v17, %s2497_s22 }
  0x6e   :  { %822 = vrot.lane.b32.xlu1 %v2616_v10, %s2497_s22  ;;  %820 = vrot.lane.b32.xlu0 %v2621_v11, %s2497_s22 }
  0x72   :  { %175 = vrot.lane.b32.xlu1 %v2644_v14, %s2497_s22  ;;  %173 = vrot.lane.b32.xlu0 %v2649_v15, %s2497_s22 }
  0x74   :  { %v2771_v25 = vpop.permute.xlu1 %339  ;;  %v332_v26 = vpop.permute.xlu0 %331 }
  0x75   :  { %v370_v28 = vsel %vm359_vm0, %v332_v26, %v2771_v25 }
  0x76   :  { %830 = vrot.lane.b32.xlu1 %v2704_v18, %s2497_s22  ;;  %828 = vrot.lane.b32.xlu0 %v2709_v19, %s2497_s22  ;;  %v401_v33 = vmul.f32 %v2780_v27, %v370_v28 }
  0x78   :  { %v2790_v30 = vpop.permute.xlu1 %341  ;;  %v334_v31 = vpop.permute.xlu0 %333 }
  0x79   :  { %v371_v32 = vsel %vm359_vm0, %v334_v31, %v2790_v30 }
  0x7a   :  { %64 = vrot.lane.b32.xlu1 %v2565_v3, %s2498_s29  ;;  %62 = vrot.lane.b32.xlu0 %v2551_v1, %s2498_s29  ;;  %v405_v34 = vmul.f32 %v2780_v27, %v371_v32 }
  0x7c   :  { %v2805_v36 = vpop.permute.xlu1 %357  ;;  %v2807_v37 = vpop.permute.xlu0 %355  ;;  %v413_v38 = vpack.c.bf16 %v405_v34, %v401_v33 }
  0x7d   :  { %v375_v39 = vsel %vm359_vm0, %v2805_v36, %v334_v31  ;;  %v374_v40 = vsel %vm359_vm0, %v2807_v37, %v332_v26 }
  0x7e   :  { %1377 = vmatprep.subr.bf16.mxu0 %v413_v38  ;;  %72 = vrot.lane.b32.xlu1 %v2560_v2, %s2498_s29  ;;  %v400_v41 = vmul.f32 %v2803_v35, %v374_v40  ;;  %v404_v42 = vmul.f32 %v2803_v35, %v375_v39 }
  0x7f   :  { %70 = vrot.lane.b32.xlu0 %v2546_v0, %s2498_s29 }
  0x80   :  { %v330_v43 = vpop.permute.xlu1 %329  ;;  %v328_v44 = vpop.permute.xlu0 %327  ;;  %v412_v45 = vpack.c.bf16 %v404_v42, %v400_v41  ;;  %v2904_v41 = vsub.s32 2, %v2755_v21  ;;  %v925_v42 = vpack.c.bf16 %v2616_v10, %v2621_v11 }
  0x82   :  { %1378 = vmatpush1.bf16.msra.mxu0 %v412_v45  ;;  %782 = vrot.lane.b32.xlu1 %v2658_v16, %s2498_s29 }
  0x83   :  { %780 = vrot.lane.b32.xlu0 %v2663_v17, %s2498_s29 }
  0x84   :  { %v2825_v46 = vpop.permute.xlu1 %337  ;;  %v2827_v47 = vpop.permute.xlu0 %335 }
  0x85   :  { %v369_v48 = vsel %vm359_vm0, %v330_v43, %v2825_v46  ;;  %v368_v49 = vsel %vm359_vm0, %v328_v44, %v2827_v47 }
  0x86   :  { %v397_v50 = vmul.f32 %v2780_v27, %v369_v48  ;;  %v393_v51 = vmul.f32 %v2780_v27, %v368_v49  ;;  %786 = vrot.lane.b32.xlu1 %v2616_v10, %s2498_s29  ;;  %v2915_v48 = vrot.slane %v2769_v24, %v2904_v41  ;;  %v924_v49 = vpack.c.bf16 %v2658_v16, %v2663_v17 }
  0x87   :  { %784 = vrot.lane.b32.xlu0 %v2621_v11, %s2498_s29 }
  0x88   :  { %v935_v53 = vpop.permute.xlu1 %934  ;;  %v933_v54 = vpop.permute.xlu0 %932  ;;  %v409_v55 = vpack.c.bf16 %v397_v50, %v393_v51  ;;  %v2924_v50 = vld [vmem:[%s5082_s1 + $0x70] sm:$0xff] }
  0x8a   :  { %1379 = vmatprep.subr.bf16.mxu0 %v409_v55  ;;  %88 = vrot.lane.b32.xlu1 %v2574_v4, %s2498_s29 }
  0x8b   :  { %86 = vrot.lane.b32.xlu0 %v2579_v5, %s2498_s29 }
  0x8c   :  { %v2853_v57 = vpop.permute.xlu1 %938  ;;  %v2855_v58 = vpop.permute.xlu0 %936 }
  0x8d   :  { %5155 = vst [vmem:[#allocation3_spill] sm:$0xff] %v2853_v57  ;;  %5156 = vst [vmem:[#allocation4_spill] sm:$0xff] %v2855_v58  ;;  %v946_v59 = vsel %vm456_vm1, %v933_v54, %v2855_v58  ;;  %v947_v60 = vsel %vm456_vm1, %v935_v53, %v2853_v57 }
  0x8e   :  { %794 = vrot.lane.b32.xlu1 %v2704_v18, %s2498_s29  ;;  %v953_v61 = vmul.f32 %v946_v59, %v2849_v56  ;;  %v957_v62 = vmul.f32 %v947_v60, %v2849_v56 }
  0x8f   :  { %792 = vrot.lane.b32.xlu0 %v2709_v19, %s2498_s29  ;;  %v2885_v19 = vrot.slane %v2788_v29, %v2840_v52 }
  0x90   :  { %v2869_v63 = vpop.permute.xlu1 %353  ;;  %v2871_v4 = vpop.permute.xlu0 %351  ;;  %v961_v5 = vpack.c.bf16 %v957_v62, %v953_v61  ;;  %v2947_v62 = vrot.slane %v2788_v29, %v2904_v41 }
  0x91   :  { %v373_v20 = vsel %vm359_vm0, %v2869_v63, %v330_v43  ;;  %v372_v18 = vsel %vm359_vm0, %v2871_v4, %v328_v44 }
  0x92   :  { %v396_v26 = vmul.f32 %v2803_v35, %v373_v20  ;;  %v392_v28 = vmul.f32 %v2803_v35, %v372_v18  ;;  %60 = vrot.lane.b32.xlu1 %v2588_v6, %s2498_s29  ;;  %1490 = vmatprep.subr.bf16.mxu1 %v961_v5 }
  0x93   :  { %58 = vrot.lane.b32.xlu0 %v2593_v7, %s2498_s29 }
  0x94   :  { %v2889_v31 = vpop.permute.xlu1 %930  ;;  %v2891_v32 = vpop.permute.xlu0 %928  ;;  %v408_v33 = vpack.c.bf16 %v396_v26, %v392_v28 }
  0x95   :  { %5157 = vst [vmem:[#allocation5_spill] sm:$0xff] %v2889_v31  ;;  %5158 = vst [vmem:[#allocation6_spill] sm:$0xff] %v2891_v32  ;;  %v949_v34 = vsel %vm456_vm1, %v2889_v31, %v935_v53  ;;  %v948_v38 = vsel %vm456_vm1, %v2891_v32, %v933_v54  ;;  %v2933_v54 = vld [vmem:[%s5082_s1 + $0x50] sm:$0xff] }
  0x96   :  { %68 = vrot.lane.b32.xlu1 %v2602_v8, %s2498_s29  ;;  %1380 = vmatpush1.bf16.msra.mxu0 %v408_v33  ;;  %v952_v39 = vmul.f32 %v948_v38, %v2885_v19  ;;  %v956_v40 = vmul.f32 %v949_v34, %v2885_v19 }
  0x97   :  { %66 = vrot.lane.b32.xlu0 %v2607_v9, %s2498_s29 }
  0x98   :  { %v245_v43 = vpop.permute.xlu1 %244  ;;  %v243_v44 = vpop.permute.xlu0 %242  ;;  %v960_v45 = vpack.c.bf16 %v956_v40, %v952_v39 }
  0x9a   :  { %705 = vrot.lane.b32.xlu1 %v2560_v2, %s2499_s30  ;;  %1491 = vmatpush1.bf16.msra.mxu1 %v960_v45 }
  0x9b   :  { %703 = vrot.lane.b32.xlu0 %v2546_v0, %s2499_s30  ;;  %1492 = vmatprep.subr.bf16.mxu1 %v925_v42 }
  0x9c   :  { %v2926_v51 = vpop.permute.xlu1 %252  ;;  %v2928_v53 = vpop.permute.xlu0 %250 }
  0x9d   :  { %v282_v55 = vsel %vm270_vm2, %v245_v43, %v2926_v51  ;;  %v281_v59 = vsel %vm270_vm2, %v243_v44, %v2928_v53 }
  0x9e   :  { %v316_v60 = vmul.f32 %v2915_v48, %v282_v55  ;;  %v312_v61 = vmul.f32 %v2915_v48, %v281_v59  ;;  %713 = vrot.lane.b32.xlu1 %v2924_v50, %s2499_s30  ;;  %1493 = vmatpush1.bf16.msra.mxu1 %v924_v49 }
  0x9f   :  { %711 = vrot.lane.b32.xlu0 %v2933_v54, %s2499_s30 }
  0xa0   :  { %v2951_v5 = vpop.permute.xlu1 %268  ;;  %v2953_v20 = vpop.permute.xlu0 %266  ;;  %v324_v18 = vpack.c.bf16 %v316_v60, %v312_v61 }
  0xa1   :  { %v286_v26 = vsel %vm270_vm2, %v2951_v5, %v245_v43  ;;  %v285_v28 = vsel %vm270_vm2, %v2953_v20, %v243_v44 }
  0xa2   :  { %v315_v33 = vmul.f32 %v2947_v62, %v286_v26  ;;  %v311_v34 = vmul.f32 %v2947_v62, %v285_v28  ;;  %84 = vrot.lane.b32.xlu1 %v2644_v14, %s2498_s29  ;;  %1381 = vmatprep.subr.bf16.mxu0 %v324_v18 }
  0xa3   :  { %82 = vrot.lane.b32.xlu0 %v2649_v15, %s2498_s29 }
  0xa4   :  { %v241_v38 = vpop.permute.xlu1 %240  ;;  %v239_v39 = vpop.permute.xlu0 %238  ;;  %v323_v40 = vpack.c.bf16 %v315_v33, %v311_v34  ;;  %v3010_v34 = vld [vmem:[%s5082_s1 + $0x30] sm:$0xff] }
  0xa6   :  { %697 = vrot.lane.b32.xlu1 %v2565_v3, %s2499_s30  ;;  %1382 = vmatpush1.bf16.msra.mxu0 %v323_v40 }
  0xa7   :  { %695 = vrot.lane.b32.xlu0 %v2551_v1, %s2499_s30 }
  0xa8   :  { %v2971_v42 = vpop.permute.xlu1 %248  ;;  %v2973_v43 = vpop.permute.xlu0 %246 }
  0xa9   :  { %v280_v14 = vsel %vm270_vm2, %v241_v38, %v2971_v42  ;;  %v279_v15 = vsel %vm270_vm2, %v239_v39, %v2973_v43 }
  0xaa   :  { %v308_v44 = vmul.f32 %v2915_v48, %v280_v14  ;;  %v304_v45 = vmul.f32 %v2915_v48, %v279_v15  ;;  %616 = vrot.lane.b32.xlu1 %v2560_v2, %s2500_s12  ;;  %v3019_v15 = vld [vmem:[%s5082_s1 + $0x10] sm:$0xff] }
  0xab   :  { %614 = vrot.lane.b32.xlu0 %v2546_v0, %s2500_s12 }
  0xac   :  { %v891_v49 = vpop.permute.xlu1 %890  ;;  %v889_v55 = vpop.permute.xlu0 %888  ;;  %v320_v59 = vpack.c.bf16 %v308_v44, %v304_v45 }
  0xae   :  { %624 = vrot.lane.b32.xlu1 %v2924_v50, %s2500_s12  ;;  %1383 = vmatprep.subr.bf16.mxu0 %v320_v59 }
  0xaf   :  { %622 = vrot.lane.b32.xlu0 %v2933_v54, %s2500_s12 }
  0xb0   :  { %v2991_v60 = vpop.permute.xlu1 %894  ;;  %v2993_v61 = vpop.permute.xlu0 %892 }
  0xb1   :  { %5159 = vst [vmem:[#allocation7_spill] sm:$0xff] %v2991_v60  ;;  %5160 = vst [vmem:[#allocation8_spill] sm:$0xff] %v2993_v61  ;;  %v909_v18 = vsel %vm359_vm0, %v891_v49, %v2991_v60  ;;  %v908_v26 = vsel %vm359_vm0, %v889_v55, %v2993_v61 }
  0xb2   :  { %v917_v28 = vmul.f32 %v909_v18, %v2780_v27  ;;  %v913_v33 = vmul.f32 %v908_v26, %v2780_v27  ;;  %701 = vrot.lane.b32.xlu1 %v2602_v8, %s2499_s30 }
  0xb3   :  { %699 = vrot.lane.b32.xlu0 %v2607_v9, %s2499_s30 }
  0xb4   :  { %v3012_v40 = vpop.permute.xlu1 %264  ;;  %v3014_v14 = vpop.permute.xlu0 %262  ;;  %v921_v27 = vpack.c.bf16 %v917_v28, %v913_v33 }
  0xb5   :  { %v284_v44 = vsel %vm270_vm2, %v3012_v40, %v241_v38  ;;  %v283_v45 = vsel %vm270_vm2, %v3014_v14, %v239_v39 }
  0xb6   :  { %v307_v59 = vmul.f32 %v2947_v62, %v284_v44  ;;  %v303_v18 = vmul.f32 %v2947_v62, %v283_v45  ;;  %709 = vrot.lane.b32.xlu1 %v3010_v34, %s2499_s30  ;;  %1494 = vmatprep.subr.bf16.mxu1 %v921_v27  ;;  %v3048_v45 = vsub.s32 1, %v2755_v21 }
  0xb7   :  { %707 = vrot.lane.b32.xlu0 %v3019_v15, %s2499_s30 }
  0xb8   :  { %v3033_v26 = vpop.permute.xlu1 %902  ;;  %v3035_v28 = vpop.permute.xlu0 %900  ;;  %v319_v38 = vpack.c.bf16 %v307_v59, %v303_v18 }
  0xb9   :  { %5161 = vst [vmem:[#allocation9_spill] sm:$0xff] %v3033_v26  ;;  %5162 = vst [vmem:[#allocation10_spill] sm:$0xff] %v3035_v28  ;;  %v911_v39 = vsel %vm359_vm0, %v3033_v26, %v891_v49  ;;  %v910_v33 = vsel %vm359_vm0, %v3035_v28, %v889_v55 }
  0xba   :  { %v916_v44 = vmul.f32 %v911_v39, %v2803_v35  ;;  %v912_v27 = vmul.f32 %v910_v33, %v2803_v35  ;;  %608 = vrot.lane.b32.xlu1 %v2565_v3, %s2500_s12  ;;  %1384 = vmatpush1.bf16.msra.mxu0 %v319_v38  ;;  %v3057_v35 = vrot.slane %v2769_v24, %v3048_v45 }
  0xbb   :  { %606 = vrot.lane.b32.xlu0 %v2551_v1, %s2500_s12 }
  0xbc   :  { %v156_v59 = vpop.permute.xlu1 %155  ;;  %v154_v49 = vpop.permute.xlu0 %153  ;;  %v920_v18 = vpack.c.bf16 %v916_v44, %v912_v27 }
  0xbe   :  { %693 = vrot.lane.b32.xlu1 %v2588_v6, %s2499_s30  ;;  %1495 = vmatpush1.bf16.msra.mxu1 %v920_v18 }
  0xbf   :  { %691 = vrot.lane.b32.xlu0 %v2593_v7, %s2499_s30 }
  0xc0   :  { %v3061_v55 = vpop.permute.xlu1 %163  ;;  %v3063_v38 = vpop.permute.xlu0 %161 }
  0xc1   :  { %v193_v39 = vsel %vm181_vm3, %v156_v59, %v3061_v55  ;;  %v192_v33 = vsel %vm181_vm3, %v154_v49, %v3063_v38 }
  0xc2   :  { %v227_v44 = vmul.f32 %v3057_v35, %v193_v39  ;;  %v223_v27 = vmul.f32 %v3057_v35, %v192_v33  ;;  %612 = vrot.lane.b32.xlu1 %v2602_v8, %s2500_s12 }
  0xc3   :  { %610 = vrot.lane.b32.xlu0 %v2607_v9, %s2500_s12 }
  0xc4   :  { %v855_v18 = vpop.permute.xlu1 %854  ;;  %v853_v61 = vpop.permute.xlu0 %852  ;;  %v235_v28 = vpack.c.bf16 %v227_v44, %v223_v27 }
  0xc6   :  { %620 = vrot.lane.b32.xlu1 %v3010_v34, %s2500_s12  ;;  %1385 = vmatprep.subr.bf16.mxu0 %v235_v28  ;;  %v3097_v28 = vrot.slane %v2788_v29, %v3048_v45 }
  0xc7   :  { %618 = vrot.lane.b32.xlu0 %v3019_v15, %s2500_s12 }
  0xc8   :  { %v3081_v60 = vpop.permute.xlu1 %858  ;;  %v3083_v39 = vpop.permute.xlu0 %856 }
  0xc9   :  { %5163 = vst [vmem:[#allocation11_spill] sm:$0xff] %v3081_v60  ;;  %5164 = vst [vmem:[#allocation12_spill] sm:$0xff] %v3083_v39  ;;  %v873_v33 = vsel %vm270_vm2, %v855_v18, %v3081_v60  ;;  %v872_v26 = vsel %vm270_vm2, %v853_v61, %v3083_v39 }
  0xca   :  { %v881_v44 = vmul.f32 %v873_v33, %v2915_v48  ;;  %v877_v27 = vmul.f32 %v872_v26, %v2915_v48  ;;  %1042 = vrot.lane.b32.xlu1 %v2616_v10, %s2499_s30 }
  0xcb   :  { %1040 = vrot.lane.b32.xlu0 %v2621_v11, %s2499_s30 }
  0xcc   :  { %v3101_v32 = vpop.permute.xlu1 %179  ;;  %v3103_v60 = vpop.permute.xlu0 %177  ;;  %v885_v58 = vpack.c.bf16 %v881_v44, %v877_v27 }
  0xcd   :  { %v197_v33 = vsel %vm181_vm3, %v3101_v32, %v156_v59  ;;  %v196_v48 = vsel %vm181_vm3, %v3103_v60, %v154_v49 }
  0xce   :  { %v226_v26 = vmul.f32 %v3097_v28, %v197_v33  ;;  %v222_v39 = vmul.f32 %v3097_v28, %v196_v48  ;;  %1046 = vrot.lane.b32.xlu1 %v2630_v12, %s2499_s30  ;;  %1496 = vmatprep.subr.bf16.mxu1 %v885_v58 }
  0xcf   :  { %1044 = vrot.lane.b32.xlu0 %v2635_v13, %s2499_s30 }
  0xd0   :  { %v3117_v44 = vpop.permute.xlu1 %866  ;;  %v3119_v27 = vpop.permute.xlu0 %864  ;;  %v234_v59 = vpack.c.bf16 %v226_v26, %v222_v39 }
  0xd1   :  { %5165 = vst [vmem:[#allocation13_spill] sm:$0xff] %v3117_v44  ;;  %5166 = vst [vmem:[#allocation14_spill] sm:$0xff] %v3119_v27  ;;  %v875_v49 = vsel %vm270_vm2, %v3117_v44, %v855_v18  ;;  %v874_v33 = vsel %vm270_vm2, %v3119_v27, %v853_v61 }
  0xd2   :  { %v880_v48 = vmul.f32 %v875_v49, %v2947_v62  ;;  %v876_v58 = vmul.f32 %v874_v33, %v2947_v62  ;;  %604 = vrot.lane.b32.xlu1 %v2588_v6, %s2500_s12  ;;  %1386 = vmatpush1.bf16.msra.mxu0 %v234_v59 }
  0xd3   :  { %602 = vrot.lane.b32.xlu0 %v2593_v7, %s2500_s12 }
  0xd4   :  { %v152_v39 = vpop.permute.xlu1 %151  ;;  %v150_v26 = vpop.permute.xlu0 %149  ;;  %v884_v31 = vpack.c.bf16 %v880_v48, %v876_v58 }
  0xd6   :  { %1038 = vrot.lane.b32.xlu1 %v2658_v16, %s2499_s30  ;;  %1497 = vmatpush1.bf16.msra.mxu1 %v884_v31 }
  0xd7   :  { %1036 = vrot.lane.b32.xlu0 %v2663_v17, %s2499_s30 }
  0xd8   :  { %v3137_v61 = vpop.permute.xlu1 %159  ;;  %v3139_v62 = vpop.permute.xlu0 %157 }
  0xd9   :  { %5167 = vst [vmem:[#allocation15_spill] sm:$0xff] %v3139_v62  ;;  %v191_v18 = vsel %vm181_vm3, %v152_v39, %v3137_v61  ;;  %v190_v59 = vsel %vm181_vm3, %v150_v26, %v3139_v62 }
  0xda   :  { %v219_v49 = vmul.f32 %v3057_v35, %v191_v18  ;;  %v215_v33 = vmul.f32 %v3057_v35, %v190_v59  ;;  %527 = vrot.lane.b32.xlu1 %v2560_v2, %s2501_s18 }
  0xdb   :  { %525 = vrot.lane.b32.xlu0 %v2546_v0, %s2501_s18 }
  0xdc   :  { %v819_v31 = vpop.permute.xlu1 %818  ;;  %v817_v48 = vpop.permute.xlu0 %816  ;;  %v231_v58 = vpack.c.bf16 %v219_v49, %v215_v33 }
  0xde   :  { %535 = vrot.lane.b32.xlu1 %v2924_v50, %s2501_s18  ;;  %1387 = vmatprep.subr.bf16.mxu0 %v231_v58 }
  0xdf   :  { %533 = vrot.lane.b32.xlu0 %v2933_v54, %s2501_s18 }
  0xe0   :  { %v3157_v18 = vpop.permute.xlu1 %822  ;;  %v3159_v59 = vpop.permute.xlu0 %820 }
  0xe1   :  { %5168 = vst [vmem:[#allocation16_spill] sm:$0xff] %v3157_v18  ;;  %5169 = vst [vmem:[#allocation17_spill] sm:$0xff] %v3159_v59  ;;  %v837_v27 = vsel %vm181_vm3, %v819_v31, %v3157_v18  ;;  %v836_v44 = vsel %vm181_vm3, %v817_v48, %v3159_v59  ;;  %v3204_v59 = vsub.s32 0, %v2755_v21 }
  0xe2   :  { %v845_v49 = vmul.f32 %v837_v27, %v3057_v35  ;;  %v841_v33 = vmul.f32 %v836_v44, %v3057_v35  ;;  %1006 = vrot.lane.b32.xlu1 %v2616_v10, %s2500_s12 }
  0xe3   :  { %1004 = vrot.lane.b32.xlu0 %v2621_v11, %s2500_s12 }
  0xe4   :  { %v3173_v58 = vpop.permute.xlu1 %175  ;;  %v3175_v57 = vpop.permute.xlu0 %173  ;;  %v849_v52 = vpack.c.bf16 %v845_v49, %v841_v33 }
  0xe5   :  { %5170 = vst [vmem:[#allocation18_spill] sm:$0xff] %v3175_v57  ;;  %v195_v18 = vsel %vm181_vm3, %v3173_v58, %v152_v39  ;;  %v194_v27 = vsel %vm181_vm3, %v3175_v57, %v150_v26 }
  0xe6   :  { %v218_v35 = vmul.f32 %v3097_v28, %v195_v18  ;;  %v214_v44 = vmul.f32 %v3097_v28, %v194_v27  ;;  %1010 = vrot.lane.b32.xlu1 %v2630_v12, %s2500_s12  ;;  %1498 = vmatprep.subr.bf16.mxu1 %v849_v52 }
  0xe7   :  { %1008 = vrot.lane.b32.xlu0 %v2635_v13, %s2500_s12 }
  0xe8   :  { %v3189_v49 = vpop.permute.xlu1 %830  ;;  %v3191_v33 = vpop.permute.xlu0 %828  ;;  %v230_v39 = vpack.c.bf16 %v218_v35, %v214_v44 }
  0xe9   :  { %5171 = vst [vmem:[#allocation19_spill] sm:$0xff] %v3189_v49  ;;  %5172 = vst [vmem:[#allocation20_spill] sm:$0xff] %v3191_v33  ;;  %v839_v26 = vsel %vm181_vm3, %v3189_v49, %v819_v31  ;;  %v838_v18 = vsel %vm181_vm3, %v3191_v33, %v817_v48 }
  0xea   :  { %v844_v27 = vmul.f32 %v839_v26, %v3097_v28  ;;  %v840_v52 = vmul.f32 %v838_v18, %v3097_v28  ;;  %519 = vrot.lane.b32.xlu1 %v2565_v3, %s2501_s18  ;;  %1388 = vmatpush1.bf16.msra.mxu0 %v230_v39  ;;  %v116_v28 = vrot.slane %v2769_v24, %v3204_v59 }
  0xeb   :  { %517 = vrot.lane.b32.xlu0 %v2551_v1, %s2501_s18 }
  0xec   :  { %v65_v35 = vpop.permute.xlu1 %64  ;;  %v63_v31 = vpop.permute.xlu0 %62  ;;  %v848_v44 = vpack.c.bf16 %v844_v27, %v840_v52 }
  0xee   :  { %1002 = vrot.lane.b32.xlu1 %v2658_v16, %s2500_s12  ;;  %1499 = vmatpush1.bf16.msra.mxu1 %v848_v44 }
  0xef   :  { %1000 = vrot.lane.b32.xlu0 %v2663_v17, %s2500_s12 }
  0xf0   :  { %v3215_v48 = vpop.permute.xlu1 %72 }
  0xf1   :  { %5173 = vst [vmem:[#allocation21_spill] sm:$0xff] %v3215_v48  ;;  %v104_v39 = vsel %vm92_vm4, %v65_v35, %v3215_v48  ;;  %v3220_v26 = vpop.permute.xlu0 %70 }
  0xf2   :  { %5174 = vst [vmem:[#allocation22_spill] sm:$0xff] %v3220_v26  ;;  %v138_v18 = vmul.f32 %v116_v28, %v104_v39  ;;  %v103_v27 = vsel %vm92_vm4, %v63_v31, %v3220_v26  ;;  %523 = vrot.lane.b32.xlu1 %v2602_v8, %s2501_s18 }
  0xf3   :  { %v134_v52 = vmul.f32 %v116_v28, %v103_v27  ;;  %521 = vrot.lane.b32.xlu0 %v2607_v9, %s2501_s18 }
  0xf4   :  { %v783_v44 = vpop.permute.xlu1 %782 }
  0xf5   :  { %v781_v33 = vpop.permute.xlu0 %780  ;;  %v146_v49 = vpack.c.bf16 %v138_v18, %v134_v52  ;;  %v3247_v52 = vrot.slane %v2788_v29, %v3204_v59 }
  0xf6   :  { %531 = vrot.lane.b32.xlu1 %v3010_v34, %s2501_s18 }
  0xf7   :  { %529 = vrot.lane.b32.xlu0 %v3019_v15, %s2501_s18  ;;  %1389 = vmatprep.subr.bf16.mxu0 %v146_v49 }
  0xf8   :  { %v3233_v39 = vpop.permute.xlu1 %786 }
  0xf9   :  { %5175 = vst [vmem:[#allocation23_spill] sm:$0xff] %v3233_v39  ;;  %v801_v26 = vsel %vm92_vm4, %v783_v44, %v3233_v39  ;;  %v3238_v27 = vpop.permute.xlu0 %784 }
  0xfa   :  { %5176 = vst [vmem:[#allocation24_spill] sm:$0xff] %v3238_v27  ;;  %v809_v48 = vmul.f32 %v801_v26, %v116_v28  ;;  %v800_v18 = vsel %vm92_vm4, %v781_v33, %v3238_v27  ;;  %970 = vrot.lane.b32.xlu1 %v2616_v10, %s2501_s18 }
  0xfb   :  { %v805_v49 = vmul.f32 %v800_v18, %v116_v28  ;;  %968 = vrot.lane.b32.xlu0 %v2621_v11, %s2501_s18 }
  0xfc   :  { %v3251_v62 = vpop.permute.xlu1 %88 }
  0xfd   :  { %v108_v26 = vsel %vm92_vm4, %v3251_v62, %v65_v35  ;;  %v3256_v39 = vpop.permute.xlu0 %86  ;;  %v813_v27 = vpack.c.bf16 %v809_v48, %v805_v49 }
  0xfe   :  { %v137_v57 = vmul.f32 %v3247_v52, %v108_v26  ;;  %v107_v10 = vsel %vm92_vm4, %v3256_v39, %v63_v31  ;;  %974 = vrot.lane.b32.xlu1 %v2630_v12, %s2501_s18 }
  0xff   :  { %v133_v11 = vmul.f32 %v3247_v52, %v107_v10  ;;  %972 = vrot.lane.b32.xlu0 %v2635_v13, %s2501_s18  ;;  %1500 = vmatprep.subr.bf16.mxu1 %v813_v27  ;;  %v2260_v13 = vld [vmem:[%s5085_s4 + $0xc] ss:$16 sps:$4 sm:$0xff]  }
 0x100   :  { %v3267_v18 = vpop.permute.xlu1 %794  ;;  %2209 = vmatprep.mubr.msk.bf16.mxu1 %vm1352_vm5, %v2260_v13  ;;  %v3313_v13 = vld [vmem:[%s5084_s3 + $0x28] ss:$0 sm:$0xff] }
 0x101   :  { %5177 = vst [vmem:[#allocation25_spill] sm:$0xff] %v3267_v18  ;;  %v803_v35 = vsel %vm92_vm4, %v3267_v18, %v783_v44  ;;  %v3272_v48 = vpop.permute.xlu0 %792  ;;  %v145_v49 = vpack.c.bf16 %v137_v57, %v133_v11 }
 0x102   :  { %5178 = vst [vmem:[#allocation26_spill] sm:$0xff] %v3272_v48  ;;  %v808_v31 = vmul.f32 %v803_v35, %v3247_v52  ;;  %v802_v12 = vsel %vm92_vm4, %v3272_v48, %v781_v33  ;;  %515 = vrot.lane.b32.xlu1 %v2588_v6, %s2501_s18 }
 0x103   :  { %v804_v27 = vmul.f32 %v802_v12, %v3247_v52  ;;  %513 = vrot.lane.b32.xlu0 %v2593_v7, %s2501_s18  ;;  %1390 = vmatpush1.bf16.msra.mxu0 %v145_v49 }
 0x104   :  { %v61_v57 = vpop.permute.xlu1 %60 }
 0x105   :  { %v59_v44 = vpop.permute.xlu0 %58  ;;  %v812_v26 = vpack.c.bf16 %v808_v31, %v804_v27 }
 0x106   :  { %966 = vrot.lane.b32.xlu1 %v2658_v16, %s2501_s18 }
 0x107   :  { %964 = vrot.lane.b32.xlu0 %v2663_v17, %s2501_s18  ;;  %1501 = vmatpush1.bf16.msra.mxu1 %v812_v26 }
 0x108   :  { %v3291_v33 = vpop.permute.xlu1 %68 }
 0x109   :  { %v102_v10 = vsel %vm92_vm4, %v61_v57, %v3291_v33  ;;  %v3296_v11 = vpop.permute.xlu0 %66 }
 0x10a   :  { %v130_v35 = vmul.f32 %v116_v28, %v102_v10  ;;  %v101_v49 = vsel %vm92_vm4, %v59_v44, %v3296_v11  ;;  %349 = vrot.lane.b32.xlu1 %v2924_v50, %s2494_s28 }
 0x10b   :  { %v126_v16 = vmul.f32 %v116_v28, %v101_v49  ;;  %347 = vrot.lane.b32.xlu0 %v2933_v54, %s2494_s28 }
 0x10c   :  { %v706_v17 = vpop.permute.xlu1 %705 }
 0x10d   :  { %v704_v31 = vpop.permute.xlu0 %703  ;;  %v142_v12 = vpack.c.bf16 %v130_v35, %v126_v16 }
 0x10e   :  { %438 = vrot.lane.b32.xlu1 %v2560_v2, %s2495_s26 }
 0x10f   :  { %436 = vrot.lane.b32.xlu0 %v2546_v0, %s2495_s26  ;;  %1391 = vmatprep.subr.bf16.mxu0 %v142_v12 }
 0x110   :  { %v3315_v28 = vpop.permute.xlu1 %713 }
 0x111   :  { %5179 = vst [vmem:[#allocation27_spill] sm:$0xff] %v3315_v28  ;;  %v731_v27 = vsel %vm723_vm6, %v706_v17, %v3315_v28  ;;  %v3320_v26 = vpop.permute.xlu0 %711 }
 0x112   :  { %5180 = vst [vmem:[#allocation28_spill] sm:$0xff] %v3320_v26  ;;  %v769_v10 = vmul.f32 %v3313_v13, %v731_v27  ;;  %v730_v0 = vsel %vm723_vm6, %v704_v31, %v3320_v26  ;;  %446 = vrot.lane.b32.xlu1 %v2924_v50, %s2495_s26 }
 0x113   :  { %v765_v2 = vmul.f32 %v3313_v13, %v730_v0  ;;  %444 = vrot.lane.b32.xlu0 %v2933_v54, %s2495_s26 }
 0x114   :  { %v3331_v35 = vpop.permute.xlu1 %84 }
 0x115   :  { %v106_v49 = vsel %vm92_vm4, %v3331_v35, %v61_v57  ;;  %v3336_v16 = vpop.permute.xlu0 %82  ;;  %v777_v12 = vpack.c.bf16 %v769_v10, %v765_v2  ;;  %v3350_v57 = vld [vmem:[%s5084_s3 + $0x20] ss:$0 sm:$0xff] }
 0x116   :  { %v129_v27 = vmul.f32 %v3247_v52, %v106_v49  ;;  %v105_v26 = vsel %vm92_vm4, %v3336_v16, %v59_v44  ;;  %430 = vrot.lane.b32.xlu1 %v2565_v3, %s2495_s26 }
 0x117   :  { %v125_v0 = vmul.f32 %v3247_v52, %v105_v26  ;;  %428 = vrot.lane.b32.xlu0 %v2551_v1, %s2495_s26  ;;  %1502 = vmatprep.subr.bf16.mxu1 %v777_v12  ;;  %v3366_v26 = vsub.s32 7, %v2755_v21 }
 0x118   :  { %v3352_v10 = vpop.permute.xlu1 %697 }
 0x119   :  { %5181 = vst [vmem:[#allocation29_spill] sm:$0xff] %v3352_v10  ;;  %v735_v44 = vsel %vm723_vm6, %v3352_v10, %v706_v17  ;;  %v3357_v2 = vpop.permute.xlu0 %695  ;;  %v141_v3 = vpack.c.bf16 %v129_v27, %v125_v0 }
 0x11a   :  { %5182 = vst [vmem:[#allocation30_spill] sm:$0xff] %v3357_v2  ;;  %v768_v52 = vmul.f32 %v3350_v57, %v735_v44  ;;  %v734_v1 = vsel %vm723_vm6, %v3357_v2, %v704_v31  ;;  %345 = vrot.lane.b32.xlu1 %v3010_v34, %s2494_s28  ;;  %v3376_v31 = vrot.slane %v2769_v24, %v3366_v26 }
 0x11b   :  { %v764_v49 = vmul.f32 %v3350_v57, %v734_v1  ;;  %343 = vrot.lane.b32.xlu0 %v3019_v15, %s2494_s28  ;;  %1392 = vmatpush1.bf16.msra.mxu0 %v141_v3 }
 0x11c   :  { %v617_v17 = vpop.permute.xlu1 %616 }
 0x11d   :  { %v615_v12 = vpop.permute.xlu0 %614  ;;  %v776_v27 = vpack.c.bf16 %v768_v52, %v764_v49 }
 0x11e   :  { %434 = vrot.lane.b32.xlu1 %v2602_v8, %s2495_s26 }
 0x11f   :  { %432 = vrot.lane.b32.xlu0 %v2607_v9, %s2495_s26  ;;  %1503 = vmatpush1.bf16.msra.mxu1 %v776_v27  ;;  %v3403_v27 = vld [vmem:[%s5085_s4 + $0x4] ss:$16 sps:$4 sm:$0xff]  }
 0x120   :  { %v3380_v0 = vpop.permute.xlu1 %624  ;;  %5184 = vst [vmem:[#allocation32_spill] sm:$0xff] %v3403_v27  ;;  %1409 = vmatprep.mubr.bf16.mxu0 %v3403_v27  ;;  %v3548_v27 = vld [vmem:[%s5083_s0 + $0x38] sm:$0xff] }
 0x121   :  { %v642_v44 = vsel %vm634_vm7, %v617_v17, %v3380_v0  ;;  %v3385_v3 = vpop.permute.xlu0 %622 }
 0x122   :  { %5183 = vst [vmem:[#allocation31_spill] sm:$0xff] %v3385_v3  ;;  %v680_v52 = vmul.f32 %v3376_v31, %v642_v44  ;;  %v641_v8 = vsel %vm634_vm7, %v615_v12, %v3385_v3  ;;  %442 = vrot.lane.b32.xlu1 %v3010_v34, %s2495_s26 }
 0x123   :  { %v676_v9 = vmul.f32 %v3376_v31, %v641_v8  ;;  %440 = vrot.lane.b32.xlu0 %v3019_v15, %s2495_s26 }
 0x124   :  { %v702_v24 = vpop.permute.xlu1 %701 }
 0x125   :  { %v700_v1 = vpop.permute.xlu0 %699  ;;  %v688_v49 = vpack.c.bf16 %v680_v52, %v676_v9  ;;  %v3421_v52 = vrot.slane %v2788_v29, %v3366_v26 }
 0x126   :  { %426 = vrot.lane.b32.xlu1 %v2588_v6, %s2495_s26 }
 0x127   :  { %424 = vrot.lane.b32.xlu0 %v2593_v7, %s2495_s26  ;;  %1393 = vmatprep.subr.bf16.mxu0 %v688_v49 }
 0x128   :  { %v3405_v44 = vpop.permute.xlu1 %709 }
 0x129   :  { %5185 = vst [vmem:[#allocation33_spill] sm:$0xff] %v3405_v44  ;;  %v729_v8 = vsel %vm723_vm6, %v702_v24, %v3405_v44  ;;  %v3410_v2 = vpop.permute.xlu0 %707 }
 0x12a   :  { %5186 = vst [vmem:[#allocation34_spill] sm:$0xff] %v3410_v2  ;;  %v761_v6 = vmul.f32 %v3313_v13, %v729_v8  ;;  %v728_v7 = vsel %vm723_vm6, %v700_v1, %v3410_v2  ;;  %260 = vrot.lane.b32.xlu1 %v2924_v50, %s2496_s17 }
 0x12b   :  { %v757_v9 = vmul.f32 %v3313_v13, %v728_v7  ;;  %258 = vrot.lane.b32.xlu0 %v2933_v54, %s2496_s17 }
 0x12c   :  { %v3426_v49 = vpop.permute.xlu1 %608 }
 0x12d   :  { %v646_v8 = vsel %vm634_vm7, %v3426_v49, %v617_v17  ;;  %v3431_v44 = vpop.permute.xlu0 %606  ;;  %v773_v2 = vpack.c.bf16 %v761_v6, %v757_v9 }
 0x12e   :  { %5187 = vst [vmem:[#allocation35_spill] sm:$0xff] %v3431_v44  ;;  %v679_v10 = vmul.f32 %v3421_v52, %v646_v8  ;;  %v645_v29 = vsel %vm634_vm7, %v3431_v44, %v615_v12  ;;  %256 = vrot.lane.b32.xlu1 %v3010_v34, %s2496_s17 }
 0x12f   :  { %v675_v7 = vmul.f32 %v3421_v52, %v645_v29  ;;  %254 = vrot.lane.b32.xlu0 %v3019_v15, %s2496_s17  ;;  %1504 = vmatprep.subr.bf16.mxu1 %v773_v2 }
 0x130   :  { %v3442_v28 = vpop.permute.xlu1 %693 }
 0x131   :  { %5188 = vst [vmem:[#allocation36_spill] sm:$0xff] %v3442_v28  ;;  %v733_v17 = vsel %vm723_vm6, %v3442_v28, %v702_v24  ;;  %v3447_v6 = vpop.permute.xlu0 %691  ;;  %v687_v9 = vpack.c.bf16 %v679_v10, %v675_v7 }
 0x132   :  { %5189 = vst [vmem:[#allocation37_spill] sm:$0xff] %v3447_v6  ;;  %v760_v12 = vmul.f32 %v3350_v57, %v733_v17  ;;  %v732_v8 = vsel %vm723_vm6, %v3447_v6, %v700_v1  ;;  %171 = vrot.lane.b32.xlu1 %v2924_v50, %s2497_s22 }
 0x133   :  { %v756_v2 = vmul.f32 %v3350_v57, %v732_v8  ;;  %169 = vrot.lane.b32.xlu0 %v2933_v54, %s2497_s22  ;;  %1394 = vmatpush2.bf16.msra.mxu0 %v687_v9 }
 0x134   :  { %v613_v29 = vpop.permute.xlu1 %612 }
 0x135   :  { %v611_v24 = vpop.permute.xlu0 %610  ;;  %v772_v28 = vpack.c.bf16 %v760_v12, %v756_v2 }
 0x136   :  { %167 = vrot.lane.b32.xlu1 %v3010_v34, %s2497_s22 }
 0x137   :  { %165 = vrot.lane.b32.xlu0 %v3019_v15, %s2497_s22  ;;  %1505 = vmatpush1.bf16.msra.mxu1 %v772_v28 }
 0x138   :  { %v3462_v10 = vpop.permute.xlu1 %620 }
 0x139   :  { %5190 = vst [vmem:[#allocation38_spill] sm:$0xff] %v3462_v10  ;;  %v640_v1 = vsel %vm634_vm7, %v613_v29, %v3462_v10  ;;  %v3467_v7 = vpop.permute.xlu0 %618 }
 0x13a   :  { %5191 = vst [vmem:[#allocation39_spill] sm:$0xff] %v3467_v7  ;;  %v672_v17 = vmul.f32 %v3376_v31, %v640_v1  ;;  %v639_v9 = vsel %vm634_vm7, %v611_v24, %v3467_v7  ;;  %80 = vrot.lane.b32.xlu1 %v2924_v50, %s2498_s29 }
 0x13b   :  { %v668_v12 = vmul.f32 %v3376_v31, %v639_v9  ;;  %78 = vrot.lane.b32.xlu0 %v2933_v54, %s2498_s29 }
 0x13c   :  { %v1043_v28 = vpop.permute.xlu1 %1042 }
 0x13d   :  { %v1041_v8 = vpop.permute.xlu0 %1040  ;;  %v684_v2 = vpack.c.bf16 %v672_v17, %v668_v12  ;;  %v3504_v12 = vld [vmem:[%s5082_s1 + $0x58] sm:$0xff] }
 0x13e   :  { %76 = vrot.lane.b32.xlu1 %v3010_v34, %s2498_s29  ;;  %v3496_v34 = vld [vmem:[%s5082_s1 + $0x78] sm:$0xff] }
 0x13f   :  { %74 = vrot.lane.b32.xlu0 %v3019_v15, %s2498_s29  ;;  %1395 = vmatprep.subr.bf16.mxu0 %v684_v2 }
 0x140   :  { %v3482_v1 = vpop.permute.xlu1 %1046 }
 0x141   :  { %5192 = vst [vmem:[#allocation40_spill] sm:$0xff] %v3482_v1  ;;  %v1055_v50 = vsel %vm723_vm6, %v1043_v28, %v3482_v1  ;;  %v3487_v9 = vpop.permute.xlu0 %1044 }
 0x142   :  { %5193 = vst [vmem:[#allocation41_spill] sm:$0xff] %v3487_v9  ;;  %v1065_v54 = vmul.f32 %v3313_v13, %v1055_v50  ;;  %v1054_v17 = vsel %vm723_vm6, %v1041_v8, %v3487_v9  ;;  %632 = vrot.lane.b32.xlu1 %v3496_v34, %s2500_s12 }
 0x143   :  { %v1061_v15 = vmul.f32 %v3313_v13, %v1054_v17  ;;  %630 = vrot.lane.b32.xlu0 %v3504_v12, %s2500_s12  ;;  %v3522_v17 = vld [vmem:[%s5082_s1 + $0x38] sm:$0xff] }
 0x144   :  { %v3508_v2 = vpop.permute.xlu1 %604 }
 0x145   :  { %5194 = vst [vmem:[#allocation42_spill] sm:$0xff] %v3508_v2  ;;  %v644_v50 = vsel %vm634_vm7, %v3508_v2, %v613_v29  ;;  %v3513_v9 = vpop.permute.xlu0 %602  ;;  %v1069_v1 = vpack.c.bf16 %v1065_v54, %v1061_v15  ;;  %v3530_v29 = vld [vmem:[%s5082_s1 + $0x18] sm:$0xff] }
 0x146   :  { %5195 = vst [vmem:[#allocation43_spill] sm:$0xff] %v3513_v9  ;;  %v671_v6 = vmul.f32 %v3421_v52, %v644_v50  ;;  %v643_v13 = vsel %vm634_vm7, %v3513_v9, %v611_v24  ;;  %628 = vrot.lane.b32.xlu1 %v3522_v17, %s2500_s12 }
 0x147   :  { %v667_v48 = vmul.f32 %v3421_v52, %v643_v13  ;;  %626 = vrot.lane.b32.xlu0 %v3530_v29, %s2500_s12  ;;  %1516 = vmatprep.subr.bf16.mxu1 %v1069_v1  ;;  %v3553_v1 = vsub.s32 6, %v2755_v21  ;;  %v2472_v21 = vld [vmem:[%s5084_s3 + $0x8] sm:$0xff] }
 0x148   :  { %v3534_v24 = vpop.permute.xlu1 %1038 }
 0x149   :  { %5196 = vst [vmem:[#allocation44_spill] sm:$0xff] %v3534_v24  ;;  %v1057_v54 = vsel %vm723_vm6, %v3534_v24, %v1043_v28  ;;  %v3539_v15 = vpop.permute.xlu0 %1036  ;;  %v683_v50 = vpack.c.bf16 %v671_v6, %v667_v48  ;;  %v3559_v48 = vld [vmem:[%s5083_s0 + $0x18] sm:$0xff] }
 0x14a   :  { %5197 = vst [vmem:[#allocation45_spill] sm:$0xff] %v3539_v15  ;;  %v1064_v13 = vmul.f32 %v3350_v57, %v1057_v54  ;;  %v1056_v18 = vsel %vm723_vm6, %v3539_v15, %v1041_v8  ;;  %942 = vrot.lane.b32.xlu1 %v3548_v27, %s2495_s26 }
 0x14b   :  { %v1060_v28 = vmul.f32 %v3350_v57, %v1056_v18  ;;  %940 = vrot.lane.b32.xlu0 %v3559_v48, %s2495_s26  ;;  %1396 = vmatpush2.bf16.msra.mxu0 %v683_v50  ;;  %v3570_v18 = vrot.slane %v2472_v21, %v3553_v1 }
 0x14c   :  { %v528_v6 = vpop.permute.xlu1 %527 }
 0x14d   :  { %v526_v8 = vpop.permute.xlu0 %525  ;;  %v1068_v54 = vpack.c.bf16 %v1064_v13, %v1060_v28 }
 0x14e   :  { %543 = vrot.lane.b32.xlu1 %v3496_v34, %s2501_s18 }
 0x14f   :  { %541 = vrot.lane.b32.xlu0 %v3504_v12, %s2501_s18  ;;  %1517 = vmatpush2.bf16.msra.mxu1 %v1068_v54 }
 0x150   :  { %v3574_v57 = vpop.permute.xlu1 %535 }
 0x151   :  { %5198 = vst [vmem:[#allocation46_spill] sm:$0xff] %v3574_v57  ;;  %v553_v50 = vsel %vm545_vm8, %v528_v6, %v3574_v57  ;;  %v3579_v13 = vpop.permute.xlu0 %533  ;;  %v3593_v57 = vld [vmem:[%s5083_s0 + $0x30] sm:$0xff] }
 0x152   :  { %5199 = vst [vmem:[#allocation47_spill] sm:$0xff] %v3579_v13  ;;  %v591_v28 = vmul.f32 %v3570_v18, %v553_v50  ;;  %v552_v15 = vsel %vm545_vm8, %v526_v8, %v3579_v13  ;;  %539 = vrot.lane.b32.xlu1 %v3522_v17, %s2501_s18  ;;  %v3600_v50 = vld [vmem:[%s5083_s0 + $0x10] sm:$0xff] }
 0x153   :  { %v587_v21 = vmul.f32 %v3570_v18, %v552_v15  ;;  %537 = vrot.lane.b32.xlu0 %v3530_v29, %s2501_s18 }
 0x154   :  { %v1007_v54 = vpop.permute.xlu1 %1006 }
 0x155   :  { %v1005_v24 = vpop.permute.xlu0 %1004  ;;  %v599_v9 = vpack.c.bf16 %v591_v28, %v587_v21 }
 0x156   :  { %898 = vrot.lane.b32.xlu1 %v3593_v57, %s2494_s28 }
 0x157   :  { %896 = vrot.lane.b32.xlu0 %v3600_v50, %s2494_s28  ;;  %1397 = vmatprep.subr.bf16.mxu0 %v599_v9  ;;  %v2475_v9 = vld [vmem:[%s5084_s3] sm:$0xff] }
 0x158   :  { %v3604_v15 = vpop.permute.xlu1 %1010  ;;  %v3621_v2 = vrot.slane %v2475_v9, %v3553_v1 }
 0x159   :  { %5200 = vst [vmem:[#allocation48_spill] sm:$0xff] %v3604_v15  ;;  %v1019_v28 = vsel %vm634_vm7, %v1007_v54, %v3604_v15  ;;  %v3609_v21 = vpop.permute.xlu0 %1008 }
 0x15a   :  { %5201 = vst [vmem:[#allocation49_spill] sm:$0xff] %v3609_v21  ;;  %v1029_v13 = vmul.f32 %v1019_v28, %v3376_v31  ;;  %v1018_v7 = vsel %vm634_vm7, %v1005_v24, %v3609_v21  ;;  %454 = vrot.lane.b32.xlu1 %v3496_v34, %s2495_s26 }
 0x15b   :  { %v1025_v15 = vmul.f32 %v1018_v7, %v3376_v31  ;;  %452 = vrot.lane.b32.xlu0 %v3504_v12, %s2495_s26 }
 0x15c   :  { %v3626_v28 = vpop.permute.xlu1 %519 }
 0x15d   :  { %v557_v21 = vsel %vm545_vm8, %v3626_v28, %v528_v6  ;;  %v3631_v10 = vpop.permute.xlu0 %517  ;;  %v1033_v44 = vpack.c.bf16 %v1029_v13, %v1025_v15 }
 0x15e   :  { %v590_v3 = vmul.f32 %v3621_v2, %v557_v21  ;;  %v556_v9 = vsel %vm545_vm8, %v3631_v10, %v526_v8  ;;  %862 = vrot.lane.b32.xlu1 %v3593_v57, %s2496_s17 }
 0x15f   :  { %v586_v31 = vmul.f32 %v3621_v2, %v556_v9  ;;  %860 = vrot.lane.b32.xlu0 %v3600_v50, %s2496_s17  ;;  %1518 = vmatprep.subr.bf16.mxu1 %v1033_v44 }
 0x160   :  { %v3642_v7 = vpop.permute.xlu1 %1002 }
 0x161   :  { %5202 = vst [vmem:[#allocation50_spill] sm:$0xff] %v3642_v7  ;;  %v1021_v6 = vsel %vm634_vm7, %v3642_v7, %v1007_v54  ;;  %v3647_v13 = vpop.permute.xlu0 %1000  ;;  %v598_v15 = vpack.c.bf16 %v590_v3, %v586_v31 }
 0x162   :  { %5203 = vst [vmem:[#allocation51_spill] sm:$0xff] %v3647_v13  ;;  %v1028_v8 = vmul.f32 %v1021_v6, %v3421_v52  ;;  %v1020_v21 = vsel %vm634_vm7, %v3647_v13, %v1005_v24  ;;  %450 = vrot.lane.b32.xlu1 %v3522_v17, %s2495_s26 }
 0x163   :  { %v1024_v44 = vmul.f32 %v1020_v21, %v3421_v52  ;;  %448 = vrot.lane.b32.xlu0 %v3530_v29, %s2495_s26  ;;  %1398 = vmatpush2.bf16.msra.mxu0 %v598_v15 }
 0x164   :  { %v524_v9 = vpop.permute.xlu1 %523 }
 0x165   :  { %v522_v54 = vpop.permute.xlu0 %521  ;;  %v1032_v7 = vpack.c.bf16 %v1028_v8, %v1024_v44  ;;  %v2502_v44 = vmov 0  }
 0x166   :  { %826 = vrot.lane.b32.xlu1 %v3593_v57, %s2497_s22  ;;  %2256 = vset.pattern.permute.xlu0 %v2502_v44 }
 0x167   :  { %824 = vrot.lane.b32.xlu0 %v3600_v50, %s2497_s22  ;;  %1519 = vmatpush2.bf16.msra.mxu1 %v1032_v7 }
 0x168   :  { %v3662_v3 = vpop.permute.xlu1 %531  ;;  %2257 = vset.pattern.permute.xlu1 %v2502_v44 }
 0x169   :  { %v551_v52 = vsel %vm545_vm8, %v524_v9, %v3662_v3  ;;  %v3667_v24 = vpop.permute.xlu0 %529 }
 0x16a   :  { %v583_v31 = vmul.f32 %v3570_v18, %v551_v52  ;;  %v550_v6 = vsel %vm545_vm8, %v522_v54, %v3667_v24  ;;  %790 = vrot.lane.b32.xlu1 %v3593_v57, %s2498_s29 }
 0x16b   :  { %v579_v15 = vmul.f32 %v3570_v18, %v550_v6  ;;  %788 = vrot.lane.b32.xlu0 %v3600_v50, %s2498_s29 }
 0x16c   :  { %v971_v7 = vpop.permute.xlu1 %970 }
 0x16d   :  { %v969_v8 = vpop.permute.xlu0 %968  ;;  %v595_v21 = vpack.c.bf16 %v583_v31, %v579_v15 }
 0x16e   :  { %721 = vrot.lane.b32.xlu1 %v3496_v34, %s2499_s30 }
 0x16f   :  { %719 = vrot.lane.b32.xlu0 %v3504_v12, %s2499_s30  ;;  %1399 = vmatprep.subr.bf16.mxu0 %v595_v21 }
 0x170   :  { %v3682_v52 = vpop.permute.xlu1 %974 }
 0x171   :  { %5204 = vst [vmem:[#allocation52_spill] sm:$0xff] %v3682_v52  ;;  %v983_v6 = vsel %vm545_vm8, %v971_v7, %v3682_v52  ;;  %v3687_v13 = vpop.permute.xlu0 %972 }
 0x172   :  { %5205 = vst [vmem:[#allocation53_spill] sm:$0xff] %v3687_v13  ;;  %v993_v31 = vmul.f32 %v983_v6, %v3570_v18  ;;  %v982_v34 = vsel %vm545_vm8, %v969_v8, %v3687_v13  ;;  %717 = vrot.lane.b32.xlu1 %v3522_v17, %s2499_s30 }
 0x173   :  { %v989_v12 = vmul.f32 %v982_v34, %v3570_v18  ;;  %715 = vrot.lane.b32.xlu0 %v3530_v29, %s2499_s30  ;;  %v3717_v18 = vld [vmem:[%s5084_s3 + $0x10] sm:$0xff] }
 0x174   :  { %v3698_v15 = vpop.permute.xlu1 %515 }
 0x175   :  { %v555_v21 = vsel %vm545_vm8, %v3698_v15, %v524_v9  ;;  %v3703_v44 = vpop.permute.xlu0 %513  ;;  %v997_v6 = vpack.c.bf16 %v993_v31, %v989_v12  ;;  %v3722_v9 = vld [vmem:[%s5084_s3 + $0x18] sm:$0xff] }
 0x176   :  { %v582_v52 = vmul.f32 %v3621_v2, %v555_v21  ;;  %v554_v17 = vsel %vm545_vm8, %v3703_v44, %v522_v54  ;;  %1050 = vrot.lane.b32.xlu1 %v3548_v27, %s2499_s30  ;;  %v3743_v13 = vrot.slane %v3722_v9, %v2764_v23 }
 0x177   :  { %v578_v29 = vmul.f32 %v3621_v2, %v554_v17  ;;  %1048 = vrot.lane.b32.xlu0 %v3559_v48, %s2499_s30  ;;  %1520 = vmatprep.subr.bf16.mxu1 %v997_v6  ;;  %v3739_v17 = vrot.slane %v3717_v18, %v2764_v23 }
 0x178   :  { %v3724_v54 = vpop.permute.xlu1 %966 }
 0x179   :  { %5206 = vst [vmem:[#allocation54_spill] sm:$0xff] %v3724_v54  ;;  %v985_v31 = vsel %vm545_vm8, %v3724_v54, %v971_v7  ;;  %v3729_v34 = vpop.permute.xlu0 %964  ;;  %v594_v12 = vpack.c.bf16 %v582_v52, %v578_v29 }
 0x17a   :  { %5207 = vst [vmem:[#allocation55_spill] sm:$0xff] %v3729_v34  ;;  %v992_v21 = vmul.f32 %v985_v31, %v3621_v2  ;;  %v984_v6 = vsel %vm545_vm8, %v3729_v34, %v969_v8  ;;  %1014 = vrot.lane.b32.xlu1 %v3548_v27, %s2500_s12 }
 0x17b   :  { %v988_v7 = vmul.f32 %v984_v6, %v3621_v2  ;;  %1012 = vrot.lane.b32.xlu0 %v3559_v48, %s2500_s12  ;;  %1400 = vmatpush2.bf16.msra.mxu0 %v594_v12 }
 0x17c   :  { %v350_v52 = vpop.permute.xlu1 %349 }
 0x17d   :  { %v363_v8 = vsel %vm359_vm0, %v350_v52, %v2805_v36  ;;  %v367_v29 = vsel %vm359_vm0, %v2790_v30, %v350_v52  ;;  %v348_v31 = vpop.permute.xlu0 %347  ;;  %v996_v34 = vpack.c.bf16 %v992_v21, %v988_v7  ;;  %v2258_v30 = vld [vmem:[%s5085_s4 + $0x8] ss:$16 sps:$4 sm:$0xff]  }
 0x17e   :  { %v406_v23 = vmul.f32 %v3739_v17, %v367_v29  ;;  %v407_v54 = vmul.f32 %v3743_v13, %v363_v8  ;;  %v362_v2 = vsel %vm359_vm0, %v348_v31, %v2807_v37  ;;  %v366_v12 = vsel %vm359_vm0, %v2771_v25, %v348_v31  ;;  %978 = vrot.lane.b32.xlu1 %v3548_v27, %s2501_s18  ;;  %v3774_v37 = vld [vmem:[%s5085_s4 + $0x2c] ss:$16 sps:$4 sm:$0xff]   ;;  %v1104_v29 = vld [vmem:[%s5086_s5] sm:$0xff] }
 0x17f   :  { %v402_v36 = vmul.f32 %v3739_v17, %v366_v12  ;;  %v403_v21 = vmul.f32 %v3743_v13, %v362_v2  ;;  %976 = vrot.lane.b32.xlu0 %v3559_v48, %s2501_s18  ;;  %1521 = vmatpush2.bf16.msra.mxu1 %v996_v34  ;;  %5208 = vst [vmem:[#allocation56_spill] sm:$0xff] %v3774_v37  ;;  %v1105_v25 = vld [vmem:[%s5086_s5 + $0x8] sm:$0xff]  ;;  %v1106_v34 = vld [vmem:[%s5086_s5 + $0x10] sm:$0xff]  ;;  %v1107_v2 = vld [vmem:[%s5086_s5 + $0x18] sm:$0xff] }
 0x180   :  { %v439_v6 = vpop.permute.xlu1 %438 }
 0x181   :  { %v414_v7 = vpack.c.bf16 %v406_v23, %v402_v36  ;;  %v437_v52 = vpop.permute.xlu0 %436  ;;  %v415_v8 = vpack.c.bf16 %v407_v54, %v403_v21  ;;  %v3804_v36 = vld [vmem:[%s5085_s4 + $0x28] ss:$16 sps:$4 sm:$0xff]  }
 0x182   :  { %1523 = vmatmul.mubr.bf16.vlgmr.msra.gmra.mxu1 %v2258_v30  ;;  %1127 = vperm.xlu1 %2257, %v1105_v25   ;;  %5210 = vst [vmem:[#allocation58_spill] sm:$0xff] %v3804_v36  ;;  %v3810_v25 = vld [vmem:[%s5085_s4 + $0x4c] ss:$16 sps:$4 sm:$0xff]  }
 0x183   :  { %1603 = vmatprep.subr.bf16.mxu1 %v415_v8  ;;  %2210 = vmatprep.mubr.msk.bf16.mxu1 %vm1352_vm5, %v3774_v37  ;;  %5211 = vst [vmem:[#allocation59_spill] sm:$0xff] %v3810_v25 }
 0x184   :  { %1604 = vmatpush1.bf16.msra.mxu1 %v414_v7  ;;  %v3787_v31 = vpop.permute.xlu1 %446  ;;  %1122 = vperm.xlu0 %2256, %v1104_v29   ;;  %v1108_v7 = vld [vmem:[%s5086_s5 + $0x20] sm:$0xff] }
 0x185   :  { %v464_v54 = vsel %vm456_vm1, %v439_v6, %v3787_v31  ;;  %v3792_v23 = vpop.permute.xlu0 %444 }
 0x186   :  { %5209 = vst [vmem:[#allocation57_spill] sm:$0xff] %v3792_v23  ;;  %v502_v12 = vmul.f32 %v2849_v56, %v464_v54  ;;  %v463_v30 = vsel %vm456_vm1, %v437_v52, %v3792_v23  ;;  %1132 = vperm.xlu1 %2257, %v1106_v34  }
 0x187   :  { %v498_v21 = vmul.f32 %v2849_v56, %v463_v30  ;;  %v1109_v30 = vld [vmem:[%s5086_s5 + $0x28] sm:$0xff] }
 0x188   :  { %v3815_v8 = vpop.permute.xlu1 %430  ;;  %1137 = vperm.xlu0 %2256, %v1107_v2  }
 0x189   :  { %v468_v29 = vsel %vm456_vm1, %v3815_v8, %v439_v6  ;;  %v3820_v54 = vpop.permute.xlu0 %428  ;;  %v510_v34 = vpack.c.bf16 %v502_v12, %v498_v21  ;;  %v1110_v6 = vld [vmem:[%s5086_s5 + $0x30] sm:$0xff] }
 0x18a   :  { %v501_v37 = vmul.f32 %v2885_v19, %v468_v29  ;;  %v467_v23 = vsel %vm456_vm1, %v3820_v54, %v437_v52  ;;  %1533 = vmatmul.mubr.bf16.gmra.mxu1 %v3804_v36  ;;  %1142 = vperm.xlu1 %2257, %v1108_v7   ;;  %v1111_v29 = vld [vmem:[%s5086_s5 + $0x38] sm:$0xff] }
 0x18b   :  { %v497_v2 = vmul.f32 %v2885_v19, %v467_v23  ;;  %1401 = vmatprep.subr.bf16.mxu0 %v510_v34  ;;  %2211 = vmatprep.mubr.msk.bf16.mxu1 %vm1352_vm5, %v3810_v25 }
 0x18c   :  { %v346_v12 = vpop.permute.xlu1 %345  ;;  %1147 = vperm.xlu0 %2256, %v1109_v30  }
 0x18d   :  { %v361_v21 = vsel %vm359_vm0, %v346_v12, %v2869_v63  ;;  %v365_v52 = vsel %vm359_vm0, %v2825_v46, %v346_v12  ;;  %v344_v7 = vpop.permute.xlu0 %343  ;;  %v509_v23 = vpack.c.bf16 %v501_v37, %v497_v2  ;;  %v3856_v46 = vld [vmem:[%s5085_s4 + $0x48] ss:$16 sps:$4 sm:$0xff]   ;;  %v3863_v12 = vld [vmem:[%s5085_s4 + $0x6c] ss:$16 sps:$4 sm:$0xff]  }
 0x18e   :  { %v398_v34 = vmul.f32 %v3739_v17, %v365_v52  ;;  %v399_v25 = vmul.f32 %v3743_v13, %v361_v21  ;;  %v360_v30 = vsel %vm359_vm0, %v344_v7, %v2871_v4  ;;  %v364_v63 = vsel %vm359_vm0, %v2827_v47, %v344_v7  ;;  %5212 = vst [vmem:[#allocation60_spill] sm:$0xff] %v3856_v46  ;;  %v1116_v47 = vld [vmem:[%s5086_s5 + $0x60] sm:$0xff] }
 0x18f   :  { %1152 = vperm.xlu1 %2257, %v1110_v6   ;;  %v394_v37 = vmul.f32 %v3739_v17, %v364_v63  ;;  %v395_v2 = vmul.f32 %v3743_v13, %v360_v30  ;;  %1402 = vmatpush2.bf16.msra.mxu0 %v509_v23  ;;  %5213 = vst [vmem:[#allocation61_spill] sm:$0xff] %v3863_v12  ;;  %v1117_v6 = vld [vmem:[%s5086_s5 + $0x68] sm:$0xff]  ;;  %v1118_v23 = vld [vmem:[%s5086_s5 + $0x70] sm:$0xff]  ;;  %v1119_v30 = vld [vmem:[%s5086_s5 + $0x78] sm:$0xff] }
 0x190   :  { %v435_v4 = vpop.permute.xlu1 %434  ;;  %1157 = vperm.xlu0 %2256, %v1111_v29  }
 0x191   :  { %v410_v21 = vpack.c.bf16 %v398_v34, %v394_v37  ;;  %v433_v52 = vpop.permute.xlu0 %432  ;;  %v411_v7 = vpack.c.bf16 %v399_v25, %v395_v2  ;;  %v3894_v2 = vld [vmem:[%s5085_s4 + $0x68] ss:$16 sps:$4 sm:$0xff]  }
 0x192   :  { %1543 = vmatmul.mubr.bf16.gmra.mxu1 %v3856_v46  ;;  %5214 = vst [vmem:[#allocation62_spill] sm:$0xff] %v3894_v2 }
 0x193   :  { %1182 = vperm.xlu1 %2257, %v1116_v47   ;;  %1605 = vmatprep.subr.bf16.mxu1 %v411_v7  ;;  %v1112_v7 = vld [vmem:[%s5086_s5 + $0x40] sm:$0xff] }
 0x194   :  { %2212 = vmatprep.mubr.msk.bf16.mxu1 %vm1352_vm5, %v3863_v12  ;;  %1606 = vmatpush1.bf16.msra.mxu1 %v410_v21  ;;  %v3877_v29 = vpop.permute.xlu1 %442  ;;  %v3900_v21 = vld [vmem:[%s5085_s4 + $0x8c] ss:$16 sps:$4 sm:$0xff]  }
 0x195   :  { %1187 = vperm.xlu0 %2256, %v1117_v6   ;;  %v462_v25 = vsel %vm456_vm1, %v435_v4, %v3877_v29  ;;  %v3882_v34 = vpop.permute.xlu0 %440  ;;  %5215 = vst [vmem:[#allocation63_spill] sm:$0xff] %v3900_v21 }
 0x196   :  { %v494_v63 = vmul.f32 %v2849_v56, %v462_v25  ;;  %v461_v37 = vsel %vm456_vm1, %v433_v52, %v3882_v34 }
 0x197   :  { %1192 = vperm.xlu1 %2257, %v1118_v23   ;;  %v490_v47 = vmul.f32 %v2849_v56, %v461_v37  ;;  %v3914_v56 = vrot.slane %v3717_v18, %v2904_v41  ;;  %v1113_v37 = vld [vmem:[%s5086_s5 + $0x48] sm:$0xff] }
 0x198   :  { %v3905_v6 = vpop.permute.xlu1 %426 }
 0x199   :  { %1197 = vperm.xlu0 %2256, %v1119_v30   ;;  %v466_v25 = vsel %vm456_vm1, %v3905_v6, %v435_v4  ;;  %v3910_v12 = vpop.permute.xlu0 %424  ;;  %v506_v23 = vpack.c.bf16 %v494_v63, %v490_v47  ;;  %v3925_v4 = vrot.slane %v3722_v9, %v2904_v41  ;;  %v1114_v47 = vld [vmem:[%s5086_s5 + $0x50] sm:$0xff]  ;;  %v2477_v41 = vld [vmem:[%s5082_s1 + $0x68] sm:$0xff] }
 0x19a   :  { %5216 = vst [vmem:[#allocation64_spill] sm:$0xff] %v3910_v12  ;;  %v493_v46 = vmul.f32 %v2885_v19, %v466_v25  ;;  %v465_v30 = vsel %vm456_vm1, %v3910_v12, %v433_v52  ;;  %1553 = vmatmul.mubr.bf16.gmra.mxu1 %v3894_v2  ;;  %v2476_v52 = vld [vmem:[%s5082_s1 + $0x48] sm:$0xff]  ;;  %v1115_v2 = vld [vmem:[%s5086_s5 + $0x58] sm:$0xff] }
 0x19b   :  { %1162 = vperm.xlu1 %2257, %v1112_v7   ;;  %v489_v63 = vmul.f32 %v2885_v19, %v465_v30  ;;  %1403 = vmatprep.subr.bf16.mxu0 %v506_v23  ;;  %v421_v7 = vpack.c.bf16 %v2477_v41, %v2476_v52  ;;  %v3972_v41 = vrot.slane %v3717_v18, %v3048_v45 }
 0x19c   :  { %2213 = vmatprep.mubr.msk.bf16.mxu1 %vm1352_vm5, %v3900_v21  ;;  %v261_v25 = vpop.permute.xlu1 %260 }
 0x19d   :  { %1167 = vperm.xlu0 %2256, %v1113_v37   ;;  %v274_v19 = vsel %vm270_vm2, %v261_v25, %v2951_v5  ;;  %v278_v23 = vsel %vm270_vm2, %v2926_v51, %v261_v25  ;;  %v259_v30 = vpop.permute.xlu0 %258  ;;  %v505_v21 = vpack.c.bf16 %v493_v46, %v489_v63  ;;  %v3960_v51 = vld [vmem:[%s5085_s4 + $0x88] ss:$16 sps:$4 sm:$0xff]   ;;  %v2478_v25 = vld [vmem:[%s5082_s1 + $0x40] sm:$0xff] }
 0x19e   :  { %v317_v36 = vmul.f32 %v3914_v56, %v278_v23  ;;  %v318_v12 = vmul.f32 %v3925_v4, %v274_v19  ;;  %v273_v37 = vsel %vm270_vm2, %v259_v30, %v2953_v20  ;;  %v277_v5 = vsel %vm270_vm2, %v2928_v53, %v259_v30  ;;  %v2479_v20 = vld [vmem:[%s5082_s1 + $0x60] sm:$0xff]  ;;  %v2481_v19 = vld [vmem:[%s5082_s1 + $0x8] sm:$0xff] }
 0x19f   :  { %1172 = vperm.xlu1 %2257, %v1114_v47   ;;  %v313_v46 = vmul.f32 %v3914_v56, %v277_v5  ;;  %v314_v63 = vmul.f32 %v3925_v4, %v273_v37  ;;  %1404 = vmatpush2.bf16.msra.mxu0 %v505_v21  ;;  %v420_v53 = vpack.c.bf16 %v2479_v20, %v2478_v25  ;;  %v2480_v21 = vld [vmem:[%s5082_s1 + $0x28] sm:$0xff] }
 0x1a0   :  { %v257_v52 = vpop.permute.xlu1 %256  ;;  %1405 = vmatprep.subr.bf16.mxu0 %v421_v7  ;;  %v3976_v47 = vrot.slane %v3722_v9, %v3048_v45  ;;  %v417_v23 = vpack.c.bf16 %v2480_v21, %v2481_v19  ;;  %v3993_v25 = vld [vmem:[%s5085_s4 + $0xac] ss:$16 sps:$4 sm:$0xff]  }
 0x1a1   :  { %1177 = vperm.xlu0 %2256, %v1115_v2   ;;  %v325_v30 = vpack.c.bf16 %v317_v36, %v313_v46  ;;  %v272_v7 = vsel %vm270_vm2, %v257_v52, %v3012_v40  ;;  %v276_v45 = vsel %vm270_vm2, %v2971_v42, %v257_v52  ;;  %v255_v37 = vpop.permute.xlu0 %254  ;;  %v326_v5 = vpack.c.bf16 %v318_v12, %v314_v63  ;;  %v2482_v46 = vld [vmem:[%s5082_s1 + $0x20] sm:$0xff] }
 0x1a2   :  { %v309_v20 = vmul.f32 %v3914_v56, %v276_v45  ;;  %v310_v2 = vmul.f32 %v3925_v4, %v272_v7  ;;  %v271_v36 = vsel %vm270_vm2, %v255_v37, %v3014_v14  ;;  %v275_v40 = vsel %vm270_vm2, %v2973_v43, %v255_v37  ;;  %1563 = vmatmul.mubr.bf16.gmra.mxu1 %v3960_v51  ;;  %v2483_v14 = vld [vmem:[%s5082_s1] sm:$0xff] }
 0x1a3   :  { %v305_v42 = vmul.f32 %v3914_v56, %v275_v40  ;;  %v306_v12 = vmul.f32 %v3925_v4, %v271_v36  ;;  %1406 = vmatpush2.bf16.msra.mxu0 %v420_v53  ;;  %1607 = vmatprep.subr.bf16.mxu1 %v326_v5  ;;  %v416_v63 = vpack.c.bf16 %v2482_v46, %v2483_v14  ;;  %v4057_v14 = vld [vmem:[%s5085_s4 + $0xa8] ss:$16 sps:$4 sm:$0xff]  }
 0x1a4   :  { %1608 = vmatpush1.bf16.msra.mxu1 %v325_v30  ;;  %v172_v52 = vpop.permute.xlu1 %171  ;;  %1407 = vmatprep.subr.bf16.mxu0 %v417_v23 }
 0x1a5   :  { %v321_v43 = vpack.c.bf16 %v309_v20, %v305_v42  ;;  %v185_v21 = vsel %vm181_vm3, %v172_v52, %v3101_v32  ;;  %v189_v53 = vsel %vm181_vm3, %v3061_v55, %v172_v52  ;;  %v170_v19 = vpop.permute.xlu0 %169  ;;  %v322_v7 = vpack.c.bf16 %v310_v2, %v306_v12  ;;  %2214 = vmatprep.mubr.msk.bf16.mxu1 %vm1352_vm5, %v3993_v25  ;;  %v4031_v55 = vld [vmem:[%s5085_s4] ss:$16 sps:$4 sm:$0xff]   ;;  %v4038_v20 = vld [vmem:[%s5085_s4 + $0x24] ss:$16 sps:$4 sm:$0xff]  }
 0x1a6   :  { %v228_v45 = vmul.f32 %v3972_v41, %v189_v53  ;;  %v229_v30 = vmul.f32 %v3976_v47, %v185_v21  ;;  %v184_v23 = vsel %vm181_vm3, %v170_v19, %v3103_v60  ;;  %v188_v32 = vsel %vm181_vm3, %v3063_v38, %v170_v19  ;;  %v5217_v52 = vld [vmem:[#allocation18_spill] sm:$0xff] }
 0x1a7   :  { %v224_v37 = vmul.f32 %v3972_v41, %v188_v32  ;;  %v225_v5 = vmul.f32 %v3976_v47, %v184_v23  ;;  %1408 = vmatpush2.bf16.msra.mxu0 %v416_v63  ;;  %1609 = vmatprep.subr.bf16.mxu1 %v322_v7  ;;  %v4042_v38 = vrot.slane %v3717_v18, %v3204_v59  ;;  %v5219_v23 = vld [vmem:[#allocation21_spill] sm:$0xff] }
 0x1a8   :  { %1610 = vmatpush1.bf16.msra.mxu1 %v321_v43  ;;  %v168_v60 = vpop.permute.xlu1 %167  ;;  %v4046_v2 = vrot.slane %v3722_v9, %v3204_v59 }
 0x1a9   :  { %v236_v36 = vpack.c.bf16 %v228_v45, %v224_v37  ;;  %v183_v40 = vsel %vm181_vm3, %v168_v60, %v3173_v58  ;;  %v187_v42 = vsel %vm181_vm3, %v3137_v61, %v168_v60  ;;  %v166_v12 = vpop.permute.xlu0 %165  ;;  %v237_v46 = vpack.c.bf16 %v229_v30, %v225_v5  ;;  %v5218_v58 = vld [vmem:[#allocation15_spill] sm:$0xff] }
 0x1aa   :  { %v220_v63 = vmul.f32 %v3972_v41, %v187_v42  ;;  %v221_v59 = vmul.f32 %v3976_v47, %v183_v40  ;;  %v182_v43 = vsel %vm181_vm3, %v166_v12, %v5217_v52  ;;  %v186_v21 = vsel %vm181_vm3, %v5218_v58, %v166_v12  ;;  %1410 = vmatmul.mubr.bf16.vlgmr.msra.gmra.mxu0 %v4031_v55  ;;  %v4071_v61 = vld [vmem:[%s5085_s4 + $0xcc] ss:$16 sps:$4 sm:$0xff]   ;;  %v5220_v42 = vld [vmem:[#allocation22_spill] sm:$0xff] }
 0x1ab   :  { %v216_v53 = vmul.f32 %v3972_v41, %v186_v21  ;;  %v217_v19 = vmul.f32 %v3976_v47, %v182_v43  ;;  %1611 = vmatprep.subr.bf16.mxu1 %v237_v46  ;;  %1419 = vmatprep.mubr.bf16.mxu0 %v4038_v20  ;;  %v4094_v12 = vld [vmem:[%s5085_s4 + $0x20] ss:$16 sps:$4 sm:$0xff]   ;;  %v4107_v52 = vrot.slane %v3717_v18, %v3366_v26 }
 0x1ac   :  { %1612 = vmatpush1.bf16.msra.mxu1 %v236_v36  ;;  %v81_v7 = vpop.permute.xlu1 %80  ;;  %v4111_v43 = vrot.slane %v3722_v9, %v3366_v26 }
 0x1ad   :  { %v232_v45 = vpack.c.bf16 %v220_v63, %v216_v53  ;;  %v96_v30 = vsel %vm92_vm4, %v81_v7, %v3251_v62  ;;  %v100_v32 = vsel %vm92_vm4, %v5219_v23, %v81_v7  ;;  %v79_v37 = vpop.permute.xlu0 %78  ;;  %v233_v5 = vpack.c.bf16 %v221_v59, %v217_v19  ;;  %1573 = vmatmul.mubr.bf16.gmra.mxu1 %v4057_v14 }
 0x1ae   :  { %v139_v60 = vmul.f32 %v4042_v38, %v100_v32  ;;  %v140_v40 = vmul.f32 %v4046_v2, %v96_v30  ;;  %v95_v36 = vsel %vm92_vm4, %v79_v37, %v3256_v39  ;;  %v99_v62 = vsel %vm92_vm4, %v5220_v42, %v79_v37  ;;  %2215 = vmatprep.mubr.msk.bf16.mxu1 %vm1352_vm5, %v4071_v61  ;;  %v4103_v39 = vld [vmem:[%s5085_s4 + $0x44] ss:$16 sps:$4 sm:$0xff]  }
 0x1af   :  { %v135_v46 = vmul.f32 %v4042_v38, %v99_v62  ;;  %v136_v63 = vmul.f32 %v4046_v2, %v95_v36  ;;  %1613 = vmatprep.subr.bf16.mxu1 %v233_v5 }
 0x1b0   :  { %1614 = vmatpush1.bf16.msra.mxu1 %v232_v45  ;;  %v77_v59 = vpop.permute.xlu1 %76  ;;  %v4122_v45 = vld [vmem:[%s5085_s4 + $0xc8] ss:$16 sps:$4 sm:$0xff]  }
 0x1b1   :  { %v147_v58 = vpack.c.bf16 %v139_v60, %v135_v46  ;;  %v94_v21 = vsel %vm92_vm4, %v77_v59, %v3331_v35  ;;  %v98_v53 = vsel %vm92_vm4, %v3291_v33, %v77_v59  ;;  %v75_v19 = vpop.permute.xlu0 %74  ;;  %v148_v7 = vpack.c.bf16 %v140_v40, %v136_v63  ;;  %v4136_v33 = vld [vmem:[%s5085_s4 + $0xec] ss:$16 sps:$4 sm:$0xff]  }
 0x1b2   :  { %v131_v30 = vmul.f32 %v4042_v38, %v98_v53  ;;  %v132_v26 = vmul.f32 %v4046_v2, %v94_v21  ;;  %v93_v23 = vsel %vm92_vm4, %v75_v19, %v3336_v16  ;;  %v97_v35 = vsel %vm92_vm4, %v3296_v11, %v75_v19  ;;  %1420 = vmatmul.mubr.bf16.gmra.mxu0 %v4094_v12  ;;  %v5221_v46 = vld [vmem:[#allocation31_spill] sm:$0xff]  ;;  %v4168_v53 = vld [vmem:[%s5085_s4 + $0x64] ss:$16 sps:$4 sm:$0xff]  }
 0x1b3   :  { %v127_v32 = vmul.f32 %v4042_v38, %v97_v35  ;;  %v128_v37 = vmul.f32 %v4046_v2, %v93_v23  ;;  %1615 = vmatprep.subr.bf16.mxu1 %v148_v7  ;;  %1429 = vmatprep.mubr.bf16.mxu0 %v4103_v39  ;;  %v5222_v59 = vld [vmem:[#allocation35_spill] sm:$0xff]  ;;  %v5223_v7 = vld [vmem:[#allocation2_spill] sm:$0xff] }
 0x1b4   :  { %1616 = vmatpush1.bf16.msra.mxu1 %v147_v58  ;;  %v633_v16 = vpop.permute.xlu1 %632  ;;  %v5224_v35 = vld [vmem:[#allocation38_spill] sm:$0xff] }
 0x1b5   :  { %v143_v5 = vpack.c.bf16 %v131_v30, %v127_v32  ;;  %v638_v11 = vsel %vm634_vm7, %v3380_v0, %v633_v16  ;;  %v650_v60 = vsel %vm634_vm7, %v633_v16, %v3426_v49  ;;  %v631_v40 = vpop.permute.xlu0 %630  ;;  %v144_v36 = vpack.c.bf16 %v132_v26, %v128_v37  ;;  %1583 = vmatmul.mubr.bf16.gmra.mxu1 %v4122_v45  ;;  %v4159_v49 = vld [vmem:[%s5085_s4 + $0x40] ss:$16 sps:$4 sm:$0xff]  }
 0x1b6   :  { %v681_v42 = vmul.f32 %v4107_v52, %v638_v11  ;;  %v682_v62 = vmul.f32 %v4111_v43, %v650_v60  ;;  %v637_v63 = vsel %vm634_vm7, %v5221_v46, %v631_v40  ;;  %v649_v0 = vsel %vm634_vm7, %v631_v40, %v5222_v59  ;;  %2216 = vmatprep.mubr.msk.bf16.mxu1 %vm1352_vm5, %v4136_v33  ;;  %v5225_v37 = vld [vmem:[#allocation42_spill] sm:$0xff]  ;;  %v4187_v60 = vld [vmem:[%s5085_s4 + $0xe8] ss:$16 sps:$4 sm:$0xff]  }
 0x1b7   :  { %v677_v58 = vmul.f32 %v4107_v52, %v637_v63  ;;  %v678_v21 = vmul.f32 %v4111_v43, %v649_v0  ;;  %1617 = vmatprep.subr.bf16.mxu1 %v144_v36  ;;  %v4172_v30 = vrot.slane %v3717_v18, %v5223_v7  ;;  %v4176_v26 = vrot.slane %v3722_v9, %v5223_v7  ;;  %v5227_v63 = vld [vmem:[#allocation43_spill] sm:$0xff] }
 0x1b8   :  { %1618 = vmatpush1.bf16.msra.mxu1 %v143_v5  ;;  %v629_v19 = vpop.permute.xlu1 %628 }
 0x1b9   :  { %v689_v23 = vpack.c.bf16 %v681_v42, %v677_v58  ;;  %v636_v32 = vsel %vm634_vm7, %v5224_v35, %v629_v19  ;;  %v648_v16 = vsel %vm634_vm7, %v629_v19, %v5225_v37  ;;  %v627_v11 = vpop.permute.xlu0 %626  ;;  %v690_v5 = vpack.c.bf16 %v682_v62, %v678_v21  ;;  %v5226_v42 = vld [vmem:[#allocation39_spill] sm:$0xff]  ;;  %v5229_v37 = vld [vmem:[#allocation5_spill] sm:$0xff] }
 0x1ba   :  { %v673_v40 = vmul.f32 %v4107_v52, %v636_v32  ;;  %v674_v36 = vmul.f32 %v4111_v43, %v648_v16  ;;  %v635_v46 = vsel %vm634_vm7, %v5226_v42, %v627_v11  ;;  %v647_v59 = vsel %vm634_vm7, %v627_v11, %v5227_v63  ;;  %1430 = vmatmul.mubr.bf16.gmra.mxu0 %v4159_v49  ;;  %v5228_v35 = vld [vmem:[#allocation3_spill] sm:$0xff]  ;;  %v5230_v42 = vld [vmem:[#allocation4_spill] sm:$0xff] }
 0x1bb   :  { %v669_v62 = vmul.f32 %v4107_v52, %v635_v46  ;;  %v670_v0 = vmul.f32 %v4111_v43, %v647_v59  ;;  %1619 = vmatprep.subr.bf16.mxu1 %v690_v5  ;;  %1439 = vmatprep.mubr.bf16.mxu0 %v4168_v53  ;;  %v4203_v21 = vrot.slane %v3717_v18, %v3553_v1  ;;  %v4227_v46 = vld [vmem:[%s5085_s4 + $0x60] ss:$16 sps:$4 sm:$0xff]  }
 0x1bc   :  { %1620 = vmatpush2.bf16.msra.mxu1 %v689_v23  ;;  %v943_v58 = vpop.permute.xlu1 %942  ;;  %v4207_v19 = vrot.slane %v3722_v9, %v3553_v1  ;;  %v5231_v9 = vld [vmem:[#allocation6_spill] sm:$0xff] }
 0x1bd   :  { %v685_v7 = vpack.c.bf16 %v673_v40, %v669_v62  ;;  %v945_v32 = vsel %vm456_vm1, %v5228_v35, %v943_v58  ;;  %v951_v16 = vsel %vm456_vm1, %v943_v58, %v5229_v37  ;;  %v941_v11 = vpop.permute.xlu0 %940  ;;  %v686_v23 = vpack.c.bf16 %v674_v36, %v670_v0  ;;  %1593 = vmatmul.mubr.bf16.gmra.mxu1 %v4187_v60  ;;  %v5232_v36 = vld [vmem:[#allocation32_spill] sm:$0xff] }
 0x1be   :  { %v958_v18 = vmul.f32 %v945_v32, %v4172_v30  ;;  %v959_v5 = vmul.f32 %v951_v16, %v4176_v26  ;;  %v944_v1 = vsel %vm456_vm1, %v5230_v42, %v941_v11  ;;  %v950_v40 = vsel %vm456_vm1, %v941_v11, %v5231_v9  ;;  %1635 = vmatprep.mubr.bf16.mxu1 %v5232_v36  ;;  %v4235_v62 = vld [vmem:[%s5085_s4 + $0x84] ss:$16 sps:$4 sm:$0xff]  }
 0x1bf   :  { %v954_v63 = vmul.f32 %v944_v1, %v4172_v30  ;;  %v955_v59 = vmul.f32 %v950_v40, %v4176_v26  ;;  %1621 = vmatprep.subr.bf16.mxu1 %v686_v23  ;;  %v4239_v58 = vpack.c.bf16 %v3548_v27, %v3559_v48  ;;  %v5233_v32 = vld [vmem:[#allocation46_spill] sm:$0xff]  ;;  %v5234_v1 = vld [vmem:[#allocation47_spill] sm:$0xff]  ;;  %v4267_v9 = vpack.c.bf16 %v3593_v57, %v3600_v50 }
 0x1c0   :  { %1622 = vmatpush2.bf16.msra.mxu1 %v685_v7  ;;  %v544_v0 = vpop.permute.xlu1 %543 }
 0x1c1   :  { %v4241_v35 = vpack.c.bf16 %v958_v18, %v954_v63  ;;  %v549_v37 = vsel %vm545_vm8, %v5233_v32, %v544_v0  ;;  %v561_v16 = vsel %vm545_vm8, %v544_v0, %v3626_v28  ;;  %v542_v11 = vpop.permute.xlu0 %541  ;;  %v4249_v23 = vpack.c.bf16 %v959_v5, %v955_v59 }
 0x1c2   :  { %v592_v7 = vmul.f32 %v4203_v21, %v549_v37  ;;  %v593_v42 = vmul.f32 %v4207_v19, %v561_v16  ;;  %v548_v27 = vsel %vm545_vm8, %v5234_v1, %v542_v11  ;;  %v560_v48 = vsel %vm545_vm8, %v542_v11, %v3631_v10  ;;  %1440 = vmatmul.mubr.bf16.gmra.mxu0 %v4227_v46  ;;  %v4294_v16 = vld [vmem:[%s5085_s4 + $0xa4] ss:$16 sps:$4 sm:$0xff]   ;;  %v5235_v11 = vld [vmem:[#allocation9_spill] sm:$0xff] }
 0x1c3   :  { %v588_v18 = vmul.f32 %v4203_v21, %v548_v27  ;;  %v589_v28 = vmul.f32 %v4207_v19, %v560_v48  ;;  %1716 = vmatprep.subr.bf16.mxu0 %v4249_v23  ;;  %1449 = vmatprep.mubr.bf16.mxu0 %v4235_v62 }
 0x1c4   :  { %1717 = vmatpush1.bf16.msra.mxu0 %v4241_v35  ;;  %v540_v5 = vpop.permute.xlu1 %539 }
 0x1c5   :  { %v600_v40 = vpack.c.bf16 %v592_v7, %v588_v18  ;;  %v547_v10 = vsel %vm545_vm8, %v3662_v3, %v540_v5  ;;  %v559_v36 = vsel %vm545_vm8, %v540_v5, %v3698_v15  ;;  %v538_v63 = vpop.permute.xlu0 %537  ;;  %v601_v59 = vpack.c.bf16 %v593_v42, %v589_v28  ;;  %1718 = vmatprep.subr.bf16.mxu0 %v4239_v58  ;;  %v4287_v3 = vld [vmem:[%s5085_s4 + $0x80] ss:$16 sps:$4 sm:$0xff]   ;;  %v5236_v42 = vld [vmem:[#allocation7_spill] sm:$0xff] }
 0x1c6   :  { %v584_v0 = vmul.f32 %v4203_v21, %v547_v10  ;;  %v585_v32 = vmul.f32 %v4207_v19, %v559_v36  ;;  %v546_v57 = vsel %vm545_vm8, %v3667_v24, %v538_v63  ;;  %v558_v50 = vsel %vm545_vm8, %v538_v63, %v3703_v44  ;;  %v5237_v5 = vld [vmem:[#allocation10_spill] sm:$0xff]  ;;  %v5238_v10 = vld [vmem:[#allocation8_spill] sm:$0xff] }
 0x1c7   :  { %v580_v15 = vmul.f32 %v4203_v21, %v546_v57  ;;  %v581_v37 = vmul.f32 %v4207_v19, %v558_v50  ;;  %1623 = vmatprep.subr.bf16.mxu1 %v601_v59 }
 0x1c8   :  { %1624 = vmatpush2.bf16.msra.mxu1 %v600_v40  ;;  %v899_v24 = vpop.permute.xlu1 %898  ;;  %1719 = vmatpush1.bf16.msra.mxu0 %v4267_v9 }
 0x1c9   :  { %v596_v44 = vpack.c.bf16 %v584_v0, %v580_v15  ;;  %v905_v7 = vsel %vm359_vm0, %v899_v24, %v5235_v11  ;;  %v907_v1 = vsel %vm359_vm0, %v5236_v42, %v899_v24  ;;  %v897_v27 = vpop.permute.xlu0 %896  ;;  %v597_v48 = vpack.c.bf16 %v585_v32, %v581_v37  ;;  %v5239_v24 = vld [vmem:[#allocation57_spill] sm:$0xff]  ;;  %v4344_v42 = vld [vmem:[%s5085_s4 + $0xc4] ss:$16 sps:$4 sm:$0xff]  }
 0x1ca   :  { %v918_v18 = vmul.f32 %v907_v1, %v3739_v17  ;;  %v919_v28 = vmul.f32 %v905_v7, %v3743_v13  ;;  %v904_v40 = vsel %vm359_vm0, %v897_v27, %v5237_v5  ;;  %v906_v36 = vsel %vm359_vm0, %v5238_v10, %v897_v27  ;;  %1450 = vmatmul.mubr.bf16.gmra.mxu0 %v4287_v3  ;;  %v5240_v27 = vld [vmem:[#allocation13_spill] sm:$0xff] }
 0x1cb   :  { %v914_v63 = vmul.f32 %v906_v36, %v3739_v17  ;;  %v915_v59 = vmul.f32 %v904_v40, %v3743_v13  ;;  %1625 = vmatprep.subr.bf16.mxu1 %v597_v48  ;;  %1459 = vmatprep.mubr.bf16.mxu0 %v4294_v16 }
 0x1cc   :  { %1626 = vmatpush2.bf16.msra.mxu1 %v596_v44  ;;  %v455_v0 = vpop.permute.xlu1 %454 }
 0x1cd   :  { %v4315_v32 = vpack.c.bf16 %v918_v18, %v914_v63  ;;  %v460_v57 = vsel %vm456_vm1, %v3787_v31, %v455_v0  ;;  %v472_v50 = vsel %vm456_vm1, %v455_v0, %v3815_v8  ;;  %v453_v15 = vpop.permute.xlu0 %452  ;;  %v4323_v37 = vpack.c.bf16 %v919_v28, %v915_v59  ;;  %v4336_v31 = vld [vmem:[%s5085_s4 + $0xa0] ss:$16 sps:$4 sm:$0xff]   ;;  %v5241_v18 = vld [vmem:[#allocation11_spill] sm:$0xff] }
 0x1ce   :  { %v503_v13 = vmul.f32 %v4172_v30, %v460_v57  ;;  %v504_v17 = vmul.f32 %v4176_v26, %v472_v50  ;;  %v459_v44 = vsel %vm456_vm1, %v5239_v24, %v453_v15  ;;  %v471_v11 = vsel %vm456_vm1, %v453_v15, %v3820_v54  ;;  %v5242_v63 = vld [vmem:[#allocation14_spill] sm:$0xff]  ;;  %v5243_v0 = vld [vmem:[#allocation12_spill] sm:$0xff] }
 0x1cf   :  { %v499_v8 = vmul.f32 %v4172_v30, %v459_v44  ;;  %v500_v7 = vmul.f32 %v4176_v26, %v471_v11  ;;  %1720 = vmatprep.subr.bf16.mxu0 %v4323_v37 }
 0x1d0   :  { %1721 = vmatpush1.bf16.msra.mxu0 %v4315_v32  ;;  %v863_v1 = vpop.permute.xlu1 %862 }
 0x1d1   :  { %v511_v54 = vpack.c.bf16 %v503_v13, %v499_v8  ;;  %v869_v48 = vsel %vm270_vm2, %v863_v1, %v5240_v27  ;;  %v871_v28 = vsel %vm270_vm2, %v5241_v18, %v863_v1  ;;  %v861_v5 = vpop.permute.xlu0 %860  ;;  %v512_v40 = vpack.c.bf16 %v504_v17, %v500_v7  ;;  %v5244_v1 = vld [vmem:[#allocation64_spill] sm:$0xff]  ;;  %v2484_v18 = vld [vmem:[%s5082_s1 + $0x78] sm:$0xff] }
 0x1d2   :  { %v882_v10 = vmul.f32 %v871_v28, %v3914_v56  ;;  %v883_v36 = vmul.f32 %v869_v48, %v3925_v4  ;;  %v868_v59 = vsel %vm270_vm2, %v861_v5, %v5242_v63  ;;  %v870_v57 = vsel %vm270_vm2, %v5243_v0, %v861_v5  ;;  %1460 = vmatmul.mubr.bf16.gmra.mxu0 %v4336_v31  ;;  %v4394_v48 = vld [vmem:[%s5085_s4 + $0xe4] ss:$16 sps:$4 sm:$0xff]   ;;  %v5245_v5 = vld [vmem:[#allocation19_spill] sm:$0xff] }
 0x1d3   :  { %v878_v50 = vmul.f32 %v870_v57, %v3914_v56  ;;  %v879_v15 = vmul.f32 %v868_v59, %v3925_v4  ;;  %1627 = vmatprep.subr.bf16.mxu1 %v512_v40  ;;  %1469 = vmatprep.mubr.bf16.mxu0 %v4344_v42 }
 0x1d4   :  { %1628 = vmatpush2.bf16.msra.mxu1 %v511_v54  ;;  %v451_v13 = vpop.permute.xlu1 %450 }
 0x1d5   :  { %v4365_v17 = vpack.c.bf16 %v882_v10, %v878_v50  ;;  %v458_v24 = vsel %vm456_vm1, %v3877_v29, %v451_v13  ;;  %v470_v44 = vsel %vm456_vm1, %v451_v13, %v3905_v6  ;;  %v449_v11 = vpop.permute.xlu0 %448  ;;  %v4373_v8 = vpack.c.bf16 %v883_v36, %v879_v15  ;;  %v4386_v29 = vld [vmem:[%s5085_s4 + $0xc0] ss:$16 sps:$4 sm:$0xff]   ;;  %v5248_v13 = vld [vmem:[#allocation17_spill] sm:$0xff] }
 0x1d6   :  { %v495_v56 = vmul.f32 %v4172_v30, %v458_v24  ;;  %v496_v4 = vmul.f32 %v4176_v26, %v470_v44  ;;  %v457_v7 = vsel %vm456_vm1, %v3882_v34, %v449_v11  ;;  %v469_v54 = vsel %vm456_vm1, %v449_v11, %v5244_v1  ;;  %v5246_v10 = vld [vmem:[#allocation16_spill] sm:$0xff] }
 0x1d7   :  { %v491_v6 = vmul.f32 %v4172_v30, %v457_v7  ;;  %v492_v27 = vmul.f32 %v4176_v26, %v469_v54  ;;  %1722 = vmatprep.subr.bf16.mxu0 %v4373_v8  ;;  %v2485_v30 = vld [vmem:[%s5082_s1 + $0x58] sm:$0xff]  ;;  %v5247_v50 = vld [vmem:[#allocation20_spill] sm:$0xff] }
 0x1d8   :  { %1723 = vmatpush1.bf16.msra.mxu0 %v4365_v17  ;;  %v827_v34 = vpop.permute.xlu1 %826  ;;  %v423_v28 = vpack.c.bf16 %v2484_v18, %v2485_v30  ;;  %v2487_v7 = vld [vmem:[%s5082_s1 + $0x50] sm:$0xff]  ;;  %v5250_v18 = vld [vmem:[#allocation23_spill] sm:$0xff] }
 0x1d9   :  { %v507_v26 = vpack.c.bf16 %v495_v56, %v491_v6  ;;  %v833_v40 = vsel %vm181_vm3, %v827_v34, %v5245_v5  ;;  %v835_v36 = vsel %vm181_vm3, %v5246_v10, %v827_v34  ;;  %v825_v63 = vpop.permute.xlu0 %824  ;;  %v508_v59 = vpack.c.bf16 %v496_v4, %v492_v27  ;;  %v2486_v4 = vld [vmem:[%s5082_s1 + $0x70] sm:$0xff]  ;;  %v5249_v27 = vld [vmem:[#allocation25_spill] sm:$0xff] }
 0x1da   :  { %v846_v0 = vmul.f32 %v835_v36, %v3972_v41  ;;  %v847_v57 = vmul.f32 %v833_v40, %v3976_v47  ;;  %v832_v15 = vsel %vm181_vm3, %v825_v63, %v5247_v50  ;;  %v834_v24 = vsel %vm181_vm3, %v5248_v13, %v825_v63  ;;  %1470 = vmatmul.mubr.bf16.gmra.mxu0 %v4386_v29  ;;  %v5251_v36 = vld [vmem:[#allocation26_spill] sm:$0xff]  ;;  %v2176_v13 = vld [vmem:[%s5084_s3 + $0x38] ss:$0 sm:$0xff] }
 0x1db   :  { %v842_v44 = vmul.f32 %v834_v24, %v3972_v41  ;;  %v843_v11 = vmul.f32 %v832_v15, %v3976_v47  ;;  %1629 = vmatprep.subr.bf16.mxu1 %v508_v59  ;;  %1479 = vmatprep.mubr.bf16.mxu0 %v4394_v48  ;;  %v422_v1 = vpack.c.bf16 %v2486_v4, %v2487_v7  ;;  %v2488_v41 = vld [vmem:[%s5082_s1 + $0x38] sm:$0xff]  ;;  %v5252_v59 = vld [vmem:[#allocation24_spill] sm:$0xff] }
 0x1dc   :  { %1630 = vmatpush2.bf16.msra.mxu1 %v507_v26  ;;  %v791_v56 = vpop.permute.xlu1 %790  ;;  %v2489_v47 = vld [vmem:[%s5082_s1 + $0x18] sm:$0xff]  ;;  %v4454_v50 = vld [vmem:[%s5085_s4 + $0xe0] ss:$16 sps:$4 sm:$0xff]  }
 0x1dd   :  { %v419_v54 = vpack.c.bf16 %v2488_v41, %v2489_v47  ;;  %v4433_v6 = vpack.c.bf16 %v846_v0, %v842_v44  ;;  %v797_v34 = vsel %vm92_vm4, %v791_v56, %v5249_v27  ;;  %v799_v30 = vsel %vm92_vm4, %v5250_v18, %v791_v56  ;;  %v789_v26 = vpop.permute.xlu0 %788  ;;  %1631 = vmatprep.subr.bf16.mxu1 %v423_v28  ;;  %v2175_v15 = vld [vmem:[%s5084_s3 + $0x30] ss:$0 sm:$0xff]  ;;  %v5253_v56 = vld [vmem:[#allocation27_spill] sm:$0xff]  ;;  %v5254_v7 = vld [vmem:[#allocation29_spill] sm:$0xff] }
 0x1de   :  { %v4441_v5 = vpack.c.bf16 %v847_v57, %v843_v11  ;;  %v810_v40 = vmul.f32 %v799_v30, %v4042_v38  ;;  %v811_v10 = vmul.f32 %v797_v34, %v4046_v2  ;;  %v796_v63 = vsel %vm92_vm4, %v789_v26, %v5251_v36  ;;  %v5255_v18 = vld [vmem:[#allocation28_spill] sm:$0xff] }
 0x1df   :  { %v798_v0 = vsel %vm92_vm4, %v5252_v59, %v789_v26  ;;  %v807_v57 = vmul.f32 %v796_v63, %v4046_v2  ;;  %v2491_v2 = vld [vmem:[%s5082_s1 + $0x10] sm:$0xff]  ;;  %v5256_v26 = vld [vmem:[#allocation30_spill] sm:$0xff] }
 0x1e0   :  { %v806_v28 = vmul.f32 %v798_v0, %v4042_v38  ;;  %1724 = vmatprep.subr.bf16.mxu0 %v4441_v5  ;;  %1632 = vmatpush2.bf16.msra.mxu1 %v422_v1  ;;  %v722_v24 = vpop.permute.xlu1 %721  ;;  %v2490_v38 = vld [vmem:[%s5082_s1 + $0x30] sm:$0xff]  ;;  %v5257_v0 = vld [vmem:[#allocation33_spill] sm:$0xff] }
 0x1e1   :  { %1725 = vmatpush1.bf16.msra.mxu0 %v4433_v6  ;;  %v418_v44 = vpack.c.bf16 %v2490_v38, %v2491_v2  ;;  %v727_v4 = vsel %vm723_vm6, %v5253_v56, %v722_v24  ;;  %v739_v1 = vsel %vm723_vm6, %v722_v24, %v5254_v7  ;;  %v720_v41 = vpop.permute.xlu0 %719  ;;  %1633 = vmatprep.subr.bf16.mxu1 %v419_v54  ;;  %v2492_v54 = vld [vmem:[%s5085_s4 + $0xc] ss:$16 sps:$4 sm:$0xff]  }
 0x1e2   :  { %v4472_v11 = vpack.c.bf16 %v810_v40, %v806_v28  ;;  %v4480_v47 = vpack.c.bf16 %v811_v10, %v807_v57  ;;  %v770_v27 = vmul.f32 %v2175_v15, %v727_v4  ;;  %v771_v34 = vmul.f32 %v2176_v13, %v739_v1  ;;  %1480 = vmatmul.mubr.bf16.gmra.mxu0 %v4454_v50  ;;  %v5258_v57 = vld [vmem:[#allocation36_spill] sm:$0xff]  ;;  %v5259_v4 = vld [vmem:[#allocation34_spill] sm:$0xff]  ;;  %v5260_v1 = vld [vmem:[#allocation37_spill] sm:$0xff] }
 0x1e3   :  { %v726_v30 = vsel %vm723_vm6, %v5255_v18, %v720_v41  ;;  %v738_v40 = vsel %vm723_vm6, %v720_v41, %v5256_v26  ;;  %2217 = vmatprep.mubr.msk.bf16.mxu0 %vm1352_vm5, %v2492_v54 }
 0x1e4   :  { %v766_v36 = vmul.f32 %v2175_v15, %v726_v30  ;;  %v767_v63 = vmul.f32 %v2176_v13, %v738_v40  ;;  %1726 = vmatprep.subr.bf16.mxu0 %v4480_v47  ;;  %1634 = vmatpush2.bf16.msra.mxu1 %v418_v44  ;;  %v718_v10 = vpop.permute.xlu1 %717  ;;  %v5261_v30 = vld [vmem:[#allocation40_spill] sm:$0xff] }
 0x1e5   :  { %1727 = vmatpush1.bf16.msra.mxu0 %v4472_v11  ;;  %v725_v28 = vsel %vm723_vm6, %v5257_v0, %v718_v10  ;;  %v737_v24 = vsel %vm723_vm6, %v718_v10, %v5258_v57  ;;  %v716_v38 = vpop.permute.xlu0 %715  ;;  %2225 = vmatprep.subr.bf16.mxu1 %v4249_v23  ;;  %v5262_v40 = vld [vmem:[#allocation44_spill] sm:$0xff] }
 0x1e6   :  { %v4495_v59 = vpack.c.bf16 %v770_v27, %v766_v36  ;;  %v4504_v2 = vpack.c.bf16 %v771_v34, %v767_v63  ;;  %v762_v56 = vmul.f32 %v2175_v15, %v725_v28  ;;  %v763_v44 = vmul.f32 %v2176_v13, %v737_v24  ;;  %v5264_v28 = vld [vmem:[#allocation45_spill] sm:$0xff] }
 0x1e7   :  { %v724_v7 = vsel %vm723_vm6, %v5259_v4, %v716_v38  ;;  %v736_v41 = vsel %vm723_vm6, %v716_v38, %v5260_v1  ;;  %1636 = vmatmul.mubr.bf16.vlgmr.msra.gmra.mxu1 %v4031_v55 }
 0x1e8   :  { %v758_v27 = vmul.f32 %v2175_v15, %v724_v7  ;;  %v759_v18 = vmul.f32 %v2176_v13, %v736_v41  ;;  %1728 = vmatprep.subr.bf16.mxu0 %v4504_v2  ;;  %2236 = vmatpush1.bf16.msra.mxu1 %v4241_v35  ;;  %v1051_v23 = vpop.permute.xlu1 %1050  ;;  %v5263_v35 = vld [vmem:[#allocation41_spill] sm:$0xff]  ;;  %v5266_v7 = vld [vmem:[#allocation50_spill] sm:$0xff] }
 0x1e9   :  { %1729 = vmatpush1.bf16.msra.mxu0 %v4495_v59  ;;  %v1053_v26 = vsel %vm723_vm6, %v5261_v30, %v1051_v23  ;;  %v1059_v36 = vsel %vm723_vm6, %v1051_v23, %v5262_v40  ;;  %v1049_v63 = vpop.permute.xlu0 %1048  ;;  %2226 = vmatprep.subr.bf16.mxu1 %v4239_v58 }
 0x1ea   :  { %v4516_v34 = vpack.c.bf16 %v762_v56, %v758_v27  ;;  %v775_v55 = vpack.c.bf16 %v763_v44, %v759_v18  ;;  %v1066_v54 = vmul.f32 %v2175_v15, %v1053_v26  ;;  %v1067_v10 = vmul.f32 %v2176_v13, %v1059_v36  ;;  %1645 = vmatprep.mubr.bf16.mxu1 %v4038_v20  ;;  %v5265_v44 = vld [vmem:[#allocation48_spill] sm:$0xff]  ;;  %v5268_v18 = vld [vmem:[#allocation51_spill] sm:$0xff] }
 0x1eb   :  { %v1052_v0 = vsel %vm723_vm6, %v5263_v35, %v1049_v63  ;;  %v1058_v57 = vsel %vm723_vm6, %v1049_v63, %v5264_v28  ;;  %v5269_v36 = vld [vmem:[#allocation52_spill] sm:$0xff]  ;;  %v5272_v28 = vld [vmem:[#allocation55_spill] sm:$0xff] }
 0x1ec   :  { %v1062_v24 = vmul.f32 %v2175_v15, %v1052_v0  ;;  %v1063_v38 = vmul.f32 %v2176_v13, %v1058_v57  ;;  %1730 = vmatprep.subr.bf16.mxu0 %v775_v55  ;;  %2237 = vmatpush1.bf16.msra.mxu1 %v4267_v9  ;;  %v1015_v58 = vpop.permute.xlu1 %1014  ;;  %v5267_v13 = vld [vmem:[#allocation49_spill] sm:$0xff] }
 0x1ed   :  { %1731 = vmatpush1.bf16.msra.mxu0 %v4516_v34  ;;  %v1017_v4 = vsel %vm634_vm7, %v5265_v44, %v1015_v58  ;;  %v1023_v1 = vsel %vm634_vm7, %v1015_v58, %v5266_v7  ;;  %v1013_v41 = vpop.permute.xlu0 %1012  ;;  %2227 = vmatprep.subr.bf16.mxu1 %v4323_v37 }
 0x1ee   :  { %v1070_v56 = vpack.c.bf16 %v1066_v54, %v1062_v24  ;;  %v1071_v20 = vpack.c.bf16 %v1067_v10, %v1063_v38  ;;  %v1030_v15 = vmul.f32 %v1017_v4, %v4107_v52  ;;  %v1031_v9 = vmul.f32 %v1023_v1, %v4111_v43  ;;  %v5270_v54 = vld [vmem:[#allocation54_spill] sm:$0xff] }
 0x1ef   :  { %v1016_v27 = vsel %vm634_vm7, %v5267_v13, %v1013_v41  ;;  %v1022_v23 = vsel %vm634_vm7, %v1013_v41, %v5268_v18  ;;  %1646 = vmatmul.mubr.bf16.gmra.mxu1 %v4094_v12 }
 0x1f0   :  { %v1026_v30 = vmul.f32 %v1016_v27, %v4107_v52  ;;  %v1027_v26 = vmul.f32 %v1022_v23, %v4111_v43  ;;  %1742 = vmatprep.subr.bf16.mxu0 %v1071_v20  ;;  %2238 = vmatpush1.bf16.msra.mxu1 %v4315_v32  ;;  %v979_v37 = vpop.permute.xlu1 %978  ;;  %v5271_v32 = vld [vmem:[#allocation53_spill] sm:$0xff] }
 0x1f1   :  { %1743 = vmatpush2.bf16.msra.mxu0 %v1070_v56  ;;  %v981_v63 = vsel %vm545_vm8, %v5269_v36, %v979_v37  ;;  %v987_v10 = vsel %vm545_vm8, %v979_v37, %v5270_v54  ;;  %v977_v35 = vpop.permute.xlu0 %976  ;;  %2228 = vmatprep.subr.bf16.mxu1 %v4373_v8 }
 0x1f2   :  { %v1034_v40 = vpack.c.bf16 %v1030_v15, %v1026_v30  ;;  %v1035_v52 = vpack.c.bf16 %v1031_v9, %v1027_v26  ;;  %v994_v12 = vmul.f32 %v981_v63, %v4203_v21  ;;  %v995_v43 = vmul.f32 %v987_v10, %v4207_v19  ;;  %1655 = vmatprep.mubr.bf16.mxu1 %v4103_v39  ;;  %v5273_v39 = vld [vmem:[#allocation56_spill] sm:$0xff] }
 0x1f3   :  { %v980_v0 = vsel %vm545_vm8, %v5271_v32, %v977_v35  ;;  %v986_v57 = vsel %vm545_vm8, %v977_v35, %v5272_v28 }
 0x1f4   :  { %v990_v24 = vmul.f32 %v980_v0, %v4203_v21  ;;  %v991_v38 = vmul.f32 %v986_v57, %v4207_v19  ;;  %1744 = vmatprep.subr.bf16.mxu0 %v1035_v52  ;;  %2239 = vmatpush1.bf16.msra.mxu1 %v4365_v17  ;;  %v5276_v21 = vld [vmem:[#allocation60_spill] sm:$0xff]  ;;  %v5277_v19 = vld [vmem:[#allocation61_spill] sm:$0xff] }
 0x1f5   :  { %1745 = vmatpush2.bf16.msra.mxu0 %v1034_v40  ;;  %2229 = vmatprep.subr.bf16.mxu1 %v4441_v5 }
 0x1f6   :  { %v998_v8 = vpack.c.bf16 %v994_v12, %v990_v24  ;;  %v999_v58 = vpack.c.bf16 %v995_v43, %v991_v38 }
 0x1f7   :  { %1656 = vmatmul.mubr.bf16.gmra.mxu1 %v4159_v49  ;;  %v5274_v49 = vld [vmem:[#allocation58_spill] sm:$0xff] }
 0x1f8   :  { %1746 = vmatprep.subr.bf16.mxu0 %v999_v58  ;;  %2240 = vmatpush1.bf16.msra.mxu1 %v4433_v6 }
 0x1f9   :  { %1747 = vmatpush2.bf16.msra.mxu0 %v998_v8  ;;  %2230 = vmatprep.subr.bf16.mxu1 %v4480_v47 }
 0x1fa   :  { %1665 = vmatprep.mubr.bf16.mxu1 %v4168_v53  ;;  %v5275_v53 = vld [vmem:[#allocation59_spill] sm:$0xff] }
 0x1fc   :  { %1749 = vmatmul.mubr.bf16.vlgmr.msra.gmra.mxu0 %v2493_v22  ;;  %2241 = vmatpush1.bf16.msra.mxu1 %v4472_v11 }
 0x1fd   :  { %2218 = vmatprep.mubr.msk.bf16.mxu0 %vm1352_vm5, %v5273_v39  ;;  %2231 = vmatprep.subr.bf16.mxu1 %v4504_v2  ;;  %v4640_v4 = vpop.permute.xlu1 %1127 }
 0x1ff   :  { %1666 = vmatmul.mubr.bf16.gmra.mxu1 %v4227_v46  ;;  %v5278_v46 = vld [vmem:[#allocation62_spill] sm:$0xff]  ;;  %v4648_v13 = vpop.permute.xlu0 %1122 }
 0x200   :  { %2242 = vmatpush1.bf16.msra.mxu1 %v4495_v59  ;;  %1675 = vmatprep.mubr.bf16.mxu1 %v4235_v62  ;;  %v5279_v62 = vld [vmem:[#allocation63_spill] sm:$0xff] }
 0x201   :  { %2232 = vmatprep.subr.bf16.mxu1 %v775_v55  ;;  %v4646_v9 = vpop.permute.xlu1 %1132 }
 0x203   :  { %v4655_v37 = vpop.permute.xlu0 %1137 }
 0x204   :  { %1759 = vmatmul.mubr.bf16.gmra.mxu0 %v5274_v49  ;;  %2243 = vmatpush1.bf16.msra.mxu1 %v4516_v34 }
 0x205   :  { %2219 = vmatprep.mubr.msk.bf16.mxu0 %vm1352_vm5, %v5275_v53  ;;  %2233 = vmatprep.subr.bf16.mxu1 %v1071_v20  ;;  %v4652_v30 = vpop.permute.xlu1 %1142 }
 0x207   :  { %1676 = vmatmul.mubr.bf16.gmra.mxu1 %v4287_v3 }
 0x208   :  { %2244 = vmatpush2.bf16.msra.mxu1 %v1070_v56  ;;  %1685 = vmatprep.mubr.bf16.mxu1 %v4294_v16 }
 0x209   :  { %2234 = vmatprep.subr.bf16.mxu1 %v1035_v52  ;;  %v4661_v52 = vpop.permute.xlu0 %1147 }
 0x20a   :  { %v4663_v32 = vpop.permute.xlu1 %1152 }
 0x20c   :  { %1769 = vmatmul.mubr.bf16.gmra.mxu0 %v5276_v21  ;;  %2245 = vmatpush2.bf16.msra.mxu1 %v1034_v40 }
 0x20d   :  { %2220 = vmatprep.mubr.msk.bf16.mxu0 %vm1352_vm5, %v5277_v19  ;;  %2235 = vmatprep.subr.bf16.mxu1 %v999_v58  ;;  %v4670_v49 = vpop.permute.xlu0 %1157 }
 0x20f   :  { %1686 = vmatmul.mubr.bf16.gmra.mxu1 %v4336_v31 }
 0x210   :  { %2246 = vmatpush2.bf16.msra.mxu1 %v998_v8  ;;  %1695 = vmatprep.mubr.bf16.mxu1 %v4344_v42 }
 0x214   :  { %1779 = vmatmul.mubr.bf16.gmra.mxu0 %v5278_v46  ;;  %v4674_v46 = vpop.permute.xlu1 %1182 }
 0x215   :  { %2221 = vmatprep.mubr.msk.bf16.mxu0 %vm1352_vm5, %v5279_v62 }
 0x217   :  { %1696 = vmatmul.mubr.bf16.gmra.mxu1 %v4386_v29 }
 0x218   :  { %1705 = vmatprep.mubr.bf16.mxu1 %v4394_v48 }
 0x21c   :  { %1789 = vmatmul.mubr.bf16.gmra.mxu0 %v3960_v51 }
 0x21d   :  { %2222 = vmatprep.mubr.msk.bf16.mxu0 %vm1352_vm5, %v3993_v25 }
 0x21f   :  { %1706 = vmatmul.mubr.bf16.gmra.mxu1 %v4454_v50 }
 0x220   :  { %2224 = vmatprep.mubr.msk.bf16.mxu1 %vm1352_vm5, %v4136_v33 }
 0x224   :  { %1799 = vmatmul.mubr.bf16.gmra.mxu0 %v4057_v14 }
 0x225   :  { %2223 = vmatprep.mubr.msk.bf16.mxu0 %vm1352_vm5, %v4071_v61 }
 0x227   :  { %1819 = vmatmul.mubr.bf16.vlgmr.msra.gmra.mxu1 %v4187_v60 }
 0x22c   :  { %1809 = vmatmul.mubr.bf16.gmra.mxu0 %v4122_v45 }
 0x242   :  { %v1524_v3 = vpop.f32.mrf.mxu1 }
 0x244   :  { %v1526_v16 = vpop.f32.mrf.mxu1 }
 0x246   :  { %v1528_v51 = vpop.f32.mrf.mxu1 }
 0x248   :  { %v1530_v31 = vpop.f32.mrf.mxu1 }
 0x24a   :  { %v4614_v42 = vpop.f32.mrf.mxu1 }
 0x24c   :  { %v4616_v25 = vpop.f32.mrf.mxu1 }
 0x24e   :  { %v4618_v17 = vpop.f32.mrf.mxu1 }
 0x250   :  { %v4620_v33 = vpop.f32.mrf.mxu1 }
 0x252   :  { %v1544_v14 = vpop.f32.mrf.mxu1 }
 0x254   :  { %v1546_v29 = vpop.f32.mrf.mxu1 }
 0x256   :  { %v4622_v48 = vpop.f32.mrf.mxu1 }
 0x258   :  { %v4624_v61 = vpop.f32.mrf.mxu1 }
 0x25a   :  { %v4626_v60 = vpop.f32.mrf.mxu1 }
 0x25c   :  { %v4628_v45 = vpop.f32.mrf.mxu1 }
 0x25e   :  { %v4630_v6 = vpop.f32.mrf.mxu1 }
 0x260   :  { %v4632_v5 = vpop.f32.mrf.mxu1 }
 0x262   :  { %v4634_v50 = vpop.f32.mrf.mxu1 }
 0x264   :  { %v4636_v59 = vpop.f32.mrf.mxu1 }
 0x266   :  { %v4638_v55 = vpop.f32.mrf.mxu1 }
 0x268   :  { %v4642_v7 = vpop.f32.mrf.mxu1 }
 0x26a   :  { %v1411_v11 = vpop.f32.mrf.mxu0 }
 0x26b   :  { %v1412_v26 = vadd.f32 %v1411_v11, %v4648_v13 }
 0x26c   :  { %v1413_v47 = vpop.f32.mrf.mxu0 }
 0x26d   :  { %v4644_v20 = vpop.f32.mrf.mxu1  ;;  %v1414_v40 = vadd.f32 %v1413_v47, %v4648_v13  ;;  %v1525_v35 = vadd.f32 %v1524_v3, %v1412_v26 }
 0x26e   :  { %v1415_v2 = vpop.f32.mrf.mxu0 }
 0x26f   :  { %v4650_v18 = vpop.f32.mrf.mxu1  ;;  %v1416_v10 = vadd.f32 %v1415_v2, %v4640_v4  ;;  %v1527_v12 = vadd.f32 %v1526_v16, %v1414_v40  ;;  %v1829_v38 = vmul.f32 0.5, %v1525_v35  ;;  %v4688_v40 = vpop.permute.xlu0 %1187 }
 0x270   :  { %v1417_v34 = vpop.f32.mrf.mxu0  ;;  %v4694_v35 = vpop.permute.xlu1 %1192 }
 0x271   :  { %v4658_v63 = vpop.f32.mrf.mxu1  ;;  %v1418_v28 = vadd.f32 %v1417_v34, %v4640_v4  ;;  %v1529_v24 = vadd.f32 %v1528_v51, %v1416_v10  ;;  %v1830_v58 = vmul.f32 0.5, %v1527_v12  ;;  %2306 = vtanh.f32 %v1829_v38 }
 0x272   :  { %v1421_v56 = vpop.f32.mrf.mxu0 }
 0x273   :  { %v4665_v0 = vpop.f32.mrf.mxu1  ;;  %v1531_v21 = vadd.f32 %v1530_v31, %v1418_v28  ;;  %v1833_v62 = vmul.f32 0.5, %v1529_v24  ;;  %2308 = vtanh.f32 %v1830_v58  ;;  %v1422_v51 = vadd.f32 %v1421_v56, %v4646_v9 }
 0x274   :  { %v1423_v44 = vpop.f32.mrf.mxu0 }
 0x275   :  { %v4672_v53 = vpop.f32.mrf.mxu1  ;;  %v1424_v2 = vadd.f32 %v1423_v44, %v4646_v9  ;;  %2310 = vtanh.f32 %v1833_v62 }
 0x276   :  { %v1425_v1 = vpop.f32.mrf.mxu0 }
 0x277   :  { %v4681_v34 = vpop.f32.mrf.mxu1 }
 0x278   :  { %v1427_v41 = vpop.f32.mrf.mxu0 }
 0x279   :  { %v1428_v12 = vadd.f32 %v1427_v41, %v4655_v37  ;;  %v4698_v28 = vpop.f32.mrf.mxu1 }
 0x27a   :  { %v1431_v15 = vpop.f32.mrf.mxu0 }
 0x27b   :  { %v1432_v8 = vadd.f32 %v1431_v15, %v4652_v30  ;;  %v1834_v15 = vmul.f32 0.5, %v1531_v21 }
 0x27c   :  { %v1433_v27 = vpop.f32.mrf.mxu0 }
 0x27d   :  { %v1434_v22 = vadd.f32 %v1433_v27, %v4652_v30  ;;  %v1545_v3 = vadd.f32 %v1544_v14, %v1432_v8  ;;  %v1426_v14 = vadd.f32 %v1425_v1, %v4655_v37  ;;  %2312 = vtanh.f32 %v1834_v15 }
 0x27e   :  { %v1435_v23 = vpop.f32.mrf.mxu0 }
 0x27f   :  { %v1436_v16 = vadd.f32 %v1435_v23, %v4661_v52  ;;  %v1547_v11 = vadd.f32 %v1546_v29, %v1434_v22  ;;  %v1893_v26 = vmul.f32 0.5, %v1545_v3  ;;  %v1535_v29 = vadd.f32 %v4614_v42, %v1422_v51  ;;  %v4716_v3 = vpop.permute.xlu1 %1162 }
 0x280   :  { %v1437_v36 = vpop.f32.mrf.mxu0  ;;  %v1539_v42 = vadd.f32 %v4618_v17, %v1426_v14  ;;  %v1541_v22 = vadd.f32 %v4620_v33, %v1428_v12 }
 0x281   :  { %v1438_v31 = vadd.f32 %v1437_v36, %v4661_v52  ;;  %v1549_v23 = vadd.f32 %v4622_v48, %v1436_v16  ;;  %v1894_v56 = vmul.f32 0.5, %v1547_v11  ;;  %v1537_v36 = vadd.f32 %v4616_v25, %v1424_v2 }
 0x282   :  { %v1441_v54 = vpop.f32.mrf.mxu0  ;;  %2314 = vtanh.f32 %v1893_v26  ;;  %v1837_v38 = vmul.f32 0.5, %v1535_v29  ;;  %v1842_v15 = vmul.f32 0.5, %v1541_v22 }
 0x283   :  { %v1442_v44 = vadd.f32 %v1441_v54, %v4663_v32  ;;  %v1551_v48 = vadd.f32 %v4624_v61, %v1438_v31  ;;  %v1897_v54 = vmul.f32 0.5, %v1549_v23  ;;  %2316 = vtanh.f32 %v1894_v56  ;;  %v4710_v61 = vpop.permute.xlu0 %1197 }
 0x284   :  { %v1443_v43 = vpop.f32.mrf.mxu0  ;;  %v1838_v58 = vmul.f32 0.5, %v1537_v36 }
 0x285   :  { %v1444_v1 = vadd.f32 %v1443_v43, %v4663_v32  ;;  %v1555_v8 = vadd.f32 %v4626_v60, %v1442_v44  ;;  %v4712_v43 = vpop.f32.mrf.mxu1  ;;  %v1898_v21 = vmul.f32 0.5, %v1551_v48  ;;  %v1841_v60 = vmul.f32 0.5, %v1539_v42 }
 0x286   :  { %v1445_v57 = vpop.f32.mrf.mxu0  ;;  %2318 = vtanh.f32 %v1897_v54 }
 0x287   :  { %v1446_v25 = vadd.f32 %v1445_v57, %v4670_v49  ;;  %v1557_v17 = vadd.f32 %v4628_v45, %v1444_v1  ;;  %v2307_v57 = vpop.eup %2306  ;;  %2320 = vtanh.f32 %v1837_v38  ;;  %v1901_v51 = vmul.f32 0.5, %v1555_v8  ;;  %v1594_v31 = vpop.f32.mrf.mxu1 }
 0x288   :  { %v1447_v39 = vpop.f32.mrf.mxu0  ;;  %v2309_v2 = vpop.eup %2308  ;;  %2322 = vtanh.f32 %v1838_v58  ;;  %v1861_v23 = vadd.f32 1.0, %v2307_v57 }
 0x289   :  { %v1448_v62 = vadd.f32 %v1447_v39, %v4670_v49  ;;  %v1559_v33 = vadd.f32 %v4630_v6, %v1446_v25  ;;  %2324 = vtanh.f32 %v1898_v21  ;;  %v1902_v39 = vmul.f32 0.5, %v1557_v17  ;;  %v4725_v29 = vpop.permute.xlu0 %1167  ;;  %v2311_v6 = vpop.eup %2310 }
 0x28a   :  { %v1451_v19 = vpop.f32.mrf.mxu0  ;;  %2326 = vtanh.f32 %v1841_v60  ;;  %v1862_v44 = vadd.f32 1.0, %v2309_v2  ;;  %v1596_v42 = vpop.f32.mrf.mxu1  ;;  %v1865_v58 = vadd.f32 1.0, %v2311_v6 }
 0x28b   :  { %v1452_v45 = vadd.f32 %v1451_v19, %v4716_v3  ;;  %v1561_v14 = vadd.f32 %v4632_v5, %v1448_v62  ;;  %2328 = vtanh.f32 %v1901_v51  ;;  %v1905_v36 = vmul.f32 0.5, %v1559_v33  ;;  %v2313_v25 = vpop.eup %2312  ;;  %v4744_v51 = vpop.permute.xlu1 %1172 }
 0x28c   :  { %v4678_v47 = vpop.f32.mrf.mxu0  ;;  %2330 = vtanh.f32 %v1842_v15  ;;  %v1598_v33 = vpop.f32.mrf.mxu1  ;;  %v1866_v2 = vadd.f32 1.0, %v2313_v25 }
 0x28d   :  { %v1454_v12 = vadd.f32 %v4678_v47, %v4716_v3  ;;  %v1565_v48 = vadd.f32 %v4634_v50, %v1452_v45  ;;  %2332 = vtanh.f32 %v1902_v39  ;;  %v1906_v54 = vmul.f32 0.5, %v1561_v14 }
 0x28e   :  { %v4684_v27 = vpop.f32.mrf.mxu0  ;;  %v4737_v50 = vmul.f32 0.5, %v1861_v23 }
 0x28f   :  { %v1456_v38 = vadd.f32 %v4684_v27, %v4725_v29  ;;  %v2315_v21 = vpop.eup %2314  ;;  %v1567_v17 = vadd.f32 %v4636_v59, %v1454_v12  ;;  %v1957_v57 = vmul.f32 0.5, %v1565_v48  ;;  %v4749_v59 = vmul.f32 0.5, %v1865_v58  ;;  %v4756_v12 = vpop.permute.xlu0 %1177 }
 0x290   :  { %v4692_v10 = vpop.f32.mrf.mxu0  ;;  %v2317_v60 = vpop.eup %2316  ;;  %v1925_v14 = vadd.f32 1.0, %v2315_v21 }
 0x291   :  { %v1458_v27 = vadd.f32 %v4692_v10, %v4725_v29  ;;  %v1569_v15 = vadd.f32 %v4638_v55, %v1456_v38  ;;  %v1926_v23 = vadd.f32 1.0, %v2317_v60 }
 0x292   :  { %v4702_v24 = vpop.f32.mrf.mxu0 }
 0x293   :  { %v2319_v10 = vpop.eup %2318  ;;  %v1571_v55 = vadd.f32 %v4642_v7, %v1458_v27  ;;  %v1961_v38 = vmul.f32 0.5, %v1569_v15  ;;  %v1942_v60 = vmul.f32 0.5, %v1926_v23 }
 0x294   :  { %v4707_v41 = vpop.f32.mrf.mxu0  ;;  %v1929_v25 = vadd.f32 1.0, %v2319_v10 }
 0x296   :  { %v4718_v16 = vpop.f32.mrf.mxu0 }
 0x298   :  { %v4721_v11 = vpop.f32.mrf.mxu0 }
 0x29a   :  { %v1471_v26 = vpop.f32.mrf.mxu0 }
 0x29b   :  { %v1472_v56 = vadd.f32 %v1471_v26, %v4674_v46 }
 0x29c   :  { %v1473_v19 = vpop.f32.mrf.mxu0 }
 0x29d   :  { %v1585_v5 = vadd.f32 %v4672_v53, %v1472_v56  ;;  %v1474_v1 = vadd.f32 %v1473_v19, %v4674_v46  ;;  %v4739_v53 = vmul.f32 0.5, %v1862_v44  ;;  %v1958_v56 = vmul.f32 0.5, %v1567_v17 }
 0x29e   :  { %v1475_v8 = vpop.f32.mrf.mxu0  ;;  %v1466_v17 = vadd.f32 %v4718_v16, %v4756_v12 }
 0x29f   :  { %2334 = vtanh.f32 %v1585_v5  ;;  %v1587_v47 = vadd.f32 %v4681_v34, %v1474_v1  ;;  %v1476_v22 = vadd.f32 %v1475_v8, %v4688_v40  ;;  %v1600_v5 = vpop.f32.mrf.mxu1 }
 0x2a0   :  { %2336 = vtanh.f32 %v1905_v36  ;;  %v1477_v62 = vpop.f32.mrf.mxu0  ;;  %v2321_v36 = vpop.eup %2320 }
 0x2a1   :  { %2338 = vtanh.f32 %v1587_v47  ;;  %v1589_v34 = vadd.f32 %v4698_v28, %v1476_v22  ;;  %v1478_v45 = vadd.f32 %v1477_v62, %v4688_v40  ;;  %v1462_v28 = vadd.f32 %v4702_v24, %v4744_v51  ;;  %v2323_v1 = vpop.eup %2322 }
 0x2a2   :  { %2340 = vtanh.f32 %v1906_v54  ;;  %v1481_v39 = vpop.f32.mrf.mxu0  ;;  %v4759_v54 = vmul.f32 0.5, %v1866_v2  ;;  %v1464_v24 = vadd.f32 %v4707_v41, %v4744_v51  ;;  %v2325_v8 = vpop.eup %2324  ;;  %v1941_v22 = vmul.f32 0.5, %v1925_v14  ;;  %v2037_v2 = vld [vmem:[%s5087_s2] sm:$0xff] }
 0x2a3   :  { %2342 = vtanh.f32 %v1589_v34  ;;  %v1482_v26 = vadd.f32 %v1481_v39, %v4694_v35  ;;  %v1591_v6 = vadd.f32 %v4712_v43, %v1478_v45  ;;  %v1575_v21 = vadd.f32 %v4644_v20, %v1462_v28 }
 0x2a4   :  { %v1483_v44 = vpop.f32.mrf.mxu0  ;;  %2344 = vtanh.f32 %v1957_v57  ;;  %v1962_v57 = vmul.f32 0.5, %v1571_v55  ;;  %v1930_v15 = vadd.f32 1.0, %v2325_v8  ;;  %v1577_v20 = vadd.f32 %v4650_v18, %v1464_v24 }
 0x2a5   :  { %v1595_v19 = vadd.f32 %v1594_v31, %v1482_v26  ;;  %v1484_v48 = vadd.f32 %v1483_v44, %v4694_v35  ;;  %2346 = vtanh.f32 %v1591_v6  ;;  %v4766_v31 = vpop.eup %2326  ;;  %v1869_v39 = vadd.f32 1.0, %v2321_v36 }
 0x2a6   :  { %v1485_v43 = vpop.f32.mrf.mxu0  ;;  %v2329_v62 = vpop.eup %2328  ;;  %v1945_v14 = vmul.f32 0.5, %v1929_v25  ;;  %v1468_v26 = vadd.f32 %v4721_v11, %v4756_v12  ;;  %v1965_v28 = vmul.f32 0.5, %v1575_v21  ;;  %v1579_v18 = vadd.f32 %v4658_v63, %v1466_v17 }
 0x2a7   :  { %2348 = vtanh.f32 %v1595_v19  ;;  %v1597_v58 = vadd.f32 %v1596_v42, %v1484_v48  ;;  %v1486_v7 = vadd.f32 %v1485_v43, %v4710_v61  ;;  %v4764_v47 = vpop.f32.mrf.mxu1  ;;  %v4773_v34 = vpop.eup %2330  ;;  %v1870_v55 = vadd.f32 1.0, %v2323_v1  ;;  %v2041_v19 = vld [vmem:[%s5087_s2 + $0x20] sm:$0xff] }
 0x2a8   :  { %2350 = vtanh.f32 %v1958_v56  ;;  %v1487_v41 = vpop.f32.mrf.mxu0  ;;  %v2333_v45 = vpop.eup %2332  ;;  %v1933_v56 = vadd.f32 1.0, %v2329_v62  ;;  %v2053_v36 = vmul.f32 %v2037_v2, %v1941_v22  ;;  %v1946_v43 = vmul.f32 0.5, %v1930_v15 }
 0x2a9   :  { %2352 = vtanh.f32 %v1597_v58  ;;  %v1599_v27 = vadd.f32 %v1598_v33, %v1486_v7  ;;  %v4771_v42 = vpop.f32.mrf.mxu1  ;;  %v1488_v16 = vadd.f32 %v1487_v41, %v4710_v61  ;;  %v2038_v33 = vld [vmem:[%s5087_s2 + $0x8] sm:$0xff]  ;;  %v1966_v8 = vmul.f32 0.5, %v1577_v20  ;;  %v2045_v20 = vld [vmem:[%s5087_s2 + $0x40] sm:$0xff] }
 0x2aa   :  { %2354 = vtanh.f32 %v1961_v38  ;;  %v2054_v24 = vmul.f32 %v2038_v33, %v1942_v60  ;;  %v1934_v63 = vadd.f32 1.0, %v2333_v45  ;;  %v1581_v58 = vadd.f32 %v4665_v0, %v1468_v26  ;;  %v2042_v41 = vld [vmem:[%s5087_s2 + $0x28] sm:$0xff] }
 0x2ab   :  { %2356 = vtanh.f32 %v1599_v27  ;;  %v4785_v10 = vpop.f32.mrf.mxu1  ;;  %v1601_v6 = vadd.f32 %v1600_v5, %v1488_v16  ;;  %v2057_v21 = vmul.f32 %v2041_v19, %v1945_v14  ;;  %v1949_v17 = vmul.f32 0.5, %v1933_v56 }
 0x2ac   :  { %v2335_v23 = vpop.eup %2334  ;;  %2358 = vtanh.f32 %v1962_v57  ;;  %v1885_v27 = vmul.f32 0.5, %v1869_v39  ;;  %v1886_v2 = vmul.f32 0.5, %v1870_v55  ;;  %v1873_v15 = vadd.f32 1.0, %v4766_v31  ;;  %v2046_v31 = vld [vmem:[%s5087_s2 + $0x48] sm:$0xff] }
 0x2ad   :  { %v2337_v44 = vpop.eup %2336  ;;  %v2069_v48 = vmul.f32 %v2335_v23, %v4737_v50  ;;  %v4792_v11 = vpop.f32.mrf.mxu1  ;;  %2360 = vtanh.f32 %v1601_v6  ;;  %v1969_v50 = vmul.f32 0.5, %v1579_v18  ;;  %v1950_v45 = vmul.f32 0.5, %v1934_v63 }
 0x2ae   :  { %v2339_v38 = vpop.eup %2338  ;;  %2362 = vtanh.f32 %v1965_v28  ;;  %v1937_v62 = vadd.f32 1.0, %v2337_v44  ;;  %v1970_v33 = vmul.f32 0.5, %v1581_v58  ;;  %v2058_v26 = vmul.f32 %v2042_v41, %v1946_v43 }
 0x2af   :  { %v2341_v25 = vpop.eup %2340  ;;  %v2085_v5 = vadd.f32 %v2069_v48, %v2053_v36  ;;  %v2070_v1 = vmul.f32 %v2339_v38, %v4739_v53  ;;  %v4796_v7 = vpop.f32.mrf.mxu1  ;;  %v2061_v18 = vmul.f32 %v2045_v20, %v1949_v17  ;;  %v1874_v19 = vadd.f32 1.0, %v4773_v34  ;;  %v2049_v38 = vld [vmem:[%s5087_s2 + $0x60] sm:$0xff]  ;;  %v2050_v34 = vld [vmem:[%s5087_s2 + $0x68] sm:$0xff] }
 0x2b0   :  { %v2343_v22 = vpop.eup %2342  ;;  %v1938_v23 = vadd.f32 1.0, %v2341_v25  ;;  %v1953_v6 = vmul.f32 0.5, %v1937_v62  ;;  %v1889_v48 = vmul.f32 0.5, %v1873_v15  ;;  %v2062_v43 = vmul.f32 %v2046_v31, %v1950_v45 }
 0x2b1   :  { %2101 = vst [vmem:[%s5088_s7] sm:$0xff] %v2085_v5  ;;  %2364 = vtanh.f32 %v2085_v5  ;;  %v2086_v53 = vadd.f32 %v2070_v1, %v2054_v24  ;;  %v2073_v0 = vmul.f32 %v2343_v22, %v4749_v59  ;;  %v4805_v60 = vpop.f32.mrf.mxu1  ;;  %v2345_v57 = vpop.eup %2344  ;;  %v1890_v62 = vmul.f32 0.5, %v1874_v19 }
 0x2b2   :  { %2366 = vtanh.f32 %v1966_v8  ;;  %v2347_v16 = vpop.eup %2346  ;;  %v1954_v1 = vmul.f32 0.5, %v1938_v23  ;;  %v1989_v58 = vadd.f32 1.0, %v2345_v57  ;;  %v2065_v22 = vmul.f32 %v2049_v38, %v1953_v6 }
 0x2b3   :  { %2102 = vst [vmem:[%s5088_s7 + $0x8] sm:$0xff] %v2086_v53  ;;  %2368 = vtanh.f32 %v2086_v53  ;;  %v2089_v59 = vadd.f32 %v2073_v0, %v2057_v21  ;;  %v4814_v14 = vpop.f32.mrf.mxu1  ;;  %v2074_v56 = vmul.f32 %v2347_v16, %v4759_v54 }
 0x2b4   :  { %v2349_v39 = vpop.eup %2348  ;;  %2370 = vtanh.f32 %v1969_v50  ;;  %v2066_v15 = vmul.f32 %v2050_v34, %v1954_v1  ;;  %v2005_v45 = vmul.f32 0.5, %v1989_v58 }
 0x2b5   :  { %v2351_v28 = vpop.eup %2350  ;;  %2105 = vst [vmem:[%s5088_s7 + $0x20] sm:$0xff] %v2089_v59  ;;  %2372 = vtanh.f32 %v2089_v59  ;;  %v2077_v44 = vmul.f32 %v2349_v39, %v1885_v27  ;;  %v4823_v55 = vpop.f32.mrf.mxu1  ;;  %v2090_v54 = vadd.f32 %v2074_v56, %v2058_v26 }
 0x2b6   :  { %v2353_v36 = vpop.eup %2352  ;;  %2374 = vtanh.f32 %v1970_v33  ;;  %v1990_v0 = vadd.f32 1.0, %v2351_v28 }
 0x2b7   :  { %v2355_v24 = vpop.eup %2354  ;;  %v2093_v8 = vadd.f32 %v2077_v44, %v2061_v18  ;;  %v2078_v25 = vmul.f32 %v2353_v36, %v1886_v2  ;;  %v4829_v63 = vpop.f32.mrf.mxu1  ;;  %2106 = vst [vmem:[%s5088_s7 + $0x28] sm:$0xff] %v2090_v54  ;;  %2376 = vtanh.f32 %v2090_v54 }
 0x2b8   :  { %v2357_v5 = vpop.eup %2356  ;;  %v1993_v59 = vadd.f32 1.0, %v2355_v24  ;;  %v2006_v56 = vmul.f32 0.5, %v1990_v0 }
 0x2b9   :  { %2109 = vst [vmem:[%s5088_s7 + $0x40] sm:$0xff] %v2093_v8  ;;  %2378 = vtanh.f32 %v2093_v8  ;;  %v2094_v21 = vadd.f32 %v2078_v25, %v2062_v43  ;;  %v2081_v17 = vmul.f32 %v2357_v5, %v1889_v48  ;;  %v4840_v50 = vpop.f32.mrf.mxu1  ;;  %v2359_v41 = vpop.eup %2358 }
 0x2ba   :  { %v2361_v53 = vpop.eup %2360  ;;  %v1994_v36 = vadd.f32 1.0, %v2359_v41  ;;  %v2009_v48 = vmul.f32 0.5, %v1993_v59 }
 0x2bb   :  { %2110 = vst [vmem:[%s5088_s7 + $0x48] sm:$0xff] %v2094_v21  ;;  %2380 = vtanh.f32 %v2094_v21  ;;  %v2097_v57 = vadd.f32 %v2081_v17, %v2065_v22  ;;  %v4845_v27 = vpop.f32.mrf.mxu1  ;;  %v2082_v20 = vmul.f32 %v2361_v53, %v1890_v62  ;;  %v2363_v16 = vpop.eup %2362 }
 0x2bc   :  { %v1750_v2 = vpop.f32.mrf.mxu0  ;;  %v1997_v54 = vadd.f32 1.0, %v2363_v16  ;;  %v2010_v22 = vmul.f32 0.5, %v1994_v36 }
 0x2bd   :  { %2113 = vst [vmem:[%s5088_s7 + $0x60] sm:$0xff] %v2097_v57  ;;  %2382 = vtanh.f32 %v2097_v57  ;;  %v4850_v33 = vpop.f32.mrf.mxu1  ;;  %v2098_v31 = vadd.f32 %v2082_v20, %v2066_v15 }
 0x2be   :  { %v1752_v39 = vpop.f32.mrf.mxu0  ;;  %v2365_v26 = vpop.eup %2364  ;;  %v2013_v17 = vmul.f32 0.5, %v1997_v54 }
 0x2bf   :  { %v2367_v23 = vpop.eup %2366  ;;  %v2133_v28 = vmul.f32 %v2365_v26, %v2005_v45  ;;  %v4852_v18 = vpop.f32.mrf.mxu1  ;;  %2114 = vst [vmem:[%s5088_s7 + $0x68] sm:$0xff] %v2098_v31  ;;  %2384 = vtanh.f32 %v2098_v31 }
 0x2c0   :  { %v1754_v6 = vpop.f32.mrf.mxu0  ;;  %v2369_v44 = vpop.eup %2368  ;;  %v1998_v25 = vadd.f32 1.0, %v2367_v23 }
 0x2c1   :  { %v2371_v19 = vpop.eup %2370  ;;  %2149 = vst [vmem:[%s5089_s6] sm:$0xff] %v2133_v28  ;;  %v2134_v38 = vmul.f32 %v2369_v44, %v2006_v56  ;;  %v4860_v24 = vpop.f32.mrf.mxu1  ;;  %v1638_v56 = vadd.f32 %v4764_v47, %v4648_v13  ;;  %v1642_v47 = vadd.f32 %v4785_v10, %v4640_v4  ;;  %v1644_v10 = vadd.f32 %v4792_v11, %v4640_v4 }
 0x2c2   :  { %v1756_v43 = vpop.f32.mrf.mxu0  ;;  %v2373_v8 = vpop.eup %2372  ;;  %v2001_v41 = vadd.f32 1.0, %v2371_v19  ;;  %v2014_v15 = vmul.f32 0.5, %v1998_v25  ;;  %v1640_v19 = vadd.f32 %v4771_v42, %v4648_v13  ;;  %v1654_v4 = vadd.f32 %v4823_v55, %v4655_v37 }
 0x2c3   :  { %2150 = vst [vmem:[%s5089_s6 + $0x8] sm:$0xff] %v2134_v38  ;;  %v2137_v5 = vmul.f32 %v2373_v8, %v2009_v48  ;;  %v4865_v1 = vpop.f32.mrf.mxu1  ;;  %v2375_v34 = vpop.eup %2374  ;;  %v1751_v38 = vadd.f32 %v1750_v2, %v1638_v56  ;;  %v1648_v2 = vadd.f32 %v4796_v7, %v4646_v9  ;;  %v1652_v56 = vadd.f32 %v4814_v14, %v4655_v37 }
 0x2c4   :  { %v1760_v58 = vpop.f32.mrf.mxu0  ;;  %v2377_v21 = vpop.eup %2376  ;;  %v2002_v26 = vadd.f32 1.0, %v2375_v34  ;;  %v2017_v31 = vmul.f32 0.5, %v2001_v41  ;;  %v1658_v14 = vadd.f32 %v4829_v63, %v4652_v30  ;;  %v1670_v37 = vadd.f32 %v4860_v24, %v4663_v32 }
 0x2c5   :  { %2153 = vst [vmem:[%s5089_s6 + $0x20] sm:$0xff] %v2137_v5  ;;  %v4870_v62 = vpop.f32.mrf.mxu1  ;;  %v2138_v57 = vmul.f32 %v2377_v21, %v2010_v22  ;;  %v1753_v5 = vadd.f32 %v1752_v39, %v1640_v19  ;;  %v1755_v21 = vadd.f32 %v1754_v6, %v1642_v47  ;;  %v1662_v24 = vadd.f32 %v4845_v27, %v4661_v52 }
 0x2c6   :  { %v1762_v53 = vpop.f32.mrf.mxu0  ;;  %v2379_v0 = vpop.eup %2378  ;;  %v2018_v25 = vmul.f32 0.5, %v2002_v26 }
 0x2c7   :  { %v2141_v20 = vmul.f32 %v2379_v0, %v2013_v17  ;;  %v4872_v16 = vpop.f32.mrf.mxu1  ;;  %2154 = vst [vmem:[%s5089_s6 + $0x28] sm:$0xff] %v2138_v57  ;;  %v1831_v17 = vmul.f32 0.5, %v1751_v38  ;;  %v1832_v39 = vmul.f32 0.5, %v1753_v5  ;;  %v1650_v57 = vadd.f32 %v4805_v60, %v4646_v9 }
 0x2c8   :  { %v1764_v45 = vpop.f32.mrf.mxu0  ;;  %v2381_v59 = vpop.eup %2380  ;;  %v1835_v7 = vmul.f32 0.5, %v1755_v21 }
 0x2c9   :  { %2157 = vst [vmem:[%s5089_s6 + $0x40] sm:$0xff] %v2141_v20  ;;  %v2142_v23 = vmul.f32 %v2381_v59, %v2014_v15  ;;  %v4882_v28 = vpop.f32.mrf.mxu1  ;;  %v1761_v15 = vadd.f32 %v1760_v58, %v1648_v2  ;;  %v1757_v59 = vadd.f32 %v1756_v43, %v1644_v10  ;;  %2386 = vtanh.f32 %v1831_v17 }
 0x2ca   :  { %v1766_v44 = vpop.f32.mrf.mxu0  ;;  %v2383_v36 = vpop.eup %2382  ;;  %v1763_v26 = vadd.f32 %v1762_v53, %v1650_v57  ;;  %2388 = vtanh.f32 %v1832_v39  ;;  %v1668_v43 = vadd.f32 %v4852_v18, %v4663_v32  ;;  %v1660_v18 = vadd.f32 %v4840_v50, %v4652_v30 }
 0x2cb   :  { %2158 = vst [vmem:[%s5089_s6 + $0x48] sm:$0xff] %v2142_v23  ;;  %v2145_v48 = vmul.f32 %v2383_v36, %v2017_v31  ;;  %v4889_v54 = vpop.f32.mrf.mxu1  ;;  %v1839_v11 = vmul.f32 0.5, %v1761_v15  ;;  %2390 = vtanh.f32 %v1835_v7  ;;  %v1836_v58 = vmul.f32 0.5, %v1757_v59 }
 0x2cc   :  { %v1770_v8 = vpop.f32.mrf.mxu0  ;;  %v2385_v34 = vpop.eup %2384  ;;  %v1765_v36 = vadd.f32 %v1764_v45, %v1652_v56  ;;  %v1840_v53 = vmul.f32 0.5, %v1763_v26  ;;  %v1767_v19 = vadd.f32 %v1766_v44, %v1654_v4  ;;  %v1672_v32 = vadd.f32 %v4865_v1, %v4670_v49 }
 0x2cd   :  { %2161 = vst [vmem:[%s5089_s6 + $0x60] sm:$0xff] %v2145_v48  ;;  %v4896_v13 = vpop.f32.mrf.mxu1  ;;  %v2146_v22 = vmul.f32 %v2385_v34, %v2018_v25  ;;  %2392 = vtanh.f32 %v1839_v11  ;;  %v1771_v5 = vadd.f32 %v1770_v8, %v1658_v14  ;;  %v1674_v30 = vadd.f32 %v4870_v62, %v4670_v49 }
 0x2ce   :  { %v1772_v42 = vpop.f32.mrf.mxu0  ;;  %2394 = vtanh.f32 %v1836_v58  ;;  %v1843_v45 = vmul.f32 0.5, %v1765_v36  ;;  %v1844_v44 = vmul.f32 0.5, %v1767_v19  ;;  %v1664_v39 = vadd.f32 %v4850_v33, %v4661_v52 }
 0x2cf   :  { %v4900_v41 = vpop.f32.mrf.mxu1  ;;  %2162 = vst [vmem:[%s5089_s6 + $0x68] sm:$0xff] %v2146_v22  ;;  %2396 = vtanh.f32 %v1840_v53  ;;  %v1773_v21 = vadd.f32 %v1772_v42, %v1660_v18  ;;  %v1895_v50 = vmul.f32 0.5, %v1771_v5  ;;  %v1678_v36 = vadd.f32 %v4872_v16, %v4716_v3 }
 0x2d0   :  { %v1774_v0 = vpop.f32.mrf.mxu0  ;;  %2398 = vtanh.f32 %v1843_v45  ;;  %v1680_v14 = vadd.f32 %v4882_v28, %v4716_v3  ;;  %v1688_v16 = vadd.f32 %v4900_v41, %v4744_v51 }
 0x2d1   :  { %v4909_v6 = vpop.f32.mrf.mxu1  ;;  %2400 = vtanh.f32 %v1844_v44  ;;  %v1775_v1 = vadd.f32 %v1774_v0, %v1662_v24  ;;  %v1896_v26 = vmul.f32 0.5, %v1773_v21 }
 0x2d2   :  { %v1776_v20 = vpop.f32.mrf.mxu0 }
 0x2d3   :  { %v4911_v31 = vpop.f32.mrf.mxu1  ;;  %v1899_v11 = vmul.f32 0.5, %v1775_v1 }
 0x2d4   :  { %v1780_v23 = vpop.f32.mrf.mxu0 }
 0x2d5   :  { %v4917_v9 = vpop.f32.mrf.mxu1  ;;  %v1781_v55 = vadd.f32 %v1780_v23, %v1668_v43  ;;  %v1777_v23 = vadd.f32 %v1776_v20, %v1664_v39 }
 0x2d6   :  { %v1782_v60 = vpop.f32.mrf.mxu0  ;;  %v2387_v42 = vpop.eup %2386 }
 0x2d7   :  { %v4921_v48 = vpop.f32.mrf.mxu1  ;;  %v1783_v34 = vadd.f32 %v1782_v60, %v1670_v37  ;;  %v1903_v2 = vmul.f32 0.5, %v1781_v55  ;;  %v2389_v59 = vpop.eup %2388  ;;  %v1863_v0 = vadd.f32 1.0, %v2387_v42  ;;  %v1900_v43 = vmul.f32 0.5, %v1777_v23 }
 0x2d8   :  { %v1784_v38 = vpop.f32.mrf.mxu0  ;;  %v2391_v4 = vpop.eup %2390  ;;  %v1864_v60 = vadd.f32 1.0, %v2389_v59  ;;  %v4957_v37 = vadd.f32 %v4889_v54, %v4725_v29  ;;  %v1690_v54 = vadd.f32 %v4909_v6, %v4744_v51 }
 0x2d9   :  { %v4927_v25 = vpop.f32.mrf.mxu1  ;;  %v1785_v10 = vadd.f32 %v1784_v38, %v1672_v32  ;;  %v1904_v57 = vmul.f32 0.5, %v1783_v34  ;;  %2402 = vtanh.f32 %v1903_v2  ;;  %v1867_v38 = vadd.f32 1.0, %v2391_v4 }
 0x2da   :  { %v1786_v47 = vpop.f32.mrf.mxu0  ;;  %2404 = vtanh.f32 %v1895_v50  ;;  %v2393_v19 = vpop.eup %2392  ;;  %v4966_v3 = vmul.f32 0.5, %v1863_v0  ;;  %v4968_v28 = vmul.f32 0.5, %v1864_v60  ;;  %v1692_v2 = vadd.f32 %v4911_v31, %v4756_v12 }
 0x2db   :  { %v4931_v22 = vpop.f32.mrf.mxu1  ;;  %v1787_v7 = vadd.f32 %v1786_v47, %v1674_v30  ;;  %v1907_v62 = vmul.f32 0.5, %v1785_v10  ;;  %2406 = vtanh.f32 %v1904_v57  ;;  %v2395_v55 = vpop.eup %2394  ;;  %v4961_v47 = vadd.f32 %v4896_v13, %v4725_v29 }
 0x2dc   :  { %v4933_v63 = vpop.f32.mrf.mxu0  ;;  %2408 = vtanh.f32 %v1896_v26  ;;  %v2397_v44 = vpop.eup %2396  ;;  %v1871_v34 = vadd.f32 1.0, %v2393_v19  ;;  %v4973_v24 = vmul.f32 0.5, %v1867_v38  ;;  %v4975_v21 = vadd.f32 1.0, %v2395_v55 }
 0x2dd   :  { %v4939_v17 = vpop.f32.mrf.mxu1  ;;  %v1908_v58 = vmul.f32 0.5, %v1787_v7  ;;  %2410 = vtanh.f32 %v1907_v62  ;;  %v1698_v30 = vadd.f32 %v4921_v48, %v4674_v46  ;;  %v2399_v50 = vpop.eup %2398  ;;  %v1872_v51 = vadd.f32 1.0, %v2397_v44 }
 0x2de   :  { %v4941_v8 = vpop.f32.mrf.mxu0  ;;  %2412 = vtanh.f32 %v1899_v11  ;;  %v2401_v1 = vpop.eup %2400  ;;  %v1694_v57 = vadd.f32 %v4917_v9, %v4756_v12  ;;  %v4987_v7 = vmul.f32 0.5, %v1871_v34  ;;  %v1702_v62 = vadd.f32 %v4931_v22, %v4688_v40 }
 0x2df   :  { %v1707_v15 = vpop.f32.mrf.mxu1  ;;  %2414 = vtanh.f32 %v1908_v58  ;;  %v4991_v11 = vmul.f32 0.5, %v1872_v51  ;;  %v1704_v60 = vadd.f32 %v4939_v17, %v4688_v40  ;;  %v1793_v22 = vadd.f32 %v4941_v8, %v1680_v14 }
 0x2e0   :  { %v4947_v27 = vpop.f32.mrf.mxu0  ;;  %v1708_v45 = vadd.f32 %v1707_v15, %v4694_v35  ;;  %2416 = vtanh.f32 %v1900_v43  ;;  %v1700_v15 = vadd.f32 %v4927_v25, %v4674_v46  ;;  %v1875_v46 = vadd.f32 1.0, %v2399_v50 }
 0x2e1   :  { %v1709_v56 = vpop.f32.mrf.mxu1 }
 0x2e2   :  { %v4949_v49 = vpop.f32.mrf.mxu0  ;;  %v1710_v29 = vadd.f32 %v1709_v56, %v4694_v35  ;;  %v1891_v17 = vmul.f32 0.5, %v1875_v46 }
 0x2e3   :  { %v1711_v52 = vpop.f32.mrf.mxu1 }
 0x2e4   :  { %v1800_v33 = vpop.f32.mrf.mxu0  ;;  %v1712_v6 = vadd.f32 %v1711_v52, %v4710_v61 }
 0x2e5   :  { %v1713_v20 = vpop.f32.mrf.mxu1  ;;  %v1801_v48 = vadd.f32 %v1800_v33, %v1688_v16  ;;  %v1791_v33 = vadd.f32 %v4933_v63, %v1678_v36  ;;  %v1795_v63 = vadd.f32 %v4947_v27, %v4957_v37  ;;  %v1797_v37 = vadd.f32 %v4949_v49, %v4961_v47 }
 0x2e6   :  { %v1802_v53 = vpop.f32.mrf.mxu0  ;;  %v1714_v31 = vadd.f32 %v1713_v20, %v4710_v61  ;;  %v2403_v56 = vpop.eup %2402  ;;  %v1876_v61 = vadd.f32 1.0, %v2401_v1  ;;  %v2039_v1 = vld [vmem:[%s5087_s2 + $0x10] sm:$0xff] }
 0x2e7   :  { %v1820_v18 = vpop.f32.mrf.mxu1  ;;  %v2405_v9 = vpop.eup %2404  ;;  %v1803_v25 = vadd.f32 %v1802_v53, %v1690_v54  ;;  %v1935_v43 = vadd.f32 1.0, %v2403_v56  ;;  %v1967_v20 = vmul.f32 0.5, %v1801_v48  ;;  %v1959_v44 = vmul.f32 0.5, %v1791_v33  ;;  %v2043_v33 = vld [vmem:[%s5087_s2 + $0x30] sm:$0xff] }
 0x2e8   :  { %v1804_v5 = vpop.f32.mrf.mxu0  ;;  %v1821_v13 = vadd.f32 %v1820_v18, %v1708_v45  ;;  %v2407_v0 = vpop.eup %2406  ;;  %v1927_v55 = vadd.f32 1.0, %v2405_v9  ;;  %v4999_v14 = vmul.f32 0.5, %v1876_v61  ;;  %v1963_v50 = vmul.f32 0.5, %v1795_v63 }
 0x2e9   :  { %v1822_v32 = vpop.f32.mrf.mxu1  ;;  %v2409_v38 = vpop.eup %2408  ;;  %v1805_v16 = vadd.f32 %v1804_v5, %v1692_v2  ;;  %v1936_v18 = vadd.f32 1.0, %v2407_v0  ;;  %v1968_v36 = vmul.f32 0.5, %v1803_v25  ;;  %v1951_v34 = vmul.f32 0.5, %v1935_v43 }
 0x2ea   :  { %v1806_v41 = vpop.f32.mrf.mxu0  ;;  %2418 = vtanh.f32 %v1821_v13  ;;  %v1823_v10 = vadd.f32 %v1822_v32, %v1710_v29  ;;  %v2411_v45 = vpop.eup %2410  ;;  %v1960_v29 = vmul.f32 0.5, %v1793_v22  ;;  %v1928_v13 = vadd.f32 1.0, %v2409_v38  ;;  %v2047_v32 = vld [vmem:[%s5087_s2 + $0x50] sm:$0xff] }
 0x2eb   :  { %v1824_v39 = vpop.f32.mrf.mxu1  ;;  %v2413_v40 = vpop.eup %2412  ;;  %v1807_v54 = vadd.f32 %v1806_v41, %v1694_v57  ;;  %v1939_v27 = vadd.f32 1.0, %v2411_v45  ;;  %v1971_v2 = vmul.f32 0.5, %v1805_v16  ;;  %v1952_v41 = vmul.f32 0.5, %v1936_v18 }
 0x2ec   :  { %v1810_v35 = vpop.f32.mrf.mxu0  ;;  %2420 = vtanh.f32 %v1823_v10  ;;  %v1825_v59 = vadd.f32 %v1824_v39, %v1712_v6  ;;  %v2415_v8 = vpop.eup %2414  ;;  %v1931_v6 = vadd.f32 1.0, %v2413_v40  ;;  %v2048_v10 = vld [vmem:[%s5087_s2 + $0x58] sm:$0xff]  ;;  %v2063_v49 = vmul.f32 %v2047_v32, %v1951_v34 }
 0x2ed   :  { %v1811_v42 = vadd.f32 %v1810_v35, %v1698_v30  ;;  %v1826_v23 = vpop.f32.mrf.mxu1  ;;  %v2417_v5 = vpop.eup %2416  ;;  %v1943_v30 = vmul.f32 0.5, %v1927_v55  ;;  %v1940_v35 = vadd.f32 1.0, %v2415_v8  ;;  %v1972_v39 = vmul.f32 0.5, %v1807_v54 }
 0x2ee   :  { %v1812_v26 = vpop.f32.mrf.mxu0  ;;  %v1827_v12 = vadd.f32 %v1826_v23, %v1714_v31  ;;  %v1932_v57 = vadd.f32 1.0, %v2417_v5  ;;  %v1944_v31 = vmul.f32 0.5, %v1928_v13  ;;  %v1964_v48 = vmul.f32 0.5, %v1797_v37  ;;  %v2051_v23 = vld [vmem:[%s5087_s2 + $0x70] sm:$0xff] }
 0x2ef   :  { %2422 = vtanh.f32 %v1811_v42  ;;  %v1813_v4 = vadd.f32 %v1812_v26, %v1700_v15  ;;  %v1955_v42 = vmul.f32 0.5, %v1939_v27  ;;  %v2064_v26 = vmul.f32 %v2048_v10, %v1952_v41 }
 0x2f0   :  { %v1814_v52 = vpop.f32.mrf.mxu0  ;;  %2424 = vtanh.f32 %v1825_v59  ;;  %v1947_v61 = vmul.f32 0.5, %v1931_v6  ;;  %v1948_v25 = vmul.f32 0.5, %v1932_v57  ;;  %v1884_v22 = vmul.f32 0.5, %v4975_v21 }
 0x2f1   :  { %v1815_v58 = vadd.f32 %v1814_v52, %v1702_v62  ;;  %2426 = vtanh.f32 %v1813_v4  ;;  %v2055_v4 = vmul.f32 %v2039_v1, %v1943_v30  ;;  %v2052_v52 = vld [vmem:[%s5087_s2 + $0x78] sm:$0xff] }
 0x2f2   :  { %v1816_v19 = vpop.f32.mrf.mxu0  ;;  %2428 = vtanh.f32 %v1827_v12  ;;  %v1956_v12 = vmul.f32 0.5, %v1940_v35  ;;  %v2059_v18 = vmul.f32 %v2043_v33, %v1947_v61 }
 0x2f3   :  { %v1817_v53 = vadd.f32 %v1816_v19, %v1704_v60  ;;  %2430 = vtanh.f32 %v1815_v58  ;;  %v2067_v60 = vmul.f32 %v2051_v23, %v1955_v42  ;;  %v2044_v19 = vld [vmem:[%s5087_s2 + $0x38] sm:$0xff] }
 0x2f4   :  { %v2068_v16 = vmul.f32 %v2052_v52, %v1956_v12 }
 0x2f5   :  { %2432 = vtanh.f32 %v1817_v53 }
 0x2f6   :  { %2434 = vtanh.f32 %v1967_v20 }
 0x2f7   :  { %2436 = vtanh.f32 %v1968_v36  ;;  %v2419_v51 = vpop.eup %2418 }
 0x2f8   :  { %2438 = vtanh.f32 %v1959_v44  ;;  %v2079_v47 = vmul.f32 %v2419_v51, %v4987_v7  ;;  %v2040_v7 = vld [vmem:[%s5087_s2 + $0x18] sm:$0xff] }
 0x2f9   :  { %2440 = vtanh.f32 %v1960_v29  ;;  %v2421_v15 = vpop.eup %2420  ;;  %v2056_v20 = vmul.f32 %v2040_v7, %v1944_v31 }
 0x2fa   :  { %2442 = vtanh.f32 %v1971_v2  ;;  %v2095_v56 = vadd.f32 %v2079_v47, %v2063_v49  ;;  %v2080_v62 = vmul.f32 %v2421_v15, %v4991_v11 }
 0x2fb   :  { %2444 = vtanh.f32 %v1963_v50 }
 0x2fc   :  { %v2423_v59 = vpop.eup %2422  ;;  %2446 = vtanh.f32 %v1972_v39  ;;  %2111 = vst [vmem:[%s5088_s7 + $0x50] sm:$0xff] %v2095_v56  ;;  %v2096_v11 = vadd.f32 %v2080_v62, %v2064_v26 }
 0x2fd   :  { %v2071_v9 = vmul.f32 %v2423_v59, %v4966_v3  ;;  %v2425_v46 = vpop.eup %2424  ;;  %2448 = vtanh.f32 %v2095_v56 }
 0x2fe   :  { %v2427_v0 = vpop.eup %2426  ;;  %2450 = vtanh.f32 %v1964_v48  ;;  %v2083_v58 = vmul.f32 %v2425_v46, %v1891_v17  ;;  %2112 = vst [vmem:[%s5088_s7 + $0x58] sm:$0xff] %v2096_v11  ;;  %v2060_v17 = vmul.f32 %v2044_v19, %v1948_v25 }
 0x2ff   :  { %v2087_v3 = vadd.f32 %v2071_v9, %v2055_v4  ;;  %v2429_v43 = vpop.eup %2428  ;;  %2452 = vtanh.f32 %v2096_v11  ;;  %v2072_v38 = vmul.f32 %v2427_v0, %v4968_v28 }
 0x300   :  { %v2431_v55 = vpop.eup %2430  ;;  %v2099_v21 = vadd.f32 %v2083_v58, %v2067_v60  ;;  %v2084_v53 = vmul.f32 %v2429_v43, %v4999_v14 }
 0x301   :  { %2103 = vst [vmem:[%s5088_s7 + $0x10] sm:$0xff] %v2087_v3  ;;  %2454 = vtanh.f32 %v2087_v3  ;;  %v2088_v63 = vadd.f32 %v2072_v38, %v2056_v20  ;;  %v2075_v36 = vmul.f32 %v2431_v55, %v4973_v24 }
 0x302   :  { %v2433_v45 = vpop.eup %2432  ;;  %2115 = vst [vmem:[%s5088_s7 + $0x70] sm:$0xff] %v2099_v21  ;;  %2456 = vtanh.f32 %v2099_v21  ;;  %v2100_v28 = vadd.f32 %v2084_v53, %v2068_v16 }
 0x303   :  { %v2435_v40 = vpop.eup %2434  ;;  %v2076_v44 = vmul.f32 %v2433_v45, %v1884_v22  ;;  %2104 = vst [vmem:[%s5088_s7 + $0x18] sm:$0xff] %v2088_v63  ;;  %2458 = vtanh.f32 %v2088_v63  ;;  %v2091_v54 = vadd.f32 %v2075_v36, %v2059_v18 }
 0x304   :  { %v2437_v8 = vpop.eup %2436  ;;  %2116 = vst [vmem:[%s5088_s7 + $0x78] sm:$0xff] %v2100_v28  ;;  %2460 = vtanh.f32 %v2100_v28  ;;  %v1999_v34 = vadd.f32 1.0, %v2435_v40 }
 0x305   :  { %v2092_v24 = vadd.f32 %v2076_v44, %v2060_v17  ;;  %v2439_v14 = vpop.eup %2438  ;;  %2107 = vst [vmem:[%s5088_s7 + $0x30] sm:$0xff] %v2091_v54  ;;  %2462 = vtanh.f32 %v2091_v54  ;;  %v2000_v13 = vadd.f32 1.0, %v2437_v8 }
 0x306   :  { %v2441_v29 = vpop.eup %2440  ;;  %v1991_v27 = vadd.f32 1.0, %v2439_v14  ;;  %v2015_v2 = vmul.f32 0.5, %v1999_v34 }
 0x307   :  { %2108 = vst [vmem:[%s5088_s7 + $0x38] sm:$0xff] %v2092_v24  ;;  %2464 = vtanh.f32 %v2092_v24  ;;  %v2443_v5 = vpop.eup %2442  ;;  %v1992_v51 = vadd.f32 1.0, %v2441_v29  ;;  %v2016_v6 = vmul.f32 0.5, %v2000_v13 }
 0x308   :  { %v2445_v32 = vpop.eup %2444  ;;  %v2003_v41 = vadd.f32 1.0, %v2443_v5  ;;  %v2007_v39 = vmul.f32 0.5, %v1991_v27 }
 0x309   :  { %v2447_v37 = vpop.eup %2446  ;;  %v1995_v49 = vadd.f32 1.0, %v2445_v32  ;;  %v2008_v59 = vmul.f32 0.5, %v1992_v51 }
 0x30a   :  { %v2449_v30 = vpop.eup %2448  ;;  %v2004_v1 = vadd.f32 1.0, %v2447_v37  ;;  %v2019_v31 = vmul.f32 0.5, %v2003_v41 }
 0x30b   :  { %v2451_v50 = vpop.eup %2450  ;;  %v2143_v10 = vmul.f32 %v2449_v30, %v2015_v2  ;;  %v2011_v4 = vmul.f32 0.5, %v1995_v49 }
 0x30c   :  { %v2453_v35 = vpop.eup %2452  ;;  %v1996_v15 = vadd.f32 1.0, %v2451_v50  ;;  %v2020_v23 = vmul.f32 0.5, %v2004_v1 }
 0x30d   :  { %2159 = vst [vmem:[%s5089_s6 + $0x50] sm:$0xff] %v2143_v10  ;;  %v2144_v47 = vmul.f32 %v2453_v35, %v2016_v6 }
 0x30e   :  { %v2455_v57 = vpop.eup %2454  ;;  %v2012_v9 = vmul.f32 0.5, %v1996_v15 }
 0x30f   :  { %v2135_v42 = vmul.f32 %v2455_v57, %v2007_v39  ;;  %v2457_v48 = vpop.eup %2456  ;;  %2160 = vst [vmem:[%s5089_s6 + $0x58] sm:$0xff] %v2144_v47 }
 0x310   :  { %v2459_v26 = vpop.eup %2458  ;;  %v2147_v56 = vmul.f32 %v2457_v48, %v2019_v31 }
 0x311   :  { %2151 = vst [vmem:[%s5089_s6 + $0x10] sm:$0xff] %v2135_v42  ;;  %v2461_v62 = vpop.eup %2460  ;;  %v2136_v7 = vmul.f32 %v2459_v26, %v2008_v59 }
 0x312   :  { %v2463_v12 = vpop.eup %2462  ;;  %2163 = vst [vmem:[%s5089_s6 + $0x70] sm:$0xff] %v2147_v56  ;;  %v2148_v46 = vmul.f32 %v2461_v62, %v2020_v23 }
 0x313   :  { %2152 = vst [vmem:[%s5089_s6 + $0x18] sm:$0xff] %v2136_v7  ;;  %v2139_v25 = vmul.f32 %v2463_v12, %v2011_v4 }
 0x314   :  { %v2465_v61 = vpop.eup %2464  ;;  %2164 = vst [vmem:[%s5089_s6 + $0x78] sm:$0xff] %v2148_v46 }
 0x315   :  { %v2140_v52 = vmul.f32 %v2465_v61, %v2012_v9  ;;  %2155 = vst [vmem:[%s5089_s6 + $0x30] sm:$0xff] %v2139_v25 }
 0x317   :  { %2156 = vst [vmem:[%s5089_s6 + $0x38] sm:$0xff] %v2140_v52 }

// kernel: closed_call.19
= control target key start
LH: loop header
LB: loop body
LE: loop exit
PB: predicated region body
PF: predicated region fallthrough
CT: control target
= control target key end

     0   :  { %s3118_s28 = smov 17   ;;  %s3119_s8 = smov 1   ;;  %v98_v38 = vlaneseq  ;;  %vm1716_vm8 = vcmask 523264   ;;  %s6554_s1 = inlined_call_operand.vmem [shape: f32[32,512], index: 1, kind: input, shape index: {}]   ;;  %s6555_s0 = inlined_call_operand.vmem [shape: f32[32,512], index: 0, kind: input, shape index: {}]   ;;  %s6556_s3 = inlined_call_operand.vmem [shape: f32[9,512], index: 3, kind: input, shape index: {}]   ;;  %s6557_s4 = inlined_call_operand.vmem [shape: bf16[128,576], index: 4, kind: input, shape index: {}]   ;;  %s6558_s5 = inlined_call_operand.vmem [shape: f32[128,1], index: 5, kind: input, shape index: {}]   ;;  %s6559_s2 = inlined_call_operand.vmem [shape: f32[32,512], index: 2, kind: input, shape index: {}]   ;;  %s6560_s7 = inlined_call_operand.vmem [shape: f32[32,512], index: 7, kind: output, shape index: {1}]   ;;  %s6561_s6 = inlined_call_operand.vmem [shape: f32[32,512], index: 6, kind: output, shape index: {0}]  }
   0x1   :  { %v3170_v0 = vld [vmem:[%s6554_s1 + $0x40] sm:$0xff]  ;;  %v3198_v4 = vld [vmem:[%s6554_s1 + $0x28] sm:$0xff]  ;;  %v3226_v8 = vld [vmem:[%s6554_s1 + $0x30] sm:$0xff]  ;;  %s3120_s17 = smov 15   ;;  %s3121_s18 = smov 16  }
   0x2   :  { %v3175_v1 = vld [vmem:[%s6554_s1] sm:$0xff]  ;;  %70 = vrot.lane.b32.xlu1 %v3170_v0, %s3118_s28  ;;  %v3203_v5 = vld [vmem:[%s6554_s1 + $0x8] sm:$0xff]  ;;  %v3231_v9 = vld [vmem:[%s6554_s1 + $0x10] sm:$0xff]  ;;  %v3471_v41 = vshrl.u32 %v98_v38, 7  ;;  %v3484_v45 = vand.u32 127, %v98_v38  ;;  %s3122_s23 = smov 111  }
   0x3   :  { %66 = vrot.lane.b32.xlu0 %v3175_v1, %s3118_s28  ;;  %v3184_v2 = vld [vmem:[%s6554_s1 + $0x60] sm:$0xff]  ;;  %v3212_v6 = vld [vmem:[%s6554_s1 + $0x68] sm:$0xff]  ;;  %v3240_v10 = vld [vmem:[%s6554_s1 + $0x70] sm:$0xff]  ;;  %s3123_s24 = smov 112   ;;  %s3124_s25 = smov 113  }
   0x4   :  { %v3189_v3 = vld [vmem:[%s6554_s1 + $0x20] sm:$0xff]  ;;  %v3217_v7 = vld [vmem:[%s6554_s1 + $0x48] sm:$0xff]  ;;  %v3245_v11 = vld [vmem:[%s6554_s1 + $0x50] sm:$0xff]  ;;  %v3480_v44 = vsub.s32 3, %v3471_v41  ;;  %vm367_vm0 = vcmp.lt.s32.totalorder %v3484_v45, 1  ;;  %vm278_vm1 = vcmp.lt.s32.totalorder %v3484_v45, 15 }
   0x5   :  { %v3254_v12 = vld [vmem:[%s6554_s1 + $0x38] sm:$0xff]  ;;  %v3290_v16 = vld [vmem:[%s6555_s0 + $0x60] sm:$0xff]  ;;  %v3304_v18 = vld [vmem:[%s6555_s0 + $0x68] sm:$0xff]  ;;  %vm189_vm2 = vcmp.lt.s32.totalorder %v3484_v45, 16  ;;  %vm100_vm3 = vcmp.lt.s32.totalorder %v3484_v45, 17  ;;  %s3125_s13 = smov 127  }
   0x6   :  { %72 = vrot.lane.b32.xlu1 %v3184_v2, %s3118_s28  ;;  %v3259_v13 = vld [vmem:[%s6554_s1 + $0x18] sm:$0xff]  ;;  %v3295_v17 = vld [vmem:[%s6555_s0 + $0x40] sm:$0xff]  ;;  %v3309_v19 = vld [vmem:[%s6555_s0 + $0x48] sm:$0xff]  ;;  %vm731_vm4 = vcmp.lt.s32.totalorder %v3484_v45, 111  ;;  %vm642_vm5 = vcmp.lt.s32.totalorder %v3484_v45, 112  ;;  %vm553_vm6 = vcmp.lt.s32.totalorder %v3484_v45, 113 }
   0x7   :  { %68 = vrot.lane.b32.xlu0 %v3189_v3, %s3118_s28  ;;  %v3276_v14 = vld [vmem:[%s6554_s1 + $0x78] sm:$0xff]  ;;  %v3344_v22 = vld [vmem:[%s6555_s0 + $0x20] sm:$0xff]  ;;  %v3358_v24 = vld [vmem:[%s6555_s0 + $0x28] sm:$0xff]  ;;  %vm464_vm7 = vcmp.lt.s32.totalorder %v3484_v45, 127 }
   0x8   :  { %v3281_v15 = vld [vmem:[%s6554_s1 + $0x58] sm:$0xff]  ;;  %v3349_v23 = vld [vmem:[%s6555_s0] sm:$0xff]  ;;  %v3363_v25 = vld [vmem:[%s6555_s0 + $0x8] sm:$0xff] }
   0x9   :  { %v3318_v20 = vld [vmem:[%s6555_s0 + $0x78] sm:$0xff]  ;;  %v3489_v48 = vld [vmem:[%s6556_s3 + $0x8] sm:$0xff]  ;;  %v3507_v52 = vld [vmem:[%s6556_s3] sm:$0xff] }
   0xa   :  { %76 = vrot.lane.b32.xlu1 %v3198_v4, %s3118_s28  ;;  %v3323_v21 = vld [vmem:[%s6555_s0 + $0x58] sm:$0xff]  ;;  %v3496_v49 = vrot.slane %v3489_v48, %v3480_v44  ;;  %v3521_v57 = vrot.slane %v3507_v52, %v3480_v44  ;;  %v3105_v45 = vld [vmem:[%s6557_s4 + $0x34] ss:$20 sps:$4 sm:$0xff]  }
   0xb   :  { %74 = vrot.lane.b32.xlu0 %v3203_v5, %s3118_s28  ;;  %v3372_v26 = vld [vmem:[%s6555_s0 + $0x38] sm:$0xff] }
   0xc   :  { %v3377_v27 = vld [vmem:[%s6555_s0 + $0x18] sm:$0xff] }
   0xe   :  { %80 = vrot.lane.b32.xlu1 %v3212_v6, %s3118_s28 }
   0xf   :  { %78 = vrot.lane.b32.xlu0 %v3217_v7, %s3118_s28 }
  0x12   :  { %84 = vrot.lane.b32.xlu1 %v3226_v8, %s3118_s28 }
  0x13   :  { %82 = vrot.lane.b32.xlu0 %v3231_v9, %s3118_s28 }
  0x16   :  { %88 = vrot.lane.b32.xlu1 %v3240_v10, %s3118_s28 }
  0x17   :  { %86 = vrot.lane.b32.xlu0 %v3245_v11, %s3118_s28 }
  0x1a   :  { %92 = vrot.lane.b32.xlu1 %v3254_v12, %s3118_s28 }
  0x1b   :  { %90 = vrot.lane.b32.xlu0 %v3259_v13, %s3118_s28 }
  0x1e   :  { %341 = vrot.lane.b32.xlu1 %v3184_v2, %s3119_s8 }
  0x1f   :  { %339 = vrot.lane.b32.xlu0 %v3170_v0, %s3119_s8 }
  0x22   :  { %349 = vrot.lane.b32.xlu1 %v3212_v6, %s3119_s8 }
  0x23   :  { %347 = vrot.lane.b32.xlu0 %v3217_v7, %s3119_s8 }
  0x26   :  { %365 = vrot.lane.b32.xlu1 %v3276_v14, %s3119_s8 }
  0x27   :  { %363 = vrot.lane.b32.xlu0 %v3281_v15, %s3119_s8 }
  0x2a   :  { %938 = vrot.lane.b32.xlu1 %v3290_v16, %s3120_s17 }
  0x2b   :  { %936 = vrot.lane.b32.xlu0 %v3295_v17, %s3120_s17 }
  0x2e   :  { %946 = vrot.lane.b32.xlu1 %v3304_v18, %s3120_s17 }
  0x2f   :  { %944 = vrot.lane.b32.xlu0 %v3309_v19, %s3120_s17 }
  0x32   :  { %962 = vrot.lane.b32.xlu1 %v3318_v20, %s3120_s17 }
  0x33   :  { %960 = vrot.lane.b32.xlu0 %v3323_v21, %s3120_s17 }
  0x36   :  { %337 = vrot.lane.b32.xlu1 %v3189_v3, %s3119_s8 }
  0x37   :  { %335 = vrot.lane.b32.xlu0 %v3175_v1, %s3119_s8 }
  0x3a   :  { %345 = vrot.lane.b32.xlu1 %v3198_v4, %s3119_s8 }
  0x3b   :  { %343 = vrot.lane.b32.xlu0 %v3203_v5, %s3119_s8 }
  0x3e   :  { %361 = vrot.lane.b32.xlu1 %v3254_v12, %s3119_s8 }
  0x3f   :  { %359 = vrot.lane.b32.xlu0 %v3259_v13, %s3119_s8 }
  0x42   :  { %934 = vrot.lane.b32.xlu1 %v3344_v22, %s3120_s17 }
  0x43   :  { %932 = vrot.lane.b32.xlu0 %v3349_v23, %s3120_s17 }
  0x46   :  { %942 = vrot.lane.b32.xlu1 %v3358_v24, %s3120_s17 }
  0x47   :  { %940 = vrot.lane.b32.xlu0 %v3363_v25, %s3120_s17 }
  0x4a   :  { %958 = vrot.lane.b32.xlu1 %v3372_v26, %s3120_s17 }
  0x4b   :  { %956 = vrot.lane.b32.xlu0 %v3377_v27, %s3120_s17 }
  0x4e   :  { %252 = vrot.lane.b32.xlu1 %v3184_v2, %s3120_s17 }
  0x4f   :  { %250 = vrot.lane.b32.xlu0 %v3170_v0, %s3120_s17 }
  0x52   :  { %260 = vrot.lane.b32.xlu1 %v3212_v6, %s3120_s17 }
  0x53   :  { %258 = vrot.lane.b32.xlu0 %v3217_v7, %s3120_s17 }
  0x56   :  { %276 = vrot.lane.b32.xlu1 %v3276_v14, %s3120_s17 }
  0x57   :  { %274 = vrot.lane.b32.xlu0 %v3281_v15, %s3120_s17 }
  0x5a   :  { %866 = vrot.lane.b32.xlu1 %v3290_v16, %s3121_s18 }
  0x5b   :  { %864 = vrot.lane.b32.xlu0 %v3295_v17, %s3121_s18 }
  0x5e   :  { %874 = vrot.lane.b32.xlu1 %v3304_v18, %s3121_s18 }
  0x5f   :  { %872 = vrot.lane.b32.xlu0 %v3309_v19, %s3121_s18 }
  0x62   :  { %890 = vrot.lane.b32.xlu1 %v3318_v20, %s3121_s18 }
  0x63   :  { %888 = vrot.lane.b32.xlu0 %v3323_v21, %s3121_s18 }
  0x66   :  { %248 = vrot.lane.b32.xlu1 %v3189_v3, %s3120_s17 }
  0x67   :  { %246 = vrot.lane.b32.xlu0 %v3175_v1, %s3120_s17 }
  0x6a   :  { %256 = vrot.lane.b32.xlu1 %v3198_v4, %s3120_s17 }
  0x6b   :  { %254 = vrot.lane.b32.xlu0 %v3203_v5, %s3120_s17 }
  0x6e   :  { %272 = vrot.lane.b32.xlu1 %v3254_v12, %s3120_s17 }
  0x6f   :  { %270 = vrot.lane.b32.xlu0 %v3259_v13, %s3120_s17 }
  0x72   :  { %862 = vrot.lane.b32.xlu1 %v3344_v22, %s3121_s18 }
  0x73   :  { %860 = vrot.lane.b32.xlu0 %v3349_v23, %s3121_s18 }
  0x74   :  { %v3423_v28 = vpop.permute.xlu1 %70 }
  0x75   :  { %v3425_v29 = vpop.permute.xlu0 %66 }
  0x76   :  { %870 = vrot.lane.b32.xlu1 %v3358_v24, %s3121_s18 }
  0x77   :  { %868 = vrot.lane.b32.xlu0 %v3363_v25, %s3121_s18 }
  0x78   :  { %v3431_v30 = vpop.permute.xlu1 %72 }
  0x79   :  { %v3433_v31 = vpop.permute.xlu0 %68 }
  0x7a   :  { %886 = vrot.lane.b32.xlu1 %v3372_v26, %s3121_s18 }
  0x7b   :  { %884 = vrot.lane.b32.xlu0 %v3377_v27, %s3121_s18 }
  0x7c   :  { %v3439_v32 = vpop.permute.xlu1 %76 }
  0x7d   :  { %v3441_v33 = vpop.permute.xlu0 %74 }
  0x7e   :  { %163 = vrot.lane.b32.xlu1 %v3184_v2, %s3121_s18 }
  0x7f   :  { %161 = vrot.lane.b32.xlu0 %v3170_v0, %s3121_s18 }
  0x80   :  { %v3447_v34 = vpop.permute.xlu1 %80 }
  0x81   :  { %6696 = vst [vmem:[#allocation2_spill] sm:$0xff] %v3447_v34  ;;  %v3449_v35 = vpop.permute.xlu0 %78 }
  0x82   :  { %6697 = vst [vmem:[#allocation3_spill] sm:$0xff] %v3449_v35  ;;  %171 = vrot.lane.b32.xlu1 %v3212_v6, %s3121_s18 }
  0x83   :  { %169 = vrot.lane.b32.xlu0 %v3217_v7, %s3121_s18 }
  0x84   :  { %v3455_v36 = vpop.permute.xlu1 %84 }
  0x85   :  { %6698 = vst [vmem:[#allocation4_spill] sm:$0xff] %v3455_v36  ;;  %v3457_v37 = vpop.permute.xlu0 %82 }
  0x86   :  { %6699 = vst [vmem:[#allocation5_spill] sm:$0xff] %v3457_v37  ;;  %187 = vrot.lane.b32.xlu1 %v3276_v14, %s3121_s18 }
  0x87   :  { %185 = vrot.lane.b32.xlu0 %v3281_v15, %s3121_s18 }
  0x88   :  { %v3463_v39 = vpop.permute.xlu1 %88 }
  0x89   :  { %6700 = vst [vmem:[#allocation6_spill] sm:$0xff] %v3463_v39  ;;  %v3465_v40 = vpop.permute.xlu0 %86  ;;  %v3696_v39 = vsub.s32 1, %v3471_v41 }
  0x8a   :  { %6701 = vst [vmem:[#allocation7_spill] sm:$0xff] %v3465_v40  ;;  %794 = vrot.lane.b32.xlu1 %v3290_v16, %s3118_s28 }
  0x8b   :  { %792 = vrot.lane.b32.xlu0 %v3295_v17, %s3118_s28  ;;  %6718 = vst [vmem:[#allocation24_spill] sm:$0xff] %v3696_v39 }
  0x8c   :  { %v3473_v42 = vpop.permute.xlu1 %92 }
  0x8d   :  { %v3475_v43 = vpop.permute.xlu0 %90 }
  0x8e   :  { %802 = vrot.lane.b32.xlu1 %v3304_v18, %s3118_s28 }
  0x8f   :  { %800 = vrot.lane.b32.xlu0 %v3309_v19, %s3118_s28 }
  0x90   :  { %v342_v46 = vpop.permute.xlu1 %341 }
  0x91   :  { %v340_v47 = vpop.permute.xlu0 %339 }
  0x92   :  { %818 = vrot.lane.b32.xlu1 %v3318_v20, %s3118_s28 }
  0x93   :  { %816 = vrot.lane.b32.xlu0 %v3323_v21, %s3118_s28 }
  0x94   :  { %v3500_v50 = vpop.permute.xlu1 %349 }
  0x95   :  { %v3502_v51 = vpop.permute.xlu0 %347  ;;  %v379_v54 = vsel %vm367_vm0, %v342_v46, %v3500_v50 }
  0x96   :  { %v378_v53 = vsel %vm367_vm0, %v340_v47, %v3502_v51  ;;  %159 = vrot.lane.b32.xlu1 %v3189_v3, %s3121_s18  ;;  %v413_v56 = vmul.f32 %v3496_v49, %v379_v54 }
  0x97   :  { %v409_v55 = vmul.f32 %v3496_v49, %v378_v53  ;;  %157 = vrot.lane.b32.xlu0 %v3175_v1, %s3121_s18  ;;  %v3540_v53 = vsub.s32 2, %v3471_v41 }
  0x98   :  { %v3525_v58 = vpop.permute.xlu1 %365 }
  0x99   :  { %v3527_v59 = vpop.permute.xlu0 %363  ;;  %v421_v60 = vpack.c.bf16 %v413_v56, %v409_v55  ;;  %v383_v61 = vsel %vm367_vm0, %v3525_v58, %v342_v46 }
  0x9a   :  { %v382_v62 = vsel %vm367_vm0, %v3527_v59, %v340_v47  ;;  %167 = vrot.lane.b32.xlu1 %v3198_v4, %s3121_s18  ;;  %v412_v38 = vmul.f32 %v3521_v57, %v383_v61  ;;  %v3549_v47 = vrot.slane %v3489_v48, %v3540_v53 }
  0x9b   :  { %1741 = vmatprep.subr.bf16.mxu0 %v421_v60  ;;  %v408_v63 = vmul.f32 %v3521_v57, %v382_v62  ;;  %165 = vrot.lane.b32.xlu0 %v3203_v5, %s3121_s18 }
  0x9c   :  { %v939_v54 = vpop.permute.xlu1 %938 }
  0x9d   :  { %v937_v46 = vpop.permute.xlu0 %936  ;;  %v420_v55 = vpack.c.bf16 %v412_v38, %v408_v63 }
  0x9e   :  { %183 = vrot.lane.b32.xlu1 %v3254_v12, %s3121_s18 }
  0x9f   :  { %1742 = vmatpush1.bf16.msra.mxu0 %v420_v55  ;;  %181 = vrot.lane.b32.xlu0 %v3259_v13, %s3121_s18  ;;  %v3569_v13 = vrot.slane %v3507_v52, %v3540_v53 }
  0xa0   :  { %v3553_v56 = vpop.permute.xlu1 %946 }
  0xa1   :  { %6702 = vst [vmem:[#allocation8_spill] sm:$0xff] %v3553_v56  ;;  %v3555_v60 = vpop.permute.xlu0 %944  ;;  %v975_v62 = vsel %vm278_vm1, %v939_v54, %v3553_v56 }
  0xa2   :  { %6703 = vst [vmem:[#allocation9_spill] sm:$0xff] %v3555_v60  ;;  %v974_v61 = vsel %vm278_vm1, %v937_v46, %v3555_v60  ;;  %790 = vrot.lane.b32.xlu1 %v3344_v22, %s3118_s28  ;;  %v993_v63 = vmul.f32 %v975_v62, %v3549_v47 }
  0xa3   :  { %v989_v12 = vmul.f32 %v974_v61, %v3549_v47  ;;  %788 = vrot.lane.b32.xlu0 %v3349_v23, %s3118_s28 }
  0xa4   :  { %v3573_v38 = vpop.permute.xlu1 %962 }
  0xa5   :  { %6704 = vst [vmem:[#allocation10_spill] sm:$0xff] %v3573_v38  ;;  %v3575_v55 = vpop.permute.xlu0 %960  ;;  %v1001_v60 = vpack.c.bf16 %v993_v63, %v989_v12  ;;  %v979_v56 = vsel %vm278_vm1, %v3573_v38, %v939_v54 }
  0xa6   :  { %6705 = vst [vmem:[#allocation11_spill] sm:$0xff] %v3575_v55  ;;  %v978_v61 = vsel %vm278_vm1, %v3575_v55, %v937_v46  ;;  %798 = vrot.lane.b32.xlu1 %v3358_v24, %s3118_s28  ;;  %v992_v37 = vmul.f32 %v979_v56, %v3569_v13 }
  0xa7   :  { %1854 = vmatprep.subr.bf16.mxu1 %v1001_v60  ;;  %v988_v62 = vmul.f32 %v978_v61, %v3569_v13  ;;  %796 = vrot.lane.b32.xlu0 %v3363_v25, %s3118_s28 }
  0xa8   :  { %v338_v12 = vpop.permute.xlu1 %337 }
  0xa9   :  { %v336_v63 = vpop.permute.xlu0 %335  ;;  %v1000_v36 = vpack.c.bf16 %v992_v37, %v988_v62 }
  0xaa   :  { %814 = vrot.lane.b32.xlu1 %v3372_v26, %s3118_s28 }
  0xab   :  { %1855 = vmatpush1.bf16.msra.mxu1 %v1000_v36  ;;  %812 = vrot.lane.b32.xlu0 %v3377_v27, %s3118_s28 }
  0xac   :  { %v3593_v54 = vpop.permute.xlu1 %345 }
  0xad   :  { %6706 = vst [vmem:[#allocation12_spill] sm:$0xff] %v3593_v54  ;;  %v3595_v46 = vpop.permute.xlu0 %343  ;;  %v377_v56 = vsel %vm367_vm0, %v338_v12, %v3593_v54 }
  0xae   :  { %6707 = vst [vmem:[#allocation13_spill] sm:$0xff] %v3595_v46  ;;  %v376_v60 = vsel %vm367_vm0, %v336_v63, %v3595_v46  ;;  %v405_v36 = vmul.f32 %v3496_v49, %v377_v56  ;;  %96 = vrot.lane.b32.xlu1 %v3276_v14, %s3118_s28 }
  0xaf   :  { %v401_v37 = vmul.f32 %v3496_v49, %v376_v60  ;;  %94 = vrot.lane.b32.xlu0 %v3281_v15, %s3118_s28 }
  0xb0   :  { %v3609_v26 = vpop.permute.xlu1 %361 }
  0xb1   :  { %6708 = vst [vmem:[#allocation14_spill] sm:$0xff] %v3609_v26  ;;  %v3611_v27 = vpop.permute.xlu0 %359  ;;  %v417_v61 = vpack.c.bf16 %v405_v36, %v401_v37  ;;  %v381_v62 = vsel %vm367_vm0, %v3609_v26, %v338_v12 }
  0xb2   :  { %6709 = vst [vmem:[#allocation15_spill] sm:$0xff] %v3611_v27  ;;  %v380_v56 = vsel %vm367_vm0, %v3611_v27, %v336_v63  ;;  %v404_v60 = vmul.f32 %v3521_v57, %v381_v62  ;;  %713 = vrot.lane.b32.xlu1 %v3212_v6, %s3122_s23 }
  0xb3   :  { %v400_v14 = vmul.f32 %v3521_v57, %v380_v56  ;;  %1743 = vmatprep.subr.bf16.mxu0 %v417_v61  ;;  %711 = vrot.lane.b32.xlu0 %v3217_v7, %s3122_s23 }
  0xb4   :  { %v935_v15 = vpop.permute.xlu1 %934 }
  0xb5   :  { %v933_v36 = vpop.permute.xlu0 %932  ;;  %v416_v37 = vpack.c.bf16 %v404_v60, %v400_v14 }
  0xb6   :  { %721 = vrot.lane.b32.xlu1 %v3240_v10, %s3122_s23 }
  0xb7   :  { %1744 = vmatpush1.bf16.msra.mxu0 %v416_v37  ;;  %719 = vrot.lane.b32.xlu0 %v3245_v11, %s3122_s23 }
  0xb8   :  { %v3629_v12 = vpop.permute.xlu1 %942 }
  0xb9   :  { %6710 = vst [vmem:[#allocation16_spill] sm:$0xff] %v3629_v12  ;;  %v3631_v63 = vpop.permute.xlu0 %940  ;;  %v973_v61 = vsel %vm278_vm1, %v935_v15, %v3629_v12 }
  0xba   :  { %6711 = vst [vmem:[#allocation17_spill] sm:$0xff] %v3631_v63  ;;  %v972_v62 = vsel %vm278_vm1, %v933_v36, %v3631_v63  ;;  %v985_v56 = vmul.f32 %v973_v61, %v3549_v47  ;;  %705 = vrot.lane.b32.xlu1 %v3184_v2, %s3122_s23 }
  0xbb   :  { %v981_v60 = vmul.f32 %v972_v62, %v3549_v47  ;;  %703 = vrot.lane.b32.xlu0 %v3170_v0, %s3122_s23 }
  0xbc   :  { %v3645_v14 = vpop.permute.xlu1 %958 }
  0xbd   :  { %6712 = vst [vmem:[#allocation18_spill] sm:$0xff] %v3645_v14  ;;  %v3647_v37 = vpop.permute.xlu0 %956  ;;  %v997_v55 = vpack.c.bf16 %v985_v56, %v981_v60  ;;  %v977_v12 = vsel %vm278_vm1, %v3645_v14, %v935_v15 }
  0xbe   :  { %6713 = vst [vmem:[#allocation19_spill] sm:$0xff] %v3647_v37  ;;  %v976_v61 = vsel %vm278_vm1, %v3647_v37, %v933_v36  ;;  %v984_v62 = vmul.f32 %v977_v12, %v3569_v13  ;;  %709 = vrot.lane.b32.xlu1 %v3198_v4, %s3122_s23 }
  0xbf   :  { %v980_v63 = vmul.f32 %v976_v61, %v3569_v13  ;;  %1856 = vmatprep.subr.bf16.mxu1 %v997_v55  ;;  %707 = vrot.lane.b32.xlu0 %v3203_v5, %s3122_s23 }
  0xc0   :  { %v253_v56 = vpop.permute.xlu1 %252 }
  0xc1   :  { %v251_v60 = vpop.permute.xlu0 %250  ;;  %v996_v38 = vpack.c.bf16 %v984_v62, %v980_v63 }
  0xc2   :  { %717 = vrot.lane.b32.xlu1 %v3226_v8, %s3122_s23 }
  0xc3   :  { %1857 = vmatpush1.bf16.msra.mxu1 %v996_v38  ;;  %715 = vrot.lane.b32.xlu0 %v3231_v9, %s3122_s23 }
  0xc4   :  { %v3665_v15 = vpop.permute.xlu1 %260 }
  0xc5   :  { %6714 = vst [vmem:[#allocation20_spill] sm:$0xff] %v3665_v15  ;;  %v3667_v36 = vpop.permute.xlu0 %258  ;;  %v290_v55 = vsel %vm278_vm1, %v253_v56, %v3665_v15 }
  0xc6   :  { %6715 = vst [vmem:[#allocation21_spill] sm:$0xff] %v3667_v36  ;;  %v289_v12 = vsel %vm278_vm1, %v251_v60, %v3667_v36  ;;  %v324_v63 = vmul.f32 %v3549_v47, %v290_v55  ;;  %701 = vrot.lane.b32.xlu1 %v3189_v3, %s3122_s23  ;;  %v3725_v36 = vrot.slane %v3507_v52, %v3696_v39 }
  0xc7   :  { %v320_v61 = vmul.f32 %v3549_v47, %v289_v12  ;;  %699 = vrot.lane.b32.xlu0 %v3175_v1, %s3122_s23 }
  0xc8   :  { %v3681_v38 = vpop.permute.xlu1 %276 }
  0xc9   :  { %6716 = vst [vmem:[#allocation22_spill] sm:$0xff] %v3681_v38  ;;  %v3683_v62 = vpop.permute.xlu0 %274  ;;  %v332_v37 = vpack.c.bf16 %v324_v63, %v320_v61  ;;  %v294_v14 = vsel %vm278_vm1, %v3681_v38, %v253_v56 }
  0xca   :  { %6717 = vst [vmem:[#allocation23_spill] sm:$0xff] %v3683_v62  ;;  %v293_v55 = vsel %vm278_vm1, %v3683_v62, %v251_v60  ;;  %v323_v12 = vmul.f32 %v3569_v13, %v294_v14  ;;  %624 = vrot.lane.b32.xlu1 %v3212_v6, %s3123_s24  ;;  %v3705_v14 = vrot.slane %v3489_v48, %v3696_v39 }
  0xcb   :  { %v319_v40 = vmul.f32 %v3569_v13, %v293_v55  ;;  %1745 = vmatprep.subr.bf16.mxu0 %v332_v37  ;;  %622 = vrot.lane.b32.xlu0 %v3217_v7, %s3123_s24 }
  0xcc   :  { %v867_v56 = vpop.permute.xlu1 %866 }
  0xcd   :  { %v865_v63 = vpop.permute.xlu0 %864  ;;  %v331_v61 = vpack.c.bf16 %v323_v12, %v319_v40 }
  0xce   :  { %632 = vrot.lane.b32.xlu1 %v3240_v10, %s3123_s24 }
  0xcf   :  { %1746 = vmatpush1.bf16.msra.mxu0 %v331_v61  ;;  %630 = vrot.lane.b32.xlu0 %v3245_v11, %s3123_s24 }
  0xd0   :  { %v3709_v37 = vpop.permute.xlu1 %874 }
  0xd1   :  { %6719 = vst [vmem:[#allocation25_spill] sm:$0xff] %v3709_v37  ;;  %v3711_v60 = vpop.permute.xlu0 %872  ;;  %v903_v40 = vsel %vm189_vm2, %v867_v56, %v3709_v37 }
  0xd2   :  { %6720 = vst [vmem:[#allocation26_spill] sm:$0xff] %v3711_v60  ;;  %v902_v55 = vsel %vm189_vm2, %v865_v63, %v3711_v60  ;;  %v921_v12 = vmul.f32 %v903_v40, %v3705_v14  ;;  %616 = vrot.lane.b32.xlu1 %v3184_v2, %s3123_s24 }
  0xd3   :  { %v917_v61 = vmul.f32 %v902_v55, %v3705_v14  ;;  %614 = vrot.lane.b32.xlu0 %v3170_v0, %s3123_s24 }
  0xd4   :  { %v3729_v62 = vpop.permute.xlu1 %890 }
  0xd5   :  { %6721 = vst [vmem:[#allocation27_spill] sm:$0xff] %v3729_v62  ;;  %v3731_v37 = vpop.permute.xlu0 %888  ;;  %v929_v15 = vpack.c.bf16 %v921_v12, %v917_v61  ;;  %v907_v40 = vsel %vm189_vm2, %v3729_v62, %v867_v56  ;;  %v3748_v56 = vld [vmem:[%s6555_s0 + $0x70] sm:$0xff] }
  0xd6   :  { %6722 = vst [vmem:[#allocation28_spill] sm:$0xff] %v3731_v37  ;;  %v906_v55 = vsel %vm189_vm2, %v3731_v37, %v865_v63  ;;  %v920_v60 = vmul.f32 %v907_v40, %v3725_v36  ;;  %1170 = vrot.lane.b32.xlu1 %v3304_v18, %s3124_s25  ;;  %v3753_v63 = vld [vmem:[%s6555_s0 + $0x50] sm:$0xff] }
  0xd7   :  { %v916_v39 = vmul.f32 %v906_v55, %v3725_v36  ;;  %1858 = vmatprep.subr.bf16.mxu1 %v929_v15  ;;  %1168 = vrot.lane.b32.xlu0 %v3309_v19, %s3124_s25 }
  0xd8   :  { %v249_v12 = vpop.permute.xlu1 %248 }
  0xd9   :  { %v247_v61 = vpop.permute.xlu0 %246  ;;  %v928_v40 = vpack.c.bf16 %v920_v60, %v916_v39 }
  0xda   :  { %1178 = vrot.lane.b32.xlu1 %v3748_v56, %s3124_s25 }
  0xdb   :  { %1859 = vmatpush1.bf16.msra.mxu1 %v928_v40  ;;  %1176 = vrot.lane.b32.xlu0 %v3753_v63, %s3124_s25 }
  0xdc   :  { %v3759_v15 = vpop.permute.xlu1 %256 }
  0xdd   :  { %6723 = vst [vmem:[#allocation29_spill] sm:$0xff] %v3759_v15  ;;  %v3761_v55 = vpop.permute.xlu0 %254  ;;  %v288_v37 = vsel %vm278_vm1, %v249_v12, %v3759_v15 }
  0xde   :  { %6724 = vst [vmem:[#allocation30_spill] sm:$0xff] %v3761_v55  ;;  %v287_v62 = vsel %vm278_vm1, %v247_v61, %v3761_v55  ;;  %v316_v39 = vmul.f32 %v3549_v47, %v288_v37  ;;  %1162 = vrot.lane.b32.xlu1 %v3290_v16, %s3124_s25 }
  0xdf   :  { %v312_v60 = vmul.f32 %v3549_v47, %v287_v62  ;;  %1160 = vrot.lane.b32.xlu0 %v3295_v17, %s3124_s25 }
  0xe0   :  { %v3775_v40 = vpop.permute.xlu1 %272 }
  0xe1   :  { %6725 = vst [vmem:[#allocation31_spill] sm:$0xff] %v3775_v40  ;;  %v3777_v38 = vpop.permute.xlu0 %270  ;;  %v328_v46 = vpack.c.bf16 %v316_v39, %v312_v60  ;;  %v292_v15 = vsel %vm278_vm1, %v3775_v40, %v249_v12 }
  0xe2   :  { %6726 = vst [vmem:[#allocation32_spill] sm:$0xff] %v3777_v38  ;;  %v291_v37 = vsel %vm278_vm1, %v3777_v38, %v247_v61  ;;  %v315_v47 = vmul.f32 %v3569_v13, %v292_v15  ;;  %620 = vrot.lane.b32.xlu1 %v3198_v4, %s3123_s24 }
  0xe3   :  { %v311_v62 = vmul.f32 %v3569_v13, %v291_v37  ;;  %1747 = vmatprep.subr.bf16.mxu0 %v328_v46  ;;  %618 = vrot.lane.b32.xlu0 %v3203_v5, %s3123_s24 }
  0xe4   :  { %v863_v39 = vpop.permute.xlu1 %862 }
  0xe5   :  { %v861_v60 = vpop.permute.xlu0 %860  ;;  %v327_v55 = vpack.c.bf16 %v315_v47, %v311_v62 }
  0xe6   :  { %628 = vrot.lane.b32.xlu1 %v3226_v8, %s3123_s24 }
  0xe7   :  { %1748 = vmatpush1.bf16.msra.mxu0 %v327_v55  ;;  %626 = vrot.lane.b32.xlu0 %v3231_v9, %s3123_s24 }
  0xe8   :  { %v3795_v12 = vpop.permute.xlu1 %870 }
  0xe9   :  { %6727 = vst [vmem:[#allocation33_spill] sm:$0xff] %v3795_v12  ;;  %v3797_v13 = vpop.permute.xlu0 %868  ;;  %v901_v46 = vsel %vm189_vm2, %v863_v39, %v3795_v12 }
  0xea   :  { %6728 = vst [vmem:[#allocation34_spill] sm:$0xff] %v3797_v13  ;;  %v900_v61 = vsel %vm189_vm2, %v861_v60, %v3797_v13  ;;  %v913_v15 = vmul.f32 %v901_v46, %v3705_v14  ;;  %612 = vrot.lane.b32.xlu1 %v3189_v3, %s3123_s24 }
  0xeb   :  { %v909_v37 = vmul.f32 %v900_v61, %v3705_v14  ;;  %610 = vrot.lane.b32.xlu0 %v3175_v1, %s3123_s24 }
  0xec   :  { %v3811_v55 = vpop.permute.xlu1 %886 }
  0xed   :  { %6729 = vst [vmem:[#allocation35_spill] sm:$0xff] %v3811_v55  ;;  %v3813_v47 = vpop.permute.xlu0 %884  ;;  %v925_v62 = vpack.c.bf16 %v913_v15, %v909_v37  ;;  %v905_v12 = vsel %vm189_vm2, %v3811_v55, %v863_v39  ;;  %v3830_v15 = vld [vmem:[%s6555_s0 + $0x30] sm:$0xff] }
  0xee   :  { %6730 = vst [vmem:[#allocation36_spill] sm:$0xff] %v3813_v47  ;;  %v904_v46 = vsel %vm189_vm2, %v3813_v47, %v861_v60  ;;  %v912_v61 = vmul.f32 %v905_v12, %v3725_v36  ;;  %1166 = vrot.lane.b32.xlu1 %v3358_v24, %s3124_s25  ;;  %v3835_v60 = vld [vmem:[%s6555_s0 + $0x10] sm:$0xff] }
  0xef   :  { %v908_v13 = vmul.f32 %v904_v46, %v3725_v36  ;;  %1860 = vmatprep.subr.bf16.mxu1 %v925_v62  ;;  %1164 = vrot.lane.b32.xlu0 %v3363_v25, %s3124_s25 }
  0xf0   :  { %v164_v39 = vpop.permute.xlu1 %163 }
  0xf1   :  { %v162_v37 = vpop.permute.xlu0 %161  ;;  %v924_v12 = vpack.c.bf16 %v912_v61, %v908_v13 }
  0xf2   :  { %1174 = vrot.lane.b32.xlu1 %v3830_v15, %s3124_s25 }
  0xf3   :  { %1861 = vmatpush1.bf16.msra.mxu1 %v924_v12  ;;  %1172 = vrot.lane.b32.xlu0 %v3835_v60, %s3124_s25 }
  0xf4   :  { %v3841_v62 = vpop.permute.xlu1 %171 }
  0xf5   :  { %6731 = vst [vmem:[#allocation37_spill] sm:$0xff] %v3841_v62  ;;  %v3843_v46 = vpop.permute.xlu0 %169  ;;  %v201_v47 = vsel %vm189_vm2, %v164_v39, %v3841_v62 }
  0xf6   :  { %6732 = vst [vmem:[#allocation38_spill] sm:$0xff] %v3843_v46  ;;  %v200_v55 = vsel %vm189_vm2, %v162_v37, %v3843_v46  ;;  %v235_v13 = vmul.f32 %v3705_v14, %v201_v47  ;;  %1158 = vrot.lane.b32.xlu1 %v3344_v22, %s3124_s25 }
  0xf7   :  { %v231_v61 = vmul.f32 %v3705_v14, %v200_v55  ;;  %1156 = vrot.lane.b32.xlu0 %v3349_v23, %s3124_s25 }
  0xf8   :  { %v3857_v12 = vpop.permute.xlu1 %187 }
  0xf9   :  { %6733 = vst [vmem:[#allocation39_spill] sm:$0xff] %v3857_v12  ;;  %v3859_v38 = vpop.permute.xlu0 %185  ;;  %v243_v40 = vpack.c.bf16 %v235_v13, %v231_v61  ;;  %v205_v62 = vsel %vm189_vm2, %v3857_v12, %v164_v39  ;;  %v3874_v13 = vsub.s32 0, %v3471_v41 }
  0xfa   :  { %6734 = vst [vmem:[#allocation40_spill] sm:$0xff] %v3859_v38  ;;  %v204_v47 = vsel %vm189_vm2, %v3859_v38, %v162_v37  ;;  %v234_v55 = vmul.f32 %v3725_v36, %v205_v62  ;;  %535 = vrot.lane.b32.xlu1 %v3212_v6, %s3124_s25 }
  0xfb   :  { %v230_v46 = vmul.f32 %v3725_v36, %v204_v47  ;;  %1749 = vmatprep.subr.bf16.mxu0 %v243_v40  ;;  %533 = vrot.lane.b32.xlu0 %v3217_v7, %s3124_s25  ;;  %6735 = vst [vmem:[#allocation41_spill] sm:$0xff] %v3874_v13  ;;  %v3883_v40 = vrot.slane %v3489_v48, %v3874_v13 }
  0xfc   :  { %v795_v61 = vpop.permute.xlu1 %794  ;;  %v3903_v38 = vrot.slane %v3507_v52, %v3874_v13 }
  0xfd   :  { %v793_v39 = vpop.permute.xlu0 %792  ;;  %v242_v12 = vpack.c.bf16 %v234_v55, %v230_v46 }
  0xfe   :  { %543 = vrot.lane.b32.xlu1 %v3240_v10, %s3124_s25 }
  0xff   :  { %1750 = vmatpush1.bf16.msra.mxu0 %v242_v12  ;;  %541 = vrot.lane.b32.xlu0 %v3245_v11, %s3124_s25 }
 0x100   :  { %v3885_v37 = vpop.permute.xlu1 %802 }
 0x101   :  { %6736 = vst [vmem:[#allocation42_spill] sm:$0xff] %v3885_v37  ;;  %v831_v62 = vsel %vm100_vm3, %v795_v61, %v3885_v37  ;;  %v3890_v46 = vpop.permute.xlu0 %800 }
 0x102   :  { %6737 = vst [vmem:[#allocation43_spill] sm:$0xff] %v3890_v46  ;;  %v849_v47 = vmul.f32 %v831_v62, %v3883_v40  ;;  %v830_v12 = vsel %vm100_vm3, %v793_v39, %v3890_v46  ;;  %527 = vrot.lane.b32.xlu1 %v3184_v2, %s3124_s25 }
 0x103   :  { %v845_v55 = vmul.f32 %v830_v12, %v3883_v40  ;;  %525 = vrot.lane.b32.xlu0 %v3170_v0, %s3124_s25 }
 0x104   :  { %v3905_v37 = vpop.permute.xlu1 %818 }
 0x105   :  { %6738 = vst [vmem:[#allocation44_spill] sm:$0xff] %v3905_v37  ;;  %v835_v62 = vsel %vm100_vm3, %v3905_v37, %v795_v61  ;;  %v3910_v27 = vpop.permute.xlu0 %816  ;;  %v857_v46 = vpack.c.bf16 %v849_v47, %v845_v55 }
 0x106   :  { %6739 = vst [vmem:[#allocation45_spill] sm:$0xff] %v3910_v27  ;;  %v848_v54 = vmul.f32 %v835_v62, %v3903_v38  ;;  %v834_v12 = vsel %vm100_vm3, %v3910_v27, %v793_v39  ;;  %1098 = vrot.lane.b32.xlu1 %v3304_v18, %s3125_s13 }
 0x107   :  { %v844_v13 = vmul.f32 %v834_v12, %v3903_v38  ;;  %1096 = vrot.lane.b32.xlu0 %v3309_v19, %s3125_s13  ;;  %1862 = vmatprep.subr.bf16.mxu1 %v857_v46 }
 0x108   :  { %v160_v61 = vpop.permute.xlu1 %159 }
 0x109   :  { %v158_v37 = vpop.permute.xlu0 %157  ;;  %v856_v26 = vpack.c.bf16 %v848_v54, %v844_v13  ;;  %v111_v13 = vsel %vm100_vm3, %v3423_v28, %v3449_v35 }
 0x10a   :  { %1106 = vrot.lane.b32.xlu1 %v3748_v56, %s3125_s13 }
 0x10b   :  { %1104 = vrot.lane.b32.xlu0 %v3753_v63, %s3125_s13  ;;  %1863 = vmatpush1.bf16.msra.mxu1 %v856_v26  ;;  %v112_v26 = vsel %vm100_vm3, %v3431_v30, %v3447_v34  ;;  %v142_v34 = vmul.f32 %v3883_v40, %v111_v13 }
 0x10c   :  { %v3925_v39 = vpop.permute.xlu1 %167 }
 0x10d   :  { %6740 = vst [vmem:[#allocation46_spill] sm:$0xff] %v3925_v39  ;;  %v199_v47 = vsel %vm189_vm2, %v160_v61, %v3925_v39  ;;  %v3930_v55 = vpop.permute.xlu0 %165  ;;  %v146_v39 = vmul.f32 %v3883_v40, %v112_v26 }
 0x10e   :  { %6741 = vst [vmem:[#allocation47_spill] sm:$0xff] %v3930_v55  ;;  %v227_v46 = vmul.f32 %v3705_v14, %v199_v47  ;;  %v198_v54 = vsel %vm189_vm2, %v158_v37, %v3930_v55  ;;  %1090 = vrot.lane.b32.xlu1 %v3290_v16, %s3125_s13 }
 0x10f   :  { %v223_v62 = vmul.f32 %v3705_v14, %v198_v54  ;;  %1088 = vrot.lane.b32.xlu0 %v3295_v17, %s3125_s13  ;;  %v154_v13 = vpack.c.bf16 %v146_v39, %v142_v34 }
 0x110   :  { %v3949_v12 = vpop.permute.xlu1 %183 }
 0x111   :  { %v203_v47 = vsel %vm189_vm2, %v3949_v12, %v160_v61  ;;  %v3954_v27 = vpop.permute.xlu0 %181  ;;  %v239_v55 = vpack.c.bf16 %v227_v46, %v223_v62 }
 0x112   :  { %v226_v35 = vmul.f32 %v3725_v36, %v203_v47  ;;  %v202_v14 = vsel %vm189_vm2, %v3954_v27, %v158_v37  ;;  %531 = vrot.lane.b32.xlu1 %v3198_v4, %s3124_s25 }
 0x113   :  { %v222_v54 = vmul.f32 %v3725_v36, %v202_v14  ;;  %529 = vrot.lane.b32.xlu0 %v3203_v5, %s3124_s25  ;;  %1751 = vmatprep.subr.bf16.mxu0 %v239_v55 }
 0x114   :  { %v791_v61 = vpop.permute.xlu1 %790 }
 0x115   :  { %v789_v46 = vpop.permute.xlu0 %788  ;;  %v238_v26 = vpack.c.bf16 %v226_v35, %v222_v54 }
 0x116   :  { %539 = vrot.lane.b32.xlu1 %v3226_v8, %s3124_s25 }
 0x117   :  { %537 = vrot.lane.b32.xlu0 %v3231_v9, %s3124_s25  ;;  %1752 = vmatpush1.bf16.msra.mxu0 %v238_v26  ;;  %v110_v26 = vsel %vm100_vm3, %v3433_v31, %v3439_v32 }
 0x118   :  { %1753 = vmatprep.subr.bf16.mxu0 %v154_v13  ;;  %v3971_v37 = vpop.permute.xlu1 %798 }
 0x119   :  { %6742 = vst [vmem:[#allocation48_spill] sm:$0xff] %v3971_v37  ;;  %v829_v36 = vsel %vm100_vm3, %v791_v61, %v3971_v37  ;;  %v3976_v62 = vpop.permute.xlu0 %796 }
 0x11a   :  { %6743 = vst [vmem:[#allocation49_spill] sm:$0xff] %v3976_v62  ;;  %v841_v55 = vmul.f32 %v829_v36, %v3883_v40  ;;  %v828_v35 = vsel %vm100_vm3, %v789_v46, %v3976_v62  ;;  %523 = vrot.lane.b32.xlu1 %v3189_v3, %s3124_s25  ;;  %v109_v3 = vsel %vm100_vm3, %v3425_v29, %v3441_v33 }
 0x11b   :  { %v837_v34 = vmul.f32 %v828_v35, %v3883_v40  ;;  %521 = vrot.lane.b32.xlu0 %v3175_v1, %s3124_s25  ;;  %v134_v35 = vmul.f32 %v3883_v40, %v109_v3 }
 0x11c   :  { %v3987_v39 = vpop.permute.xlu1 %814 }
 0x11d   :  { %6744 = vst [vmem:[#allocation50_spill] sm:$0xff] %v3987_v39  ;;  %v833_v47 = vsel %vm100_vm3, %v3987_v39, %v791_v61  ;;  %v3992_v14 = vpop.permute.xlu0 %812  ;;  %v853_v54 = vpack.c.bf16 %v841_v55, %v837_v34  ;;  %v138_v55 = vmul.f32 %v3883_v40, %v110_v26 }
 0x11e   :  { %6745 = vst [vmem:[#allocation51_spill] sm:$0xff] %v3992_v14  ;;  %v840_v1 = vmul.f32 %v833_v47, %v3903_v38  ;;  %v832_v13 = vsel %vm100_vm3, %v3992_v14, %v789_v46  ;;  %1094 = vrot.lane.b32.xlu1 %v3358_v24, %s3125_s13 }
 0x11f   :  { %v836_v61 = vmul.f32 %v832_v13, %v3903_v38  ;;  %1092 = vrot.lane.b32.xlu0 %v3363_v25, %s3125_s13  ;;  %1864 = vmatprep.subr.bf16.mxu1 %v853_v54  ;;  %v114_v13 = vsel %vm100_vm3, %v3473_v42, %v3433_v31  ;;  %v113_v54 = vsel %vm100_vm3, %v3475_v43, %v3425_v29 }
 0x120   :  { %v4011_v36 = vpop.permute.xlu1 %96  ;;  %v137_v3 = vmul.f32 %v3903_v38, %v114_v13  ;;  %v133_v29 = vmul.f32 %v3903_v38, %v113_v54 }
 0x121   :  { %v116_v46 = vsel %vm100_vm3, %v4011_v36, %v3431_v30  ;;  %v4019_v34 = vpop.permute.xlu0 %94  ;;  %v852_v47 = vpack.c.bf16 %v840_v1, %v836_v61 }
 0x122   :  { %v145_v40 = vmul.f32 %v3903_v38, %v116_v46  ;;  %v115_v30 = vsel %vm100_vm3, %v4019_v34, %v3423_v28  ;;  %1102 = vrot.lane.b32.xlu1 %v3830_v15, %s3125_s13  ;;  %v150_v28 = vpack.c.bf16 %v138_v55, %v134_v35  ;;  %v2764_v46 = vld [vmem:[%s6556_s3 + $0x28] ss:$0 sm:$0xff]  ;;  %v149_v54 = vpack.c.bf16 %v137_v3, %v133_v29 }
 0x123   :  { %v141_v26 = vmul.f32 %v3903_v38, %v115_v30  ;;  %1100 = vrot.lane.b32.xlu0 %v3835_v60, %s3125_s13  ;;  %1865 = vmatpush1.bf16.msra.mxu1 %v852_v47  ;;  %v2763_v30 = vld [vmem:[%s6556_s3 + $0x20] ss:$0 sm:$0xff] }
 0x124   :  { %v714_v31 = vpop.permute.xlu1 %713 }
 0x125   :  { %v712_v1 = vpop.permute.xlu0 %711  ;;  %v153_v61 = vpack.c.bf16 %v145_v40, %v141_v26 }
 0x126   :  { %1086 = vrot.lane.b32.xlu1 %v3344_v22, %s3125_s13 }
 0x127   :  { %1084 = vrot.lane.b32.xlu0 %v3349_v23, %s3125_s13  ;;  %1754 = vmatpush1.bf16.msra.mxu0 %v153_v61 }
 0x128   :  { %1755 = vmatprep.subr.bf16.mxu0 %v150_v28  ;;  %v4049_v47 = vpop.permute.xlu1 %721 }
 0x129   :  { %6746 = vst [vmem:[#allocation52_spill] sm:$0xff] %v4049_v47  ;;  %v739_v38 = vsel %vm731_vm4, %v714_v31, %v4049_v47  ;;  %v4054_v13 = vpop.permute.xlu0 %719 }
 0x12a   :  { %6747 = vst [vmem:[#allocation53_spill] sm:$0xff] %v4054_v13  ;;  %v777_v40 = vmul.f32 %v2764_v46, %v739_v38  ;;  %v738_v55 = vsel %vm731_vm4, %v712_v1, %v4054_v13  ;;  %446 = vrot.lane.b32.xlu1 %v3212_v6, %s3125_s13 }
 0x12b   :  { %v773_v35 = vmul.f32 %v2764_v46, %v738_v55  ;;  %444 = vrot.lane.b32.xlu0 %v3217_v7, %s3125_s13  ;;  %1756 = vmatpush1.bf16.msra.mxu0 %v149_v54 }
 0x12c   :  { %v4066_v26 = vpop.permute.xlu1 %705 }
 0x12d   :  { %6748 = vst [vmem:[#allocation54_spill] sm:$0xff] %v4066_v26  ;;  %v743_v3 = vsel %vm731_vm4, %v4066_v26, %v714_v31  ;;  %v4071_v29 = vpop.permute.xlu0 %703  ;;  %v785_v61 = vpack.c.bf16 %v777_v40, %v773_v35 }
 0x12e   :  { %6749 = vst [vmem:[#allocation55_spill] sm:$0xff] %v4071_v29  ;;  %v776_v28 = vmul.f32 %v2763_v30, %v743_v3  ;;  %v742_v6 = vsel %vm731_vm4, %v4071_v29, %v712_v1  ;;  %454 = vrot.lane.b32.xlu1 %v3240_v10, %s3125_s13 }
 0x12f   :  { %v772_v7 = vmul.f32 %v2763_v30, %v742_v6  ;;  %452 = vrot.lane.b32.xlu0 %v3245_v11, %s3125_s13  ;;  %1866 = vmatprep.subr.bf16.mxu1 %v785_v61 }
 0x130   :  { %v710_v38 = vpop.permute.xlu1 %709 }
 0x131   :  { %v708_v54 = vpop.permute.xlu0 %707  ;;  %v784_v55 = vpack.c.bf16 %v776_v28, %v772_v7 }
 0x132   :  { %438 = vrot.lane.b32.xlu1 %v3184_v2, %s3125_s13 }
 0x133   :  { %436 = vrot.lane.b32.xlu0 %v3170_v0, %s3125_s13  ;;  %1867 = vmatpush1.bf16.msra.mxu1 %v784_v55 }
 0x134   :  { %v4084_v31 = vpop.permute.xlu1 %717 }
 0x135   :  { %6750 = vst [vmem:[#allocation56_spill] sm:$0xff] %v4084_v31  ;;  %v737_v10 = vsel %vm731_vm4, %v710_v38, %v4084_v31  ;;  %v4089_v1 = vpop.permute.xlu0 %715 }
 0x136   :  { %6751 = vst [vmem:[#allocation57_spill] sm:$0xff] %v4089_v1  ;;  %v769_v11 = vmul.f32 %v2764_v46, %v737_v10  ;;  %v736_v40 = vsel %vm731_vm4, %v708_v54, %v4089_v1  ;;  %442 = vrot.lane.b32.xlu1 %v3198_v4, %s3125_s13  ;;  %v4111_v4 = vsub.s32 7, %v3471_v41 }
 0x137   :  { %v765_v2 = vmul.f32 %v2764_v46, %v736_v40  ;;  %440 = vrot.lane.b32.xlu0 %v3203_v5, %s3125_s13 }
 0x138   :  { %v4098_v0 = vpop.permute.xlu1 %701 }
 0x139   :  { %6752 = vst [vmem:[#allocation58_spill] sm:$0xff] %v4098_v0  ;;  %v741_v35 = vsel %vm731_vm4, %v4098_v0, %v710_v38  ;;  %v4103_v3 = vpop.permute.xlu0 %699  ;;  %v781_v61 = vpack.c.bf16 %v769_v11, %v765_v2  ;;  %v4149_v2 = vrot.slane %v3507_v52, %v4111_v4 }
 0x13a   :  { %6753 = vst [vmem:[#allocation59_spill] sm:$0xff] %v4103_v3  ;;  %v768_v28 = vmul.f32 %v2763_v30, %v741_v35  ;;  %v740_v6 = vsel %vm731_vm4, %v4103_v3, %v708_v54  ;;  %450 = vrot.lane.b32.xlu1 %v3226_v8, %s3125_s13  ;;  %v4119_v54 = vld [vmem:[%s6554_s1 + $0x20] sm:$0xff]  ;;  %v4125_v8 = vrot.slane %v3489_v48, %v4111_v4 }
 0x13b   :  { %v764_v5 = vmul.f32 %v2763_v30, %v740_v6  ;;  %448 = vrot.lane.b32.xlu0 %v3231_v9, %s3125_s13  ;;  %1868 = vmatprep.subr.bf16.mxu1 %v781_v61  ;;  %v4130_v9 = vld [vmem:[%s6554_s1] sm:$0xff]  ;;  %6755 = vst [vmem:[#allocation61_spill] sm:$0xff] %v4149_v2 }
 0x13c   :  { %v625_v46 = vpop.permute.xlu1 %624  ;;  %6754 = vst [vmem:[#allocation60_spill] sm:$0xff] %v4125_v8 }
 0x13d   :  { %v623_v7 = vpop.permute.xlu0 %622  ;;  %v780_v38 = vpack.c.bf16 %v768_v28, %v764_v5 }
 0x13e   :  { %434 = vrot.lane.b32.xlu1 %v4119_v54, %s3125_s13 }
 0x13f   :  { %432 = vrot.lane.b32.xlu0 %v4130_v9, %s3125_s13  ;;  %1869 = vmatpush1.bf16.msra.mxu1 %v780_v38 }
 0x140   :  { %v4134_v30 = vpop.permute.xlu1 %632 }
 0x141   :  { %v650_v55 = vsel %vm642_vm5, %v625_v46, %v4134_v30  ;;  %v4139_v10 = vpop.permute.xlu0 %630 }
 0x142   :  { %v688_v11 = vmul.f32 %v4125_v8, %v650_v55  ;;  %v649_v40 = vsel %vm642_vm5, %v623_v7, %v4139_v10  ;;  %1010 = vrot.lane.b32.xlu1 %v3290_v16, %s3119_s8 }
 0x143   :  { %v684_v35 = vmul.f32 %v4125_v8, %v649_v40  ;;  %1008 = vrot.lane.b32.xlu0 %v3295_v17, %s3119_s8  ;;  %v4168_v17 = vsub.s32 6, %v3471_v41 }
 0x144   :  { %v4154_v61 = vpop.permute.xlu1 %616 }
 0x145   :  { %v654_v28 = vsel %vm642_vm5, %v4154_v61, %v625_v46  ;;  %v4159_v6 = vpop.permute.xlu0 %614  ;;  %v696_v5 = vpack.c.bf16 %v688_v11, %v684_v35 }
 0x146   :  { %v687_v16 = vmul.f32 %v4149_v2, %v654_v28  ;;  %v653_v38 = vsel %vm642_vm5, %v4159_v6, %v623_v7  ;;  %1018 = vrot.lane.b32.xlu1 %v3304_v18, %s3119_s8  ;;  %v4178_v18 = vrot.slane %v3489_v48, %v4168_v17 }
 0x147   :  { %v683_v55 = vmul.f32 %v4149_v2, %v653_v38  ;;  %1016 = vrot.lane.b32.xlu0 %v3309_v19, %s3119_s8  ;;  %1757 = vmatprep.subr.bf16.mxu0 %v696_v5 }
 0x148   :  { %v1171_v46 = vpop.permute.xlu1 %1170 }
 0x149   :  { %v1169_v11 = vpop.permute.xlu0 %1168  ;;  %v695_v40 = vpack.c.bf16 %v687_v16, %v683_v55 }
 0x14a   :  { %1034 = vrot.lane.b32.xlu1 %v3318_v20, %s3119_s8 }
 0x14b   :  { %1032 = vrot.lane.b32.xlu0 %v3323_v21, %s3119_s8  ;;  %1758 = vmatpush2.bf16.msra.mxu0 %v695_v40  ;;  %v4197_v21 = vrot.slane %v3507_v52, %v4168_v17 }
 0x14c   :  { %v4182_v7 = vpop.permute.xlu1 %1178 }
 0x14d   :  { %6756 = vst [vmem:[#allocation62_spill] sm:$0xff] %v4182_v7  ;;  %v1195_v19 = vsel %vm553_vm6, %v1171_v46, %v4182_v7  ;;  %v4187_v35 = vpop.permute.xlu0 %1176 }
 0x14e   :  { %6757 = vst [vmem:[#allocation63_spill] sm:$0xff] %v4187_v35  ;;  %v1217_v28 = vmul.f32 %v1195_v19, %v4178_v18  ;;  %v1194_v20 = vsel %vm553_vm6, %v1169_v11, %v4187_v35  ;;  %1006 = vrot.lane.b32.xlu1 %v3344_v22, %s3119_s8  ;;  %v2836_v22 = vld [vmem:[%s6557_s4 + $0xc] ss:$20 sps:$4 sm:$0xff]  }
 0x14f   :  { %v1213_v48 = vmul.f32 %v1194_v20, %v4178_v18  ;;  %1004 = vrot.lane.b32.xlu0 %v3349_v23, %s3119_s8  ;;  %1886 = vmatprep.mubr.bf16.mxu1 %v2836_v22  ;;  %v4224_v20 = vld [vmem:[%s6555_s0 + $0x38] sm:$0xff]  ;;  %v3054_v22 = vld [vmem:[%s6554_s1 + $0x70] sm:$0xff] }
 0x150   :  { %v4202_v5 = vpop.permute.xlu1 %1162 }
 0x151   :  { %6758 = vst [vmem:[#allocation64_spill] sm:$0xff] %v4202_v5  ;;  %v1199_v16 = vsel %vm553_vm6, %v4202_v5, %v1171_v46  ;;  %v4207_v38 = vpop.permute.xlu0 %1160  ;;  %v1225_v55 = vpack.c.bf16 %v1217_v28, %v1213_v48  ;;  %v3056_v5 = vld [vmem:[%s6554_s1 + $0x30] sm:$0xff] }
 0x152   :  { %6759 = vst [vmem:[#allocation65_spill] sm:$0xff] %v4207_v38  ;;  %v1216_v52 = vmul.f32 %v1199_v16, %v4197_v21  ;;  %v1198_v40 = vsel %vm553_vm6, %v4207_v38, %v1169_v11  ;;  %1014 = vrot.lane.b32.xlu1 %v3358_v24, %s3119_s8  ;;  %v4231_v24 = vld [vmem:[%s6555_s0 + $0x18] sm:$0xff] }
 0x153   :  { %v1212_v23 = vmul.f32 %v1198_v40, %v4197_v21  ;;  %1012 = vrot.lane.b32.xlu0 %v3363_v25, %s3119_s8  ;;  %1870 = vmatprep.subr.bf16.mxu1 %v1225_v55  ;;  %v3055_v40 = vld [vmem:[%s6554_s1 + $0x50] sm:$0xff] }
 0x154   :  { %v621_v46 = vpop.permute.xlu1 %620 }
 0x155   :  { %v619_v19 = vpop.permute.xlu0 %618  ;;  %v1224_v28 = vpack.c.bf16 %v1216_v52, %v1212_v23 }
 0x156   :  { %1030 = vrot.lane.b32.xlu1 %v4224_v20, %s3119_s8 }
 0x157   :  { %1028 = vrot.lane.b32.xlu0 %v4231_v24, %s3119_s8  ;;  %1871 = vmatpush2.bf16.msra.mxu1 %v1224_v28 }
 0x158   :  { %v4235_v25 = vpop.permute.xlu1 %628 }
 0x159   :  { %v648_v11 = vsel %vm642_vm5, %v621_v46, %v4235_v25  ;;  %v4240_v48 = vpop.permute.xlu0 %626 }
 0x15a   :  { %v680_v16 = vmul.f32 %v4125_v8, %v648_v11  ;;  %v647_v55 = vsel %vm642_vm5, %v619_v19, %v4240_v48  ;;  %357 = vrot.lane.b32.xlu1 %v3054_v22, %s3119_s8 }
 0x15b   :  { %v676_v52 = vmul.f32 %v4125_v8, %v647_v55  ;;  %355 = vrot.lane.b32.xlu0 %v3055_v40, %s3119_s8 }
 0x15c   :  { %v4255_v23 = vpop.permute.xlu1 %612 }
 0x15d   :  { %v652_v28 = vsel %vm642_vm5, %v4255_v23, %v621_v46  ;;  %v4260_v11 = vpop.permute.xlu0 %610  ;;  %v692_v38 = vpack.c.bf16 %v680_v16, %v676_v52  ;;  %v3057_v46 = vld [vmem:[%s6554_s1 + $0x10] sm:$0xff] }
 0x15e   :  { %v679_v35 = vmul.f32 %v4149_v2, %v652_v28  ;;  %v651_v55 = vsel %vm642_vm5, %v4260_v11, %v619_v19  ;;  %353 = vrot.lane.b32.xlu1 %v3056_v5, %s3119_s8 }
 0x15f   :  { %v675_v7 = vmul.f32 %v4149_v2, %v651_v55  ;;  %351 = vrot.lane.b32.xlu0 %v3057_v46, %s3119_s8  ;;  %1759 = vmatprep.subr.bf16.mxu0 %v692_v38 }
 0x160   :  { %v1167_v16 = vpop.permute.xlu1 %1166 }
 0x161   :  { %v1165_v52 = vpop.permute.xlu0 %1164  ;;  %v691_v28 = vpack.c.bf16 %v679_v35, %v675_v7 }
 0x162   :  { %268 = vrot.lane.b32.xlu1 %v3054_v22, %s3120_s17 }
 0x163   :  { %266 = vrot.lane.b32.xlu0 %v3055_v40, %s3120_s17  ;;  %1760 = vmatpush2.bf16.msra.mxu0 %v691_v28 }
 0x164   :  { %v4277_v19 = vpop.permute.xlu1 %1174 }
 0x165   :  { %6760 = vst [vmem:[#allocation66_spill] sm:$0xff] %v4277_v19  ;;  %v1193_v55 = vsel %vm553_vm6, %v1167_v16, %v4277_v19  ;;  %v4282_v3 = vpop.permute.xlu0 %1172 }
 0x166   :  { %6761 = vst [vmem:[#allocation67_spill] sm:$0xff] %v4282_v3  ;;  %v1209_v1 = vmul.f32 %v1193_v55, %v4178_v18  ;;  %v1192_v38 = vsel %vm553_vm6, %v1165_v52, %v4282_v3  ;;  %264 = vrot.lane.b32.xlu1 %v3056_v5, %s3120_s17 }
 0x167   :  { %v1205_v7 = vmul.f32 %v1192_v38, %v4178_v18  ;;  %262 = vrot.lane.b32.xlu0 %v3057_v46, %s3120_s17 }
 0x168   :  { %v4291_v35 = vpop.permute.xlu1 %1158 }
 0x169   :  { %6762 = vst [vmem:[#allocation68_spill] sm:$0xff] %v4291_v35  ;;  %v1197_v28 = vsel %vm553_vm6, %v4291_v35, %v1167_v16  ;;  %v4296_v19 = vpop.permute.xlu0 %1156  ;;  %v1221_v0 = vpack.c.bf16 %v1209_v1, %v1205_v7  ;;  %v2839_v16 = vld [vmem:[%s6557_s4 + $0x4] ss:$20 sps:$4 sm:$0xff]  }
 0x16a   :  { %6763 = vst [vmem:[#allocation69_spill] sm:$0xff] %v4296_v19  ;;  %v1208_v55 = vmul.f32 %v1197_v28, %v4197_v21  ;;  %v1196_v3 = vsel %vm553_vm6, %v4296_v19, %v1165_v52  ;;  %179 = vrot.lane.b32.xlu1 %v3054_v22, %s3121_s18  ;;  %1773 = vmatprep.mubr.bf16.mxu0 %v2839_v16 }
 0x16b   :  { %v1204_v38 = vmul.f32 %v1196_v3, %v4197_v21  ;;  %177 = vrot.lane.b32.xlu0 %v3055_v40, %s3121_s18  ;;  %1872 = vmatprep.subr.bf16.mxu1 %v1221_v0 }
 0x16c   :  { %v536_v31 = vpop.permute.xlu1 %535 }
 0x16d   :  { %v534_v29 = vpop.permute.xlu0 %533  ;;  %v1220_v13 = vpack.c.bf16 %v1208_v55, %v1204_v38 }
 0x16e   :  { %175 = vrot.lane.b32.xlu1 %v3056_v5, %s3121_s18 }
 0x16f   :  { %173 = vrot.lane.b32.xlu0 %v3057_v46, %s3121_s18  ;;  %1873 = vmatpush2.bf16.msra.mxu1 %v1220_v13  ;;  %v4324_v13 = vld [vmem:[%s6554_s1 + $0x78] sm:$0xff] }
 0x170   :  { %v4307_v1 = vpop.permute.xlu1 %543  ;;  %v4332_v46 = vld [vmem:[%s6554_s1 + $0x58] sm:$0xff] }
 0x171   :  { %v561_v3 = vsel %vm553_vm6, %v536_v31, %v4307_v1  ;;  %v4315_v22 = vpop.permute.xlu0 %541 }
 0x172   :  { %v599_v0 = vmul.f32 %v4178_v18, %v561_v3  ;;  %v560_v5 = vsel %vm553_vm6, %v534_v29, %v4315_v22  ;;  %640 = vrot.lane.b32.xlu1 %v4324_v13, %s3123_s24  ;;  %v4350_v3 = vld [vmem:[%s6554_s1 + $0x38] sm:$0xff] }
 0x173   :  { %v595_v40 = vmul.f32 %v4178_v18, %v560_v5  ;;  %638 = vrot.lane.b32.xlu0 %v4332_v46, %s3123_s24  ;;  %v4355_v5 = vsub.s32 5, %v3471_v41  ;;  %v3062_v41 = vld [vmem:[%s6556_s3 + $0x8] sm:$0xff] }
 0x174   :  { %v4336_v52 = vpop.permute.xlu1 %527 }
 0x175   :  { %v565_v7 = vsel %vm553_vm6, %v4336_v52, %v536_v31  ;;  %v4341_v28 = vpop.permute.xlu0 %525  ;;  %v607_v55 = vpack.c.bf16 %v599_v0, %v595_v40  ;;  %6764 = vst [vmem:[#allocation70_spill] sm:$0xff] %v4355_v5  ;;  %v4361_v0 = vld [vmem:[%s6554_s1 + $0x18] sm:$0xff] }
 0x176   :  { %v598_v38 = vmul.f32 %v4197_v21, %v565_v7  ;;  %v564_v16 = vsel %vm553_vm6, %v4341_v28, %v534_v29  ;;  %636 = vrot.lane.b32.xlu1 %v4350_v3, %s3123_s24 }
 0x177   :  { %v594_v31 = vmul.f32 %v4197_v21, %v564_v16  ;;  %634 = vrot.lane.b32.xlu0 %v4361_v0, %s3123_s24  ;;  %1761 = vmatprep.subr.bf16.mxu0 %v607_v55  ;;  %v4372_v16 = vrot.slane %v3062_v41, %v4355_v5 }
 0x178   :  { %v1099_v29 = vpop.permute.xlu1 %1098 }
 0x179   :  { %v1097_v40 = vpop.permute.xlu0 %1096  ;;  %v606_v7 = vpack.c.bf16 %v598_v38, %v594_v31 }
 0x17a   :  { %551 = vrot.lane.b32.xlu1 %v4324_v13, %s3124_s25 }
 0x17b   :  { %549 = vrot.lane.b32.xlu0 %v4332_v46, %s3124_s25  ;;  %1762 = vmatpush2.bf16.msra.mxu0 %v606_v7  ;;  %v3063_v7 = vld [vmem:[%s6556_s3] sm:$0xff] }
 0x17c   :  { %v4376_v55 = vpop.permute.xlu1 %1106  ;;  %v4393_v41 = vrot.slane %v3063_v7, %v4355_v5 }
 0x17d   :  { %6765 = vst [vmem:[#allocation71_spill] sm:$0xff] %v4376_v55  ;;  %v1123_v38 = vsel %vm464_vm7, %v1099_v29, %v4376_v55  ;;  %v4381_v31 = vpop.permute.xlu0 %1104 }
 0x17e   :  { %6766 = vst [vmem:[#allocation72_spill] sm:$0xff] %v4381_v31  ;;  %v1145_v19 = vmul.f32 %v1123_v38, %v4372_v16  ;;  %v1122_v35 = vsel %vm464_vm7, %v1097_v40, %v4381_v31  ;;  %547 = vrot.lane.b32.xlu1 %v4350_v3, %s3124_s25 }
 0x17f   :  { %v1141_v55 = vmul.f32 %v1122_v35, %v4372_v16  ;;  %545 = vrot.lane.b32.xlu0 %v4361_v0, %s3124_s25  ;;  %v4412_v35 = vld [vmem:[%s6555_s0 + $0x68] sm:$0xff] }
 0x180   :  { %v4398_v38 = vpop.permute.xlu1 %1090 }
 0x181   :  { %6767 = vst [vmem:[#allocation73_spill] sm:$0xff] %v4398_v38  ;;  %v1127_v31 = vsel %vm464_vm7, %v4398_v38, %v1099_v29  ;;  %v4403_v26 = vpop.permute.xlu0 %1088  ;;  %v1153_v47 = vpack.c.bf16 %v1145_v19, %v1141_v55  ;;  %v4420_v19 = vld [vmem:[%s6555_s0 + $0x48] sm:$0xff] }
 0x182   :  { %6768 = vst [vmem:[#allocation74_spill] sm:$0xff] %v4403_v26  ;;  %v1144_v62 = vmul.f32 %v1127_v31, %v4393_v41  ;;  %v1126_v7 = vsel %vm464_vm7, %v4403_v26, %v1097_v40  ;;  %1314 = vrot.lane.b32.xlu1 %v4412_v35, %s3122_s23 }
 0x183   :  { %v1140_v14 = vmul.f32 %v1126_v7, %v4393_v41  ;;  %1312 = vrot.lane.b32.xlu0 %v4420_v19, %s3122_s23  ;;  %1874 = vmatprep.subr.bf16.mxu1 %v1153_v47 }
 0x184   :  { %v532_v29 = vpop.permute.xlu1 %531 }
 0x185   :  { %v530_v40 = vpop.permute.xlu0 %529  ;;  %v1152_v55 = vpack.c.bf16 %v1144_v62, %v1140_v14  ;;  %v4450_v14 = vld [vmem:[%s6555_s0 + $0x40] sm:$0xff] }
 0x186   :  { %1322 = vrot.lane.b32.xlu1 %v3748_v56, %s3122_s23  ;;  %v4442_v56 = vld [vmem:[%s6555_s0 + $0x60] sm:$0xff] }
 0x187   :  { %1320 = vrot.lane.b32.xlu0 %v3753_v63, %s3122_s23  ;;  %1875 = vmatpush2.bf16.msra.mxu1 %v1152_v55 }
 0x188   :  { %v4428_v31 = vpop.permute.xlu1 %539 }
 0x189   :  { %6769 = vst [vmem:[#allocation75_spill] sm:$0xff] %v4428_v31  ;;  %v559_v7 = vsel %vm553_vm6, %v532_v29, %v4428_v31  ;;  %v4433_v26 = vpop.permute.xlu0 %537 }
 0x18a   :  { %6770 = vst [vmem:[#allocation76_spill] sm:$0xff] %v4433_v26  ;;  %v591_v47 = vmul.f32 %v4178_v18, %v559_v7  ;;  %v558_v62 = vsel %vm553_vm6, %v530_v40, %v4433_v26  ;;  %1306 = vrot.lane.b32.xlu1 %v4442_v56, %s3122_s23 }
 0x18b   :  { %v587_v63 = vmul.f32 %v4178_v18, %v558_v62  ;;  %1304 = vrot.lane.b32.xlu0 %v4450_v14, %s3122_s23 }
 0x18c   :  { %v4454_v55 = vpop.permute.xlu1 %523 }
 0x18d   :  { %v563_v7 = vsel %vm553_vm6, %v4454_v55, %v532_v29  ;;  %v4459_v38 = vpop.permute.xlu0 %521  ;;  %v603_v37 = vpack.c.bf16 %v591_v47, %v587_v63  ;;  %v4473_v47 = vld [vmem:[%s6555_s0 + $0x28] sm:$0xff] }
 0x18e   :  { %6771 = vst [vmem:[#allocation77_spill] sm:$0xff] %v4459_v38  ;;  %v590_v39 = vmul.f32 %v4197_v21, %v563_v7  ;;  %v562_v18 = vsel %vm553_vm6, %v4459_v38, %v530_v40  ;;  %462 = vrot.lane.b32.xlu1 %v4324_v13, %s3125_s13  ;;  %v4480_v40 = vld [vmem:[%s6555_s0 + $0x8] sm:$0xff] }
 0x18f   :  { %v586_v62 = vmul.f32 %v4197_v21, %v562_v18  ;;  %460 = vrot.lane.b32.xlu0 %v4332_v46, %s3125_s13  ;;  %1763 = vmatprep.subr.bf16.mxu0 %v603_v37 }
 0x190   :  { %v1095_v2 = vpop.permute.xlu1 %1094 }
 0x191   :  { %v1093_v29 = vpop.permute.xlu0 %1092  ;;  %v602_v8 = vpack.c.bf16 %v590_v39, %v586_v62 }
 0x192   :  { %1310 = vrot.lane.b32.xlu1 %v4473_v47, %s3122_s23 }
 0x193   :  { %1308 = vrot.lane.b32.xlu0 %v4480_v40, %s3122_s23  ;;  %1764 = vmatpush2.bf16.msra.mxu0 %v602_v8 }
 0x194   :  { %v4484_v37 = vpop.permute.xlu1 %1102 }
 0x195   :  { %6772 = vst [vmem:[#allocation78_spill] sm:$0xff] %v4484_v37  ;;  %v1121_v39 = vsel %vm464_vm7, %v1095_v2, %v4484_v37  ;;  %v4489_v21 = vpop.permute.xlu0 %1100 }
 0x196   :  { %6773 = vst [vmem:[#allocation79_spill] sm:$0xff] %v4489_v21  ;;  %v1137_v63 = vmul.f32 %v1121_v39, %v4372_v16  ;;  %v1120_v7 = vsel %vm464_vm7, %v1093_v29, %v4489_v21  ;;  %1318 = vrot.lane.b32.xlu1 %v3830_v15, %s3122_s23 }
 0x197   :  { %v1133_v18 = vmul.f32 %v1120_v7, %v4372_v16  ;;  %1316 = vrot.lane.b32.xlu0 %v3835_v60, %s3122_s23  ;;  %v4514_v7 = vld [vmem:[%s6555_s0 + $0x20] sm:$0xff] }
 0x198   :  { %v4500_v8 = vpop.permute.xlu1 %1086 }
 0x199   :  { %6774 = vst [vmem:[#allocation80_spill] sm:$0xff] %v4500_v8  ;;  %v1125_v62 = vsel %vm464_vm7, %v4500_v8, %v1095_v2  ;;  %v4505_v37 = vpop.permute.xlu0 %1084  ;;  %v1149_v39 = vpack.c.bf16 %v1137_v63, %v1133_v18  ;;  %v4522_v2 = vld [vmem:[%s6555_s0] sm:$0xff]  ;;  %v1081_v63 = vpack.c.bf16 %v4412_v35, %v4420_v19 }
 0x19a   :  { %6775 = vst [vmem:[#allocation81_spill] sm:$0xff] %v4505_v37  ;;  %v1136_v5 = vmul.f32 %v1125_v62, %v4393_v41  ;;  %v1124_v21 = vsel %vm464_vm7, %v4505_v37, %v1093_v29  ;;  %1302 = vrot.lane.b32.xlu1 %v4514_v7, %s3122_s23 }
 0x19b   :  { %v1132_v26 = vmul.f32 %v1124_v21, %v4393_v41  ;;  %1300 = vrot.lane.b32.xlu0 %v4522_v2, %s3122_s23  ;;  %1876 = vmatprep.subr.bf16.mxu1 %v1149_v39  ;;  %v1080_v21 = vpack.c.bf16 %v4442_v56, %v4450_v14  ;;  %v1077_v39 = vpack.c.bf16 %v4473_v47, %v4480_v40 }
 0x19c   :  { %v447_v29 = vpop.permute.xlu1 %446 }
 0x19d   :  { %v445_v18 = vpop.permute.xlu0 %444  ;;  %v1148_v62 = vpack.c.bf16 %v1136_v5, %v1132_v26 }
 0x19e   :  { %458 = vrot.lane.b32.xlu1 %v4350_v3, %s3125_s13 }
 0x19f   :  { %456 = vrot.lane.b32.xlu0 %v4361_v0, %s3125_s13  ;;  %1877 = vmatpush2.bf16.msra.mxu1 %v1148_v62 }
 0x1a0   :  { %v4534_v37 = vpop.permute.xlu1 %454  ;;  %1878 = vmatprep.subr.bf16.mxu1 %v1081_v63 }
 0x1a1   :  { %6776 = vst [vmem:[#allocation82_spill] sm:$0xff] %v4534_v37  ;;  %v472_v26 = vsel %vm464_vm7, %v447_v29, %v4534_v37  ;;  %v4541_v5 = vpop.permute.xlu0 %452  ;;  %v1076_v37 = vpack.c.bf16 %v4514_v7, %v4522_v2 }
 0x1a2   :  { %6777 = vst [vmem:[#allocation83_spill] sm:$0xff] %v4541_v5  ;;  %v510_v8 = vmul.f32 %v4372_v16, %v472_v26  ;;  %v471_v62 = vsel %vm464_vm7, %v445_v18, %v4541_v5  ;;  %1242 = vrot.lane.b32.xlu1 %v4412_v35, %s3123_s24 }
 0x1a3   :  { %v506_v63 = vmul.f32 %v4372_v16, %v471_v62  ;;  %1240 = vrot.lane.b32.xlu0 %v4420_v19, %s3123_s24  ;;  %1879 = vmatpush2.bf16.msra.mxu1 %v1080_v21  ;;  %v4568_v21 = vld [vmem:[%s6555_s0 + $0x70] sm:$0xff] }
 0x1a4   :  { %v4552_v31 = vpop.permute.xlu1 %438  ;;  %1880 = vmatprep.subr.bf16.mxu1 %v1077_v39 }
 0x1a5   :  { %v476_v26 = vsel %vm464_vm7, %v4552_v31, %v447_v29  ;;  %v4559_v5 = vpop.permute.xlu0 %436  ;;  %v518_v38 = vpack.c.bf16 %v510_v8, %v506_v63  ;;  %v4576_v8 = vld [vmem:[%s6555_s0 + $0x50] sm:$0xff] }
 0x1a6   :  { %v509_v35 = vmul.f32 %v4393_v41, %v476_v26  ;;  %v475_v19 = vsel %vm464_vm7, %v4559_v5, %v445_v18  ;;  %1250 = vrot.lane.b32.xlu1 %v4568_v21, %s3123_s24 }
 0x1a7   :  { %v505_v39 = vmul.f32 %v4393_v41, %v475_v19  ;;  %1248 = vrot.lane.b32.xlu0 %v4576_v8, %s3123_s24  ;;  %1765 = vmatprep.subr.bf16.mxu0 %v518_v38 }
 0x1a8   :  { %v443_v29 = vpop.permute.xlu1 %442  ;;  %1881 = vmatpush2.bf16.msra.mxu1 %v1076_v37 }
 0x1a9   :  { %v441_v18 = vpop.permute.xlu0 %440  ;;  %v517_v62 = vpack.c.bf16 %v509_v35, %v505_v39 }
 0x1aa   :  { %1234 = vrot.lane.b32.xlu1 %v4442_v56, %s3123_s24 }
 0x1ab   :  { %1232 = vrot.lane.b32.xlu0 %v4450_v14, %s3123_s24  ;;  %1766 = vmatpush2.bf16.msra.mxu0 %v517_v62 }
 0x1ac   :  { %v4584_v63 = vpop.permute.xlu1 %450 }
 0x1ad   :  { %v470_v26 = vsel %vm464_vm7, %v443_v29, %v4584_v63  ;;  %v4589_v19 = vpop.permute.xlu0 %448 }
 0x1ae   :  { %v502_v38 = vmul.f32 %v4372_v16, %v470_v26  ;;  %v469_v37 = vsel %vm464_vm7, %v441_v18, %v4589_v19  ;;  %1238 = vrot.lane.b32.xlu1 %v4473_v47, %s3123_s24 }
 0x1af   :  { %v498_v56 = vmul.f32 %v4372_v16, %v469_v37  ;;  %1236 = vrot.lane.b32.xlu0 %v4480_v40, %s3123_s24  ;;  %v6649_v16 = vmov 0  }
 0x1b0   :  { %v4600_v14 = vpop.permute.xlu1 %434  ;;  %2832 = vset.pattern.permute.xlu0 %v6649_v16  ;;  %2833 = vset.pattern.permute.xlu1 %v6649_v16  ;;  %v4721_v16 = vld [vmem:[%s6557_s4 + $0x28] ss:$20 sps:$4 sm:$0xff]  }
 0x1b1   :  { %v474_v35 = vsel %vm464_vm7, %v4600_v14, %v443_v29  ;;  %v4605_v39 = vpop.permute.xlu0 %432  ;;  %v514_v62 = vpack.c.bf16 %v502_v38, %v498_v56  ;;  %v3074_v38 = vld [vmem:[%s6554_s1 + $0x68] sm:$0xff]  ;;  %6788 = vst [vmem:[#allocation94_spill] sm:$0xff] %v4721_v16 }
 0x1b2   :  { %6778 = vst [vmem:[#allocation84_spill] sm:$0xff] %v4605_v39  ;;  %v501_v26 = vmul.f32 %v4393_v41, %v474_v35  ;;  %v473_v47 = vsel %vm464_vm7, %v4605_v39, %v441_v18  ;;  %1246 = vrot.lane.b32.xlu1 %v3830_v15, %s3123_s24  ;;  %v3075_v18 = vld [vmem:[%s6554_s1 + $0x48] sm:$0xff]  ;;  %v6797_v39 = vld [vmem:[#allocation13_spill] sm:$0xff] }
 0x1b3   :  { %v497_v40 = vmul.f32 %v4393_v41, %v473_v47  ;;  %1244 = vrot.lane.b32.xlu0 %v3835_v60, %s3123_s24  ;;  %1767 = vmatprep.subr.bf16.mxu0 %v514_v62  ;;  %v429_v37 = vpack.c.bf16 %v3074_v38, %v3075_v18  ;;  %v3076_v60 = vld [vmem:[%s6554_s1 + $0x40] sm:$0xff] }
 0x1b4   :  { %v1011_v29 = vpop.permute.xlu1 %1010  ;;  %v3077_v41 = vld [vmem:[%s6554_s1 + $0x60] sm:$0xff] }
 0x1b5   :  { %v1009_v15 = vpop.permute.xlu0 %1008  ;;  %v513_v56 = vpack.c.bf16 %v501_v26, %v497_v40  ;;  %v428_v35 = vpack.c.bf16 %v3077_v41, %v3076_v60  ;;  %v424_v60 = vpack.c.bf16 %v4119_v54, %v4130_v9  ;;  %v4680_v9 = vld [vmem:[%s6555_s0 + $0x10] sm:$0xff] }
 0x1b6   :  { %1230 = vrot.lane.b32.xlu1 %v4514_v7, %s3123_s24  ;;  %v3078_v7 = vld [vmem:[%s6554_s1 + $0x28] sm:$0xff] }
 0x1b7   :  { %1228 = vrot.lane.b32.xlu0 %v4522_v2, %s3123_s24  ;;  %1768 = vmatpush2.bf16.msra.mxu0 %v513_v56  ;;  %v3079_v2 = vld [vmem:[%s6554_s1 + $0x8] sm:$0xff] }
 0x1b8   :  { %v4634_v62 = vpop.permute.xlu1 %1018  ;;  %1769 = vmatprep.subr.bf16.mxu0 %v429_v37  ;;  %v425_v26 = vpack.c.bf16 %v3078_v7, %v3079_v2 }
 0x1b9   :  { %6779 = vst [vmem:[#allocation85_spill] sm:$0xff] %v4634_v62  ;;  %v1047_v47 = vsel %vm367_vm0, %v1011_v29, %v4634_v62  ;;  %v4645_v40 = vpop.permute.xlu0 %1016 }
 0x1ba   :  { %6780 = vst [vmem:[#allocation86_spill] sm:$0xff] %v4645_v40  ;;  %v1065_v38 = vmul.f32 %v1047_v47, %v3496_v49  ;;  %v1046_v18 = vsel %vm367_vm0, %v1009_v15, %v4645_v40  ;;  %954 = vrot.lane.b32.xlu1 %v4568_v21, %s3120_s17  ;;  %v4741_v40 = vld [vmem:[%s6557_s4 + $0x54] ss:$20 sps:$4 sm:$0xff]  }
 0x1bb   :  { %v1061_v37 = vmul.f32 %v1046_v18, %v3496_v49  ;;  %952 = vrot.lane.b32.xlu0 %v4576_v8, %s3120_s17  ;;  %1770 = vmatpush2.bf16.msra.mxu0 %v428_v35  ;;  %v4672_v35 = vld [vmem:[%s6555_s0 + $0x30] sm:$0xff]  ;;  %6790 = vst [vmem:[#allocation96_spill] sm:$0xff] %v4741_v40 }
 0x1bc   :  { %v4656_v56 = vpop.permute.xlu1 %1034  ;;  %1771 = vmatprep.subr.bf16.mxu0 %v425_v26 }
 0x1bd   :  { %6781 = vst [vmem:[#allocation87_spill] sm:$0xff] %v4656_v56  ;;  %v1051_v41 = vsel %vm367_vm0, %v4656_v56, %v1011_v29  ;;  %v4663_v7 = vpop.permute.xlu0 %1032  ;;  %v1073_v2 = vpack.c.bf16 %v1065_v38, %v1061_v37  ;;  %v4692_v37 = vld [vmem:[%s6557_s4 + $0x2c] ss:$20 sps:$4 sm:$0xff]  }
 0x1be   :  { %6782 = vst [vmem:[#allocation88_spill] sm:$0xff] %v4663_v7  ;;  %v1064_v47 = vmul.f32 %v1051_v41, %v3521_v57  ;;  %v1050_v18 = vsel %vm367_vm0, %v4663_v7, %v1009_v15  ;;  %950 = vrot.lane.b32.xlu1 %v4672_v35, %s3120_s17  ;;  %v4687_v15 = vld [vmem:[%s6557_s4] ss:$20 sps:$4 sm:$0xff]   ;;  %6784 = vst [vmem:[#allocation90_spill] sm:$0xff] %v4692_v37 }
 0x1bf   :  { %v1060_v54 = vmul.f32 %v1050_v18, %v3521_v57  ;;  %948 = vrot.lane.b32.xlu0 %v4680_v9, %s3120_s17  ;;  %1882 = vmatprep.subr.bf16.mxu1 %v1073_v2  ;;  %6783 = vst [vmem:[#allocation89_spill] sm:$0xff] %v4687_v15 }
 0x1c0   :  { %v1007_v29 = vpop.permute.xlu1 %1006  ;;  %1772 = vmatpush2.bf16.msra.mxu0 %v424_v60 }
 0x1c1   :  { %v1005_v26 = vpop.permute.xlu0 %1004  ;;  %v1072_v38 = vpack.c.bf16 %v1064_v47, %v1060_v54 }
 0x1c2   :  { %882 = vrot.lane.b32.xlu1 %v4568_v21, %s3121_s18 }
 0x1c3   :  { %880 = vrot.lane.b32.xlu0 %v4576_v8, %s3121_s18  ;;  %1883 = vmatpush2.bf16.msra.mxu1 %v1072_v38 }
 0x1c4   :  { %v4698_v60 = vpop.permute.xlu1 %1014  ;;  %1774 = vmatmul.mubr.bf16.vlgmr.msra.gmra.mxu0 %v4687_v15 }
 0x1c5   :  { %6785 = vst [vmem:[#allocation91_spill] sm:$0xff] %v4698_v60  ;;  %v1045_v41 = vsel %vm367_vm0, %v1007_v29, %v4698_v60  ;;  %v4704_v2 = vpop.permute.xlu0 %1012  ;;  %1783 = vmatprep.mubr.bf16.mxu0 %v4692_v37  ;;  %v6796_v37 = vld [vmem:[#allocation15_spill] sm:$0xff] }
 0x1c6   :  { %6786 = vst [vmem:[#allocation92_spill] sm:$0xff] %v4704_v2  ;;  %v1057_v47 = vmul.f32 %v1045_v41, %v3496_v49  ;;  %v1044_v18 = vsel %vm367_vm0, %v1005_v26, %v4704_v2  ;;  %878 = vrot.lane.b32.xlu1 %v4672_v35, %s3121_s18  ;;  %v4726_v41 = vld [vmem:[%s6556_s3 + $0x10] sm:$0xff]  ;;  %v4731_v2 = vld [vmem:[%s6556_s3 + $0x18] sm:$0xff] }
 0x1c7   :  { %v1053_v54 = vmul.f32 %v1044_v18, %v3496_v49  ;;  %876 = vrot.lane.b32.xlu0 %v4680_v9, %s3121_s18 }
 0x1c8   :  { %v4716_v38 = vpop.permute.xlu1 %1030 }
 0x1c9   :  { %6787 = vst [vmem:[#allocation93_spill] sm:$0xff] %v4716_v38  ;;  %v1049_v49 = vsel %vm367_vm0, %v4716_v38, %v1007_v29  ;;  %v4736_v18 = vpop.permute.xlu0 %1028  ;;  %v1069_v60 = vpack.c.bf16 %v1057_v47, %v1053_v54  ;;  %v4751_v29 = vrot.slane %v4726_v41, %v3480_v44  ;;  %v4755_v47 = vrot.slane %v4731_v2, %v3480_v44 }
 0x1ca   :  { %6789 = vst [vmem:[#allocation95_spill] sm:$0xff] %v4736_v18  ;;  %v1056_v7 = vmul.f32 %v1049_v49, %v3521_v57  ;;  %v1048_v62 = vsel %vm367_vm0, %v4736_v18, %v1005_v26  ;;  %810 = vrot.lane.b32.xlu1 %v4568_v21, %s3118_s28 }
 0x1cb   :  { %6791 = vst [vmem:[#allocation97_spill] sm:$0xff] %v4751_v29  ;;  %6792 = vst [vmem:[#allocation98_spill] sm:$0xff] %v4755_v47  ;;  %v1052_v54 = vmul.f32 %v1048_v62, %v3521_v57  ;;  %808 = vrot.lane.b32.xlu0 %v4576_v8, %s3118_s28  ;;  %1884 = vmatprep.subr.bf16.mxu1 %v1069_v60 }
 0x1cc   :  { %v358_v49 = vpop.permute.xlu1 %357  ;;  %1784 = vmatmul.mubr.bf16.gmra.mxu0 %v4721_v16 }
 0x1cd   :  { %v371_v26 = vsel %vm367_vm0, %v358_v49, %v3525_v58  ;;  %v375_v18 = vsel %vm367_vm0, %v3500_v50, %v358_v49  ;;  %v356_v38 = vpop.permute.xlu0 %355  ;;  %v1068_v44 = vpack.c.bf16 %v1056_v7, %v1052_v54  ;;  %1793 = vmatprep.mubr.bf16.mxu0 %v4741_v40  ;;  %v4787_v54 = vrot.slane %v4726_v41, %v3540_v53 }
 0x1ce   :  { %v414_v57 = vmul.f32 %v4751_v29, %v375_v18  ;;  %v415_v62 = vmul.f32 %v4755_v47, %v371_v26  ;;  %v370_v60 = vsel %vm367_vm0, %v356_v38, %v3527_v59  ;;  %v374_v58 = vsel %vm367_vm0, %v3502_v51, %v356_v38  ;;  %806 = vrot.lane.b32.xlu1 %v4672_v35, %s3118_s28  ;;  %v2834_v59 = vld [vmem:[%s6557_s4 + $0x8] ss:$20 sps:$4 sm:$0xff]   ;;  %v4796_v38 = vld [vmem:[%s6557_s4 + $0x50] ss:$20 sps:$4 sm:$0xff]  }
 0x1cf   :  { %v410_v50 = vmul.f32 %v4751_v29, %v374_v58  ;;  %v411_v7 = vmul.f32 %v4755_v47, %v370_v60  ;;  %804 = vrot.lane.b32.xlu0 %v4680_v9, %s3118_s28  ;;  %1885 = vmatpush2.bf16.msra.mxu1 %v1068_v44  ;;  %v4791_v51 = vrot.slane %v4731_v2, %v3540_v53  ;;  %v6794_v26 = vld [vmem:[#allocation14_spill] sm:$0xff]  ;;  %v6795_v60 = vld [vmem:[#allocation12_spill] sm:$0xff] }
 0x1d0   :  { %v354_v18 = vpop.permute.xlu1 %353  ;;  %6793 = vst [vmem:[#allocation99_spill] sm:$0xff] %v4796_v38 }
 0x1d1   :  { %v422_v49 = vpack.c.bf16 %v414_v57, %v410_v50  ;;  %v369_v44 = vsel %vm367_vm0, %v354_v18, %v6794_v26  ;;  %v373_v58 = vsel %vm367_vm0, %v6795_v60, %v354_v18  ;;  %v352_v56 = vpop.permute.xlu0 %351  ;;  %v423_v40 = vpack.c.bf16 %v415_v62, %v411_v7  ;;  %v6801_v60 = vld [vmem:[#allocation23_spill] sm:$0xff] }
 0x1d2   :  { %v406_v16 = vmul.f32 %v4751_v29, %v373_v58  ;;  %v407_v53 = vmul.f32 %v4755_v47, %v369_v44  ;;  %v368_v15 = vsel %vm367_vm0, %v352_v56, %v6796_v37  ;;  %v372_v57 = vsel %vm367_vm0, %v6797_v39, %v352_v56  ;;  %729 = vrot.lane.b32.xlu1 %v4324_v13, %s3122_s23  ;;  %v2846_v37 = vld [vmem:[%s6557_s4 + $0x34] ss:$20 sps:$4 sm:$0xff]   ;;  %v4825_v13 = vld [vmem:[%s6557_s4 + $0x7c] ss:$20 sps:$4 sm:$0xff]   ;;  %v6799_v56 = vld [vmem:[#allocation22_spill] sm:$0xff] }
 0x1d3   :  { %v402_v50 = vmul.f32 %v4751_v29, %v372_v57  ;;  %v403_v18 = vmul.f32 %v4755_v47, %v368_v15  ;;  %727 = vrot.lane.b32.xlu0 %v4332_v46, %s3122_s23  ;;  %2080 = vmatprep.subr.bf16.mxu1 %v423_v40  ;;  %6798 = vst [vmem:[#allocation14_spill] sm:$0xff] %v4825_v13  ;;  %v6800_v40 = vld [vmem:[#allocation20_spill] sm:$0xff] }
 0x1d4   :  { %1887 = vmatmul.mubr.bf16.vlgmr.msra.gmra.mxu1 %v2834_v59  ;;  %v269_v62 = vpop.permute.xlu1 %268  ;;  %1794 = vmatmul.mubr.bf16.gmra.mxu0 %v4796_v38 }
 0x1d5   :  { %v418_v39 = vpack.c.bf16 %v406_v16, %v402_v50  ;;  %2081 = vmatpush1.bf16.msra.mxu1 %v422_v49  ;;  %v282_v46 = vsel %vm278_vm1, %v269_v62, %v6799_v56  ;;  %v286_v15 = vsel %vm278_vm1, %v6800_v40, %v269_v62  ;;  %v267_v7 = vpop.permute.xlu0 %266  ;;  %v419_v59 = vpack.c.bf16 %v407_v53, %v403_v18  ;;  %v6802_v16 = vld [vmem:[#allocation21_spill] sm:$0xff]  ;;  %v6803_v18 = vld [vmem:[#allocation24_spill] sm:$0xff]  ;;  %v6805_v40 = vld [vmem:[#allocation31_spill] sm:$0xff] }
 0x1d6   :  { %v325_v26 = vmul.f32 %v4787_v54, %v286_v15  ;;  %v326_v44 = vmul.f32 %v4791_v51, %v282_v46  ;;  %v281_v58 = vsel %vm278_vm1, %v267_v7, %v6801_v60  ;;  %v285_v49 = vsel %vm278_vm1, %v6802_v16, %v267_v7  ;;  %725 = vrot.lane.b32.xlu1 %v4350_v3, %s3122_s23  ;;  %v2848_v3 = vld [vmem:[%s6557_s4 + $0x30] ss:$20 sps:$4 sm:$0xff]   ;;  %v6806_v7 = vld [vmem:[#allocation29_spill] sm:$0xff] }
 0x1d7   :  { %v321_v57 = vmul.f32 %v4787_v54, %v285_v49  ;;  %v322_v50 = vmul.f32 %v4791_v51, %v281_v58  ;;  %723 = vrot.lane.b32.xlu0 %v4361_v0, %s3122_s23  ;;  %2082 = vmatprep.subr.bf16.mxu1 %v419_v59  ;;  %v4849_v62 = vrot.slane %v4726_v41, %v6803_v18  ;;  %v4862_v0 = vld [vmem:[%s6557_s4 + $0x78] ss:$20 sps:$4 sm:$0xff]   ;;  %v6807_v49 = vld [vmem:[#allocation32_spill] sm:$0xff] }
 0x1d8   :  { %v265_v53 = vpop.permute.xlu1 %264  ;;  %v4853_v56 = vrot.slane %v4731_v2, %v6803_v18  ;;  %1896 = vmatprep.mubr.bf16.mxu1 %v2846_v37  ;;  %1803 = vmatprep.mubr.bf16.mxu0 %v4825_v13  ;;  %6804 = vst [vmem:[#allocation12_spill] sm:$0xff] %v4862_v0  ;;  %v6813_v13 = vld [vmem:[#allocation40_spill] sm:$0xff] }
 0x1d9   :  { %v333_v46 = vpack.c.bf16 %v325_v26, %v321_v57  ;;  %2083 = vmatpush1.bf16.msra.mxu1 %v418_v39  ;;  %v280_v15 = vsel %vm278_vm1, %v265_v53, %v6805_v40  ;;  %v284_v37 = vsel %vm278_vm1, %v6806_v7, %v265_v53  ;;  %v263_v59 = vpop.permute.xlu0 %262  ;;  %v334_v60 = vpack.c.bf16 %v326_v44, %v322_v50  ;;  %v6808_v26 = vld [vmem:[#allocation30_spill] sm:$0xff]  ;;  %v4881_v57 = vld [vmem:[%s6555_s0 + $0x78] sm:$0xff] }
 0x1da   :  { %v317_v58 = vmul.f32 %v4787_v54, %v284_v37  ;;  %v318_v16 = vmul.f32 %v4791_v51, %v280_v15  ;;  %v279_v18 = vsel %vm278_vm1, %v263_v59, %v6807_v49  ;;  %v283_v39 = vsel %vm278_vm1, %v6808_v26, %v263_v59  ;;  %1186 = vrot.lane.b32.xlu1 %v4881_v57, %s3124_s25  ;;  %v4890_v53 = vld [vmem:[%s6555_s0 + $0x58] sm:$0xff] }
 0x1db   :  { %v313_v44 = vmul.f32 %v4787_v54, %v283_v39  ;;  %v314_v50 = vmul.f32 %v4791_v51, %v279_v18  ;;  %1184 = vrot.lane.b32.xlu0 %v4890_v53, %s3124_s25  ;;  %2084 = vmatprep.subr.bf16.mxu1 %v334_v60  ;;  %v6809_v40 = vld [vmem:[#allocation41_spill] sm:$0xff]  ;;  %v6811_v18 = vld [vmem:[#allocation39_spill] sm:$0xff] }
 0x1dc   :  { %v4896_v15 = vrot.slane %v4726_v41, %v6809_v40  ;;  %v4900_v7 = vrot.slane %v4731_v2, %v6809_v40  ;;  %v180_v37 = vpop.permute.xlu1 %179  ;;  %1897 = vmatmul.mubr.bf16.gmra.mxu1 %v2848_v3  ;;  %1804 = vmatmul.mubr.bf16.gmra.mxu0 %v4862_v0  ;;  %v2852_v59 = vld [vmem:[%s6557_s4 + $0x5c] ss:$20 sps:$4 sm:$0xff]   ;;  %v4909_v60 = vld [vmem:[%s6557_s4 + $0xa4] ss:$20 sps:$4 sm:$0xff]  }
 0x1dd   :  { %6810 = vst [vmem:[#allocation15_spill] sm:$0xff] %v4909_v60  ;;  %v329_v49 = vpack.c.bf16 %v317_v58, %v313_v44  ;;  %2085 = vmatpush1.bf16.msra.mxu1 %v333_v46  ;;  %v193_v26 = vsel %vm189_vm2, %v180_v37, %v6811_v18  ;;  %v6812_v39 = vld [vmem:[#allocation37_spill] sm:$0xff]  ;;  %v178_v40 = vpop.permute.xlu0 %177  ;;  %v330_v47 = vpack.c.bf16 %v318_v16, %v314_v50  ;;  %v6814_v58 = vld [vmem:[#allocation38_spill] sm:$0xff] }
 0x1de   :  { %v197_v3 = vsel %vm189_vm2, %v6812_v39, %v180_v37  ;;  %v237_v0 = vmul.f32 %v4853_v56, %v193_v26  ;;  %v192_v38 = vsel %vm189_vm2, %v178_v40, %v6813_v13  ;;  %v196_v46 = vsel %vm189_vm2, %v6814_v58, %v178_v40  ;;  %1182 = vrot.lane.b32.xlu1 %v4224_v20, %s3124_s25  ;;  %v6815_v44 = vld [vmem:[#allocation6_spill] sm:$0xff]  ;;  %v6817_v13 = vld [vmem:[#allocation7_spill] sm:$0xff] }
 0x1df   :  { %v236_v29 = vmul.f32 %v4849_v62, %v197_v3  ;;  %v6816_v18 = vld [vmem:[#allocation2_spill] sm:$0xff]  ;;  %v232_v50 = vmul.f32 %v4849_v62, %v196_v46  ;;  %v233_v37 = vmul.f32 %v4853_v56, %v192_v38  ;;  %1180 = vrot.lane.b32.xlu0 %v4231_v24, %s3124_s25  ;;  %2086 = vmatprep.subr.bf16.mxu1 %v330_v47  ;;  %v6818_v26 = vld [vmem:[#allocation3_spill] sm:$0xff] }
 0x1e0   :  { %v108_v16 = vsel %vm100_vm3, %v6816_v18, %v6815_v44  ;;  %v107_v39 = vsel %vm100_vm3, %v6818_v26, %v6817_v13  ;;  %v104_v3 = vsel %vm100_vm3, %v6815_v44, %v4011_v36  ;;  %v103_v40 = vsel %vm100_vm3, %v6817_v13, %v4019_v34  ;;  %v176_v38 = vpop.permute.xlu1 %175  ;;  %1906 = vmatprep.mubr.bf16.mxu1 %v2852_v59  ;;  %v2854_v47 = vld [vmem:[%s6557_s4 + $0x58] ss:$20 sps:$4 sm:$0xff]   ;;  %v4954_v58 = vld [vmem:[%s6557_s4 + $0xa0] ss:$20 sps:$4 sm:$0xff]  }
 0x1e1   :  { %1813 = vmatprep.mubr.bf16.mxu0 %v4909_v60  ;;  %v244_v46 = vpack.c.bf16 %v236_v29, %v232_v50  ;;  %2087 = vmatpush1.bf16.msra.mxu1 %v329_v49  ;;  %v191_v36 = vsel %vm189_vm2, %v176_v38, %v3949_v12  ;;  %v6819_v34 = vld [vmem:[#allocation46_spill] sm:$0xff]  ;;  %v174_v44 = vpop.permute.xlu0 %173  ;;  %v245_v18 = vpack.c.bf16 %v237_v0, %v233_v37  ;;  %v6820_v29 = vld [vmem:[#allocation47_spill] sm:$0xff]  ;;  %v6821_v12 = vld [vmem:[#allocation4_spill] sm:$0xff] }
 0x1e2   :  { %v195_v59 = vsel %vm189_vm2, %v6819_v34, %v176_v38  ;;  %v229_v26 = vmul.f32 %v4853_v56, %v191_v36  ;;  %v190_v60 = vsel %vm189_vm2, %v174_v44, %v3954_v27  ;;  %v194_v49 = vsel %vm189_vm2, %v6820_v29, %v174_v44  ;;  %1114 = vrot.lane.b32.xlu1 %v4881_v57, %s3125_s13  ;;  %v6822_v27 = vld [vmem:[#allocation5_spill] sm:$0xff] }
 0x1e3   :  { %v228_v13 = vmul.f32 %v4849_v62, %v195_v59  ;;  %v102_v0 = vsel %vm100_vm3, %v6821_v12, %v3473_v42  ;;  %v224_v50 = vmul.f32 %v4849_v62, %v194_v49  ;;  %v225_v37 = vmul.f32 %v4853_v56, %v190_v60  ;;  %1112 = vrot.lane.b32.xlu0 %v4890_v53, %s3125_s13  ;;  %v2858_v42 = vld [vmem:[%s6557_s4 + $0x84] ss:$20 sps:$4 sm:$0xff]   ;;  %v4993_v60 = vld [vmem:[%s6557_s4 + $0xcc] ss:$20 sps:$4 sm:$0xff]  }
 0x1e4   :  { %2088 = vmatprep.subr.bf16.mxu1 %v245_v18  ;;  %v101_v38 = vsel %vm100_vm3, %v6822_v27, %v3475_v43  ;;  %v148_v36 = vmul.f32 %v4900_v7, %v104_v3  ;;  %v144_v34 = vmul.f32 %v4900_v7, %v103_v40  ;;  %v641_v59 = vpop.permute.xlu1 %640  ;;  %1907 = vmatmul.mubr.bf16.gmra.mxu1 %v2854_v47  ;;  %v2860_v49 = vld [vmem:[%s6557_s4 + $0x80] ss:$20 sps:$4 sm:$0xff]  }
 0x1e5   :  { %1814 = vmatmul.mubr.bf16.gmra.mxu0 %v4954_v58  ;;  %v240_v44 = vpack.c.bf16 %v228_v13, %v224_v50  ;;  %2089 = vmatpush1.bf16.msra.mxu1 %v244_v46  ;;  %v639_v43 = vpop.permute.xlu0 %638  ;;  %v241_v18 = vpack.c.bf16 %v229_v26, %v225_v37  ;;  %v106_v3 = vsel %vm100_vm3, %v3439_v32, %v6821_v12  ;;  %v5028_v12 = vld [vmem:[%s6557_s4 + $0xc8] ss:$20 sps:$4 sm:$0xff]  }
 0x1e6   :  { %v105_v40 = vsel %vm100_vm3, %v3441_v33, %v6822_v27  ;;  %v147_v47 = vmul.f32 %v4896_v15, %v108_v16  ;;  %v143_v29 = vmul.f32 %v4896_v15, %v107_v39  ;;  %1110 = vrot.lane.b32.xlu1 %v4224_v20, %s3125_s13  ;;  %v140_v46 = vmul.f32 %v4900_v7, %v102_v0 }
 0x1e7   :  { %v136_v13 = vmul.f32 %v4900_v7, %v101_v38  ;;  %v5011_v26 = vrot.slane %v4731_v2, %v4111_v4  ;;  %1108 = vrot.lane.b32.xlu0 %v4231_v24, %s3125_s13  ;;  %2090 = vmatprep.subr.bf16.mxu1 %v241_v18  ;;  %v658_v32 = vsel %vm642_vm5, %v641_v59, %v4154_v61 }
 0x1e8   :  { %v657_v33 = vsel %vm642_vm5, %v639_v43, %v4159_v6  ;;  %v637_v16 = vpop.permute.xlu1 %636  ;;  %v156_v39 = vpack.c.bf16 %v148_v36, %v144_v34  ;;  %1916 = vmatprep.mubr.bf16.mxu1 %v2858_v42  ;;  %1823 = vmatprep.mubr.bf16.mxu0 %v4993_v60  ;;  %v139_v61 = vmul.f32 %v4896_v15, %v106_v3 }
 0x1e9   :  { %2091 = vmatpush1.bf16.msra.mxu1 %v240_v44  ;;  %v635_v0 = vpop.permute.xlu0 %634  ;;  %v135_v6 = vmul.f32 %v4896_v15, %v105_v40  ;;  %v155_v50 = vpack.c.bf16 %v147_v47, %v143_v29  ;;  %v5034_v37 = vrot.slane %v4726_v41, %v4111_v4  ;;  %v646_v27 = vsel %vm642_vm5, %v4134_v30, %v641_v59  ;;  %v2864_v30 = vld [vmem:[%s6557_s4 + $0xac] ss:$20 sps:$4 sm:$0xff]  }
 0x1ea   :  { %2092 = vmatprep.subr.bf16.mxu1 %v156_v39  ;;  %v690_v38 = vmul.f32 %v5011_v26, %v658_v32  ;;  %v645_v36 = vsel %vm642_vm5, %v4139_v10, %v639_v43  ;;  %v686_v34 = vmul.f32 %v5011_v26, %v657_v33  ;;  %1330 = vrot.lane.b32.xlu1 %v4881_v57, %s3122_s23  ;;  %v5055_v10 = vld [vmem:[%s6557_s4 + $0xf4] ss:$20 sps:$4 sm:$0xff]  }
 0x1eb   :  { %1328 = vrot.lane.b32.xlu0 %v4890_v53, %s3122_s23  ;;  %v152_v42 = vpack.c.bf16 %v140_v46, %v136_v13  ;;  %v656_v59 = vsel %vm642_vm5, %v637_v16, %v4255_v23  ;;  %v655_v44 = vsel %vm642_vm5, %v635_v0, %v4260_v11  ;;  %v151_v18 = vpack.c.bf16 %v139_v61, %v135_v6  ;;  %v2866_v32 = vld [vmem:[%s6557_s4 + $0xa8] ss:$20 sps:$4 sm:$0xff]  }
 0x1ec   :  { %v552_v4 = vpop.permute.xlu1 %551  ;;  %1917 = vmatmul.mubr.bf16.gmra.mxu1 %v2860_v49  ;;  %v689_v3 = vmul.f32 %v5034_v37, %v646_v27  ;;  %v685_v40 = vmul.f32 %v5034_v37, %v645_v36  ;;  %v644_v47 = vsel %vm642_vm5, %v4235_v25, %v637_v16  ;;  %v5070_v29 = vrot.slane %v4731_v2, %v4168_v17  ;;  %v2870_v16 = vld [vmem:[%s6557_s4 + $0xd4] ss:$20 sps:$4 sm:$0xff]  }
 0x1ed   :  { %1824 = vmatmul.mubr.bf16.gmra.mxu0 %v5028_v12  ;;  %2093 = vmatpush1.bf16.msra.mxu1 %v155_v50  ;;  %v550_v43 = vpop.permute.xlu0 %549  ;;  %v698_v23 = vpack.c.bf16 %v690_v38, %v686_v34  ;;  %v682_v11 = vmul.f32 %v5011_v26, %v656_v59  ;;  %v643_v46 = vsel %vm642_vm5, %v4240_v48, %v635_v0  ;;  %v6825_v59 = vld [vmem:[#allocation76_spill] sm:$0xff] }
 0x1ee   :  { %2094 = vmatprep.subr.bf16.mxu1 %v152_v42  ;;  %1326 = vrot.lane.b32.xlu1 %v4224_v20, %s3122_s23  ;;  %v678_v13 = vmul.f32 %v5011_v26, %v655_v44  ;;  %v5088_v20 = vld [vmem:[%s6557_s4 + $0xf0] ss:$20 sps:$4 sm:$0xff]   ;;  %v568_v48 = vsel %vm553_vm6, %v550_v43, %v4341_v28  ;;  %v697_v39 = vpack.c.bf16 %v689_v3, %v685_v40  ;;  %v6824_v42 = vld [vmem:[#allocation75_spill] sm:$0xff] }
 0x1ef   :  { %1324 = vrot.lane.b32.xlu0 %v4231_v24, %s3122_s23  ;;  %1926 = vmatprep.mubr.bf16.mxu1 %v2864_v30  ;;  %v569_v24 = vsel %vm553_vm6, %v552_v4, %v4336_v52  ;;  %v681_v49 = vmul.f32 %v5034_v37, %v644_v47  ;;  %v5102_v61 = vrot.slane %v4726_v41, %v4168_v17  ;;  %v5107_v52 = vld [vmem:[%s6557_s4 + $0x11c] ss:$20 sps:$4 sm:$0xff]  }
 0x1f0   :  { %v548_v25 = vpop.permute.xlu1 %547  ;;  %1833 = vmatprep.mubr.bf16.mxu0 %v5055_v10  ;;  %v677_v28 = vmul.f32 %v5034_v37, %v643_v46  ;;  %v557_v0 = vsel %vm553_vm6, %v4307_v1, %v552_v4  ;;  %v556_v6 = vsel %vm553_vm6, %v4315_v22, %v550_v43  ;;  %v601_v17 = vmul.f32 %v5070_v29, %v569_v24  ;;  %v6823_v22 = vld [vmem:[#allocation77_spill] sm:$0xff]  ;;  %v2872_v40 = vld [vmem:[%s6557_s4 + $0xd0] ss:$20 sps:$4 sm:$0xff]   ;;  %v5165_v46 = vld [vmem:[%s6556_s3 + $0x28] ss:$0 sm:$0xff] }
 0x1f1   :  { %2095 = vmatpush1.bf16.msra.mxu1 %v151_v18  ;;  %v546_v33 = vpop.permute.xlu0 %545  ;;  %v597_v50 = vmul.f32 %v5070_v29, %v568_v48  ;;  %v694_v38 = vpack.c.bf16 %v682_v11, %v678_v13  ;;  %v567_v1 = vsel %vm553_vm6, %v548_v25, %v4454_v55  ;;  %v596_v34 = vmul.f32 %v5102_v61, %v556_v6 }
 0x1f2   :  { %2096 = vmatprep.subr.bf16.mxu1 %v698_v23  ;;  %1026 = vrot.lane.b32.xlu1 %v4568_v21, %s3119_s8  ;;  %v566_v21 = vsel %vm553_vm6, %v546_v33, %v6823_v22  ;;  %v693_v4 = vpack.c.bf16 %v681_v49, %v677_v28  ;;  %v555_v30 = vsel %vm553_vm6, %v6824_v42, %v548_v25  ;;  %v2876_v23 = vld [vmem:[%s6557_s4 + $0xfc] ss:$20 sps:$4 sm:$0xff]  }
 0x1f3   :  { %1024 = vrot.lane.b32.xlu0 %v4576_v8, %s3119_s8  ;;  %v600_v8 = vmul.f32 %v5102_v61, %v557_v0  ;;  %v593_v55 = vmul.f32 %v5070_v29, %v567_v1  ;;  %v554_v44 = vsel %vm553_vm6, %v6825_v59, %v546_v33  ;;  %v589_v43 = vmul.f32 %v5070_v29, %v566_v21  ;;  %v6826_v0 = vld [vmem:[#allocation70_spill] sm:$0xff]  ;;  %v5208_v1 = vld [vmem:[%s6555_s0 + $0x38] sm:$0xff] }
 0x1f4   :  { %v1315_v27 = vpop.permute.xlu1 %1314  ;;  %1927 = vmatmul.mubr.bf16.gmra.mxu1 %v2866_v32  ;;  %v609_v3 = vpack.c.bf16 %v601_v17, %v597_v50  ;;  %v592_v32 = vmul.f32 %v5102_v61, %v555_v30  ;;  %v588_v24 = vmul.f32 %v5102_v61, %v554_v44  ;;  %v5201_v50 = vrot.slane %v4731_v2, %v6826_v0  ;;  %v5215_v22 = vld [vmem:[%s6555_s0 + $0x18] sm:$0xff]  ;;  %v1420_v59 = vld [vmem:[%s6558_s5] sm:$0xff] }
 0x1f5   :  { %1834 = vmatmul.mubr.bf16.gmra.mxu0 %v5088_v20  ;;  %2097 = vmatpush2.bf16.msra.mxu1 %v697_v39  ;;  %v1313_v36 = vpop.permute.xlu0 %1312  ;;  %v608_v11 = vpack.c.bf16 %v600_v8, %v596_v34  ;;  %v2878_v21 = vld [vmem:[%s6557_s4 + $0xf8] ss:$20 sps:$4 sm:$0xff]   ;;  %v6828_v34 = vld [vmem:[#allocation82_spill] sm:$0xff] }
 0x1f6   :  { %1936 = vmatprep.mubr.bf16.mxu1 %v2870_v16  ;;  %2098 = vmatprep.subr.bf16.mxu1 %v694_v38  ;;  %v605_v16 = vpack.c.bf16 %v593_v55, %v589_v43  ;;  %v2879_v55 = vld [vmem:[%s6557_s4 + $0x124] ss:$20 sps:$4 sm:$0xff]  }
 0x1f7   :  { %1843 = vmatprep.mubr.bf16.mxu0 %v5107_v52  ;;  %1258 = vrot.lane.b32.xlu1 %v4881_v57, %s3123_s24  ;;  %v5152_v57 = vld [vmem:[%s6557_s4 + $0x118] ss:$20 sps:$4 sm:$0xff]  }
 0x1f8   :  { %1256 = vrot.lane.b32.xlu0 %v4890_v53, %s3123_s24  ;;  %v5144_v18 = vpop.permute.xlu1 %1322 }
 0x1f9   :  { %2099 = vmatpush2.bf16.msra.mxu1 %v693_v4  ;;  %v1339_v53 = vsel %vm731_vm4, %v1315_v27, %v5144_v18  ;;  %v5157_v47 = vpop.permute.xlu0 %1320 }
 0x1fa   :  { %v1361_v13 = vmul.f32 %v5165_v46, %v1339_v53  ;;  %v1338_v25 = vsel %vm731_vm4, %v1313_v36, %v5157_v47  ;;  %2100 = vmatprep.subr.bf16.mxu1 %v609_v3  ;;  %v6829_v3 = vld [vmem:[#allocation83_spill] sm:$0xff] }
 0x1fb   :  { %v1357_v48 = vmul.f32 %v5165_v46, %v1338_v25  ;;  %1022 = vrot.lane.b32.xlu1 %v4672_v35, %s3119_s8  ;;  %v5188_v35 = vrot.slane %v4726_v41, %v6826_v0  ;;  %v604_v41 = vpack.c.bf16 %v592_v32, %v588_v24 }
 0x1fc   :  { %1020 = vrot.lane.b32.xlu0 %v4680_v9, %s3119_s8  ;;  %v5178_v33 = vpop.permute.xlu1 %1306  ;;  %1937 = vmatmul.mubr.bf16.gmra.mxu1 %v2872_v40  ;;  %v5193_v9 = vld [vmem:[%s6556_s3 + $0x20] ss:$0 sm:$0xff] }
 0x1fd   :  { %1844 = vmatmul.mubr.bf16.gmra.mxu0 %v5152_v57  ;;  %2101 = vmatpush2.bf16.msra.mxu1 %v608_v11  ;;  %v1343_v39 = vsel %vm731_vm4, %v5178_v33, %v1315_v27  ;;  %v5184_v49 = vpop.permute.xlu0 %1304  ;;  %v1369_v28 = vpack.c.bf16 %v1361_v13, %v1357_v48  ;;  %v6827_v27 = vmov 0   ;;  %v1422_v13 = vld [vmem:[%s6558_s5 + $0x10] sm:$0xff] }
 0x1fe   :  { %1946 = vmatprep.mubr.bf16.mxu1 %v2876_v23  ;;  %v1360_v6 = vmul.f32 %v5193_v9, %v1343_v39  ;;  %v1342_v17 = vsel %vm731_vm4, %v5184_v49, %v1313_v36  ;;  %2102 = vmatprep.subr.bf16.mxu1 %v605_v16  ;;  %v1421_v36 = vld [vmem:[%s6558_s5 + $0x8] sm:$0xff]  ;;  %v5258_v16 = vld [vmem:[%s6557_s4 + $0x120] ss:$20 sps:$4 sm:$0xff]  }
 0x1ff   :  { %1999 = vmatprep.mubr.bf16.mxu0 %v6827_v27  ;;  %v1356_v38 = vmul.f32 %v5193_v9, %v1342_v17  ;;  %1254 = vrot.lane.b32.xlu1 %v5208_v1, %s3123_s24  ;;  %v1424_v39 = vld [vmem:[%s6558_s5 + $0x20] sm:$0xff] }
 0x200   :  { %1252 = vrot.lane.b32.xlu0 %v5215_v22, %s3123_s24  ;;  %1975 = vmatprep.subr.bf16.mxu0 %v1369_v28  ;;  %v463_v2 = vpop.permute.xlu1 %462 }
 0x201   :  { %v1368_v8 = vpack.c.bf16 %v1360_v6, %v1356_v38  ;;  %2103 = vmatpush2.bf16.msra.mxu1 %v604_v41  ;;  %v468_v4 = vsel %vm464_vm7, %v6828_v34, %v463_v2  ;;  %v480_v42 = vsel %vm464_vm7, %v463_v2, %v4552_v31  ;;  %v461_v30 = vpop.permute.xlu0 %460  ;;  %v1425_v6 = vld [vmem:[%s6558_s5 + $0x28] sm:$0xff] }
 0x202   :  { %v511_v44 = vmul.f32 %v5188_v35, %v468_v4  ;;  %v512_v43 = vmul.f32 %v5201_v50, %v480_v42  ;;  %v467_v40 = vsel %vm464_vm7, %v6829_v3, %v461_v30  ;;  %v479_v31 = vsel %vm464_vm7, %v461_v30, %v4559_v5  ;;  %v1423_v5 = vld [vmem:[%s6558_s5 + $0x18] sm:$0xff] }
 0x203   :  { %v507_v53 = vmul.f32 %v5188_v35, %v467_v40  ;;  %v508_v23 = vmul.f32 %v5201_v50, %v479_v31  ;;  %1976 = vmatpush1.bf16.msra.mxu0 %v1368_v8  ;;  %1443 = vperm.xlu1 %2833, %v1421_v36   ;;  %v1427_v4 = vld [vmem:[%s6558_s5 + $0x38] sm:$0xff] }
 0x204   :  { %v1311_v11 = vpop.permute.xlu1 %1310  ;;  %1947 = vmatmul.mubr.bf16.gmra.mxu1 %v2878_v21  ;;  %1438 = vperm.xlu0 %2832, %v1420_v59   ;;  %v1426_v21 = vld [vmem:[%s6558_s5 + $0x30] sm:$0xff] }
 0x205   :  { %v519_v25 = vpack.c.bf16 %v511_v44, %v507_v53  ;;  %v1309_v32 = vpop.permute.xlu0 %1308  ;;  %v520_v24 = vpack.c.bf16 %v512_v43, %v508_v23  ;;  %1956 = vmatprep.mubr.bf16.mxu1 %v2879_v55  ;;  %v1432_v44 = vld [vmem:[%s6558_s5 + $0x60] sm:$0xff] }
 0x207   :  { %2104 = vmatprep.subr.bf16.mxu1 %v520_v24  ;;  %1448 = vperm.xlu1 %2833, %v1422_v13   ;;  %v6830_v13 = vld [vmem:[#allocation84_spill] sm:$0xff] }
 0x208   :  { %2105 = vmatpush2.bf16.msra.mxu1 %v519_v25  ;;  %v5253_v48 = vpop.permute.xlu1 %1318  ;;  %1453 = vperm.xlu0 %2832, %v1423_v5   ;;  %v1434_v24 = vld [vmem:[%s6558_s5 + $0x70] sm:$0xff] }
 0x209   :  { %v1337_v28 = vsel %vm731_vm4, %v1311_v11, %v5253_v48  ;;  %v5266_v0 = vpop.permute.xlu0 %1316 }
 0x20a   :  { %v1353_v17 = vmul.f32 %v5165_v46, %v1337_v28  ;;  %v1336_v41 = vsel %vm731_vm4, %v1309_v32, %v5266_v0 }
 0x20b   :  { %v1349_v38 = vmul.f32 %v5165_v46, %v1336_v41  ;;  %1458 = vperm.xlu1 %2833, %v1424_v39   ;;  %v3088_v46 = vld [vmem:[%s6557_s4 + $0x4] ss:$20 sps:$4 sm:$0xff]  }
 0x20c   :  { %v5276_v2 = vpop.permute.xlu1 %1302  ;;  %1957 = vmatmul.mubr.bf16.gmra.mxu1 %v5258_v16  ;;  %1463 = vperm.xlu0 %2832, %v1425_v6   ;;  %v3090_v6 = vld [vmem:[%s6554_s1 + $0x58] sm:$0xff] }
 0x20d   :  { %v1341_v36 = vsel %vm731_vm4, %v5276_v2, %v1311_v11  ;;  %v5285_v8 = vpop.permute.xlu0 %1300  ;;  %v1365_v34 = vpack.c.bf16 %v1353_v17, %v1349_v38  ;;  %2112 = vmatprep.mubr.bf16.mxu1 %v3088_v46  ;;  %v1435_v41 = vld [vmem:[%s6558_s5 + $0x78] sm:$0xff]  ;;  %v1428_v46 = vld [vmem:[%s6558_s5 + $0x40] sm:$0xff] }
 0x20e   :  { %v1352_v42 = vmul.f32 %v5193_v9, %v1341_v36  ;;  %v1340_v30 = vsel %vm731_vm4, %v5285_v8, %v1309_v32  ;;  %v3092_v36 = vld [vmem:[%s6554_s1 + $0x50] sm:$0xff] }
 0x20f   :  { %v1348_v55 = vmul.f32 %v5193_v9, %v1340_v30  ;;  %1977 = vmatprep.subr.bf16.mxu0 %v1365_v34  ;;  %1468 = vperm.xlu1 %2833, %v1426_v21   ;;  %v1433_v9 = vld [vmem:[%s6558_s5 + $0x68] sm:$0xff]  ;;  %v3091_v21 = vld [vmem:[%s6554_s1 + $0x70] sm:$0xff]  ;;  %v3093_v30 = vld [vmem:[%s6554_s1 + $0x38] sm:$0xff] }
 0x210   :  { %v459_v59 = vpop.permute.xlu1 %458  ;;  %1473 = vperm.xlu0 %2832, %v1427_v4   ;;  %v430_v34 = vpack.c.bf16 %v3091_v21, %v3092_v36  ;;  %v6833_v21 = vld [vmem:[#allocation89_spill] sm:$0xff] }
 0x211   :  { %v1364_v43 = vpack.c.bf16 %v1352_v42, %v1348_v55  ;;  %v466_v3 = vsel %vm464_vm7, %v4584_v63, %v459_v59  ;;  %v478_v40 = vsel %vm464_vm7, %v459_v59, %v4600_v14  ;;  %v457_v31 = vpop.permute.xlu0 %456  ;;  %v3094_v55 = vld [vmem:[%s6554_s1 + $0x18] sm:$0xff] }
 0x212   :  { %v503_v53 = vmul.f32 %v5188_v35, %v466_v3  ;;  %v504_v23 = vmul.f32 %v5201_v50, %v478_v40  ;;  %v465_v11 = vsel %vm464_vm7, %v4589_v19, %v457_v31  ;;  %v477_v63 = vsel %vm464_vm7, %v457_v31, %v6830_v13  ;;  %v3089_v19 = vld [vmem:[%s6554_s1 + $0x78] sm:$0xff]  ;;  %v1430_v13 = vld [vmem:[%s6558_s5 + $0x50] sm:$0xff] }
 0x213   :  { %v499_v25 = vmul.f32 %v5188_v35, %v465_v11  ;;  %v500_v14 = vmul.f32 %v5201_v50, %v477_v63  ;;  %1978 = vmatpush1.bf16.msra.mxu0 %v1364_v43  ;;  %1498 = vperm.xlu1 %2833, %v1432_v44   ;;  %v431_v17 = vpack.c.bf16 %v3089_v19, %v3090_v6  ;;  %v1429_v44 = vld [vmem:[%s6558_s5 + $0x48] sm:$0xff]  ;;  %v6831_v43 = vld [vmem:[#allocation60_spill] sm:$0xff] }
 0x214   :  { %v1243_v32 = vpop.permute.xlu1 %1242  ;;  %1503 = vperm.xlu0 %2832, %v1433_v9   ;;  %v427_v59 = vpack.c.bf16 %v3093_v30, %v3094_v55 }
 0x215   :  { %v515_v5 = vpack.c.bf16 %v503_v53, %v499_v25  ;;  %v1241_v39 = vpop.permute.xlu0 %1240  ;;  %v516_v28 = vpack.c.bf16 %v504_v23, %v500_v14  ;;  %v3095_v53 = vld [vmem:[%s6554_s1 + $0x30] sm:$0xff] }
 0x216   :  { %v3096_v23 = vld [vmem:[%s6554_s1 + $0x10] sm:$0xff] }
 0x217   :  { %2106 = vmatprep.subr.bf16.mxu1 %v516_v28  ;;  %1508 = vperm.xlu1 %2833, %v1434_v24   ;;  %v426_v11 = vpack.c.bf16 %v3095_v53, %v3096_v23  ;;  %v1431_v24 = vld [vmem:[%s6558_s5 + $0x58] sm:$0xff] }
 0x218   :  { %2107 = vmatpush2.bf16.msra.mxu1 %v515_v5  ;;  %v5332_v38 = vpop.permute.xlu1 %1250  ;;  %1513 = vperm.xlu0 %2832, %v1435_v41   ;;  %v6832_v5 = vld [vmem:[#allocation61_spill] sm:$0xff] }
 0x219   :  { %v1267_v4 = vsel %vm642_vm5, %v1243_v32, %v5332_v38  ;;  %v5346_v42 = vpop.permute.xlu0 %1248  ;;  %2108 = vmatprep.subr.bf16.mxu1 %v431_v17 }
 0x21a   :  { %v1289_v3 = vmul.f32 %v1267_v4, %v6831_v43  ;;  %v1266_v40 = vsel %vm642_vm5, %v1241_v39, %v5346_v42 }
 0x21b   :  { %v1285_v31 = vmul.f32 %v1266_v40, %v6831_v43  ;;  %1478 = vperm.xlu1 %2833, %v1428_v46  }
 0x21c   :  { %v5362_v9 = vpop.permute.xlu1 %1234  ;;  %2109 = vmatpush2.bf16.msra.mxu1 %v430_v34  ;;  %1483 = vperm.xlu0 %2832, %v1429_v44   ;;  %v6834_v34 = vld [vmem:[#allocation90_spill] sm:$0xff] }
 0x21d   :  { %v1271_v63 = vsel %vm642_vm5, %v5362_v9, %v1243_v32  ;;  %v5376_v25 = vpop.permute.xlu0 %1232  ;;  %v1297_v14 = vpack.c.bf16 %v1289_v3, %v1285_v31  ;;  %2110 = vmatprep.subr.bf16.mxu1 %v427_v59 }
 0x21e   :  { %v1288_v28 = vmul.f32 %v1271_v63, %v6832_v5  ;;  %v1270_v19 = vsel %vm642_vm5, %v5376_v25, %v1241_v39 }
 0x21f   :  { %v1284_v6 = vmul.f32 %v1270_v19, %v6832_v5  ;;  %1979 = vmatprep.subr.bf16.mxu0 %v1297_v14  ;;  %1488 = vperm.xlu1 %2833, %v1430_v13   ;;  %v6836_v13 = vld [vmem:[#allocation96_spill] sm:$0xff]  ;;  %v6837_v14 = vld [vmem:[#allocation10_spill] sm:$0xff] }
 0x220   :  { %v1239_v17 = vpop.permute.xlu1 %1238  ;;  %2111 = vmatpush2.bf16.msra.mxu1 %v426_v11  ;;  %1493 = vperm.xlu0 %2832, %v1431_v24   ;;  %v6835_v11 = vld [vmem:[#allocation94_spill] sm:$0xff] }
 0x221   :  { %v1296_v32 = vpack.c.bf16 %v1288_v28, %v1284_v6  ;;  %v1237_v41 = vpop.permute.xlu0 %1236  ;;  %v6838_v28 = vld [vmem:[#allocation8_spill] sm:$0xff] }
 0x223   :  { %1980 = vmatpush1.bf16.msra.mxu0 %v1296_v32  ;;  %2113 = vmatmul.mubr.bf16.vlgmr.msra.gmra.mxu1 %v6833_v21  ;;  %v6839_v32 = vld [vmem:[#allocation11_spill] sm:$0xff]  ;;  %v6840_v21 = vld [vmem:[#allocation9_spill] sm:$0xff] }
 0x224   :  { %v5387_v36 = vpop.permute.xlu1 %1246  ;;  %2122 = vmatprep.mubr.bf16.mxu1 %v6834_v34 }
 0x225   :  { %v1265_v39 = vsel %vm642_vm5, %v1239_v17, %v5387_v36  ;;  %v5393_v46 = vpop.permute.xlu0 %1244 }
 0x226   :  { %v1281_v4 = vmul.f32 %v1265_v39, %v6831_v43  ;;  %v1264_v30 = vsel %vm642_vm5, %v1237_v41, %v5393_v46  ;;  %v5431_v39 = vld [vmem:[%s6557_s4 + $0x10] ss:$20 sps:$4 sm:$0xff]  }
 0x227   :  { %v1277_v55 = vmul.f32 %v1264_v30, %v6831_v43 }
 0x228   :  { %v5400_v59 = vpop.permute.xlu1 %1230 }
 0x229   :  { %v1269_v44 = vsel %vm642_vm5, %v5400_v59, %v1239_v17  ;;  %v5405_v3 = vpop.permute.xlu0 %1228  ;;  %v1293_v40 = vpack.c.bf16 %v1281_v4, %v1277_v55 }
 0x22a   :  { %v1280_v31 = vmul.f32 %v1269_v44, %v6832_v5  ;;  %v1268_v53 = vsel %vm642_vm5, %v5405_v3, %v1237_v41 }
 0x22b   :  { %v1276_v23 = vmul.f32 %v1268_v53, %v6832_v5  ;;  %1981 = vmatprep.subr.bf16.mxu0 %v1293_v40  ;;  %2123 = vmatmul.mubr.bf16.gmra.mxu1 %v6835_v11  ;;  %v6841_v40 = vld [vmem:[#allocation18_spill] sm:$0xff]  ;;  %v6842_v53 = vld [vmem:[#allocation16_spill] sm:$0xff] }
 0x22c   :  { %v955_v43 = vpop.permute.xlu1 %954  ;;  %2132 = vmatprep.mubr.bf16.mxu1 %v6836_v13 }
 0x22d   :  { %v1292_v63 = vpack.c.bf16 %v1280_v31, %v1276_v23  ;;  %v967_v24 = vsel %vm278_vm1, %v955_v43, %v6837_v14  ;;  %v971_v19 = vsel %vm278_vm1, %v6838_v28, %v955_v43  ;;  %v953_v6 = vpop.permute.xlu0 %952  ;;  %v6844_v28 = vld [vmem:[#allocation17_spill] sm:$0xff] }
 0x22e   :  { %v994_v17 = vmul.f32 %v971_v19, %v4787_v54  ;;  %v995_v5 = vmul.f32 %v967_v24, %v4791_v51  ;;  %v966_v41 = vsel %vm278_vm1, %v953_v6, %v6839_v32  ;;  %v970_v34 = vsel %vm278_vm1, %v6840_v21, %v953_v6  ;;  %v6843_v24 = vld [vmem:[#allocation19_spill] sm:$0xff] }
 0x22f   :  { %v990_v4 = vmul.f32 %v970_v34, %v4787_v54  ;;  %v991_v30 = vmul.f32 %v966_v41, %v4791_v51  ;;  %1982 = vmatpush1.bf16.msra.mxu0 %v1292_v63  ;;  %v6845_v32 = vld [vmem:[#allocation99_spill] sm:$0xff] }
 0x230   :  { %v951_v55 = vpop.permute.xlu1 %950  ;;  %v6846_v21 = vld [vmem:[#allocation27_spill] sm:$0xff] }
 0x231   :  { %v1002_v44 = vpack.c.bf16 %v994_v17, %v990_v4  ;;  %v965_v31 = vsel %vm278_vm1, %v951_v55, %v6841_v40  ;;  %v969_v23 = vsel %vm278_vm1, %v6842_v53, %v951_v55  ;;  %v949_v11 = vpop.permute.xlu0 %948  ;;  %v1003_v43 = vpack.c.bf16 %v995_v5, %v991_v30  ;;  %v6847_v4 = vld [vmem:[#allocation25_spill] sm:$0xff]  ;;  %v6848_v40 = vld [vmem:[#allocation14_spill] sm:$0xff] }
 0x232   :  { %v986_v13 = vmul.f32 %v969_v23, %v4787_v54  ;;  %v987_v14 = vmul.f32 %v965_v31, %v4791_v51  ;;  %v964_v63 = vsel %vm278_vm1, %v949_v11, %v6843_v24  ;;  %v968_v19 = vsel %vm278_vm1, %v6844_v28, %v949_v11  ;;  %2807 = vmatmul.mubr.msk.bf16.vlgmr.msra.gmra.mxu0 %vm1716_vm8, %v5431_v39  ;;  %v6849_v31 = vld [vmem:[#allocation28_spill] sm:$0xff]  ;;  %v6850_v23 = vld [vmem:[#allocation26_spill] sm:$0xff]  ;;  %v6851_v28 = vld [vmem:[#allocation35_spill] sm:$0xff] }
 0x233   :  { %v982_v6 = vmul.f32 %v968_v19, %v4787_v54  ;;  %v983_v17 = vmul.f32 %v964_v63, %v4791_v51  ;;  %2193 = vmatprep.subr.bf16.mxu0 %v1003_v43  ;;  %2009 = vmatprep.mubr.bf16.mxu0 %v6827_v27  ;;  %v5473_v43 = vld [vmem:[%s6557_s4 + $0x38] ss:$20 sps:$4 sm:$0xff]  }
 0x234   :  { %2194 = vmatpush1.bf16.msra.mxu0 %v1002_v44  ;;  %v883_v5 = vpop.permute.xlu1 %882  ;;  %2133 = vmatmul.mubr.bf16.gmra.mxu1 %v6845_v32 }
 0x235   :  { %v998_v41 = vpack.c.bf16 %v986_v13, %v982_v6  ;;  %v895_v34 = vsel %vm189_vm2, %v883_v5, %v6846_v21  ;;  %v899_v30 = vsel %vm189_vm2, %v6847_v4, %v883_v5  ;;  %v881_v55 = vpop.permute.xlu0 %880  ;;  %v999_v54 = vpack.c.bf16 %v987_v14, %v983_v17  ;;  %2142 = vmatprep.mubr.bf16.mxu1 %v6848_v40  ;;  %v6852_v6 = vld [vmem:[#allocation33_spill] sm:$0xff]  ;;  %v6853_v4 = vld [vmem:[#allocation36_spill] sm:$0xff] }
 0x236   :  { %v922_v51 = vmul.f32 %v899_v30, %v4849_v62  ;;  %v923_v44 = vmul.f32 %v895_v34, %v4853_v56  ;;  %v894_v53 = vsel %vm189_vm2, %v881_v55, %v6849_v31  ;;  %v898_v11 = vsel %vm189_vm2, %v6850_v23, %v881_v55  ;;  %v6854_v30 = vld [vmem:[#allocation34_spill] sm:$0xff] }
 0x237   :  { %v918_v13 = vmul.f32 %v898_v11, %v4849_v62  ;;  %v919_v14 = vmul.f32 %v894_v53, %v4853_v56  ;;  %2195 = vmatprep.subr.bf16.mxu0 %v999_v54  ;;  %v6856_v53 = vld [vmem:[#allocation44_spill] sm:$0xff]  ;;  %v6857_v11 = vld [vmem:[#allocation42_spill] sm:$0xff] }
 0x238   :  { %2196 = vmatpush1.bf16.msra.mxu0 %v998_v41  ;;  %v879_v24 = vpop.permute.xlu1 %878 }
 0x239   :  { %v930_v63 = vpack.c.bf16 %v922_v51, %v918_v13  ;;  %v893_v19 = vsel %vm189_vm2, %v879_v24, %v6851_v28  ;;  %v897_v17 = vsel %vm189_vm2, %v6852_v6, %v879_v24  ;;  %v877_v5 = vpop.permute.xlu0 %876  ;;  %v931_v32 = vpack.c.bf16 %v923_v44, %v919_v14  ;;  %v6855_v44 = vld [vmem:[#allocation12_spill] sm:$0xff]  ;;  %v6858_v24 = vld [vmem:[#allocation15_spill] sm:$0xff]  ;;  %v6859_v28 = vld [vmem:[#allocation45_spill] sm:$0xff] }
 0x23a   :  { %v914_v21 = vmul.f32 %v897_v17, %v4849_v62  ;;  %v915_v34 = vmul.f32 %v893_v19, %v4853_v56  ;;  %v892_v41 = vsel %vm189_vm2, %v877_v5, %v6853_v4  ;;  %v896_v55 = vsel %vm189_vm2, %v6854_v30, %v877_v5  ;;  %2808 = vmatmul.mubr.msk.bf16.gmra.mxu0 %vm1716_vm8, %v5473_v43  ;;  %v6860_v6 = vld [vmem:[#allocation43_spill] sm:$0xff]  ;;  %v5515_v5 = vld [vmem:[%s6557_s4 + $0x60] ss:$20 sps:$4 sm:$0xff]  }
 0x23b   :  { %v910_v54 = vmul.f32 %v896_v55, %v4849_v62  ;;  %v911_v40 = vmul.f32 %v892_v41, %v4853_v56  ;;  %2197 = vmatprep.subr.bf16.mxu0 %v931_v32  ;;  %2019 = vmatprep.mubr.bf16.mxu0 %v6827_v27  ;;  %v6861_v41 = vld [vmem:[#allocation50_spill] sm:$0xff]  ;;  %v6862_v55 = vld [vmem:[#allocation48_spill] sm:$0xff] }
 0x23c   :  { %2198 = vmatpush1.bf16.msra.mxu0 %v930_v63  ;;  %v811_v51 = vpop.permute.xlu1 %810  ;;  %2143 = vmatmul.mubr.bf16.gmra.mxu1 %v6855_v44 }
 0x23d   :  { %v926_v31 = vpack.c.bf16 %v914_v21, %v910_v54  ;;  %v823_v23 = vsel %vm100_vm3, %v811_v51, %v6856_v53  ;;  %v827_v13 = vsel %vm100_vm3, %v6857_v11, %v811_v51  ;;  %v809_v14 = vpop.permute.xlu0 %808  ;;  %v927_v62 = vpack.c.bf16 %v915_v34, %v911_v40  ;;  %2152 = vmatprep.mubr.bf16.mxu1 %v6858_v24  ;;  %v6864_v11 = vld [vmem:[#allocation49_spill] sm:$0xff]  ;;  %v5540_v24 = vld [vmem:[%s6556_s3 + $0x30] ss:$0 sm:$0xff] }
 0x23e   :  { %v850_v56 = vmul.f32 %v827_v13, %v4896_v15  ;;  %v851_v63 = vmul.f32 %v823_v23, %v4900_v7  ;;  %v822_v19 = vsel %vm100_vm3, %v809_v14, %v6859_v28  ;;  %v826_v17 = vsel %vm100_vm3, %v6860_v6, %v809_v14  ;;  %v6863_v23 = vld [vmem:[#allocation51_spill] sm:$0xff]  ;;  %v6865_v28 = vld [vmem:[#allocation52_spill] sm:$0xff] }
 0x23f   :  { %v846_v32 = vmul.f32 %v826_v17, %v4896_v15  ;;  %v847_v21 = vmul.f32 %v822_v19, %v4900_v7  ;;  %2199 = vmatprep.subr.bf16.mxu0 %v927_v62  ;;  %v6866_v19 = vld [vmem:[#allocation54_spill] sm:$0xff] }
 0x240   :  { %2200 = vmatpush1.bf16.msra.mxu0 %v926_v31  ;;  %v807_v34 = vpop.permute.xlu1 %806 }
 0x241   :  { %v858_v4 = vpack.c.bf16 %v850_v56, %v846_v32  ;;  %v821_v30 = vsel %vm100_vm3, %v807_v34, %v6861_v41  ;;  %v825_v54 = vsel %vm100_vm3, %v6862_v55, %v807_v34  ;;  %v805_v40 = vpop.permute.xlu0 %804  ;;  %v859_v51 = vpack.c.bf16 %v851_v63, %v847_v21  ;;  %v5545_v56 = vld [vmem:[%s6556_s3 + $0x38] ss:$0 sm:$0xff]  ;;  %v6868_v41 = vld [vmem:[#allocation55_spill] sm:$0xff] }
 0x242   :  { %v842_v44 = vmul.f32 %v825_v54, %v4896_v15  ;;  %v843_v53 = vmul.f32 %v821_v30, %v4900_v7  ;;  %v820_v31 = vsel %vm100_vm3, %v805_v40, %v6863_v23  ;;  %v824_v13 = vsel %vm100_vm3, %v6864_v11, %v805_v40  ;;  %2809 = vmatmul.mubr.msk.bf16.gmra.mxu0 %vm1716_vm8, %v5515_v5  ;;  %v5567_v55 = vld [vmem:[%s6557_s4 + $0x88] ss:$20 sps:$4 sm:$0xff]   ;;  %v6870_v23 = vld [vmem:[#allocation58_spill] sm:$0xff] }
 0x243   :  { %v838_v14 = vmul.f32 %v824_v13, %v4896_v15  ;;  %v839_v62 = vmul.f32 %v820_v31, %v4900_v7  ;;  %2201 = vmatprep.subr.bf16.mxu0 %v859_v51  ;;  %2029 = vmatprep.mubr.bf16.mxu0 %v6827_v27 }
 0x244   :  { %2202 = vmatpush1.bf16.msra.mxu0 %v858_v4  ;;  %v730_v63 = vpop.permute.xlu1 %729  ;;  %2153 = vmatmul.mubr.bf16.gmra.mxu1 %v4954_v58  ;;  %v6867_v4 = vld [vmem:[#allocation53_spill] sm:$0xff] }
 0x245   :  { %v854_v15 = vpack.c.bf16 %v842_v44, %v838_v14  ;;  %v735_v7 = vsel %vm731_vm4, %v6865_v28, %v730_v63  ;;  %v747_v6 = vsel %vm731_vm4, %v730_v63, %v6866_v19  ;;  %v728_v17 = vpop.permute.xlu0 %727  ;;  %v855_v32 = vpack.c.bf16 %v843_v53, %v839_v62  ;;  %2162 = vmatprep.mubr.bf16.mxu1 %v4993_v60  ;;  %v6869_v44 = vld [vmem:[#allocation56_spill] sm:$0xff]  ;;  %v6871_v63 = vld [vmem:[#allocation57_spill] sm:$0xff]  ;;  %v6872_v28 = vld [vmem:[#allocation59_spill] sm:$0xff] }
 0x246   :  { %v778_v21 = vmul.f32 %v5540_v24, %v735_v7  ;;  %v779_v34 = vmul.f32 %v5545_v56, %v747_v6  ;;  %v734_v58 = vsel %vm731_vm4, %v6867_v4, %v728_v17  ;;  %v746_v30 = vsel %vm731_vm4, %v728_v17, %v6868_v41  ;;  %v6874_v4 = vld [vmem:[#allocation64_spill] sm:$0xff] }
 0x247   :  { %v774_v54 = vmul.f32 %v5540_v24, %v734_v58  ;;  %v775_v60 = vmul.f32 %v5545_v56, %v746_v30  ;;  %2203 = vmatprep.subr.bf16.mxu0 %v855_v32 }
 0x248   :  { %2204 = vmatpush1.bf16.msra.mxu0 %v854_v15  ;;  %v726_v40 = vpop.permute.xlu1 %725 }
 0x249   :  { %v786_v51 = vpack.c.bf16 %v778_v21, %v774_v54  ;;  %v733_v53 = vsel %vm731_vm4, %v6869_v44, %v726_v40  ;;  %v745_v31 = vsel %vm731_vm4, %v726_v40, %v6870_v23  ;;  %v724_v11 = vpop.permute.xlu0 %723  ;;  %v787_v13 = vpack.c.bf16 %v779_v34, %v775_v60  ;;  %v6873_v21 = vld [vmem:[#allocation62_spill] sm:$0xff]  ;;  %v6875_v40 = vld [vmem:[#allocation63_spill] sm:$0xff] }
 0x24a   :  { %v770_v14 = vmul.f32 %v5540_v24, %v733_v53  ;;  %v771_v62 = vmul.f32 %v5545_v56, %v745_v31  ;;  %v732_v15 = vsel %vm731_vm4, %v6871_v63, %v724_v11  ;;  %v744_v7 = vsel %vm731_vm4, %v724_v11, %v6872_v28  ;;  %2810 = vmatmul.mubr.msk.bf16.gmra.mxu0 %vm1716_vm8, %v5567_v55  ;;  %v5609_v53 = vld [vmem:[%s6557_s4 + $0xb0] ss:$20 sps:$4 sm:$0xff]  }
 0x24b   :  { %v766_v19 = vmul.f32 %v5540_v24, %v732_v15  ;;  %v767_v6 = vmul.f32 %v5545_v56, %v744_v7  ;;  %2205 = vmatprep.subr.bf16.mxu0 %v787_v13  ;;  %2039 = vmatprep.mubr.bf16.mxu0 %v6827_v27  ;;  %v6877_v13 = vld [vmem:[#allocation66_spill] sm:$0xff] }
 0x24c   :  { %2206 = vmatpush1.bf16.msra.mxu0 %v786_v51  ;;  %v1187_v17 = vpop.permute.xlu1 %1186  ;;  %2163 = vmatmul.mubr.bf16.gmra.mxu1 %v5028_v12  ;;  %v6876_v51 = vld [vmem:[#allocation65_spill] sm:$0xff] }
 0x24d   :  { %v782_v32 = vpack.c.bf16 %v770_v14, %v766_v19  ;;  %v1191_v34 = vsel %vm553_vm6, %v6873_v21, %v1187_v17  ;;  %v1203_v58 = vsel %vm553_vm6, %v1187_v17, %v6874_v4  ;;  %v1185_v41 = vpop.permute.xlu0 %1184  ;;  %v783_v30 = vpack.c.bf16 %v771_v62, %v767_v6  ;;  %2172 = vmatprep.mubr.bf16.mxu1 %v5055_v10  ;;  %v6878_v62 = vld [vmem:[#allocation68_spill] sm:$0xff]  ;;  %v6879_v6 = vld [vmem:[#allocation67_spill] sm:$0xff] }
 0x24e   :  { %v1218_v54 = vmul.f32 %v1191_v34, %v5102_v61  ;;  %v1219_v60 = vmul.f32 %v1203_v58, %v5070_v29  ;;  %v1190_v12 = vsel %vm553_vm6, %v6875_v40, %v1185_v41  ;;  %v1202_v44 = vsel %vm553_vm6, %v1185_v41, %v6876_v51 }
 0x24f   :  { %v1214_v23 = vmul.f32 %v1190_v12, %v5102_v61  ;;  %v1215_v10 = vmul.f32 %v1202_v44, %v5070_v29  ;;  %2207 = vmatprep.subr.bf16.mxu0 %v783_v30  ;;  %v6881_v30 = vld [vmem:[#allocation71_spill] sm:$0xff]  ;;  %v6883_v44 = vld [vmem:[#allocation72_spill] sm:$0xff] }
 0x250   :  { %2208 = vmatpush1.bf16.msra.mxu0 %v782_v32  ;;  %v1183_v31 = vpop.permute.xlu1 %1182  ;;  %v6880_v32 = vld [vmem:[#allocation69_spill] sm:$0xff] }
 0x251   :  { %v1226_v11 = vpack.c.bf16 %v1218_v54, %v1214_v23  ;;  %v1189_v14 = vsel %vm553_vm6, %v6877_v13, %v1183_v31  ;;  %v1201_v63 = vsel %vm553_vm6, %v1183_v31, %v6878_v62  ;;  %v1181_v15 = vpop.permute.xlu0 %1180  ;;  %v1227_v28 = vpack.c.bf16 %v1219_v60, %v1215_v10  ;;  %v6882_v60 = vld [vmem:[#allocation73_spill] sm:$0xff]  ;;  %v6884_v23 = vld [vmem:[#allocation74_spill] sm:$0xff] }
 0x252   :  { %v1210_v7 = vmul.f32 %v1189_v14, %v5102_v61  ;;  %v1211_v19 = vmul.f32 %v1201_v63, %v5070_v29  ;;  %v1188_v17 = vsel %vm553_vm6, %v6879_v6, %v1181_v15  ;;  %v1200_v21 = vsel %vm553_vm6, %v1181_v15, %v6880_v32  ;;  %2811 = vmatmul.mubr.msk.bf16.gmra.mxu0 %vm1716_vm8, %v5609_v53  ;;  %v5651_v31 = vld [vmem:[%s6557_s4 + $0xd8] ss:$20 sps:$4 sm:$0xff]   ;;  %v6885_v62 = vld [vmem:[#allocation78_spill] sm:$0xff]  ;;  %v6886_v15 = vld [vmem:[#allocation80_spill] sm:$0xff] }
 0x253   :  { %v1206_v34 = vmul.f32 %v1188_v17, %v5102_v61  ;;  %v1207_v4 = vmul.f32 %v1200_v21, %v5070_v29  ;;  %2209 = vmatprep.subr.bf16.mxu0 %v1227_v28  ;;  %2049 = vmatprep.mubr.bf16.mxu0 %v6827_v27  ;;  %v6887_v32 = vld [vmem:[#allocation79_spill] sm:$0xff] }
 0x254   :  { %2210 = vmatpush2.bf16.msra.mxu0 %v1226_v11  ;;  %v1115_v58 = vpop.permute.xlu1 %1114  ;;  %2173 = vmatmul.mubr.bf16.gmra.mxu1 %v5088_v20 }
 0x255   :  { %v1222_v41 = vpack.c.bf16 %v1210_v7, %v1206_v34  ;;  %v1119_v54 = vsel %vm464_vm7, %v6881_v30, %v1115_v58  ;;  %v1131_v40 = vsel %vm464_vm7, %v1115_v58, %v6882_v60  ;;  %v1113_v12 = vpop.permute.xlu0 %1112  ;;  %v1223_v61 = vpack.c.bf16 %v1211_v19, %v1207_v4  ;;  %2182 = vmatprep.mubr.bf16.mxu1 %v5107_v52  ;;  %v6888_v34 = vld [vmem:[#allocation81_spill] sm:$0xff] }
 0x256   :  { %v1146_v29 = vmul.f32 %v1119_v54, %v5188_v35  ;;  %v1147_v51 = vmul.f32 %v1131_v40, %v5201_v50  ;;  %v1118_v20 = vsel %vm464_vm7, %v6883_v44, %v1113_v12  ;;  %v1130_v10 = vsel %vm464_vm7, %v1113_v12, %v6884_v23  ;;  %v3097_v12 = vld [vmem:[%s6555_s0 + $0x78] sm:$0xff]  ;;  %v5697_v44 = vld [vmem:[%s6557_s4 + $0x100] ss:$20 sps:$4 sm:$0xff]  }
 0x257   :  { %v1142_v11 = vmul.f32 %v1118_v20, %v5188_v35  ;;  %v1143_v52 = vmul.f32 %v1130_v10, %v5201_v50  ;;  %2211 = vmatprep.subr.bf16.mxu0 %v1223_v61 }
 0x258   :  { %2212 = vmatpush2.bf16.msra.mxu0 %v1222_v41  ;;  %v1111_v13 = vpop.permute.xlu1 %1110 }
 0x259   :  { %v1154_v14 = vpack.c.bf16 %v1146_v29, %v1142_v11  ;;  %v1117_v63 = vsel %vm464_vm7, %v6885_v62, %v1111_v13  ;;  %v1129_v28 = vsel %vm464_vm7, %v1111_v13, %v6886_v15  ;;  %v1109_v7 = vpop.permute.xlu0 %1108  ;;  %v1155_v19 = vpack.c.bf16 %v1147_v51, %v1143_v52 }
 0x25a   :  { %v1138_v6 = vmul.f32 %v1117_v63, %v5188_v35  ;;  %v1139_v17 = vmul.f32 %v1129_v28, %v5201_v50  ;;  %v1116_v21 = vsel %vm464_vm7, %v6887_v32, %v1109_v7  ;;  %v1128_v4 = vsel %vm464_vm7, %v1109_v7, %v6888_v34  ;;  %2812 = vmatmul.mubr.msk.bf16.gmra.mxu0 %vm1716_vm8, %v5651_v31  ;;  %v6890_v34 = vld [vmem:[#allocation85_spill] sm:$0xff] }
 0x25b   :  { %v1134_v58 = vmul.f32 %v1116_v21, %v5188_v35  ;;  %v1135_v41 = vmul.f32 %v1128_v4, %v5201_v50  ;;  %2213 = vmatprep.subr.bf16.mxu0 %v1155_v19  ;;  %2059 = vmatprep.mubr.bf16.mxu0 %v6827_v27  ;;  %v3098_v35 = vld [vmem:[%s6555_s0 + $0x58] sm:$0xff]  ;;  %v1079_v62 = vpack.c.bf16 %v5208_v1, %v5215_v22 }
 0x25c   :  { %2214 = vmatpush2.bf16.msra.mxu0 %v1154_v14  ;;  %2183 = vmatmul.mubr.bf16.gmra.mxu1 %v5152_v57  ;;  %v1331_v54 = vpop.permute.xlu1 %1330  ;;  %v1083_v61 = vpack.c.bf16 %v3097_v12, %v3098_v35  ;;  %v6894_v35 = vld [vmem:[#allocation98_spill] sm:$0xff] }
 0x25d   :  { %v1150_v30 = vpack.c.bf16 %v1138_v6, %v1134_v58  ;;  %v1329_v60 = vpop.permute.xlu0 %1328  ;;  %v1151_v40 = vpack.c.bf16 %v1139_v17, %v1135_v41  ;;  %2338 = vmatprep.mubr.bf16.mxu1 %v6827_v27  ;;  %v1335_v50 = vsel %vm731_vm4, %v5144_v18, %v1331_v54  ;;  %v1347_v57 = vsel %vm731_vm4, %v1331_v54, %v5178_v33  ;;  %v6891_v58 = vld [vmem:[#allocation88_spill] sm:$0xff] }
 0x25e   :  { %v1334_v29 = vsel %vm731_vm4, %v5157_v47, %v1329_v60  ;;  %v1346_v51 = vsel %vm731_vm4, %v1329_v60, %v5184_v49  ;;  %v1362_v20 = vmul.f32 %v5540_v24, %v1335_v50  ;;  %v1363_v18 = vmul.f32 %v5545_v56, %v1347_v57  ;;  %v3099_v47 = vld [vmem:[%s6555_s0 + $0x70] sm:$0xff]  ;;  %v5751_v60 = vld [vmem:[%s6557_s4 + $0x128] ss:$20 sps:$4 sm:$0xff]  }
 0x25f   :  { %v1358_v23 = vmul.f32 %v5540_v24, %v1334_v29  ;;  %v1359_v33 = vmul.f32 %v5545_v56, %v1346_v51  ;;  %2215 = vmatprep.subr.bf16.mxu0 %v1151_v40  ;;  %v3100_v49 = vld [vmem:[%s6555_s0 + $0x50] sm:$0xff]  ;;  %v6893_v40 = vld [vmem:[#allocation97_spill] sm:$0xff] }
 0x260   :  { %2216 = vmatpush2.bf16.msra.mxu0 %v1150_v30  ;;  %v1082_v10 = vpack.c.bf16 %v3099_v47, %v3100_v49  ;;  %v1327_v52 = vpop.permute.xlu1 %1326  ;;  %v6892_v30 = vld [vmem:[#allocation86_spill] sm:$0xff] }
 0x261   :  { %v1370_v11 = vpack.c.bf16 %v1362_v20, %v1358_v23  ;;  %v1325_v13 = vpop.permute.xlu0 %1324  ;;  %2217 = vmatprep.subr.bf16.mxu0 %v1083_v61  ;;  %v1371_v14 = vpack.c.bf16 %v1363_v18, %v1359_v33  ;;  %v1333_v63 = vsel %vm731_vm4, %v5253_v48, %v1327_v52  ;;  %v1345_v15 = vsel %vm731_vm4, %v1327_v52, %v5276_v2  ;;  %v3102_v2 = vld [vmem:[%s6555_s0 + $0x10] sm:$0xff] }
 0x262   :  { %v1332_v28 = vsel %vm731_vm4, %v5266_v0, %v1325_v13  ;;  %v1344_v7 = vsel %vm731_vm4, %v1325_v13, %v5285_v8  ;;  %2813 = vmatmul.mubr.msk.bf16.gmra.mxu0 %vm1716_vm8, %v5697_v44  ;;  %v1354_v1 = vmul.f32 %v5540_v24, %v1333_v63  ;;  %v1355_v22 = vmul.f32 %v5545_v56, %v1345_v15  ;;  %v3101_v0 = vld [vmem:[%s6555_s0 + $0x30] sm:$0xff]  ;;  %v6896_v15 = vld [vmem:[#allocation91_spill] sm:$0xff] }
 0x263   :  { %v1350_v48 = vmul.f32 %v5540_v24, %v1332_v28  ;;  %v1351_v19 = vmul.f32 %v5545_v56, %v1344_v7  ;;  %2314 = vmatprep.subr.bf16.mxu1 %v1371_v14  ;;  %v1078_v8 = vpack.c.bf16 %v3101_v0, %v3102_v2  ;;  %2069 = vmatprep.mubr.bf16.mxu0 %v6827_v27  ;;  %v6889_v24 = vld [vmem:[#allocation87_spill] sm:$0xff] }
 0x264   :  { %2218 = vmatpush2.bf16.msra.mxu0 %v1082_v10  ;;  %2315 = vmatpush1.bf16.msra.mxu1 %v1370_v11  ;;  %v1027_v17 = vpop.permute.xlu1 %1026  ;;  %v6897_v7 = vld [vmem:[#allocation95_spill] sm:$0xff] }
 0x265   :  { %v1366_v6 = vpack.c.bf16 %v1354_v1, %v1350_v48  ;;  %v1025_v32 = vpop.permute.xlu0 %1024  ;;  %2219 = vmatprep.subr.bf16.mxu0 %v1079_v62  ;;  %v1367_v21 = vpack.c.bf16 %v1355_v22, %v1351_v19  ;;  %v1039_v56 = vsel %vm367_vm0, %v1027_v17, %v6889_v24  ;;  %v1043_v4 = vsel %vm367_vm0, %v6890_v34, %v1027_v17  ;;  %v6895_v62 = vld [vmem:[#allocation93_spill] sm:$0xff]  ;;  %v6898_v22 = vld [vmem:[#allocation92_spill] sm:$0xff] }
 0x266   :  { %v1038_v41 = vsel %vm367_vm0, %v1025_v32, %v6891_v58  ;;  %v1042_v54 = vsel %vm367_vm0, %v6892_v30, %v1025_v32  ;;  %v1066_v12 = vmul.f32 %v1043_v4, %v6893_v40  ;;  %v1067_v61 = vmul.f32 %v1039_v56, %v6894_v35 }
 0x267   :  { %v1062_v50 = vmul.f32 %v1042_v54, %v6893_v40  ;;  %v1063_v57 = vmul.f32 %v1038_v41, %v6894_v35  ;;  %2316 = vmatprep.subr.bf16.mxu1 %v1367_v21 }
 0x268   :  { %2220 = vmatpush2.bf16.msra.mxu0 %v1078_v8  ;;  %2317 = vmatpush1.bf16.msra.mxu1 %v1366_v6 }
 0x269   :  { %v1074_v29 = vpack.c.bf16 %v1066_v12, %v1062_v50  ;;  %v1259_v51 = vpop.permute.xlu1 %1258  ;;  %v1075_v18 = vpack.c.bf16 %v1067_v61, %v1063_v57  ;;  %v3109_v12 = vld [vmem:[%s6557_s4 + $0x84] ss:$20 sps:$4 sm:$0xff]  }
 0x26a   :  { %v1257_v20 = vpop.permute.xlu0 %1256  ;;  %v1263_v23 = vsel %vm642_vm5, %v5332_v38, %v1259_v51  ;;  %v1275_v33 = vsel %vm642_vm5, %v1259_v51, %v5362_v9  ;;  %2814 = vmatmul.mubr.msk.bf16.gmra.mxu0 %vm1716_vm8, %v5751_v60  ;;  %v3110_v51 = vld [vmem:[%s6557_s4 + $0x80] ss:$20 sps:$4 sm:$0xff]  }
 0x26b   :  { %v1262_v47 = vsel %vm642_vm5, %v5346_v42, %v1257_v20  ;;  %v1274_v49 = vsel %vm642_vm5, %v1257_v20, %v5376_v25  ;;  %v1290_v10 = vmul.f32 %v1263_v23, %v5034_v37  ;;  %v1291_v11 = vmul.f32 %v1275_v33, %v5011_v26  ;;  %2221 = vmatprep.subr.bf16.mxu0 %v1075_v18  ;;  %v3103_v42 = vld [vmem:[%s6557_s4 + $0xc] ss:$20 sps:$4 sm:$0xff]  }
 0x26c   :  { %v1286_v38 = vmul.f32 %v1262_v47, %v5034_v37  ;;  %v1287_v52 = vmul.f32 %v1274_v49, %v5011_v26  ;;  %2222 = vmatpush2.bf16.msra.mxu0 %v1074_v29  ;;  %2225 = vmatprep.mubr.bf16.mxu0 %v3103_v42  ;;  %v3111_v20 = vld [vmem:[%s6557_s4 + $0xac] ss:$20 sps:$4 sm:$0xff]  }
 0x26d   :  { %v1023_v25 = vpop.permute.xlu1 %1022 }
 0x26e   :  { %v1298_v9 = vpack.c.bf16 %v1290_v10, %v1286_v38  ;;  %v1021_v13 = vpop.permute.xlu0 %1020  ;;  %v1299_v14 = vpack.c.bf16 %v1291_v11, %v1287_v52  ;;  %v1037_v63 = vsel %vm367_vm0, %v1023_v25, %v6895_v62  ;;  %v1041_v28 = vsel %vm367_vm0, %v6896_v15, %v1023_v25  ;;  %v3113_v62 = vld [vmem:[%s6557_s4 + $0xd4] ss:$20 sps:$4 sm:$0xff]  }
 0x26f   :  { %v1036_v1 = vsel %vm367_vm0, %v1021_v13, %v6897_v7  ;;  %v1040_v48 = vsel %vm367_vm0, %v6898_v22, %v1021_v13  ;;  %v1058_v19 = vmul.f32 %v1041_v28, %v6893_v40  ;;  %v1059_v0 = vmul.f32 %v1037_v63, %v6894_v35 }
 0x270   :  { %v1054_v2 = vmul.f32 %v1040_v48, %v6893_v40  ;;  %v1055_v8 = vmul.f32 %v1036_v1, %v6894_v35  ;;  %2318 = vmatprep.subr.bf16.mxu1 %v1299_v14 }
 0x271   :  { %2319 = vmatpush1.bf16.msra.mxu1 %v1298_v9  ;;  %v1255_v17 = vpop.permute.xlu1 %1254 }
 0x272   :  { %v1070_v6 = vpack.c.bf16 %v1058_v19, %v1054_v2  ;;  %v1253_v32 = vpop.permute.xlu0 %1252  ;;  %v1071_v21 = vpack.c.bf16 %v1059_v0, %v1055_v8  ;;  %v1261_v24 = vsel %vm642_vm5, %v5387_v36, %v1255_v17  ;;  %v1273_v56 = vsel %vm642_vm5, %v1255_v17, %v5400_v59 }
 0x273   :  { %v1260_v34 = vsel %vm642_vm5, %v5393_v46, %v1253_v32  ;;  %v1272_v4 = vsel %vm642_vm5, %v1253_v32, %v5405_v3  ;;  %v1282_v58 = vmul.f32 %v1261_v24, %v5034_v37  ;;  %v1283_v41 = vmul.f32 %v1273_v56, %v5011_v26  ;;  %v3104_v46 = vld [vmem:[%s6557_s4 + $0x8] ss:$20 sps:$4 sm:$0xff]  }
 0x274   :  { %v1278_v30 = vmul.f32 %v1260_v34, %v5034_v37  ;;  %v1279_v36 = vmul.f32 %v1272_v4, %v5011_v26  ;;  %2223 = vmatprep.subr.bf16.mxu0 %v1071_v21  ;;  %v3106_v26 = vld [vmem:[%s6557_s4 + $0x30] ss:$20 sps:$4 sm:$0xff]  }
 0x275   :  { %2224 = vmatpush2.bf16.msra.mxu0 %v1070_v6  ;;  %v3107_v37 = vld [vmem:[%s6557_s4 + $0x5c] ss:$20 sps:$4 sm:$0xff]  }
 0x276   :  { %v1294_v54 = vpack.c.bf16 %v1282_v58, %v1278_v30  ;;  %v1295_v59 = vpack.c.bf16 %v1283_v41, %v1279_v36  ;;  %v3115_v58 = vld [vmem:[%s6557_s4 + $0xfc] ss:$20 sps:$4 sm:$0xff]  }
 0x278   :  { %2226 = vmatmul.mubr.bf16.vlgmr.msra.gmra.mxu0 %v3104_v46  ;;  %2320 = vmatprep.subr.bf16.mxu1 %v1295_v59 }
 0x279   :  { %2321 = vmatpush1.bf16.msra.mxu1 %v1294_v54  ;;  %2235 = vmatprep.mubr.bf16.mxu0 %v3105_v45 }
 0x27c   :  { %2815 = vmatmul.mubr.msk.bf16.vlgmr.msra.gmra.mxu1 %vm1716_vm8, %v5431_v39  ;;  %v3108_v39 = vld [vmem:[%s6557_s4 + $0x58] ss:$20 sps:$4 sm:$0xff]  }
 0x27d   :  { %2348 = vmatprep.mubr.bf16.mxu1 %v6827_v27 }
 0x27e   :  { %v5837_v50 = vpop.permute.xlu1 %1443 }
 0x27f   :  { %6899 = vst [vmem:[#allocation13_spill] sm:$0xff] %v5837_v50  ;;  %v5839_v29 = vpop.permute.xlu0 %1438 }
 0x280   :  { %2236 = vmatmul.mubr.bf16.gmra.mxu0 %v3106_v26  ;;  %6900 = vst [vmem:[#allocation22_spill] sm:$0xff] %v5839_v29 }
 0x281   :  { %2245 = vmatprep.mubr.bf16.mxu0 %v3107_v37 }
 0x283   :  { %v5854_v11 = vpop.permute.xlu0 %1453 }
 0x284   :  { %2816 = vmatmul.mubr.msk.bf16.gmra.mxu1 %vm1716_vm8, %v5473_v43  ;;  %v1775_v3 = vpop.f32.mrf.mxu0  ;;  %6902 = vst [vmem:[#allocation23_spill] sm:$0xff] %v5854_v11 }
 0x285   :  { %2358 = vmatprep.mubr.bf16.mxu1 %v6827_v27  ;;  %v1776_v23 = vadd.f32 %v1775_v3, %v5839_v29 }
 0x286   :  { %v1777_v40 = vpop.f32.mrf.mxu0 }
 0x287   :  { %v1778_v47 = vadd.f32 %v1777_v40, %v5839_v29  ;;  %v5870_v28 = vpop.permute.xlu0 %1463 }
 0x288   :  { %2246 = vmatmul.mubr.bf16.gmra.mxu0 %v3108_v39  ;;  %v1779_v35 = vpop.f32.mrf.mxu0  ;;  %6904 = vst [vmem:[#allocation24_spill] sm:$0xff] %v5870_v28 }
 0x289   :  { %2255 = vmatprep.mubr.bf16.mxu0 %v3109_v12  ;;  %v1780_v42 = vadd.f32 %v1779_v35, %v5837_v50 }
 0x28a   :  { %v1781_v61 = vpop.f32.mrf.mxu0 }
 0x28b   :  { %v1782_v14 = vadd.f32 %v1781_v61, %v5837_v50  ;;  %v5889_v56 = vpop.permute.xlu0 %1473 }
 0x28c   :  { %2817 = vmatmul.mubr.msk.bf16.gmra.mxu1 %vm1716_vm8, %v5515_v5  ;;  %v1785_v43 = vpop.f32.mrf.mxu0  ;;  %v5847_v5 = vpop.permute.xlu1 %1448  ;;  %6906 = vst [vmem:[#allocation29_spill] sm:$0xff] %v5889_v56 }
 0x28d   :  { %2368 = vmatprep.mubr.bf16.mxu1 %v6827_v27  ;;  %6901 = vst [vmem:[#allocation20_spill] sm:$0xff] %v5847_v5  ;;  %v1786_v1 = vadd.f32 %v1785_v43, %v5847_v5 }
 0x28e   :  { %v1787_v57 = vpop.f32.mrf.mxu0 }
 0x28f   :  { %v1788_v2 = vadd.f32 %v1787_v57, %v5847_v5  ;;  %v5908_v39 = vpop.permute.xlu0 %1503 }
 0x290   :  { %2256 = vmatmul.mubr.bf16.gmra.mxu0 %v3110_v51  ;;  %v1789_v18 = vpop.f32.mrf.mxu0  ;;  %v5856_v38 = vpop.permute.xlu1 %1458 }
 0x291   :  { %2265 = vmatprep.mubr.bf16.mxu0 %v3111_v20  ;;  %6903 = vst [vmem:[#allocation21_spill] sm:$0xff] %v5856_v38  ;;  %v1790_v32 = vadd.f32 %v1789_v18, %v5854_v11  ;;  %v3117_v18 = vld [vmem:[%s6557_s4 + $0x124] ss:$20 sps:$4 sm:$0xff]  }
 0x292   :  { %v1791_v33 = vpop.f32.mrf.mxu0 }
 0x293   :  { %v1792_v4 = vadd.f32 %v1791_v33, %v5854_v11 }
 0x294   :  { %2818 = vmatmul.mubr.msk.bf16.gmra.mxu1 %vm1716_vm8, %v5567_v55  ;;  %v1888_v49 = vpop.f32.mrf.mxu1  ;;  %v1795_v10 = vpop.f32.mrf.mxu0  ;;  %v3112_v55 = vld [vmem:[%s6557_s4 + $0xa8] ss:$20 sps:$4 sm:$0xff]  }
 0x295   :  { %2378 = vmatprep.mubr.bf16.mxu1 %v6827_v27  ;;  %v5858_v52 = vadd.f32 %v1888_v49, %v1776_v23  ;;  %v5877_v19 = vpop.permute.xlu1 %1468  ;;  %v1796_v59 = vadd.f32 %v1795_v10, %v5856_v38 }
 0x296   :  { %v1890_v9 = vpop.f32.mrf.mxu1  ;;  %v1797_v25 = vpop.f32.mrf.mxu0  ;;  %6905 = vst [vmem:[#allocation31_spill] sm:$0xff] %v5877_v19 }
 0x297   :  { %v5864_v13 = vadd.f32 %v1890_v9, %v1778_v47  ;;  %v1798_v37 = vadd.f32 %v1797_v25, %v5856_v38 }
 0x298   :  { %2266 = vmatmul.mubr.bf16.gmra.mxu0 %v3112_v55  ;;  %v1892_v63 = vpop.f32.mrf.mxu1  ;;  %v1799_v15 = vpop.f32.mrf.mxu0 }
 0x299   :  { %2275 = vmatprep.mubr.bf16.mxu0 %v3113_v62  ;;  %v5872_v7 = vadd.f32 %v1892_v63, %v1780_v42  ;;  %v5897_v36 = vpop.permute.xlu1 %1498  ;;  %v1800_v35 = vadd.f32 %v1799_v15, %v5870_v28  ;;  %v5929_v42 = vpop.permute.xlu0 %1513 }
 0x29a   :  { %v1894_v22 = vpop.f32.mrf.mxu1  ;;  %v1801_v48 = vpop.f32.mrf.mxu0 }
 0x29b   :  { %v5879_v0 = vadd.f32 %v1894_v22, %v1782_v14  ;;  %v1802_v20 = vadd.f32 %v1801_v48, %v5870_v28 }
 0x29c   :  { %2819 = vmatmul.mubr.msk.bf16.gmra.mxu1 %vm1716_vm8, %v5609_v53  ;;  %v1898_v8 = vpop.f32.mrf.mxu1  ;;  %v1805_v6 = vpop.f32.mrf.mxu0  ;;  %v3114_v53 = vld [vmem:[%s6557_s4 + $0xd0] ss:$20 sps:$4 sm:$0xff]  }
 0x29d   :  { %2388 = vmatprep.mubr.bf16.mxu1 %v6827_v27  ;;  %v5883_v17 = vadd.f32 %v1898_v8, %v1786_v1  ;;  %v5916_v57 = vpop.permute.xlu1 %1508  ;;  %v1806_v49 = vadd.f32 %v1805_v6, %v5877_v19 }
 0x29e   :  { %v1900_v21 = vpop.f32.mrf.mxu1  ;;  %v1807_v24 = vpop.f32.mrf.mxu0 }
 0x29f   :  { %v5891_v34 = vadd.f32 %v1900_v21, %v1788_v2  ;;  %v1808_v25 = vadd.f32 %v1807_v24, %v5877_v19 }
 0x2a0   :  { %2276 = vmatmul.mubr.bf16.gmra.mxu0 %v3114_v53  ;;  %v1902_v41 = vpop.f32.mrf.mxu1  ;;  %v1809_v30 = vpop.f32.mrf.mxu0 }
 0x2a1   :  { %2285 = vmatprep.mubr.bf16.mxu0 %v3115_v58  ;;  %v5899_v54 = vadd.f32 %v1902_v41, %v1790_v32  ;;  %v1810_v63 = vadd.f32 %v1809_v30, %v5889_v56  ;;  %v5938_v1 = vpop.permute.xlu1 %1478  ;;  %v5947_v32 = vpop.permute.xlu0 %1483 }
 0x2a2   :  { %v1904_v46 = vpop.f32.mrf.mxu1  ;;  %v1811_v45 = vpop.f32.mrf.mxu0  ;;  %6907 = vst [vmem:[#allocation32_spill] sm:$0xff] %v5938_v1  ;;  %6908 = vst [vmem:[#allocation30_spill] sm:$0xff] %v5947_v32 }
 0x2a3   :  { %v5904_v26 = vadd.f32 %v1904_v46, %v1792_v4  ;;  %v1812_v22 = vadd.f32 %v1811_v45, %v5889_v56 }
 0x2a4   :  { %2820 = vmatmul.mubr.msk.bf16.gmra.mxu1 %vm1716_vm8, %v5651_v31  ;;  %v1908_v3 = vpop.f32.mrf.mxu1  ;;  %v3116_v31 = vld [vmem:[%s6557_s4 + $0xf8] ss:$20 sps:$4 sm:$0xff]  }
 0x2a5   :  { %2398 = vmatprep.mubr.bf16.mxu1 %v6827_v27  ;;  %v1815_v40 = vpop.f32.mrf.mxu0  ;;  %v5910_v12 = vadd.f32 %v1908_v3, %v1796_v59  ;;  %v5957_v30 = vpop.permute.xlu1 %1488 }
 0x2a6   :  { %v1910_v61 = vpop.f32.mrf.mxu1  ;;  %6909 = vst [vmem:[#allocation41_spill] sm:$0xff] %v5957_v30 }
 0x2a7   :  { %v1817_v43 = vpop.f32.mrf.mxu0  ;;  %v5918_v51 = vadd.f32 %v1910_v61, %v1798_v37 }
 0x2a8   :  { %2286 = vmatmul.mubr.bf16.gmra.mxu0 %v3116_v31  ;;  %v1912_v23 = vpop.f32.mrf.mxu1 }
 0x2a9   :  { %2295 = vmatprep.mubr.bf16.mxu0 %v3117_v18  ;;  %v1819_v33 = vpop.f32.mrf.mxu0  ;;  %v5924_v47 = vadd.f32 %v1912_v23, %v1800_v35  ;;  %v5965_v35 = vpop.permute.xlu0 %1493 }
 0x2aa   :  { %v1914_v10 = vpop.f32.mrf.mxu1  ;;  %v1820_v58 = vadd.f32 %v1819_v33, %v5947_v32  ;;  %6911 = vst [vmem:[#allocation37_spill] sm:$0xff] %v5965_v35 }
 0x2ab   :  { %v5931_v9 = vadd.f32 %v1914_v10, %v1802_v20  ;;  %v1821_v14 = vpop.f32.mrf.mxu0 }
 0x2ac   :  { %2821 = vmatmul.mubr.msk.bf16.gmra.mxu1 %vm1716_vm8, %v5697_v44  ;;  %v1918_v55 = vpop.f32.mrf.mxu1  ;;  %v1822_v46 = vadd.f32 %v1821_v14, %v5947_v32 }
 0x2ad   :  { %2408 = vmatprep.mubr.bf16.mxu1 %v6827_v27  ;;  %v5935_v62 = vadd.f32 %v1918_v55, %v1806_v49  ;;  %v1825_v2 = vpop.f32.mrf.mxu0  ;;  %v1816_v27 = vadd.f32 %v1815_v40, %v5938_v1 }
 0x2ae   :  { %v1920_v15 = vpop.f32.mrf.mxu1 }
 0x2af   :  { %v5941_v44 = vadd.f32 %v1920_v15, %v1808_v25  ;;  %v1827_v53 = vpop.f32.mrf.mxu0 }
 0x2b0   :  { %2296 = vmatmul.mubr.bf16.gmra.mxu0 %v5258_v16  ;;  %v1922_v48 = vpop.f32.mrf.mxu1  ;;  %v1818_v16 = vadd.f32 %v1817_v43, %v5938_v1  ;;  %v1828_v61 = vadd.f32 %v1827_v53, %v5957_v30 }
 0x2b1   :  { %v5944_v8 = vadd.f32 %v1922_v48, %v1810_v63  ;;  %v1829_v45 = vpop.f32.mrf.mxu0 }
 0x2b2   :  { %v1924_v6 = vpop.f32.mrf.mxu1  ;;  %v1830_v18 = vadd.f32 %v1829_v45, %v5965_v35 }
 0x2b3   :  { %v5951_v21 = vadd.f32 %v1924_v6, %v1812_v22  ;;  %v1831_v31 = vpop.f32.mrf.mxu0 }
 0x2b4   :  { %2822 = vmatmul.mubr.msk.bf16.gmra.mxu1 %vm1716_vm8, %v5751_v60  ;;  %v1928_v24 = vpop.f32.mrf.mxu1  ;;  %v1826_v60 = vadd.f32 %v1825_v2, %v5957_v30  ;;  %v1832_v49 = vadd.f32 %v1831_v31, %v5965_v35 }
 0x2b5   :  { %v5954_v4 = vadd.f32 %v1928_v24, %v1816_v27  ;;  %v5988_v27 = vpop.f32.mrf.mxu0 }
 0x2b6   :  { %v1930_v41 = vpop.f32.mrf.mxu1 }
 0x2b7   :  { %v5959_v59 = vadd.f32 %v1930_v41, %v1818_v16  ;;  %v5992_v16 = vpop.f32.mrf.mxu0 }
 0x2b8   :  { %v1932_v37 = vpop.f32.mrf.mxu1 }
 0x2b9   :  { %v5963_v3 = vadd.f32 %v1932_v37, %v1820_v58  ;;  %v5996_v53 = vpop.f32.mrf.mxu0 }
 0x2ba   :  { %v1934_v40 = vpop.f32.mrf.mxu1 }
 0x2bb   :  { %6910 = vst [vmem:[#allocation39_spill] sm:$0xff] %v5963_v3  ;;  %v5968_v43 = vadd.f32 %v1934_v40, %v1822_v46  ;;  %v6000_v41 = vpop.f32.mrf.mxu0 }
 0x2bc   :  { %v1938_v20 = vpop.f32.mrf.mxu1 }
 0x2bd   :  { %6912 = vst [vmem:[#allocation40_spill] sm:$0xff] %v5968_v43  ;;  %v5971_v23 = vadd.f32 %v1938_v20, %v1826_v60  ;;  %v6004_v45 = vpop.f32.mrf.mxu0 }
 0x2be   :  { %v1940_v33 = vpop.f32.mrf.mxu1 }
 0x2bf   :  { %6913 = vst [vmem:[#allocation38_spill] sm:$0xff] %v5971_v23  ;;  %v5974_v10 = vadd.f32 %v1940_v33, %v1828_v61  ;;  %v6010_v40 = vpop.f32.mrf.mxu0 }
 0x2c0   :  { %v1942_v25 = vpop.f32.mrf.mxu1 }
 0x2c1   :  { %6914 = vst [vmem:[#allocation6_spill] sm:$0xff] %v5974_v10  ;;  %v5976_v55 = vadd.f32 %v1942_v25, %v1830_v18  ;;  %v6016_v20 = vpop.f32.mrf.mxu0 }
 0x2c2   :  { %v1944_v14 = vpop.f32.mrf.mxu1 }
 0x2c3   :  { %6915 = vst [vmem:[#allocation2_spill] sm:$0xff] %v5976_v55  ;;  %v5978_v63 = vadd.f32 %v1944_v14, %v1832_v49  ;;  %v6022_v49 = vpop.f32.mrf.mxu0 }
 0x2c4   :  { %v5980_v15 = vpop.f32.mrf.mxu1 }
 0x2c5   :  { %6916 = vst [vmem:[#allocation7_spill] sm:$0xff] %v5978_v63 }
 0x2c6   :  { %v5982_v22 = vpop.f32.mrf.mxu1 }
 0x2c8   :  { %v5984_v48 = vpop.f32.mrf.mxu1 }
 0x2ca   :  { %v5986_v2 = vpop.f32.mrf.mxu1 }
 0x2cc   :  { %v5990_v6 = vpop.f32.mrf.mxu1 }
 0x2ce   :  { %v5994_v24 = vpop.f32.mrf.mxu1 }
 0x2d0   :  { %v5998_v58 = vpop.f32.mrf.mxu1 }
 0x2d2   :  { %v6002_v46 = vpop.f32.mrf.mxu1 }
 0x2d3   :  { %6917 = vst [vmem:[#allocation3_spill] sm:$0xff] %v6002_v46 }
 0x2e3   :  { %v6006_v37 = vpop.f32.mrf.mxu1 }
 0x2e4   :  { %6918 = vst [vmem:[#allocation46_spill] sm:$0xff] %v6006_v37 }
 0x2e5   :  { %v6008_v60 = vpop.f32.mrf.mxu1 }
 0x2e6   :  { %6919 = vst [vmem:[#allocation47_spill] sm:$0xff] %v6008_v60 }
 0x2e7   :  { %v6012_v61 = vpop.f32.mrf.mxu1 }
 0x2e8   :  { %6920 = vst [vmem:[#allocation4_spill] sm:$0xff] %v6012_v61 }
 0x2e9   :  { %v6014_v31 = vpop.f32.mrf.mxu1 }
 0x2ea   :  { %6921 = vst [vmem:[#allocation5_spill] sm:$0xff] %v6014_v31 }
 0x2eb   :  { %v6018_v18 = vpop.f32.mrf.mxu1 }
 0x2ec   :  { %6922 = vst [vmem:[#allocation77_spill] sm:$0xff] %v6018_v18 }
 0x2ed   :  { %v6020_v33 = vpop.f32.mrf.mxu1 }
 0x2ee   :  { %6923 = vst [vmem:[#allocation75_spill] sm:$0xff] %v6020_v33 }
 0x2ef   :  { %v6024_v25 = vpop.f32.mrf.mxu1 }
 0x2f0   :  { %6924 = vst [vmem:[#allocation76_spill] sm:$0xff] %v6024_v25 }
 0x2f1   :  { %v6026_v14 = vpop.f32.mrf.mxu1 }
 0x2f2   :  { %6925 = vst [vmem:[#allocation70_spill] sm:$0xff] %v6026_v14  ;;  %v2001_v35 = vpop.f32.mrf.mxu0 }
 0x2f4   :  { %v2003_v30 = vpop.f32.mrf.mxu0  ;;  %v6028_v32 = vpop.f32.mrf.mxu1 }
 0x2f5   :  { %6926 = vst [vmem:[#allocation82_spill] sm:$0xff] %v6028_v32 }
 0x2f6   :  { %v2005_v1 = vpop.f32.mrf.mxu0  ;;  %v6030_v56 = vpop.f32.mrf.mxu1 }
 0x2f7   :  { %6927 = vst [vmem:[#allocation83_spill] sm:$0xff] %v6030_v56  ;;  %v2006_v10 = vadd.f32 %v2005_v1, %v5872_v7 }
 0x2f8   :  { %v2007_v19 = vpop.f32.mrf.mxu0  ;;  %v6032_v28 = vpop.f32.mrf.mxu1 }
 0x2f9   :  { %6928 = vst [vmem:[#allocation84_spill] sm:$0xff] %v6032_v28  ;;  %v2423_v46 = vmul.f32 0.5, %v2006_v10 }
 0x2fa   :  { %v2011_v11 = vpop.f32.mrf.mxu0  ;;  %v6034_v38 = vpop.f32.mrf.mxu1 }
 0x2fb   :  { %6929 = vst [vmem:[#allocation60_spill] sm:$0xff] %v6034_v38  ;;  %v2012_v3 = vadd.f32 %v2011_v11, %v5883_v17 }
 0x2fc   :  { %v2013_v33 = vpop.f32.mrf.mxu0  ;;  %v6036_v18 = vpop.f32.mrf.mxu1 }
 0x2fd   :  { %6930 = vst [vmem:[#allocation61_spill] sm:$0xff] %v6036_v18  ;;  %v2014_v11 = vadd.f32 %v2013_v33, %v5891_v34 }
 0x2fe   :  { %v2015_v5 = vpop.f32.mrf.mxu0  ;;  %v6038_v25 = vpop.f32.mrf.mxu1 }
 0x2ff   :  { %6931 = vst [vmem:[#allocation89_spill] sm:$0xff] %v6038_v25  ;;  %v2002_v25 = vadd.f32 %v2001_v35, %v5858_v52  ;;  %v2428_v10 = vmul.f32 0.5, %v2014_v11  ;;  %v1852_v11 = vadd.f32 %v6022_v49, %v5929_v42 }
 0x300   :  { %v2017_v14 = vpop.f32.mrf.mxu0  ;;  %v6040_v31 = vpop.f32.mrf.mxu1 }
 0x301   :  { %6932 = vst [vmem:[#allocation90_spill] sm:$0xff] %v6040_v31  ;;  %v2004_v31 = vadd.f32 %v2003_v30, %v5864_v13  ;;  %v2018_v34 = vadd.f32 %v2017_v14, %v5904_v26 }
 0x302   :  { %v2021_v61 = vpop.f32.mrf.mxu0  ;;  %v6042_v32 = vpop.f32.mrf.mxu1 }
 0x303   :  { %6933 = vst [vmem:[#allocation94_spill] sm:$0xff] %v6042_v32  ;;  %v2022_v52 = vadd.f32 %v2021_v61, %v5910_v12  ;;  %v2432_v26 = vmul.f32 0.5, %v2018_v34 }
 0x304   :  { %v2023_v50 = vpop.f32.mrf.mxu0  ;;  %v6044_v56 = vpop.f32.mrf.mxu1 }
 0x305   :  { %6934 = vst [vmem:[#allocation96_spill] sm:$0xff] %v6044_v56  ;;  %v2008_v56 = vadd.f32 %v2007_v19, %v5879_v0  ;;  %v2024_v13 = vadd.f32 %v2023_v50, %v5918_v51  ;;  %v2427_v0 = vmul.f32 0.5, %v2012_v3  ;;  %v2483_v17 = vmul.f32 0.5, %v2022_v52 }
 0x306   :  { %v2025_v60 = vpop.f32.mrf.mxu0  ;;  %v6046_v28 = vpop.f32.mrf.mxu1 }
 0x307   :  { %6935 = vst [vmem:[#allocation10_spill] sm:$0xff] %v6046_v28  ;;  %v2419_v28 = vmul.f32 0.5, %v2002_v25  ;;  %v2424_v35 = vmul.f32 0.5, %v2008_v56  ;;  %v2026_v7 = vadd.f32 %v2025_v60, %v5924_v47  ;;  %v2484_v12 = vmul.f32 0.5, %v2024_v13 }
 0x308   :  { %v2027_v37 = vpop.f32.mrf.mxu0  ;;  %v6048_v38 = vpop.f32.mrf.mxu1  ;;  %v1842_v25 = vadd.f32 %v6000_v41, %v5908_v39  ;;  %v1848_v13 = vadd.f32 %v6010_v40, %v5916_v57 }
 0x309   :  { %6936 = vst [vmem:[#allocation8_spill] sm:$0xff] %v6048_v38  ;;  %v2420_v38 = vmul.f32 0.5, %v2004_v31  ;;  %2890 = vtanh.f32 %v2419_v28  ;;  %v2028_v56 = vadd.f32 %v2027_v37, %v5931_v9  ;;  %v2016_v28 = vadd.f32 %v2015_v5, %v5899_v54 }
 0x30a   :  { %v2031_v29 = vpop.f32.mrf.mxu0  ;;  %v6050_v18 = vpop.f32.mrf.mxu1  ;;  %v2487_v51 = vmul.f32 0.5, %v2026_v7  ;;  %v1836_v54 = vadd.f32 %v5988_v27, %v5897_v36  ;;  %v1838_v31 = vadd.f32 %v5992_v16, %v5897_v36  ;;  %v1961_v34 = vadd.f32 %v5994_v24, %v1848_v13  ;;  %v6940_v13 = vld [vmem:[#allocation40_spill] sm:$0xff] }
 0x30b   :  { %6937 = vst [vmem:[#allocation11_spill] sm:$0xff] %v6050_v18  ;;  %2892 = vtanh.f32 %v2420_v38  ;;  %v2032_v38 = vadd.f32 %v2031_v29, %v5935_v62  ;;  %v2431_v60 = vmul.f32 0.5, %v2016_v28 }
 0x30c   :  { %v2033_v63 = vpop.f32.mrf.mxu0  ;;  %v6053_v55 = vpop.f32.mrf.mxu1  ;;  %2894 = vtanh.f32 %v2423_v46  ;;  %v2488_v46 = vmul.f32 0.5, %v2028_v56  ;;  %v1949_v27 = vadd.f32 %v5980_v15, %v1836_v54 }
 0x30d   :  { %2896 = vtanh.f32 %v2424_v35  ;;  %v2034_v9 = vadd.f32 %v2033_v63, %v5941_v44  ;;  %v2491_v62 = vmul.f32 0.5, %v2032_v38 }
 0x30e   :  { %v2035_v32 = vpop.f32.mrf.mxu0  ;;  %v6058_v43 = vpop.f32.mrf.mxu1  ;;  %2898 = vtanh.f32 %v2427_v0  ;;  %v1850_v0 = vadd.f32 %v6016_v20, %v5929_v42 }
 0x30f   :  { %2900 = vtanh.f32 %v2483_v17  ;;  %v2036_v5 = vadd.f32 %v2035_v32, %v5944_v8  ;;  %v2492_v44 = vmul.f32 0.5, %v2034_v9  ;;  %v1840_v8 = vadd.f32 %v5996_v53, %v5908_v39 }
 0x310   :  { %v2037_v23 = vpop.f32.mrf.mxu0  ;;  %v6068_v19 = vpop.f32.mrf.mxu1  ;;  %2902 = vtanh.f32 %v2484_v12  ;;  %v1951_v53 = vadd.f32 %v5982_v22, %v1838_v31  ;;  %v1955_v22 = vadd.f32 %v5986_v2, %v1842_v25 }
 0x311   :  { %2904 = vtanh.f32 %v2487_v51  ;;  %v2038_v63 = vadd.f32 %v2037_v23, %v5951_v21  ;;  %v2495_v32 = vmul.f32 0.5, %v2036_v5  ;;  %v1846_v21 = vadd.f32 %v6004_v45, %v5916_v57 }
 0x312   :  { %v6061_v18 = vpop.f32.mrf.mxu0  ;;  %v6077_v47 = vpop.f32.mrf.mxu1  ;;  %2906 = vtanh.f32 %v2428_v10  ;;  %v1953_v12 = vadd.f32 %v5984_v48, %v1840_v8 }
 0x313   :  { %2908 = vtanh.f32 %v2488_v46  ;;  %v2496_v7 = vmul.f32 0.5, %v2038_v63  ;;  %v2042_v28 = vadd.f32 %v6061_v18, %v5954_v4  ;;  %v1959_v20 = vadd.f32 %v5990_v6, %v1846_v21  ;;  %v6938_v6 = vld [vmem:[#allocation3_spill] sm:$0xff] }
 0x314   :  { %v6065_v30 = vpop.f32.mrf.mxu0  ;;  %v6089_v29 = vpop.f32.mrf.mxu1  ;;  %2910 = vtanh.f32 %v2431_v60  ;;  %v1963_v18 = vadd.f32 %v5998_v58, %v1850_v0  ;;  %v1965_v54 = vadd.f32 %v6938_v6, %v1852_v11  ;;  %v6939_v63 = vld [vmem:[#allocation39_spill] sm:$0xff] }
 0x315   :  { %2912 = vtanh.f32 %v2491_v62  ;;  %v2044_v2 = vadd.f32 %v6065_v30, %v5959_v59 }
 0x316   :  { %v6070_v1 = vpop.f32.mrf.mxu0  ;;  %v6103_v14 = vpop.f32.mrf.mxu1  ;;  %2914 = vtanh.f32 %v2432_v26 }
 0x317   :  { %v2891_v52 = vpop.eup %2890  ;;  %2916 = vtanh.f32 %v2492_v44  ;;  %v2547_v44 = vmul.f32 0.5, %v2042_v28  ;;  %v2046_v8 = vadd.f32 %v6070_v1, %v6939_v63  ;;  %v2548_v21 = vmul.f32 0.5, %v2044_v2  ;;  %v6942_v28 = vld [vmem:[#allocation6_spill] sm:$0xff] }
 0x318   :  { %v6074_v50 = vpop.f32.mrf.mxu0  ;;  %v2893_v23 = vpop.eup %2892  ;;  %2918 = vtanh.f32 %v2495_v32  ;;  %v2451_v40 = vadd.f32 1.0, %v2891_v52 }
 0x319   :  { %v2895_v15 = vpop.eup %2894  ;;  %v6116_v56 = vpop.f32.mrf.mxu1  ;;  %v2452_v10 = vadd.f32 1.0, %v2893_v23  ;;  %v2551_v11 = vmul.f32 0.5, %v2046_v8 }
 0x31a   :  { %v6080_v3 = vpop.f32.mrf.mxu0  ;;  %v2897_v17 = vpop.eup %2896  ;;  %v2455_v48 = vadd.f32 1.0, %v2895_v15  ;;  %v2467_v31 = vmul.f32 0.5, %v2451_v40  ;;  %v2048_v15 = vadd.f32 %v6074_v50, %v6940_v13 }
 0x31b   :  { %v2899_v38 = vpop.eup %2898  ;;  %v2456_v9 = vadd.f32 1.0, %v2897_v17  ;;  %v6126_v62 = vpop.f32.mrf.mxu1  ;;  %v6941_v17 = vld [vmem:[#allocation38_spill] sm:$0xff] }
 0x31c   :  { %v6084_v37 = vpop.f32.mrf.mxu0  ;;  %v2901_v46 = vpop.eup %2900  ;;  %v2459_v24 = vadd.f32 1.0, %v2899_v38  ;;  %v6132_v52 = vmul.f32 0.5, %v2455_v48  ;;  %v2628_v48 = vld [vmem:[%s6559_s2 + $0x8] sm:$0xff] }
 0x31d   :  { %v2903_v5 = vpop.eup %2902  ;;  %v2515_v59 = vadd.f32 1.0, %v2901_v46  ;;  %v6134_v58 = vmul.f32 0.5, %v2456_v9 }
 0x31e   :  { %v6091_v61 = vpop.f32.mrf.mxu0  ;;  %v2905_v26 = vpop.eup %2904  ;;  %v6140_v0 = vmul.f32 0.5, %v2459_v24 }
 0x31f   :  { %v2907_v25 = vpop.eup %2906  ;;  %v2531_v40 = vmul.f32 0.5, %v2515_v59 }
 0x320   :  { %v6096_v33 = vpop.f32.mrf.mxu0  ;;  %v2460_v38 = vadd.f32 1.0, %v2907_v25  ;;  %v6944_v25 = vld [vmem:[#allocation7_spill] sm:$0xff] }
 0x322   :  { %v2061_v16 = vpop.f32.mrf.mxu0 }
 0x323   :  { %v2062_v35 = vadd.f32 %v2061_v16, %v1949_v27  ;;  %v6130_v27 = vmul.f32 0.5, %v2452_v10  ;;  %v2516_v16 = vadd.f32 1.0, %v2903_v5  ;;  %v2627_v10 = vld [vmem:[%s6559_s2] sm:$0xff] }
 0x324   :  { %v2063_v41 = vpop.f32.mrf.mxu0  ;;  %v2643_v8 = vmul.f32 %v2627_v10, %v2531_v40 }
 0x325   :  { %v2064_v45 = vadd.f32 %v2063_v41, %v1951_v53  ;;  %2920 = vtanh.f32 %v2062_v35  ;;  %v2909_v35 = vpop.eup %2908  ;;  %v2519_v53 = vadd.f32 1.0, %v2905_v26  ;;  %v6943_v26 = vld [vmem:[#allocation2_spill] sm:$0xff] }
 0x326   :  { %v2065_v51 = vpop.f32.mrf.mxu0  ;;  %v2911_v41 = vpop.eup %2910  ;;  %v2056_v24 = vadd.f32 %v6091_v61, %v6943_v26  ;;  %v2639_v26 = vld [vmem:[%s6559_s2 + $0x60] sm:$0xff] }
 0x327   :  { %2922 = vtanh.f32 %v2064_v45  ;;  %v2066_v49 = vadd.f32 %v2065_v51, %v1953_v12  ;;  %v2052_v45 = vadd.f32 %v6080_v3, %v6941_v17  ;;  %v2054_v51 = vadd.f32 %v6084_v37, %v6942_v28 }
 0x328   :  { %2924 = vtanh.f32 %v2496_v7  ;;  %v2067_v60 = vpop.f32.mrf.mxu0  ;;  %v6138_v7 = vpop.f32.mrf.mxu1  ;;  %v2535_v9 = vmul.f32 0.5, %v2519_v53  ;;  %v2552_v37 = vmul.f32 0.5, %v2048_v15  ;;  %v2463_v63 = vadd.f32 1.0, %v2911_v41  ;;  %v2632_v53 = vld [vmem:[%s6559_s2 + $0x28] sm:$0xff] }
 0x329   :  { %2926 = vtanh.f32 %v2066_v49  ;;  %v2068_v4 = vadd.f32 %v2067_v60, %v1955_v22  ;;  %v2913_v22 = vpop.eup %2912  ;;  %v2532_v49 = vmul.f32 0.5, %v2516_v16  ;;  %v2555_v6 = vmul.f32 0.5, %v2052_v45 }
 0x32a   :  { %v2071_v32 = vpop.f32.mrf.mxu0  ;;  %v6154_v60 = vpop.f32.mrf.mxu1  ;;  %v2058_v16 = vadd.f32 %v6096_v33, %v6944_v25  ;;  %v2635_v33 = vld [vmem:[%s6559_s2 + $0x40] sm:$0xff] }
 0x32b   :  { %2928 = vtanh.f32 %v2068_v4  ;;  %v2072_v30 = vadd.f32 %v2071_v32, %v1959_v20  ;;  %v6146_v20 = vpop.eup %2914  ;;  %v2631_v4 = vld [vmem:[%s6559_s2 + $0x20] sm:$0xff]  ;;  %v2556_v32 = vmul.f32 0.5, %v2054_v51 }
 0x32c   :  { %v2073_v23 = vpop.f32.mrf.mxu0  ;;  %v2917_v3 = vpop.eup %2916  ;;  %v2560_v51 = vmul.f32 0.5, %v2058_v16 }
 0x32d   :  { %2930 = vtanh.f32 %v2072_v30  ;;  %v2074_v1 = vadd.f32 %v2073_v23, %v1961_v34  ;;  %v2520_v34 = vadd.f32 1.0, %v2909_v35  ;;  %v2919_v5 = vpop.eup %2918  ;;  %v2647_v35 = vmul.f32 %v2631_v4, %v2535_v9  ;;  %v6167_v15 = vpop.f32.mrf.mxu1 }
 0x32e   :  { %2932 = vtanh.f32 %v2547_v44  ;;  %v2075_v12 = vpop.f32.mrf.mxu0  ;;  %v2524_v13 = vadd.f32 1.0, %v2917_v3  ;;  %v2476_v3 = vmul.f32 0.5, %v2460_v38 }
 0x32f   :  { %2934 = vtanh.f32 %v2074_v1  ;;  %v2076_v50 = vadd.f32 %v2075_v12, %v1963_v18  ;;  %v2523_v18 = vadd.f32 1.0, %v2913_v22  ;;  %v2536_v30 = vmul.f32 0.5, %v2520_v34 }
 0x330   :  { %2936 = vtanh.f32 %v2548_v21  ;;  %v2077_v46 = vpop.f32.mrf.mxu0 }
 0x331   :  { %2938 = vtanh.f32 %v2076_v50  ;;  %v2078_v2 = vadd.f32 %v2077_v46, %v1965_v54  ;;  %v2644_v54 = vmul.f32 %v2628_v48, %v2532_v49  ;;  %v2539_v41 = vmul.f32 0.5, %v2523_v18  ;;  %v6182_v49 = vpop.f32.mrf.mxu1 }
 0x332   :  { %2940 = vtanh.f32 %v2551_v11  ;;  %v2921_v44 = vpop.eup %2920  ;;  %v2559_v11 = vmul.f32 0.5, %v2056_v24  ;;  %v2540_v50 = vmul.f32 0.5, %v2524_v13  ;;  %v2464_v48 = vadd.f32 1.0, %v6146_v20 }
 0x333   :  { %2942 = vtanh.f32 %v2078_v2  ;;  %v2659_v21 = vmul.f32 %v2921_v44, %v2467_v31  ;;  %v2527_v31 = vadd.f32 1.0, %v2919_v5  ;;  %v2651_v9 = vmul.f32 %v2635_v33, %v2539_v41 }
 0x334   :  { %v2923_v59 = vpop.eup %2922  ;;  %2944 = vtanh.f32 %v2552_v37  ;;  %v2636_v37 = vld [vmem:[%s6559_s2 + $0x48] sm:$0xff]  ;;  %v2480_v25 = vmul.f32 0.5, %v2464_v48 }
 0x335   :  { %v2925_v23 = vpop.eup %2924  ;;  %v2660_v61 = vmul.f32 %v2923_v59, %v6130_v27  ;;  %2946 = vtanh.f32 %v2555_v6  ;;  %v2675_v17 = vadd.f32 %v2659_v21, %v2643_v8  ;;  %v2648_v27 = vmul.f32 %v2632_v53, %v2536_v30 }
 0x336   :  { %v2927_v1 = vpop.eup %2926  ;;  %2948 = vtanh.f32 %v2556_v32  ;;  %v2528_v28 = vadd.f32 1.0, %v2925_v23  ;;  %v2543_v5 = vmul.f32 0.5, %v2527_v31  ;;  %v2479_v6 = vmul.f32 0.5, %v2463_v63  ;;  %v2640_v32 = vld [vmem:[%s6559_s2 + $0x68] sm:$0xff] }
 0x337   :  { %v2676_v45 = vadd.f32 %v2660_v61, %v2644_v54  ;;  %v2663_v12 = vmul.f32 %v2927_v1, %v6132_v52  ;;  %2691 = vst [vmem:[%s6560_s7] sm:$0xff] %v2675_v17  ;;  %2950 = vtanh.f32 %v2675_v17  ;;  %v2652_v8 = vmul.f32 %v2636_v37, %v2540_v50 }
 0x338   :  { %v6173_v22 = vpop.f32.mrf.mxu0  ;;  %v2929_v40 = vpop.eup %2928  ;;  %v2544_v24 = vmul.f32 0.5, %v2528_v28  ;;  %v2655_v21 = vmul.f32 %v2639_v26, %v2543_v5 }
 0x339   :  { %2692 = vst [vmem:[%s6560_s7 + $0x8] sm:$0xff] %v2676_v45  ;;  %2952 = vtanh.f32 %v2676_v45  ;;  %v2679_v10 = vadd.f32 %v2663_v12, %v2647_v35  ;;  %v2664_v52 = vmul.f32 %v2929_v40, %v6134_v58 }
 0x33a   :  { %v6184_v34 = vpop.f32.mrf.mxu0  ;;  %v2931_v46 = vpop.eup %2930  ;;  %2954 = vtanh.f32 %v2559_v11  ;;  %v2656_v1 = vmul.f32 %v2640_v32, %v2544_v24 }
 0x33b   :  { %v2933_v2 = vpop.eup %2932  ;;  %2695 = vst [vmem:[%s6560_s7 + $0x20] sm:$0xff] %v2679_v10  ;;  %2956 = vtanh.f32 %v2679_v10  ;;  %v2680_v58 = vadd.f32 %v2664_v52, %v2648_v27  ;;  %v2667_v4 = vmul.f32 %v2931_v46, %v6140_v0 }
 0x33c   :  { %v6194_v18 = vpop.f32.mrf.mxu0  ;;  %v6196_v38 = vpop.f32.mrf.mxu1  ;;  %2958 = vtanh.f32 %v2560_v51  ;;  %v2579_v41 = vadd.f32 1.0, %v2933_v2 }
 0x33d   :  { %v2935_v20 = vpop.eup %2934  ;;  %2696 = vst [vmem:[%s6560_s7 + $0x28] sm:$0xff] %v2680_v58  ;;  %2960 = vtanh.f32 %v2680_v58  ;;  %v2683_v0 = vadd.f32 %v2667_v4, %v2651_v9 }
 0x33e   :  { %v2937_v44 = vpop.eup %2936  ;;  %v2668_v59 = vmul.f32 %v2935_v20, %v2476_v3  ;;  %v6207_v63 = vpop.f32.mrf.mxu0  ;;  %v2595_v52 = vmul.f32 0.5, %v2579_v41 }
 0x33f   :  { %v6209_v54 = vpop.f32.mrf.mxu1  ;;  %v2939_v30 = vpop.eup %2938  ;;  %2699 = vst [vmem:[%s6560_s7 + $0x40] sm:$0xff] %v2683_v0  ;;  %2962 = vtanh.f32 %v2683_v0  ;;  %v2580_v11 = vadd.f32 1.0, %v2937_v44 }
 0x340   :  { %v2941_v16 = vpop.eup %2940  ;;  %v2684_v23 = vadd.f32 %v2668_v59, %v2652_v8  ;;  %v2671_v35 = vmul.f32 %v2939_v30, %v2479_v6  ;;  %v6214_v53 = vpop.f32.mrf.mxu0 }
 0x341   :  { %v6216_v13 = vpop.f32.mrf.mxu1  ;;  %v2943_v61 = vpop.eup %2942  ;;  %v2583_v27 = vadd.f32 1.0, %v2941_v16  ;;  %v2596_v3 = vmul.f32 0.5, %v2580_v11 }
 0x342   :  { %2700 = vst [vmem:[%s6560_s7 + $0x48] sm:$0xff] %v2684_v23  ;;  %2964 = vtanh.f32 %v2684_v23  ;;  %v2687_v17 = vadd.f32 %v2671_v35, %v2655_v21  ;;  %v2672_v33 = vmul.f32 %v2943_v61, %v2480_v25  ;;  %v6221_v31 = vpop.f32.mrf.mxu0  ;;  %v2945_v12 = vpop.eup %2944 }
 0x343   :  { %v6223_v45 = vpop.f32.mrf.mxu1  ;;  %v2947_v40 = vpop.eup %2946  ;;  %v2584_v48 = vadd.f32 1.0, %v2945_v12  ;;  %v2599_v4 = vmul.f32 0.5, %v2583_v27 }
 0x344   :  { %2703 = vst [vmem:[%s6560_s7 + $0x60] sm:$0xff] %v2687_v17  ;;  %2966 = vtanh.f32 %v2687_v17  ;;  %v2688_v28 = vadd.f32 %v2672_v33, %v2656_v1  ;;  %v6228_v51 = vpop.f32.mrf.mxu0  ;;  %v2949_v10 = vpop.eup %2948  ;;  %v2587_v20 = vadd.f32 1.0, %v2947_v40 }
 0x345   :  { %v6230_v50 = vpop.f32.mrf.mxu1  ;;  %v2951_v46 = vpop.eup %2950  ;;  %v2600_v32 = vmul.f32 0.5, %v2584_v48  ;;  %v2588_v0 = vadd.f32 1.0, %v2949_v10  ;;  %v6946_v10 = vld [vmem:[#allocation46_spill] sm:$0xff] }
 0x346   :  { %2704 = vst [vmem:[%s6560_s7 + $0x68] sm:$0xff] %v2688_v28  ;;  %2968 = vtanh.f32 %v2688_v28  ;;  %v6235_v9 = vpop.f32.mrf.mxu0  ;;  %v2953_v2 = vpop.eup %2952  ;;  %v2723_v5 = vmul.f32 %v2951_v46, %v2595_v52  ;;  %v2603_v21 = vmul.f32 0.5, %v2587_v20  ;;  %v6945_v28 = vld [vmem:[#allocation22_spill] sm:$0xff]  ;;  %v6947_v46 = vld [vmem:[#allocation47_spill] sm:$0xff]  ;;  %v6948_v20 = vld [vmem:[#allocation13_spill] sm:$0xff] }
 0x347   :  { %v6237_v37 = vpop.f32.mrf.mxu1  ;;  %v2955_v58 = vpop.eup %2954  ;;  %v2724_v6 = vmul.f32 %v2953_v2, %v2596_v3  ;;  %v2604_v11 = vmul.f32 0.5, %v2588_v0  ;;  %v2115_v52 = vadd.f32 %v6946_v10, %v6945_v28  ;;  %v2117_v3 = vadd.f32 %v6947_v46, %v6945_v28  ;;  %v6951_v46 = vld [vmem:[#allocation20_spill] sm:$0xff] }
 0x348   :  { %v6239_v26 = vpop.f32.mrf.mxu0  ;;  %v2957_v44 = vpop.eup %2956  ;;  %2739 = vst [vmem:[%s6561_s6] sm:$0xff] %v2723_v5  ;;  %v2591_v23 = vadd.f32 1.0, %v2955_v58 }
 0x349   :  { %v6241_v24 = vpop.f32.mrf.mxu1  ;;  %v2959_v8 = vpop.eup %2958  ;;  %2740 = vst [vmem:[%s6561_s6 + $0x8] sm:$0xff] %v2724_v6  ;;  %v2727_v59 = vmul.f32 %v2957_v44, %v2599_v4  ;;  %v6949_v6 = vld [vmem:[#allocation4_spill] sm:$0xff] }
 0x34a   :  { %v6249_v30 = vpop.f32.mrf.mxu0  ;;  %v2961_v16 = vpop.eup %2960  ;;  %v2592_v17 = vadd.f32 1.0, %v2959_v8  ;;  %v2607_v48 = vmul.f32 0.5, %v2591_v23  ;;  %v2119_v44 = vadd.f32 %v6949_v6, %v6948_v20  ;;  %v2228_v8 = vadd.f32 %v6173_v22, %v2115_v52 }
 0x34b   :  { %v6251_v25 = vpop.f32.mrf.mxu1  ;;  %2743 = vst [vmem:[%s6561_s6 + $0x20] sm:$0xff] %v2727_v59  ;;  %v2728_v35 = vmul.f32 %v2961_v16, %v2600_v32  ;;  %v6950_v32 = vld [vmem:[#allocation5_spill] sm:$0xff] }
 0x34c   :  { %v6256_v61 = vpop.f32.mrf.mxu0  ;;  %v2963_v41 = vpop.eup %2962  ;;  %v2121_v0 = vadd.f32 %v6950_v32, %v6948_v20  ;;  %v2608_v59 = vmul.f32 0.5, %v2592_v17 }
 0x34d   :  { %v6258_v1 = vpop.f32.mrf.mxu1  ;;  %2744 = vst [vmem:[%s6561_s6 + $0x28] sm:$0xff] %v2728_v35  ;;  %v2731_v33 = vmul.f32 %v2963_v41, %v2603_v21  ;;  %v2230_v21 = vadd.f32 %v6184_v34, %v2117_v3 }
 0x34e   :  { %v6263_v12 = vpop.f32.mrf.mxu0  ;;  %v2234_v17 = vadd.f32 %v6207_v63, %v2121_v0  ;;  %v6952_v63 = vld [vmem:[#allocation77_spill] sm:$0xff] }
 0x34f   :  { %v2362_v40 = vpop.f32.mrf.mxu1  ;;  %v2965_v27 = vpop.eup %2964  ;;  %2747 = vst [vmem:[%s6561_s6 + $0x40] sm:$0xff] %v2731_v33  ;;  %v2341_v33 = vadd.f32 %v6196_v38, %v2228_v8  ;;  %v2125_v3 = vadd.f32 %v6952_v63, %v6951_v46 }
 0x350   :  { %v2732_v2 = vmul.f32 %v2965_v27, %v2604_v11  ;;  %v6272_v5 = vpop.f32.mrf.mxu0  ;;  %v2232_v11 = vadd.f32 %v6194_v18, %v2119_v44  ;;  %v2343_v27 = vadd.f32 %v6209_v54, %v2230_v21  ;;  %v2347_v18 = vadd.f32 %v6223_v45, %v2234_v17  ;;  %v6955_v44 = vld [vmem:[#allocation75_spill] sm:$0xff]  ;;  %v6958_v21 = vld [vmem:[#allocation76_spill] sm:$0xff] }
 0x351   :  { %v6274_v58 = vpop.f32.mrf.mxu1  ;;  %v2967_v4 = vpop.eup %2966  ;;  %v2421_v54 = vmul.f32 0.5, %v2341_v33  ;;  %v2127_v8 = vadd.f32 %v6955_v44, %v6951_v46  ;;  %v6956_v45 = vld [vmem:[#allocation83_spill] sm:$0xff]  ;;  %v2238_v0 = vadd.f32 %v6214_v53, %v2125_v3  ;;  %v6960_v46 = vld [vmem:[#allocation24_spill] sm:$0xff] }
 0x352   :  { %2748 = vst [vmem:[%s6561_s6 + $0x48] sm:$0xff] %v2732_v2  ;;  %v2735_v16 = vmul.f32 %v2967_v4, %v2607_v48  ;;  %v6285_v23 = vpop.f32.mrf.mxu0  ;;  %v2345_v10 = vadd.f32 %v6216_v13, %v2232_v11  ;;  %v6953_v48 = vld [vmem:[#allocation21_spill] sm:$0xff]  ;;  %v6954_v2 = vld [vmem:[#allocation82_spill] sm:$0xff]  ;;  %v2422_v20 = vmul.f32 0.5, %v2343_v27  ;;  %v6962_v3 = vld [vmem:[#allocation60_spill] sm:$0xff] }
 0x353   :  { %v2366_v35 = vpop.f32.mrf.mxu1  ;;  %v2969_v41 = vpop.eup %2968  ;;  %v2135_v4 = vadd.f32 %v6954_v2, %v6953_v48  ;;  %v2137_v32 = vadd.f32 %v6956_v45, %v6953_v48  ;;  %v6959_v11 = vld [vmem:[#allocation70_spill] sm:$0xff]  ;;  %v6961_v2 = vld [vmem:[#allocation84_spill] sm:$0xff]  ;;  %2970 = vtanh.f32 %v2421_v54  ;;  %v2351_v53 = vadd.f32 %v6230_v50, %v2238_v0  ;;  %v6963_v45 = vld [vmem:[#allocation31_spill] sm:$0xff] }
 0x354   :  { %2751 = vst [vmem:[%s6561_s6 + $0x60] sm:$0xff] %v2735_v16  ;;  %v2736_v22 = vmul.f32 %v2969_v41, %v2608_v59  ;;  %v6294_v28 = vpop.f32.mrf.mxu0  ;;  %v2425_v59 = vmul.f32 0.5, %v2345_v10  ;;  %v6957_v16 = vld [vmem:[#allocation23_spill] sm:$0xff]  ;;  %v2139_v44 = vadd.f32 %v6961_v2, %v6960_v46  ;;  %v2141_v48 = vadd.f32 %v6962_v3, %v6960_v46  ;;  %v6968_v0 = vld [vmem:[#allocation90_spill] sm:$0xff] }
 0x355   :  { %v6296_v34 = vpop.f32.mrf.mxu1  ;;  %v2129_v41 = vadd.f32 %v6958_v21, %v6957_v16  ;;  %v2131_v33 = vadd.f32 %v6959_v11, %v6957_v16  ;;  %v2248_v17 = vadd.f32 %v6239_v26, %v2135_v4  ;;  %v2250_v10 = vadd.f32 %v6249_v30, %v2137_v32  ;;  %v6964_v16 = vld [vmem:[#allocation61_spill] sm:$0xff]  ;;  %v6969_v2 = vld [vmem:[#allocation94_spill] sm:$0xff] }
 0x356   :  { %2752 = vst [vmem:[%s6561_s6 + $0x68] sm:$0xff] %v2736_v22  ;;  %v6303_v38 = vpop.f32.mrf.mxu0  ;;  %v2426_v22 = vmul.f32 0.5, %v2347_v18  ;;  %v2145_v18 = vadd.f32 %v6964_v16, %v6963_v45  ;;  %2972 = vtanh.f32 %v2422_v20  ;;  %v6966_v11 = vld [vmem:[#allocation89_spill] sm:$0xff]  ;;  %v2252_v50 = vadd.f32 %v6256_v61, %v2139_v44  ;;  %v6971_v16 = vld [vmem:[#allocation32_spill] sm:$0xff] }
 0x357   :  { %v6305_v52 = vpop.f32.mrf.mxu1  ;;  %v2361_v26 = vadd.f32 %v6258_v1, %v2248_v17  ;;  %v2147_v54 = vadd.f32 %v6966_v11, %v6963_v45  ;;  %2974 = vtanh.f32 %v2425_v59  ;;  %v2363_v30 = vadd.f32 %v2362_v40, %v2250_v10  ;;  %v6967_v32 = vld [vmem:[#allocation29_spill] sm:$0xff]  ;;  %v6973_v59 = vld [vmem:[#allocation10_spill] sm:$0xff]  ;;  %v6975_v11 = vld [vmem:[#allocation8_spill] sm:$0xff] }
 0x358   :  { %v6311_v6 = vpop.f32.mrf.mxu0  ;;  %v2149_v46 = vadd.f32 %v6968_v0, %v6967_v32  ;;  %v2151_v3 = vadd.f32 %v6969_v2, %v6967_v32  ;;  %2976 = vtanh.f32 %v2426_v22  ;;  %v2254_v1 = vadd.f32 %v6263_v12, %v2141_v48  ;;  %v6974_v10 = vld [vmem:[#allocation30_spill] sm:$0xff] }
 0x359   :  { %v6313_v13 = vpop.f32.mrf.mxu1  ;;  %v6358_v61 = vadd.f32 %v6973_v59, %v6971_v16  ;;  %v2429_v40 = vmul.f32 0.5, %v2351_v53  ;;  %v2365_v44 = vadd.f32 %v6274_v58, %v2252_v50  ;;  %v6363_v32 = vadd.f32 %v6975_v11, %v6974_v10 }
 0x35a   :  { %v6325_v27 = vpop.f32.mrf.mxu0  ;;  %v2240_v12 = vadd.f32 %v6221_v31, %v2127_v8  ;;  %v2485_v22 = vmul.f32 0.5, %v2361_v26  ;;  %v2367_v48 = vadd.f32 %v2366_v35, %v2254_v1  ;;  %v2242_v58 = vadd.f32 %v6228_v51, %v2129_v41  ;;  %v6978_v35 = vld [vmem:[#allocation37_spill] sm:$0xff] }
 0x35b   :  { %v6327_v63 = vpop.f32.mrf.mxu1  ;;  %v2486_v50 = vmul.f32 0.5, %v2363_v30  ;;  %v6385_v8 = vadd.f32 %v6068_v19, %v6978_v35  ;;  %v2258_v1 = vadd.f32 %v6272_v5, %v2145_v18  ;;  %2978 = vtanh.f32 %v2429_v40 }
 0x35c   :  { %v6338_v4 = vpop.f32.mrf.mxu0  ;;  %v2353_v26 = vadd.f32 %v6237_v37, %v2240_v12  ;;  %v2355_v51 = vadd.f32 %v6241_v24, %v2242_v58  ;;  %v2489_v41 = vmul.f32 0.5, %v2365_v44  ;;  %2980 = vtanh.f32 %v2485_v22 }
 0x35d   :  { %6965 = vst [vmem:[#allocation9_spill] sm:$0xff] %v6338_v4  ;;  %v6340_v21 = vpop.f32.mrf.mxu1  ;;  %v6972_v4 = vld [vmem:[#allocation96_spill] sm:$0xff]  ;;  %v2490_v30 = vmul.f32 0.5, %v2367_v48  ;;  %v2371_v19 = vadd.f32 %v6296_v34, %v2258_v1  ;;  %v6403_v5 = vadd.f32 %v6077_v47, %v6978_v35  ;;  %2982 = vtanh.f32 %v2486_v50 }
 0x35e   :  { %v6350_v20 = vpop.f32.mrf.mxu0  ;;  %v2155_v45 = vadd.f32 %v6972_v4, %v6971_v16  ;;  %v6976_v4 = vld [vmem:[#allocation11_spill] sm:$0xff]  ;;  %v6977_v16 = vld [vmem:[#allocation41_spill] sm:$0xff]  ;;  %v2175_v24 = vadd.f32 %v6089_v29, %v5897_v36  ;;  %v2177_v47 = vadd.f32 %v6103_v14, %v5897_v36  ;;  %v2433_v44 = vmul.f32 0.5, %v2355_v51 }
 0x35f   :  { %6970 = vst [vmem:[#allocation18_spill] sm:$0xff] %v6350_v20  ;;  %v6352_v17 = vpop.f32.mrf.mxu1  ;;  %v6372_v20 = vadd.f32 %v6976_v4, %v6974_v10  ;;  %v6376_v53 = vadd.f32 %v6053_v55, %v6977_v16  ;;  %v6381_v31 = vadd.f32 %v6058_v43, %v6977_v16  ;;  %v2244_v55 = vadd.f32 %v6235_v9, %v2131_v33 }
 0x360   :  { %v6366_v0 = vpop.f32.mrf.mxu0  ;;  %v2260_v43 = vadd.f32 %v6285_v23, %v2147_v54  ;;  %v2262_v9 = vadd.f32 %v6294_v28, %v2149_v46  ;;  %v2430_v23 = vmul.f32 0.5, %v2353_v26  ;;  %v2264_v33 = vadd.f32 %v6303_v38, %v2151_v3  ;;  %v2971_v28 = vpop.eup %2970 }
 0x361   :  { %v6368_v2 = vpop.f32.mrf.mxu1  ;;  %v2357_v18 = vadd.f32 %v6251_v25, %v2244_v55  ;;  %2984 = vtanh.f32 %v2489_v41  ;;  %v2179_v29 = vadd.f32 %v6116_v56, %v5908_v39  ;;  %v2493_v46 = vmul.f32 0.5, %v2371_v19 }
 0x362   :  { %v6389_v59 = vpop.f32.mrf.mxu0  ;;  %v2373_v34 = vadd.f32 %v6305_v52, %v2260_v43  ;;  %v2375_v25 = vadd.f32 %v6313_v13, %v2262_v9  ;;  %2986 = vtanh.f32 %v2490_v30  ;;  %v2377_v38 = vadd.f32 %v6327_v63, %v2264_v33 }
 0x363   :  { %v6391_v10 = vpop.f32.mrf.mxu1  ;;  %v2973_v12 = vpop.eup %2972  ;;  %v2181_v22 = vadd.f32 %v6126_v62, %v5908_v39  ;;  %v2185_v36 = vadd.f32 %v6138_v7, %v5916_v57  ;;  %v6429_v14 = vadd.f32 %v6154_v60, %v5916_v57  ;;  %v2434_v13 = vmul.f32 0.5, %v2357_v18 }
 0x364   :  { %v6397_v11 = vpop.f32.mrf.mxu0  ;;  %v2975_v56 = vpop.eup %2974  ;;  %v6433_v48 = vadd.f32 %v6167_v15, %v5929_v42  ;;  %2988 = vtanh.f32 %v2430_v23  ;;  %v2494_v63 = vmul.f32 0.5, %v2373_v34  ;;  %v2268_v4 = vadd.f32 %v6311_v6, %v2155_v45  ;;  %v6979_v9 = vld [vmem:[#allocation9_spill] sm:$0xff] }
 0x365   :  { %v6399_v37 = vpop.f32.mrf.mxu1  ;;  %v2977_v39 = vpop.eup %2976  ;;  %v6440_v62 = vadd.f32 %v6182_v49, %v5929_v42  ;;  %v2453_v57 = vadd.f32 1.0, %v2971_v28  ;;  %2990 = vtanh.f32 %v2433_v44  ;;  %v2497_v7 = vmul.f32 0.5, %v2375_v25 }
 0x366   :  { %v6411_v54 = vpop.f32.mrf.mxu0  ;;  %2992 = vtanh.f32 %v2493_v46  ;;  %v2498_v60 = vmul.f32 0.5, %v2377_v38  ;;  %v2381_v15 = vadd.f32 %v6340_v21, %v2268_v4  ;;  %v2454_v1 = vadd.f32 1.0, %v2973_v12 }
 0x367   :  { %v6413_v40 = vpop.f32.mrf.mxu1  ;;  %2994 = vtanh.f32 %v2434_v13  ;;  %v2270_v6 = vadd.f32 %v6325_v27, %v6358_v61  ;;  %v2457_v55 = vadd.f32 1.0, %v2975_v56  ;;  %v2458_v51 = vadd.f32 1.0, %v2977_v39 }
 0x368   :  { %v2287_v52 = vpop.f32.mrf.mxu0  ;;  %2996 = vtanh.f32 %v2494_v63  ;;  %v2979_v19 = vpop.eup %2978  ;;  %v6446_v18 = vmul.f32 0.5, %v2453_v57  ;;  %v2549_v27 = vmul.f32 0.5, %v2381_v15  ;;  %v6450_v34 = vmul.f32 0.5, %v2454_v1 }
 0x369   :  { %v6421_v3 = vpop.f32.mrf.mxu1  ;;  %v2288_v50 = vadd.f32 %v2287_v52, %v2175_v24  ;;  %2998 = vtanh.f32 %v2497_v7  ;;  %v2383_v43 = vadd.f32 %v6352_v17, %v2270_v6  ;;  %v2272_v24 = vadd.f32 %v6979_v9, %v6363_v32  ;;  %v2981_v33 = vpop.eup %2980 }
 0x36a   :  { %v2289_v16 = vpop.f32.mrf.mxu0  ;;  %3000 = vtanh.f32 %v2498_v60  ;;  %v2983_v25 = vpop.eup %2982  ;;  %v6452_v17 = vmul.f32 0.5, %v2457_v55  ;;  %v6454_v28 = vmul.f32 0.5, %v2458_v51  ;;  %v6457_v32 = vadd.f32 1.0, %v2979_v19 }
 0x36b   :  { %v6436_v58 = vpop.f32.mrf.mxu1  ;;  %v2290_v45 = vadd.f32 %v2289_v16, %v2177_v47  ;;  %v2550_v52 = vmul.f32 0.5, %v2383_v43  ;;  %v2517_v56 = vadd.f32 1.0, %v2981_v33  ;;  %v2518_v7 = vadd.f32 1.0, %v2983_v25  ;;  %v2634_v25 = vld [vmem:[%s6559_s2 + $0x38] sm:$0xff] }
 0x36c   :  { %v2291_v35 = vpop.f32.mrf.mxu0 }
 0x36d   :  { %v2400_v26 = vpop.f32.mrf.mxu1  ;;  %v2292_v30 = vadd.f32 %v2291_v35, %v2179_v29  ;;  %v2385_v29 = vadd.f32 %v6368_v2, %v2272_v24  ;;  %v2278_v2 = vadd.f32 %v6366_v0, %v6376_v53  ;;  %v2282_v53 = vadd.f32 %v6397_v11, %v6385_v8  ;;  %v2629_v8 = vld [vmem:[%s6559_s2 + $0x10] sm:$0xff] }
 0x36e   :  { %v2401_v42 = vadd.f32 %v2400_v26, %v2288_v50  ;;  %v2293_v49 = vpop.f32.mrf.mxu0  ;;  %v2985_v13 = vpop.eup %2984  ;;  %v2280_v50 = vadd.f32 %v6389_v59, %v6381_v31  ;;  %v2533_v43 = vmul.f32 0.5, %v2517_v56  ;;  %v2633_v24 = vld [vmem:[%s6559_s2 + $0x30] sm:$0xff] }
 0x36f   :  { %v2402_v41 = vpop.f32.mrf.mxu1  ;;  %v2294_v47 = vadd.f32 %v2293_v49, %v2181_v22  ;;  %v6980_v22 = vld [vmem:[#allocation18_spill] sm:$0xff]  ;;  %v2987_v57 = vpop.eup %2986  ;;  %v2553_v15 = vmul.f32 0.5, %v2385_v29  ;;  %v2521_v6 = vadd.f32 1.0, %v2985_v13 }
 0x370   :  { %v2403_v21 = vadd.f32 %v2402_v41, %v2290_v45  ;;  %v2297_v61 = vpop.f32.mrf.mxu0  ;;  %3002 = vtanh.f32 %v2401_v42  ;;  %v2274_v63 = vadd.f32 %v6980_v22, %v6372_v20  ;;  %v2522_v0 = vadd.f32 1.0, %v2987_v57 }
 0x371   :  { %v2404_v23 = vpop.f32.mrf.mxu1  ;;  %v2298_v4 = vadd.f32 %v2297_v61, %v2185_v36  ;;  %v2989_v36 = vpop.eup %2988  ;;  %v2537_v11 = vmul.f32 0.5, %v2521_v6  ;;  %v2638_v6 = vld [vmem:[%s6559_s2 + $0x58] sm:$0xff] }
 0x372   :  { %v2405_v44 = vadd.f32 %v2404_v23, %v2292_v30  ;;  %3004 = vtanh.f32 %v2403_v21  ;;  %v2299_v46 = vpop.f32.mrf.mxu0  ;;  %v2387_v35 = vadd.f32 %v6391_v10, %v2274_v63  ;;  %v2991_v51 = vpop.eup %2990  ;;  %v2393_v10 = vadd.f32 %v6413_v40, %v2280_v50 }
 0x373   :  { %v2406_v38 = vpop.f32.mrf.mxu1  ;;  %v2300_v60 = vadd.f32 %v2299_v46, %v6429_v14  ;;  %v2391_v14 = vadd.f32 %v6399_v37, %v2278_v2  ;;  %v2993_v59 = vpop.eup %2992  ;;  %v2395_v30 = vadd.f32 %v6421_v3, %v2282_v53  ;;  %v2538_v3 = vmul.f32 0.5, %v2522_v0 }
 0x374   :  { %3006 = vtanh.f32 %v2405_v44  ;;  %v2407_v12 = vadd.f32 %v2406_v38, %v2294_v47  ;;  %v2301_v16 = vpop.f32.mrf.mxu0  ;;  %v2995_v41 = vpop.eup %2994  ;;  %v2554_v37 = vmul.f32 0.5, %v2387_v35  ;;  %v2284_v23 = vadd.f32 %v6411_v54, %v6403_v5 }
 0x375   :  { %3008 = vtanh.f32 %v2549_v27  ;;  %v2410_v39 = vpop.f32.mrf.mxu1  ;;  %v2302_v45 = vadd.f32 %v2301_v16, %v6433_v48  ;;  %v2534_v48 = vmul.f32 0.5, %v2518_v7  ;;  %v2997_v19 = vpop.eup %2996  ;;  %v2525_v27 = vadd.f32 1.0, %v2993_v59 }
 0x376   :  { %3010 = vtanh.f32 %v2407_v12  ;;  %v2411_v26 = vadd.f32 %v2410_v39, %v2298_v4  ;;  %v2303_v1 = vpop.f32.mrf.mxu0  ;;  %v2999_v9 = vpop.eup %2998  ;;  %v2557_v61 = vmul.f32 0.5, %v2391_v14  ;;  %v2462_v47 = vadd.f32 1.0, %v2989_v36  ;;  %v2641_v14 = vld [vmem:[%s6559_s2 + $0x70] sm:$0xff] }
 0x377   :  { %v2412_v20 = vpop.f32.mrf.mxu1  ;;  %3012 = vtanh.f32 %v2550_v52  ;;  %v2304_v42 = vadd.f32 %v2303_v1, %v6440_v62  ;;  %v2630_v62 = vld [vmem:[%s6559_s2 + $0x18] sm:$0xff]  ;;  %v3001_v33 = vpop.eup %3000  ;;  %v2465_v44 = vadd.f32 1.0, %v2991_v51  ;;  %v2558_v29 = vmul.f32 0.5, %v2393_v10 }
 0x378   :  { %v2413_v55 = vadd.f32 %v2412_v20, %v2300_v60  ;;  %3014 = vtanh.f32 %v2411_v26  ;;  %v2645_v38 = vmul.f32 %v2629_v8, %v2533_v43  ;;  %v2526_v52 = vadd.f32 1.0, %v2997_v19  ;;  %v2642_v43 = vld [vmem:[%s6559_s2 + $0x78] sm:$0xff] }
 0x379   :  { %v2414_v31 = vpop.f32.mrf.mxu1  ;;  %v2561_v12 = vmul.f32 0.5, %v2395_v30  ;;  %v2397_v13 = vadd.f32 %v6436_v58, %v2284_v23  ;;  %v2646_v22 = vmul.f32 %v2630_v62, %v2534_v48  ;;  %v2649_v63 = vmul.f32 %v2633_v24, %v2537_v11 }
 0x37a   :  { %3016 = vtanh.f32 %v2413_v55  ;;  %v2415_v49 = vadd.f32 %v2414_v31, %v2302_v45  ;;  %v2650_v4 = vmul.f32 %v2634_v25, %v2538_v3  ;;  %v2541_v16 = vmul.f32 0.5, %v2525_v27 }
 0x37b   :  { %3018 = vtanh.f32 %v2553_v15  ;;  %v2416_v21 = vpop.f32.mrf.mxu1  ;;  %v2529_v7 = vadd.f32 1.0, %v2999_v9  ;;  %v2542_v58 = vmul.f32 0.5, %v2526_v52  ;;  %v2562_v50 = vmul.f32 0.5, %v2397_v13 }
 0x37c   :  { %3020 = vtanh.f32 %v2415_v49  ;;  %v2417_v40 = vadd.f32 %v2416_v21, %v2304_v42  ;;  %v2530_v26 = vadd.f32 1.0, %v3001_v33  ;;  %v2478_v36 = vmul.f32 0.5, %v2462_v47 }
 0x37d   :  { %v3003_v46 = vpop.eup %3002  ;;  %v2466_v55 = vadd.f32 1.0, %v2995_v41  ;;  %v2545_v51 = vmul.f32 0.5, %v2529_v7  ;;  %v2481_v0 = vmul.f32 0.5, %v2465_v44  ;;  %v2654_v10 = vmul.f32 %v2638_v6, %v2542_v58 }
 0x37e   :  { %3022 = vtanh.f32 %v2417_v40  ;;  %v2661_v5 = vmul.f32 %v3003_v46, %v6446_v18  ;;  %v2637_v18 = vld [vmem:[%s6559_s2 + $0x50] sm:$0xff]  ;;  %v2546_v42 = vmul.f32 0.5, %v2530_v26 }
 0x37f   :  { %v3005_v56 = vpop.eup %3004  ;;  %3024 = vtanh.f32 %v2554_v37  ;;  %v2653_v53 = vmul.f32 %v2637_v18, %v2541_v16  ;;  %v2482_v30 = vmul.f32 0.5, %v2466_v55  ;;  %v2657_v21 = vmul.f32 %v2641_v14, %v2545_v51 }
 0x380   :  { %3026 = vtanh.f32 %v2557_v61  ;;  %v2662_v39 = vmul.f32 %v3005_v56, %v6450_v34  ;;  %v2677_v2 = vadd.f32 %v2661_v5, %v2645_v38  ;;  %v2658_v40 = vmul.f32 %v2642_v43, %v2546_v42 }
 0x381   :  { %v3007_v54 = vpop.eup %3006  ;;  %3028 = vtanh.f32 %v2558_v29 }
 0x382   :  { %v3009_v57 = vpop.eup %3008  ;;  %v2665_v60 = vmul.f32 %v3007_v54, %v6452_v17  ;;  %3030 = vtanh.f32 %v2561_v12  ;;  %v2678_v35 = vadd.f32 %v2662_v39, %v2646_v22  ;;  %2693 = vst [vmem:[%s6560_s7 + $0x10] sm:$0xff] %v2677_v2  ;;  %v2477_v17 = vmul.f32 0.5, %v6457_v32 }
 0x383   :  { %v3011_v15 = vpop.eup %3010  ;;  %3032 = vtanh.f32 %v2677_v2  ;;  %v2581_v37 = vadd.f32 1.0, %v3009_v57 }
 0x384   :  { %v2681_v34 = vadd.f32 %v2665_v60, %v2649_v63  ;;  %v2666_v1 = vmul.f32 %v3011_v15, %v6454_v28  ;;  %v3013_v20 = vpop.eup %3012  ;;  %2694 = vst [vmem:[%s6560_s7 + $0x18] sm:$0xff] %v2678_v35  ;;  %3034 = vtanh.f32 %v2678_v35 }
 0x385   :  { %v3015_v45 = vpop.eup %3014  ;;  %v2582_v3 = vadd.f32 1.0, %v3013_v20  ;;  %v2597_v44 = vmul.f32 0.5, %v2581_v37 }
 0x386   :  { %2697 = vst [vmem:[%s6560_s7 + $0x30] sm:$0xff] %v2681_v34  ;;  %3036 = vtanh.f32 %v2681_v34  ;;  %v2682_v28 = vadd.f32 %v2666_v1, %v2650_v4  ;;  %v2669_v31 = vmul.f32 %v3015_v45, %v2477_v17 }
 0x387   :  { %v3017_v32 = vpop.eup %3016  ;;  %3038 = vtanh.f32 %v2562_v50  ;;  %v2598_v46 = vmul.f32 0.5, %v2582_v3 }
 0x388   :  { %v3019_v59 = vpop.eup %3018  ;;  %2698 = vst [vmem:[%s6560_s7 + $0x38] sm:$0xff] %v2682_v28  ;;  %3040 = vtanh.f32 %v2682_v28  ;;  %v2670_v49 = vmul.f32 %v3017_v32, %v2478_v36  ;;  %v2685_v48 = vadd.f32 %v2669_v31, %v2653_v53 }
 0x389   :  { %v3021_v41 = vpop.eup %3020  ;;  %v2585_v61 = vadd.f32 1.0, %v3019_v59 }
 0x38a   :  { %v2686_v19 = vadd.f32 %v2670_v49, %v2654_v10  ;;  %v2673_v8 = vmul.f32 %v3021_v41, %v2481_v0  ;;  %2701 = vst [vmem:[%s6560_s7 + $0x50] sm:$0xff] %v2685_v48  ;;  %3042 = vtanh.f32 %v2685_v48 }
 0x38b   :  { %v3023_v11 = vpop.eup %3022  ;;  %v2601_v52 = vmul.f32 0.5, %v2585_v61 }
 0x38c   :  { %2702 = vst [vmem:[%s6560_s7 + $0x58] sm:$0xff] %v2686_v19  ;;  %3044 = vtanh.f32 %v2686_v19  ;;  %v2689_v9 = vadd.f32 %v2673_v8, %v2657_v21  ;;  %v2674_v62 = vmul.f32 %v3023_v11, %v2482_v30  ;;  %v3025_v24 = vpop.eup %3024 }
 0x38d   :  { %v3027_v27 = vpop.eup %3026  ;;  %v2586_v25 = vadd.f32 1.0, %v3025_v24 }
 0x38e   :  { %2705 = vst [vmem:[%s6560_s7 + $0x70] sm:$0xff] %v2689_v9  ;;  %3046 = vtanh.f32 %v2689_v9  ;;  %v2690_v23 = vadd.f32 %v2674_v62, %v2658_v40  ;;  %v3029_v33 = vpop.eup %3028  ;;  %v2589_v56 = vadd.f32 1.0, %v3027_v27 }
 0x38f   :  { %v3031_v47 = vpop.eup %3030  ;;  %v2602_v5 = vmul.f32 0.5, %v2586_v25  ;;  %v2590_v54 = vadd.f32 1.0, %v3029_v33 }
 0x390   :  { %2706 = vst [vmem:[%s6560_s7 + $0x78] sm:$0xff] %v2690_v23  ;;  %3048 = vtanh.f32 %v2690_v23  ;;  %v3033_v29 = vpop.eup %3032  ;;  %v2593_v39 = vadd.f32 1.0, %v3031_v47  ;;  %v2605_v7 = vmul.f32 0.5, %v2589_v56 }
 0x391   :  { %v3035_v38 = vpop.eup %3034  ;;  %v2725_v12 = vmul.f32 %v3033_v29, %v2597_v44  ;;  %v2606_v60 = vmul.f32 0.5, %v2590_v54 }
 0x392   :  { %v2726_v22 = vmul.f32 %v3035_v38, %v2598_v46  ;;  %v2609_v35 = vmul.f32 0.5, %v2593_v39 }
 0x393   :  { %v3037_v13 = vpop.eup %3036  ;;  %2741 = vst [vmem:[%s6561_s6 + $0x10] sm:$0xff] %v2725_v12 }
 0x394   :  { %v3039_v63 = vpop.eup %3038  ;;  %v2729_v4 = vmul.f32 %v3037_v13, %v2601_v52  ;;  %2742 = vst [vmem:[%s6561_s6 + $0x18] sm:$0xff] %v2726_v22 }
 0x395   :  { %v3041_v16 = vpop.eup %3040  ;;  %v2594_v15 = vadd.f32 1.0, %v3039_v63 }
 0x396   :  { %2745 = vst [vmem:[%s6561_s6 + $0x30] sm:$0xff] %v2729_v4  ;;  %v2730_v57 = vmul.f32 %v3041_v16, %v2602_v5 }
 0x397   :  { %v3043_v2 = vpop.eup %3042  ;;  %v2610_v34 = vmul.f32 0.5, %v2594_v15 }
 0x398   :  { %2746 = vst [vmem:[%s6561_s6 + $0x38] sm:$0xff] %v2730_v57  ;;  %v2733_v50 = vmul.f32 %v3043_v2, %v2605_v7 }
 0x399   :  { %v3045_v58 = vpop.eup %3044 }
 0x39a   :  { %v2734_v18 = vmul.f32 %v3045_v58, %v2606_v60  ;;  %2749 = vst [vmem:[%s6561_s6 + $0x50] sm:$0xff] %v2733_v50 }
 0x39b   :  { %v3047_v26 = vpop.eup %3046 }
 0x39c   :  { %2750 = vst [vmem:[%s6561_s6 + $0x58] sm:$0xff] %v2734_v18  ;;  %v2737_v1 = vmul.f32 %v3047_v26, %v2609_v35 }
 0x39d   :  { %v3049_v20 = vpop.eup %3048 }
 0x39e   :  { %2753 = vst [vmem:[%s6561_s6 + $0x70] sm:$0xff] %v2737_v1  ;;  %v2738_v17 = vmul.f32 %v3049_v20, %v2610_v34 }
 0x3a0   :  { %2754 = vst [vmem:[%s6561_s6 + $0x78] sm:$0xff] %v2738_v17 }

</bundles_post_ra>
